<compile_context>
chip_gen: v7x
topology: tpu7x:2x2x1
jax: 0.10.0
libtpu: 0.0.40
codegen_flags: <defaults>
</compile_context>

<pallas_src>
import functools

import numpy as np
import jax
import jax.numpy as jnp
from jax.experimental import pallas as pl
from jax.experimental.pallas import tpu as pltpu

SCALE_NUM = 3                      # rsp_rate_list = [1, 2, 4]
RATIO = 4
SP_CHANS = [1, 8, 8, 16, 16, 16]   # SP_2D backbone channel plan


# ----------------------------------------------------------------------------
# Static layout of the packed bias row (128-lane aligned segments).
# ----------------------------------------------------------------------------
def _bias_layout(Cb, Co):
    hid = SCALE_NUM * RATIO
    widths = [("b1d1", hid), ("b1d2", SCALE_NUM),
              ("b2d1", Cb * hid), ("b2d2", Cb * SCALE_NUM),
              ("bsp0", Cb * SP_CHANS[1]), ("bsp1", Cb * SP_CHANS[2]),
              ("bsp2", Cb * SP_CHANS[3]), ("bsp3", Cb * SP_CHANS[4]),
              ("bsp4", Cb * SP_CHANS[5]), ("fc_b", Co)]
    layout, pos = {}, 0
    for name, w in widths:
        layout[name] = (pos, w)
        pos += ((w + 127) // 128) * 128
    return layout, pos


# ----------------------------------------------------------------------------
# In-kernel 'same' conv on a lane-packed activation (H, W*Cin):
#   out = sum_dy  x_padded[dy:dy+H, :] @ band[dy]          (band: (kh, W*Cin, W*Cout))
# kw taps and W-padding are folded into the precomputed banded matrices, so the
# only layout work is one bf16 cast, an H zero-pad and kh sublane slices.
# A 1-D conv along the spectral axis is the W == 1 special case.
# ----------------------------------------------------------------------------
def _conv_packed(x, band_ref, bias, act):
    H = x.shape[0]
    kh = band_ref.shape[0]
    ph = kh // 2
    xb = x.astype(jnp.bfloat16)                         # cast BEFORE any expansion
    if ph:
        z = jnp.zeros((ph, xb.shape[1]), jnp.bfloat16)
        xb = jnp.concatenate([z, xb, z], axis=0)        # H zero-padding only
    acc = bias                                          # (1, W*Cout) f32, broadcasts
    for dy in range(kh):                                # kh banded MXU matmuls
        acc = acc + jnp.dot(xb[dy:dy + H, :], band_ref[dy],
                            preferred_element_type=jnp.float32)
    return jnp.maximum(acc, 0.0) if act == "relu" else jax.nn.sigmoid(acc)


# ----------------------------------------------------------------------------
# Fused forward kernel (one batch element per grid step).
# ----------------------------------------------------------------------------
def _fused_kernel(ms_ref, tile_ref, scat_ref,
                  bd1d1_ref, bd1d2_ref, bd2d1_ref, bd2d2_ref,
                  sp0_ref, sp1_ref, sp2_ref, sp3_ref, sp4_ref,
                  gapm_ref, fcw_ref, bias_ref,
                  out_ref, gap_out_ref, *, offs):
    def bias(name):
        o, w = offs[name]
        return bias_ref[:, o:o + w]                     # static 128-aligned slice

    # --- Conv1D_Act spectral attention (1-D conv == packed conv with W == 1) ---
    s1 = ms_ref[0]                                                  # (Cb, 3) f32
    a = _conv_packed(s1, bd1d1_ref, bias("b1d1"), "relu")           # (Cb, 12)
    att = _conv_packed(a, bd1d2_ref, bias("b1d2"), "sigmoid")       # (Cb, 3)
    spec = s1 * att                                                 # (Cb, 3)

    # --- Auto_Multiply -> lane-packed spectral image (Cb, Cb*3) ----------------
    # T[i, j*3+s] = spec[i, s]  (tiny f32 matmul against precomputed tile matrix)
    T = jnp.dot(spec, tile_ref[...], preferred_element_type=jnp.float32)
    # spec_row[0, j*3+s] = spec[j, s]  (mask + sublane reduce)
    spec_row = jnp.sum(T * scat_ref[...], axis=0, keepdims=True)
    img = T * spec_row                      # img[i, j*3+s] = spec[i,s] * spec[j,s]

    # --- Conv2D_Act 2-D spectral-image attention (banded 7x7 convs) ------------
    a2 = _conv_packed(img, bd2d1_ref, bias("b2d1"), "relu")         # (Cb, Cb*12)
    att2 = _conv_packed(a2, bd2d2_ref, bias("b2d2"), "sigmoid")     # (Cb, Cb*3)
    h = img * att2                                                  # (Cb, Cb*3)

    # --- SP_2D backbone (scale-mean fused into sp0's weights on the host) -------
    h = _conv_packed(h, sp0_ref, bias("bsp0"), "relu")              # (Cb, Cb*8)
    h = _conv_packed(h, sp1_ref, bias("bsp1"), "relu")              # (Cb, Cb*8)
    h = _conv_packed(h, sp2_ref, bias("bsp2"), "relu")              # (Cb, Cb*16)
    h = _conv_packed(h, sp3_ref, bias("bsp3"), "relu")              # (Cb, Cb*16)
    h = _conv_packed(h, sp4_ref, bias("bsp4"), "relu")              # (Cb, Cb*16)

    # --- GAP2D + out_fc epilogue (lane-dense rows, no M==1 matmuls) -------------
    gap_full = jnp.dot(h, gapm_ref[...], preferred_element_type=jnp.float32)   # (Cb, 16)
    gap = jnp.sum(gap_full, axis=0, keepdims=True)                              # (1, 16)
    logit_full = jnp.dot(gap_full, fcw_ref[...],
                         preferred_element_type=jnp.float32)                    # (Cb, Co)
    logits = jnp.sum(logit_full, axis=0, keepdims=True) + bias("fc_b")           # (1, Co)

    gap_out_ref[0] = gap
    out_ref[0] = logits


def _const_spec(a):
    n = a.ndim
    return pl.BlockSpec(a.shape, lambda b: (0,) * n)


def _fused_forward(ms, kp):
    B, Cb, _ = ms.shape
    Co = kp["fc_w"].shape[1]
    offs, _ = _bias_layout(Cb, Co)

    names = ["tilemat", "scatter01", "bd1d1", "bd1d2", "bd2d1", "bd2d2",
             "bsp0", "bsp1", "bsp2", "bsp3", "bsp4", "gap_mat", "fc_w", "bias_pack"]
    arrays = [kp[n] for n in names]

    in_specs = [pl.BlockSpec((1, Cb, SCALE_NUM), lambda b: (b, 0, 0))]
    in_specs += [_const_spec(a) for a in arrays]   # full-block, DMA'd once, VMEM-resident

    kernel = functools.partial(_fused_kernel, offs=offs)

    out, gap = pl.pallas_call(
        kernel,
        out_shape=(
            jax.ShapeDtypeStruct((B, 1, Co), jnp.float32),
            jax.ShapeDtypeStruct((B, 1, 16), jnp.float32),
        ),
        grid_spec=pltpu.PrefetchScalarGridSpec(
            num_scalar_prefetch=0,
            grid=(B,),
            in_specs=in_specs,
            out_specs=(
                pl.BlockSpec((1, 1, Co), lambda b: (b, 0, 0)),
                pl.BlockSpec((1, 1, 16), lambda b: (b, 0, 0)),
            ),
        ),
        compiler_params=pltpu.CompilerParams(
            dimension_semantics=("parallel",),      # v7x: batch split across the 2 TCs
            vmem_limit_bytes=24 * 1024 * 1024,      # ~12 MiB live (banded weights x2)
        ),
    )(ms, *arrays)
    return out.reshape(B, Co), gap.reshape(B, 16)


# ----------------------------------------------------------------------------
# Host-side parameter construction (deterministic, synthetic) and banded prep.
# ----------------------------------------------------------------------------
def init_params(seed, out_channels):
    hid = SCALE_NUM * RATIO  # 12
    key = jax.random.PRNGKey(seed)
    cnt = [0]

    def nxt(shape, scale=0.1):
        cnt[0] += 1
        return scale * jax.random.normal(jax.random.fold_in(key, cnt[0]), shape, jnp.float32)

    p = {}
    # Conv1D_Act weights stored (k, Cin, Cout)
    p["c1d_w1"], p["c1d_b1"] = nxt((7, SCALE_NUM, hid)), nxt((hid,), 0.02)
    p["c1d_w2"], p["c1d_b2"] = nxt((7, hid, SCALE_NUM)), nxt((SCALE_NUM,), 0.02)
    # Conv2D_Act weights stored (kh, kw, Cin, Cout)
    p["c2d_w1"], p["c2d_b1"] = nxt((7, 7, SCALE_NUM, hid)), nxt((hid,), 0.02)
    p["c2d_w2"], p["c2d_b2"] = nxt((7, 7, hid, SCALE_NUM)), nxt((SCALE_NUM,), 0.02)
    # SP_2D backbone: 1 -> 8 -> 8 -> 16 -> 16 -> 16, 3x3 convs
    for i in range(5):
        p[f"sp_w{i}"] = nxt((3, 3, SP_CHANS[i], SP_CHANS[i + 1]))
        p[f"sp_b{i}"] = nxt((SP_CHANS[i + 1],), 0.02)
    # out_fc = get_mlp(2, [16, out_channels]) -> Linear(16, out_channels)
    p["fc_w"] = nxt((16, out_channels))
    p["fc_b"] = nxt((out_channels,), 0.02)
    return p


def _banded(w, W):
    """(kh, kw, Cin, Cout) conv weights -> (kh, W*Cin, W*Cout) bf16 banded matrices
    with 'same' W-padding folded into the band (zero outside the band)."""
    w = np.asarray(w, np.float32)
    kh, kw, cin, cout = w.shape
    pw = kw // 2
    band = np.zeros((kh, W * cin, W * cout), np.float32)
    for dy in range(kh):
        for wo in range(W):
            for dx in range(kw):
                wi = wo + dx - pw
                if 0 <= wi < W:
                    band[dy, wi * cin:(wi + 1) * cin, wo * cout:(wo + 1) * cout] = w[dy, dx]
    return jnp.asarray(band, jnp.bfloat16)


def prep_kernel_params(params, Cb):
    Co = params["fc_w"].shape[1]
    kp = {}

    # 1-D convs == packed convs with W = 1 (conv axis on sublanes; no zero waste).
    kp["bd1d1"] = _banded(np.asarray(params["c1d_w1"])[:, None], 1)   # (7, 3, 12)
    kp["bd1d2"] = _banded(np.asarray(params["c1d_w2"])[:, None], 1)   # (7, 12, 3)
    # 7x7 Conv2D_Act convs.
    kp["bd2d1"] = _banded(params["c2d_w1"], Cb)                        # (7, Cb*3, Cb*12)
    kp["bd2d2"] = _banded(params["c2d_w2"], Cb)                        # (7, Cb*12, Cb*3)
    # SP conv 0 with the scale-mean fused in: Cin 1 -> 3, weights / 3.
    w0 = np.asarray(params["sp_w0"], np.float32)
    w0 = np.repeat(w0, SCALE_NUM, axis=2) / float(SCALE_NUM)
    kp["bsp0"] = _banded(w0, Cb)                                       # (3, Cb*3, Cb*8)
    for i in range(1, 5):
        kp[f"bsp{i}"] = _banded(params[f"sp_w{i}"], Cb)

    # Auto_Multiply helpers (precomputed, so no per-step iota/compare work).
    q = np.arange(Cb * SCALE_NUM)
    kp["tilemat"] = jnp.asarray(
        (q[None, :] % SCALE_NUM == np.arange(SCALE_NUM)[:, None]).astype(np.float32))
    kp["scatter01"] = jnp.asarray(
        (q[None, :] // SCALE_NUM == np.arange(Cb)[:, None]).astype(np.float32))

    # GAP selection matrix with the 1/(Cb*Cb) mean folded in.
    cf = SP_CHANS[-1]
    qq = np.arange(Cb * cf)
    gm = (qq[:, None] % cf == np.arange(cf)[None, :]).astype(np.float32) / float(Cb * Cb)
    kp["gap_mat"] = jnp.asarray(gm)                                    # (Cb*16, 16)
    kp["fc_w"] = jnp.asarray(params["fc_w"], jnp.float32)              # (16, Co)

    # One packed, 128-lane-aligned bias row (2-D conv biases tiled along W).
    layout, tot = _bias_layout(Cb, Co)
    packed = np.zeros((1, tot), np.float32)

    def put(name, vec):
        o, w = layout[name]
        packed[0, o:o + w] = np.asarray(vec, np.float32)

    put("b1d1", params["c1d_b1"])
    put("b1d2", params["c1d_b2"])
    put("b2d1", np.tile(np.asarray(params["c2d_b1"]), Cb))
    put("b2d2", np.tile(np.asarray(params["c2d_b2"]), Cb))
    for i in range(5):
        put(f"bsp{i}", np.tile(np.asarray(params[f"sp_b{i}"]), Cb))
    put("fc_b", params["fc_b"])
    kp["bias_pack"] = jnp.asarray(packed)
    return kp


# ----------------------------------------------------------------------------
# Forward pass: tiny center-pixel / multi-scale prep in the wrapper, everything
# else inside the single fused Pallas kernel.
# ----------------------------------------------------------------------------
@jax.jit
def auto_contrast_2d_forward(kparams, x):
    """x: [B, Cb, H, W] (NCHW, matching the PyTorch module)."""
    B, Cb, H, W = x.shape
    assert Cb % 4 == 0, "MS_spectral with rates [1,2,4] requires Cb % 4 == 0"

    # center_pixel
    center = x[:, :, H // 2, W // 2]                          # [B, Cb]

    # MS_spectral, rsp_rate_list=[1, 2, 4]; samesize=True -> upsample back to Cb
    scales = []
    for r in (1, 2, 4):
        ds = center.reshape(B, Cb // r, r).mean(axis=-1)
        scales.append(jnp.repeat(ds, r, axis=1))              # [B, Cb]
    ms = jnp.stack(scales, axis=-1)                           # [B, Cb, 3]

    out, sp5_gap = _fused_forward(ms, kparams)
    return [out], [sp5_gap]


if __name__ == "__main__":
    B, Cb, H, W = 2, 32, 8, 8          # hyperspectral cube: 32 bands, 8x8 patch
    out_channels = 10

    x = jax.random.normal(jax.random.PRNGKey(0), (B, Cb, H, W), dtype=jnp.float32)
    params = init_params(42, out_channels)
    kparams = prep_kernel_params(params, Cb)

    outs, gaps = auto_contrast_2d_forward(kparams, x)
    out = jax.block_until_ready(outs[0])
    gap = jax.block_until_ready(gaps[0])

    assert out.shape == (B, out_channels)
    assert gap.shape == (B, 16)
    assert bool(jnp.all(jnp.isfinite(out))) and bool(jnp.all(jnp.isfinite(gap)))
    print("KERNEL_OK")
</pallas_src>

<mosaic_0001>
module attributes {stable_mosaic.version = 11 : i64} {
  func.func @_fused_kernel(%arg0: i32, %arg1: memref<1x32x3xf32, #tpu.memory_space<vmem>>, %arg2: memref<3x96xf32, #tpu.memory_space<vmem>>, %arg3: memref<32x96xf32, #tpu.memory_space<vmem>>, %arg4: memref<7x3x12xbf16, #tpu.memory_space<vmem>>, %arg5: memref<7x12x3xbf16, #tpu.memory_space<vmem>>, %arg6: memref<7x96x384xbf16, #tpu.memory_space<vmem>>, %arg7: memref<7x384x96xbf16, #tpu.memory_space<vmem>>, %arg8: memref<3x96x256xbf16, #tpu.memory_space<vmem>>, %arg9: memref<3x256x256xbf16, #tpu.memory_space<vmem>>, %arg10: memref<3x256x512xbf16, #tpu.memory_space<vmem>>, %arg11: memref<3x512x512xbf16, #tpu.memory_space<vmem>>, %arg12: memref<3x512x512xbf16, #tpu.memory_space<vmem>>, %arg13: memref<512x16xf32, #tpu.memory_space<vmem>>, %arg14: memref<16x10xf32, #tpu.memory_space<vmem>>, %arg15: memref<1x2944xf32, #tpu.memory_space<vmem>>, %arg16: memref<1x1x10xf32, #tpu.memory_space<vmem>>, %arg17: memref<1x1x16xf32, #tpu.memory_space<vmem>>) attributes {dimension_semantics = [#tpu.dimension_semantics<parallel>], iteration_bounds = array<i64: 2>, scalar_prefetch = 0 : i64, scratch_operands = 0 : i64, tpu.core_type = #tpu.core_type<tc>, window_params = [{transform_indices = @transform_0, window_bounds = array<i64: 1, 32, 3>}, {pipeline_mode = #tpu.pipeline_mode<synchronous>, transform_indices = @transform_1, window_bounds = array<i64: 3, 96>}, {pipeline_mode = #tpu.pipeline_mode<synchronous>, transform_indices = @transform_2, window_bounds = array<i64: 32, 96>}, {pipeline_mode = #tpu.pipeline_mode<synchronous>, transform_indices = @transform_3, window_bounds = array<i64: 7, 3, 12>}, {pipeline_mode = #tpu.pipeline_mode<synchronous>, transform_indices = @transform_4, window_bounds = array<i64: 7, 12, 3>}, {pipeline_mode = #tpu.pipeline_mode<synchronous>, transform_indices = @transform_5, window_bounds = array<i64: 7, 96, 384>}, {pipeline_mode = #tpu.pipeline_mode<synchronous>, transform_indices = @transform_6, window_bounds = array<i64: 7, 384, 96>}, {pipeline_mode = #tpu.pipeline_mode<synchronous>, transform_indices = @transform_7, window_bounds = array<i64: 3, 96, 256>}, {pipeline_mode = #tpu.pipeline_mode<synchronous>, transform_indices = @transform_8, window_bounds = array<i64: 3, 256, 256>}, {pipeline_mode = #tpu.pipeline_mode<synchronous>, transform_indices = @transform_9, window_bounds = array<i64: 3, 256, 512>}, {pipeline_mode = #tpu.pipeline_mode<synchronous>, transform_indices = @transform_10, window_bounds = array<i64: 3, 512, 512>}, {pipeline_mode = #tpu.pipeline_mode<synchronous>, transform_indices = @transform_11, window_bounds = array<i64: 3, 512, 512>}, {pipeline_mode = #tpu.pipeline_mode<synchronous>, transform_indices = @transform_12, window_bounds = array<i64: 512, 16>}, {pipeline_mode = #tpu.pipeline_mode<synchronous>, transform_indices = @transform_13, window_bounds = array<i64: 16, 10>}, {pipeline_mode = #tpu.pipeline_mode<synchronous>, transform_indices = @transform_14, window_bounds = array<i64: 1, 2944>}, {transform_indices = @transform_15, window_bounds = array<i64: 1, 1, 10>}, {transform_indices = @transform_16, window_bounds = array<i64: 1, 1, 16>}]} {
    %c0 = arith.constant 0 : index
    %c0_0 = arith.constant 0 : index
    %c0_1 = arith.constant 0 : index
    %0 = vector.load %arg1[%c0, %c0_0, %c0_1] : memref<1x32x3xf32, #tpu.memory_space<vmem>>, vector<1x32x3xf32>
    %1 = vector.shape_cast %0 : vector<1x32x3xf32> to vector<32x3xf32>
    %c0_2 = arith.constant 0 : index
    %c0_3 = arith.constant 0 : index
    %2 = vector.load %arg15[%c0_2, %c0_3] : memref<1x2944xf32, #tpu.memory_space<vmem>>, vector<1x12xf32>
    %3 = arith.truncf %1 : vector<32x3xf32> to vector<32x3xbf16>
    %cst = arith.constant 0.000000e+00 : bf16
    %4 = vector.broadcast %cst : bf16 to vector<3x3xbf16>
    %5 = tpu.concatenate %4, %3, %4 in 0 : vector<3x3xbf16>, vector<32x3xbf16>, vector<3x3xbf16> -> vector<38x3xbf16>
    %6 = vector.extract_strided_slice %5 {offsets = [0, 0], sizes = [32, 3], strides = [1, 1]} : vector<38x3xbf16> to vector<32x3xbf16>
    %c0_4 = arith.constant 0 : index
    %c0_5 = arith.constant 0 : index
    %c0_6 = arith.constant 0 : index
    %7 = vector.load %arg4[%c0_4, %c0_5, %c0_6] : memref<7x3x12xbf16, #tpu.memory_space<vmem>>, vector<1x3x12xbf16>
    %8 = vector.shape_cast %7 : vector<1x3x12xbf16> to vector<3x12xbf16>
    %cst_7 = arith.constant dense<0.000000e+00> : vector<32x12xf32>
    %9 = tpu.matmul %6, %8, %cst_7 {dimension_numbers = #tpu.dot_dimension_numbers<[1], [0], [0], [1], [0, 0, 1, 1], [], []>} : vector<32x3xbf16>, vector<3x12xbf16>, vector<32x12xf32> -> vector<32x12xf32>
    %10 = vector.broadcast %2 : vector<1x12xf32> to vector<32x12xf32>
    %11 = arith.addf %10, %9 : vector<32x12xf32>
    %12 = vector.extract_strided_slice %5 {offsets = [1, 0], sizes = [32, 3], strides = [1, 1]} : vector<38x3xbf16> to vector<32x3xbf16>
    %c1 = arith.constant 1 : index
    %c0_8 = arith.constant 0 : index
    %c0_9 = arith.constant 0 : index
    %13 = vector.load %arg4[%c1, %c0_8, %c0_9] : memref<7x3x12xbf16, #tpu.memory_space<vmem>>, vector<1x3x12xbf16>
    %14 = vector.shape_cast %13 : vector<1x3x12xbf16> to vector<3x12xbf16>
    %cst_10 = arith.constant dense<0.000000e+00> : vector<32x12xf32>
    %15 = tpu.matmul %12, %14, %cst_10 {dimension_numbers = #tpu.dot_dimension_numbers<[1], [0], [0], [1], [0, 0, 1, 1], [], []>} : vector<32x3xbf16>, vector<3x12xbf16>, vector<32x12xf32> -> vector<32x12xf32>
    %16 = arith.addf %11, %15 : vector<32x12xf32>
    %17 = vector.extract_strided_slice %5 {offsets = [2, 0], sizes = [32, 3], strides = [1, 1]} : vector<38x3xbf16> to vector<32x3xbf16>
    %c2 = arith.constant 2 : index
    %c0_11 = arith.constant 0 : index
    %c0_12 = arith.constant 0 : index
    %18 = vector.load %arg4[%c2, %c0_11, %c0_12] : memref<7x3x12xbf16, #tpu.memory_space<vmem>>, vector<1x3x12xbf16>
    %19 = vector.shape_cast %18 : vector<1x3x12xbf16> to vector<3x12xbf16>
    %cst_13 = arith.constant dense<0.000000e+00> : vector<32x12xf32>
    %20 = tpu.matmul %17, %19, %cst_13 {dimension_numbers = #tpu.dot_dimension_numbers<[1], [0], [0], [1], [0, 0, 1, 1], [], []>} : vector<32x3xbf16>, vector<3x12xbf16>, vector<32x12xf32> -> vector<32x12xf32>
    %21 = arith.addf %16, %20 : vector<32x12xf32>
    %22 = vector.extract_strided_slice %5 {offsets = [3, 0], sizes = [32, 3], strides = [1, 1]} : vector<38x3xbf16> to vector<32x3xbf16>
    %c3 = arith.constant 3 : index
    %c0_14 = arith.constant 0 : index
    %c0_15 = arith.constant 0 : index
    %23 = vector.load %arg4[%c3, %c0_14, %c0_15] : memref<7x3x12xbf16, #tpu.memory_space<vmem>>, vector<1x3x12xbf16>
    %24 = vector.shape_cast %23 : vector<1x3x12xbf16> to vector<3x12xbf16>
    %cst_16 = arith.constant dense<0.000000e+00> : vector<32x12xf32>
    %25 = tpu.matmul %22, %24, %cst_16 {dimension_numbers = #tpu.dot_dimension_numbers<[1], [0], [0], [1], [0, 0, 1, 1], [], []>} : vector<32x3xbf16>, vector<3x12xbf16>, vector<32x12xf32> -> vector<32x12xf32>
    %26 = arith.addf %21, %25 : vector<32x12xf32>
    %27 = vector.extract_strided_slice %5 {offsets = [4, 0], sizes = [32, 3], strides = [1, 1]} : vector<38x3xbf16> to vector<32x3xbf16>
    %c4 = arith.constant 4 : index
    %c0_17 = arith.constant 0 : index
    %c0_18 = arith.constant 0 : index
    %28 = vector.load %arg4[%c4, %c0_17, %c0_18] : memref<7x3x12xbf16, #tpu.memory_space<vmem>>, vector<1x3x12xbf16>
    %29 = vector.shape_cast %28 : vector<1x3x12xbf16> to vector<3x12xbf16>
    %cst_19 = arith.constant dense<0.000000e+00> : vector<32x12xf32>
    %30 = tpu.matmul %27, %29, %cst_19 {dimension_numbers = #tpu.dot_dimension_numbers<[1], [0], [0], [1], [0, 0, 1, 1], [], []>} : vector<32x3xbf16>, vector<3x12xbf16>, vector<32x12xf32> -> vector<32x12xf32>
    %31 = arith.addf %26, %30 : vector<32x12xf32>
    %32 = vector.extract_strided_slice %5 {offsets = [5, 0], sizes = [32, 3], strides = [1, 1]} : vector<38x3xbf16> to vector<32x3xbf16>
    %c5 = arith.constant 5 : index
    %c0_20 = arith.constant 0 : index
    %c0_21 = arith.constant 0 : index
    %33 = vector.load %arg4[%c5, %c0_20, %c0_21] : memref<7x3x12xbf16, #tpu.memory_space<vmem>>, vector<1x3x12xbf16>
    %34 = vector.shape_cast %33 : vector<1x3x12xbf16> to vector<3x12xbf16>
    %cst_22 = arith.constant dense<0.000000e+00> : vector<32x12xf32>
    %35 = tpu.matmul %32, %34, %cst_22 {dimension_numbers = #tpu.dot_dimension_numbers<[1], [0], [0], [1], [0, 0, 1, 1], [], []>} : vector<32x3xbf16>, vector<3x12xbf16>, vector<32x12xf32> -> vector<32x12xf32>
    %36 = arith.addf %31, %35 : vector<32x12xf32>
    %37 = vector.extract_strided_slice %5 {offsets = [6, 0], sizes = [32, 3], strides = [1, 1]} : vector<38x3xbf16> to vector<32x3xbf16>
    %c6 = arith.constant 6 : index
    %c0_23 = arith.constant 0 : index
    %c0_24 = arith.constant 0 : index
    %38 = vector.load %arg4[%c6, %c0_23, %c0_24] : memref<7x3x12xbf16, #tpu.memory_space<vmem>>, vector<1x3x12xbf16>
    %39 = vector.shape_cast %38 : vector<1x3x12xbf16> to vector<3x12xbf16>
    %cst_25 = arith.constant dense<0.000000e+00> : vector<32x12xf32>
    %40 = tpu.matmul %37, %39, %cst_25 {dimension_numbers = #tpu.dot_dimension_numbers<[1], [0], [0], [1], [0, 0, 1, 1], [], []>} : vector<32x3xbf16>, vector<3x12xbf16>, vector<32x12xf32> -> vector<32x12xf32>
    %41 = arith.addf %36, %40 : vector<32x12xf32>
    %cst_26 = arith.constant 0.000000e+00 : f32
    %42 = vector.broadcast %cst_26 : f32 to vector<32x12xf32>
    %43 = arith.maximumf %41, %42 : vector<32x12xf32>
    %c0_27 = arith.constant 0 : index
    %c128 = arith.constant 128 : index
    %44 = vector.load %arg15[%c0_27, %c128] : memref<1x2944xf32, #tpu.memory_space<vmem>>, vector<1x3xf32>
    %45 = arith.truncf %43 : vector<32x12xf32> to vector<32x12xbf16>
    %cst_28 = arith.constant 0.000000e+00 : bf16
    %46 = vector.broadcast %cst_28 : bf16 to vector<3x12xbf16>
    %47 = tpu.concatenate %46, %45, %46 in 0 : vector<3x12xbf16>, vector<32x12xbf16>, vector<3x12xbf16> -> vector<38x12xbf16>
    %48 = vector.extract_strided_slice %47 {offsets = [0, 0], sizes = [32, 12], strides = [1, 1]} : vector<38x12xbf16> to vector<32x12xbf16>
    %c0_29 = arith.constant 0 : index
    %c0_30 = arith.constant 0 : index
    %c0_31 = arith.constant 0 : index
    %49 = vector.load %arg5[%c0_29, %c0_30, %c0_31] : memref<7x12x3xbf16, #tpu.memory_space<vmem>>, vector<1x12x3xbf16>
    %50 = vector.shape_cast %49 : vector<1x12x3xbf16> to vector<12x3xbf16>
    %cst_32 = arith.constant dense<0.000000e+00> : vector<32x3xf32>
    %51 = tpu.matmul %48, %50, %cst_32 {dimension_numbers = #tpu.dot_dimension_numbers<[1], [0], [0], [1], [0, 0, 1, 1], [], []>} : vector<32x12xbf16>, vector<12x3xbf16>, vector<32x3xf32> -> vector<32x3xf32>
    %52 = vector.broadcast %44 : vector<1x3xf32> to vector<32x3xf32>
    %53 = arith.addf %52, %51 : vector<32x3xf32>
    %54 = vector.extract_strided_slice %47 {offsets = [1, 0], sizes = [32, 12], strides = [1, 1]} : vector<38x12xbf16> to vector<32x12xbf16>
    %c1_33 = arith.constant 1 : index
    %c0_34 = arith.constant 0 : index
    %c0_35 = arith.constant 0 : index
    %55 = vector.load %arg5[%c1_33, %c0_34, %c0_35] : memref<7x12x3xbf16, #tpu.memory_space<vmem>>, vector<1x12x3xbf16>
    %56 = vector.shape_cast %55 : vector<1x12x3xbf16> to vector<12x3xbf16>
    %cst_36 = arith.constant dense<0.000000e+00> : vector<32x3xf32>
    %57 = tpu.matmul %54, %56, %cst_36 {dimension_numbers = #tpu.dot_dimension_numbers<[1], [0], [0], [1], [0, 0, 1, 1], [], []>} : vector<32x12xbf16>, vector<12x3xbf16>, vector<32x3xf32> -> vector<32x3xf32>
    %58 = arith.addf %53, %57 : vector<32x3xf32>
    %59 = vector.extract_strided_slice %47 {offsets = [2, 0], sizes = [32, 12], strides = [1, 1]} : vector<38x12xbf16> to vector<32x12xbf16>
    %c2_37 = arith.constant 2 : index
    %c0_38 = arith.constant 0 : index
    %c0_39 = arith.constant 0 : index
    %60 = vector.load %arg5[%c2_37, %c0_38, %c0_39] : memref<7x12x3xbf16, #tpu.memory_space<vmem>>, vector<1x12x3xbf16>
    %61 = vector.shape_cast %60 : vector<1x12x3xbf16> to vector<12x3xbf16>
    %cst_40 = arith.constant dense<0.000000e+00> : vector<32x3xf32>
    %62 = tpu.matmul %59, %61, %cst_40 {dimension_numbers = #tpu.dot_dimension_numbers<[1], [0], [0], [1], [0, 0, 1, 1], [], []>} : vector<32x12xbf16>, vector<12x3xbf16>, vector<32x3xf32> -> vector<32x3xf32>
    %63 = arith.addf %58, %62 : vector<32x3xf32>
    %64 = vector.extract_strided_slice %47 {offsets = [3, 0], sizes = [32, 12], strides = [1, 1]} : vector<38x12xbf16> to vector<32x12xbf16>
    %c3_41 = arith.constant 3 : index
    %c0_42 = arith.constant 0 : index
    %c0_43 = arith.constant 0 : index
    %65 = vector.load %arg5[%c3_41, %c0_42, %c0_43] : memref<7x12x3xbf16, #tpu.memory_space<vmem>>, vector<1x12x3xbf16>
    %66 = vector.shape_cast %65 : vector<1x12x3xbf16> to vector<12x3xbf16>
    %cst_44 = arith.constant dense<0.000000e+00> : vector<32x3xf32>
    %67 = tpu.matmul %64, %66, %cst_44 {dimension_numbers = #tpu.dot_dimension_numbers<[1], [0], [0], [1], [0, 0, 1, 1], [], []>} : vector<32x12xbf16>, vector<12x3xbf16>, vector<32x3xf32> -> vector<32x3xf32>
    %68 = arith.addf %63, %67 : vector<32x3xf32>
    %69 = vector.extract_strided_slice %47 {offsets = [4, 0], sizes = [32, 12], strides = [1, 1]} : vector<38x12xbf16> to vector<32x12xbf16>
    %c4_45 = arith.constant 4 : index
    %c0_46 = arith.constant 0 : index
    %c0_47 = arith.constant 0 : index
    %70 = vector.load %arg5[%c4_45, %c0_46, %c0_47] : memref<7x12x3xbf16, #tpu.memory_space<vmem>>, vector<1x12x3xbf16>
    %71 = vector.shape_cast %70 : vector<1x12x3xbf16> to vector<12x3xbf16>
    %cst_48 = arith.constant dense<0.000000e+00> : vector<32x3xf32>
    %72 = tpu.matmul %69, %71, %cst_48 {dimension_numbers = #tpu.dot_dimension_numbers<[1], [0], [0], [1], [0, 0, 1, 1], [], []>} : vector<32x12xbf16>, vector<12x3xbf16>, vector<32x3xf32> -> vector<32x3xf32>
    %73 = arith.addf %68, %72 : vector<32x3xf32>
    %74 = vector.extract_strided_slice %47 {offsets = [5, 0], sizes = [32, 12], strides = [1, 1]} : vector<38x12xbf16> to vector<32x12xbf16>
    %c5_49 = arith.constant 5 : index
    %c0_50 = arith.constant 0 : index
    %c0_51 = arith.constant 0 : index
    %75 = vector.load %arg5[%c5_49, %c0_50, %c0_51] : memref<7x12x3xbf16, #tpu.memory_space<vmem>>, vector<1x12x3xbf16>
    %76 = vector.shape_cast %75 : vector<1x12x3xbf16> to vector<12x3xbf16>
    %cst_52 = arith.constant dense<0.000000e+00> : vector<32x3xf32>
    %77 = tpu.matmul %74, %76, %cst_52 {dimension_numbers = #tpu.dot_dimension_numbers<[1], [0], [0], [1], [0, 0, 1, 1], [], []>} : vector<32x12xbf16>, vector<12x3xbf16>, vector<32x3xf32> -> vector<32x3xf32>
    %78 = arith.addf %73, %77 : vector<32x3xf32>
    %79 = vector.extract_strided_slice %47 {offsets = [6, 0], sizes = [32, 12], strides = [1, 1]} : vector<38x12xbf16> to vector<32x12xbf16>
    %c6_53 = arith.constant 6 : index
    %c0_54 = arith.constant 0 : index
    %c0_55 = arith.constant 0 : index
    %80 = vector.load %arg5[%c6_53, %c0_54, %c0_55] : memref<7x12x3xbf16, #tpu.memory_space<vmem>>, vector<1x12x3xbf16>
    %81 = vector.shape_cast %80 : vector<1x12x3xbf16> to vector<12x3xbf16>
    %cst_56 = arith.constant dense<0.000000e+00> : vector<32x3xf32>
    %82 = tpu.matmul %79, %81, %cst_56 {dimension_numbers = #tpu.dot_dimension_numbers<[1], [0], [0], [1], [0, 0, 1, 1], [], []>} : vector<32x12xbf16>, vector<12x3xbf16>, vector<32x3xf32> -> vector<32x3xf32>
    %83 = arith.addf %78, %82 : vector<32x3xf32>
    %84 = arith.negf %83 : vector<32x3xf32>
    %85 = math.exp %84 : vector<32x3xf32>
    %cst_57 = arith.constant 1.000000e+00 : f32
    %86 = vector.broadcast %cst_57 : f32 to vector<32x3xf32>
    %87 = arith.addf %86, %85 : vector<32x3xf32>
    %88 = arith.divf %86, %87 : vector<32x3xf32>
    %89 = arith.mulf %1, %88 : vector<32x3xf32>
    %c0_58 = arith.constant 0 : index
    %c0_59 = arith.constant 0 : index
    %90 = vector.load %arg2[%c0_58, %c0_59] : memref<3x96xf32, #tpu.memory_space<vmem>>, vector<3x96xf32>
    %cst_60 = arith.constant dense<0.000000e+00> : vector<32x96xf32>
    %91 = tpu.matmul %89, %90, %cst_60 {dimension_numbers = #tpu.dot_dimension_numbers<[1], [0], [0], [1], [0, 0, 1, 1], [], []>} : vector<32x3xf32>, vector<3x96xf32>, vector<32x96xf32> -> vector<32x96xf32>
    %c0_61 = arith.constant 0 : index
    %c0_62 = arith.constant 0 : index
    %92 = vector.load %arg3[%c0_61, %c0_62] : memref<32x96xf32, #tpu.memory_space<vmem>>, vector<32x96xf32>
    %93 = arith.mulf %91, %92 : vector<32x96xf32>
    %cst_63 = arith.constant dense<0.000000e+00> : vector<96xf32>
    %94 = vector.multi_reduction <add>, %93, %cst_63 [0] : vector<32x96xf32> to vector<96xf32>
    %95 = vector.shape_cast %94 : vector<96xf32> to vector<1x96xf32>
    %96 = vector.broadcast %95 : vector<1x96xf32> to vector<32x96xf32>
    %97 = arith.mulf %91, %96 : vector<32x96xf32>
    %c0_64 = arith.constant 0 : index
    %c256 = arith.constant 256 : index
    %98 = vector.load %arg15[%c0_64, %c256] : memref<1x2944xf32, #tpu.memory_space<vmem>>, vector<1x384xf32>
    %99 = arith.truncf %97 : vector<32x96xf32> to vector<32x96xbf16>
    %cst_65 = arith.constant 0.000000e+00 : bf16
    %100 = vector.broadcast %cst_65 : bf16 to vector<3x96xbf16>
    %101 = tpu.concatenate %100, %99, %100 in 0 : vector<3x96xbf16>, vector<32x96xbf16>, vector<3x96xbf16> -> vector<38x96xbf16>
    %102 = vector.extract_strided_slice %101 {offsets = [0, 0], sizes = [32, 96], strides = [1, 1]} : vector<38x96xbf16> to vector<32x96xbf16>
    %c0_66 = arith.constant 0 : index
    %c0_67 = arith.constant 0 : index
    %c0_68 = arith.constant 0 : index
    %103 = vector.load %arg6[%c0_66, %c0_67, %c0_68] : memref<7x96x384xbf16, #tpu.memory_space<vmem>>, vector<1x96x384xbf16>
    %104 = vector.shape_cast %103 : vector<1x96x384xbf16> to vector<96x384xbf16>
    %cst_69 = arith.constant dense<0.000000e+00> : vector<32x384xf32>
    %105 = tpu.matmul %102, %104, %cst_69 {dimension_numbers = #tpu.dot_dimension_numbers<[1], [0], [0], [1], [0, 0, 1, 1], [], []>} : vector<32x96xbf16>, vector<96x384xbf16>, vector<32x384xf32> -> vector<32x384xf32>
    %106 = vector.broadcast %98 : vector<1x384xf32> to vector<32x384xf32>
    %107 = arith.addf %106, %105 : vector<32x384xf32>
    %108 = vector.extract_strided_slice %101 {offsets = [1, 0], sizes = [32, 96], strides = [1, 1]} : vector<38x96xbf16> to vector<32x96xbf16>
    %c1_70 = arith.constant 1 : index
    %c0_71 = arith.constant 0 : index
    %c0_72 = arith.constant 0 : index
    %109 = vector.load %arg6[%c1_70, %c0_71, %c0_72] : memref<7x96x384xbf16, #tpu.memory_space<vmem>>, vector<1x96x384xbf16>
    %110 = vector.shape_cast %109 : vector<1x96x384xbf16> to vector<96x384xbf16>
    %cst_73 = arith.constant dense<0.000000e+00> : vector<32x384xf32>
    %111 = tpu.matmul %108, %110, %cst_73 {dimension_numbers = #tpu.dot_dimension_numbers<[1], [0], [0], [1], [0, 0, 1, 1], [], []>} : vector<32x96xbf16>, vector<96x384xbf16>, vector<32x384xf32> -> vector<32x384xf32>
    %112 = arith.addf %107, %111 : vector<32x384xf32>
    %113 = vector.extract_strided_slice %101 {offsets = [2, 0], sizes = [32, 96], strides = [1, 1]} : vector<38x96xbf16> to vector<32x96xbf16>
    %c2_74 = arith.constant 2 : index
    %c0_75 = arith.constant 0 : index
    %c0_76 = arith.constant 0 : index
    %114 = vector.load %arg6[%c2_74, %c0_75, %c0_76] : memref<7x96x384xbf16, #tpu.memory_space<vmem>>, vector<1x96x384xbf16>
    %115 = vector.shape_cast %114 : vector<1x96x384xbf16> to vector<96x384xbf16>
    %cst_77 = arith.constant dense<0.000000e+00> : vector<32x384xf32>
    %116 = tpu.matmul %113, %115, %cst_77 {dimension_numbers = #tpu.dot_dimension_numbers<[1], [0], [0], [1], [0, 0, 1, 1], [], []>} : vector<32x96xbf16>, vector<96x384xbf16>, vector<32x384xf32> -> vector<32x384xf32>
    %117 = arith.addf %112, %116 : vector<32x384xf32>
    %118 = vector.extract_strided_slice %101 {offsets = [3, 0], sizes = [32, 96], strides = [1, 1]} : vector<38x96xbf16> to vector<32x96xbf16>
    %c3_78 = arith.constant 3 : index
    %c0_79 = arith.constant 0 : index
    %c0_80 = arith.constant 0 : index
    %119 = vector.load %arg6[%c3_78, %c0_79, %c0_80] : memref<7x96x384xbf16, #tpu.memory_space<vmem>>, vector<1x96x384xbf16>
    %120 = vector.shape_cast %119 : vector<1x96x384xbf16> to vector<96x384xbf16>
    %cst_81 = arith.constant dense<0.000000e+00> : vector<32x384xf32>
    %121 = tpu.matmul %118, %120, %cst_81 {dimension_numbers = #tpu.dot_dimension_numbers<[1], [0], [0], [1], [0, 0, 1, 1], [], []>} : vector<32x96xbf16>, vector<96x384xbf16>, vector<32x384xf32> -> vector<32x384xf32>
    %122 = arith.addf %117, %121 : vector<32x384xf32>
    %123 = vector.extract_strided_slice %101 {offsets = [4, 0], sizes = [32, 96], strides = [1, 1]} : vector<38x96xbf16> to vector<32x96xbf16>
    %c4_82 = arith.constant 4 : index
    %c0_83 = arith.constant 0 : index
    %c0_84 = arith.constant 0 : index
    %124 = vector.load %arg6[%c4_82, %c0_83, %c0_84] : memref<7x96x384xbf16, #tpu.memory_space<vmem>>, vector<1x96x384xbf16>
    %125 = vector.shape_cast %124 : vector<1x96x384xbf16> to vector<96x384xbf16>
    %cst_85 = arith.constant dense<0.000000e+00> : vector<32x384xf32>
    %126 = tpu.matmul %123, %125, %cst_85 {dimension_numbers = #tpu.dot_dimension_numbers<[1], [0], [0], [1], [0, 0, 1, 1], [], []>} : vector<32x96xbf16>, vector<96x384xbf16>, vector<32x384xf32> -> vector<32x384xf32>
    %127 = arith.addf %122, %126 : vector<32x384xf32>
    %128 = vector.extract_strided_slice %101 {offsets = [5, 0], sizes = [32, 96], strides = [1, 1]} : vector<38x96xbf16> to vector<32x96xbf16>
    %c5_86 = arith.constant 5 : index
    %c0_87 = arith.constant 0 : index
    %c0_88 = arith.constant 0 : index
    %129 = vector.load %arg6[%c5_86, %c0_87, %c0_88] : memref<7x96x384xbf16, #tpu.memory_space<vmem>>, vector<1x96x384xbf16>
    %130 = vector.shape_cast %129 : vector<1x96x384xbf16> to vector<96x384xbf16>
    %cst_89 = arith.constant dense<0.000000e+00> : vector<32x384xf32>
    %131 = tpu.matmul %128, %130, %cst_89 {dimension_numbers = #tpu.dot_dimension_numbers<[1], [0], [0], [1], [0, 0, 1, 1], [], []>} : vector<32x96xbf16>, vector<96x384xbf16>, vector<32x384xf32> -> vector<32x384xf32>
    %132 = arith.addf %127, %131 : vector<32x384xf32>
    %133 = vector.extract_strided_slice %101 {offsets = [6, 0], sizes = [32, 96], strides = [1, 1]} : vector<38x96xbf16> to vector<32x96xbf16>
    %c6_90 = arith.constant 6 : index
    %c0_91 = arith.constant 0 : index
    %c0_92 = arith.constant 0 : index
    %134 = vector.load %arg6[%c6_90, %c0_91, %c0_92] : memref<7x96x384xbf16, #tpu.memory_space<vmem>>, vector<1x96x384xbf16>
    %135 = vector.shape_cast %134 : vector<1x96x384xbf16> to vector<96x384xbf16>
    %cst_93 = arith.constant dense<0.000000e+00> : vector<32x384xf32>
    %136 = tpu.matmul %133, %135, %cst_93 {dimension_numbers = #tpu.dot_dimension_numbers<[1], [0], [0], [1], [0, 0, 1, 1], [], []>} : vector<32x96xbf16>, vector<96x384xbf16>, vector<32x384xf32> -> vector<32x384xf32>
    %137 = arith.addf %132, %136 : vector<32x384xf32>
    %cst_94 = arith.constant 0.000000e+00 : f32
    %138 = vector.broadcast %cst_94 : f32 to vector<32x384xf32>
    %139 = arith.maximumf %137, %138 : vector<32x384xf32>
    %c0_95 = arith.constant 0 : index
    %c640 = arith.constant 640 : index
    %140 = vector.load %arg15[%c0_95, %c640] : memref<1x2944xf32, #tpu.memory_space<vmem>>, vector<1x96xf32>
    %141 = arith.truncf %139 : vector<32x384xf32> to vector<32x384xbf16>
    %cst_96 = arith.constant 0.000000e+00 : bf16
    %142 = vector.broadcast %cst_96 : bf16 to vector<3x384xbf16>
    %143 = tpu.concatenate %142, %141, %142 in 0 : vector<3x384xbf16>, vector<32x384xbf16>, vector<3x384xbf16> -> vector<38x384xbf16>
    %144 = vector.extract_strided_slice %143 {offsets = [0, 0], sizes = [32, 384], strides = [1, 1]} : vector<38x384xbf16> to vector<32x384xbf16>
    %c0_97 = arith.constant 0 : index
    %c0_98 = arith.constant 0 : index
    %c0_99 = arith.constant 0 : index
    %145 = vector.load %arg7[%c0_97, %c0_98, %c0_99] : memref<7x384x96xbf16, #tpu.memory_space<vmem>>, vector<1x384x96xbf16>
    %146 = vector.shape_cast %145 : vector<1x384x96xbf16> to vector<384x96xbf16>
    %cst_100 = arith.constant dense<0.000000e+00> : vector<32x96xf32>
    %147 = tpu.matmul %144, %146, %cst_100 {dimension_numbers = #tpu.dot_dimension_numbers<[1], [0], [0], [1], [0, 0, 1, 1], [], []>} : vector<32x384xbf16>, vector<384x96xbf16>, vector<32x96xf32> -> vector<32x96xf32>
    %148 = vector.broadcast %140 : vector<1x96xf32> to vector<32x96xf32>
    %149 = arith.addf %148, %147 : vector<32x96xf32>
    %150 = vector.extract_strided_slice %143 {offsets = [1, 0], sizes = [32, 384], strides = [1, 1]} : vector<38x384xbf16> to vector<32x384xbf16>
    %c1_101 = arith.constant 1 : index
    %c0_102 = arith.constant 0 : index
    %c0_103 = arith.constant 0 : index
    %151 = vector.load %arg7[%c1_101, %c0_102, %c0_103] : memref<7x384x96xbf16, #tpu.memory_space<vmem>>, vector<1x384x96xbf16>
    %152 = vector.shape_cast %151 : vector<1x384x96xbf16> to vector<384x96xbf16>
    %cst_104 = arith.constant dense<0.000000e+00> : vector<32x96xf32>
    %153 = tpu.matmul %150, %152, %cst_104 {dimension_numbers = #tpu.dot_dimension_numbers<[1], [0], [0], [1], [0, 0, 1, 1], [], []>} : vector<32x384xbf16>, vector<384x96xbf16>, vector<32x96xf32> -> vector<32x96xf32>
    %154 = arith.addf %149, %153 : vector<32x96xf32>
    %155 = vector.extract_strided_slice %143 {offsets = [2, 0], sizes = [32, 384], strides = [1, 1]} : vector<38x384xbf16> to vector<32x384xbf16>
    %c2_105 = arith.constant 2 : index
    %c0_106 = arith.constant 0 : index
    %c0_107 = arith.constant 0 : index
    %156 = vector.load %arg7[%c2_105, %c0_106, %c0_107] : memref<7x384x96xbf16, #tpu.memory_space<vmem>>, vector<1x384x96xbf16>
    %157 = vector.shape_cast %156 : vector<1x384x96xbf16> to vector<384x96xbf16>
    %cst_108 = arith.constant dense<0.000000e+00> : vector<32x96xf32>
    %158 = tpu.matmul %155, %157, %cst_108 {dimension_numbers = #tpu.dot_dimension_numbers<[1], [0], [0], [1], [0, 0, 1, 1], [], []>} : vector<32x384xbf16>, vector<384x96xbf16>, vector<32x96xf32> -> vector<32x96xf32>
    %159 = arith.addf %154, %158 : vector<32x96xf32>
    %160 = vector.extract_strided_slice %143 {offsets = [3, 0], sizes = [32, 384], strides = [1, 1]} : vector<38x384xbf16> to vector<32x384xbf16>
    %c3_109 = arith.constant 3 : index
    %c0_110 = arith.constant 0 : index
    %c0_111 = arith.constant 0 : index
    %161 = vector.load %arg7[%c3_109, %c0_110, %c0_111] : memref<7x384x96xbf16, #tpu.memory_space<vmem>>, vector<1x384x96xbf16>
    %162 = vector.shape_cast %161 : vector<1x384x96xbf16> to vector<384x96xbf16>
    %cst_112 = arith.constant dense<0.000000e+00> : vector<32x96xf32>
    %163 = tpu.matmul %160, %162, %cst_112 {dimension_numbers = #tpu.dot_dimension_numbers<[1], [0], [0], [1], [0, 0, 1, 1], [], []>} : vector<32x384xbf16>, vector<384x96xbf16>, vector<32x96xf32> -> vector<32x96xf32>
    %164 = arith.addf %159, %163 : vector<32x96xf32>
    %165 = vector.extract_strided_slice %143 {offsets = [4, 0], sizes = [32, 384], strides = [1, 1]} : vector<38x384xbf16> to vector<32x384xbf16>
    %c4_113 = arith.constant 4 : index
    %c0_114 = arith.constant 0 : index
    %c0_115 = arith.constant 0 : index
    %166 = vector.load %arg7[%c4_113, %c0_114, %c0_115] : memref<7x384x96xbf16, #tpu.memory_space<vmem>>, vector<1x384x96xbf16>
    %167 = vector.shape_cast %166 : vector<1x384x96xbf16> to vector<384x96xbf16>
    %cst_116 = arith.constant dense<0.000000e+00> : vector<32x96xf32>
    %168 = tpu.matmul %165, %167, %cst_116 {dimension_numbers = #tpu.dot_dimension_numbers<[1], [0], [0], [1], [0, 0, 1, 1], [], []>} : vector<32x384xbf16>, vector<384x96xbf16>, vector<32x96xf32> -> vector<32x96xf32>
    %169 = arith.addf %164, %168 : vector<32x96xf32>
    %170 = vector.extract_strided_slice %143 {offsets = [5, 0], sizes = [32, 384], strides = [1, 1]} : vector<38x384xbf16> to vector<32x384xbf16>
    %c5_117 = arith.constant 5 : index
    %c0_118 = arith.constant 0 : index
    %c0_119 = arith.constant 0 : index
    %171 = vector.load %arg7[%c5_117, %c0_118, %c0_119] : memref<7x384x96xbf16, #tpu.memory_space<vmem>>, vector<1x384x96xbf16>
    %172 = vector.shape_cast %171 : vector<1x384x96xbf16> to vector<384x96xbf16>
    %cst_120 = arith.constant dense<0.000000e+00> : vector<32x96xf32>
    %173 = tpu.matmul %170, %172, %cst_120 {dimension_numbers = #tpu.dot_dimension_numbers<[1], [0], [0], [1], [0, 0, 1, 1], [], []>} : vector<32x384xbf16>, vector<384x96xbf16>, vector<32x96xf32> -> vector<32x96xf32>
    %174 = arith.addf %169, %173 : vector<32x96xf32>
    %175 = vector.extract_strided_slice %143 {offsets = [6, 0], sizes = [32, 384], strides = [1, 1]} : vector<38x384xbf16> to vector<32x384xbf16>
    %c6_121 = arith.constant 6 : index
    %c0_122 = arith.constant 0 : index
    %c0_123 = arith.constant 0 : index
    %176 = vector.load %arg7[%c6_121, %c0_122, %c0_123] : memref<7x384x96xbf16, #tpu.memory_space<vmem>>, vector<1x384x96xbf16>
    %177 = vector.shape_cast %176 : vector<1x384x96xbf16> to vector<384x96xbf16>
    %cst_124 = arith.constant dense<0.000000e+00> : vector<32x96xf32>
    %178 = tpu.matmul %175, %177, %cst_124 {dimension_numbers = #tpu.dot_dimension_numbers<[1], [0], [0], [1], [0, 0, 1, 1], [], []>} : vector<32x384xbf16>, vector<384x96xbf16>, vector<32x96xf32> -> vector<32x96xf32>
    %179 = arith.addf %174, %178 : vector<32x96xf32>
    %180 = arith.negf %179 : vector<32x96xf32>
    %181 = math.exp %180 : vector<32x96xf32>
    %cst_125 = arith.constant 1.000000e+00 : f32
    %182 = vector.broadcast %cst_125 : f32 to vector<32x96xf32>
    %183 = arith.addf %182, %181 : vector<32x96xf32>
    %184 = arith.divf %182, %183 : vector<32x96xf32>
    %185 = arith.mulf %97, %184 : vector<32x96xf32>
    %c0_126 = arith.constant 0 : index
    %c768 = arith.constant 768 : index
    %186 = vector.load %arg15[%c0_126, %c768] : memref<1x2944xf32, #tpu.memory_space<vmem>>, vector<1x256xf32>
    %187 = arith.truncf %185 : vector<32x96xf32> to vector<32x96xbf16>
    %cst_127 = arith.constant 0.000000e+00 : bf16
    %188 = vector.broadcast %cst_127 : bf16 to vector<1x96xbf16>
    %189 = tpu.concatenate %188, %187, %188 in 0 : vector<1x96xbf16>, vector<32x96xbf16>, vector<1x96xbf16> -> vector<34x96xbf16>
    %190 = vector.extract_strided_slice %189 {offsets = [0, 0], sizes = [32, 96], strides = [1, 1]} : vector<34x96xbf16> to vector<32x96xbf16>
    %c0_128 = arith.constant 0 : index
    %c0_129 = arith.constant 0 : index
    %c0_130 = arith.constant 0 : index
    %191 = vector.load %arg8[%c0_128, %c0_129, %c0_130] : memref<3x96x256xbf16, #tpu.memory_space<vmem>>, vector<1x96x256xbf16>
    %192 = vector.shape_cast %191 : vector<1x96x256xbf16> to vector<96x256xbf16>
    %cst_131 = arith.constant dense<0.000000e+00> : vector<32x256xf32>
    %193 = tpu.matmul %190, %192, %cst_131 {dimension_numbers = #tpu.dot_dimension_numbers<[1], [0], [0], [1], [0, 0, 1, 1], [], []>} : vector<32x96xbf16>, vector<96x256xbf16>, vector<32x256xf32> -> vector<32x256xf32>
    %194 = vector.broadcast %186 : vector<1x256xf32> to vector<32x256xf32>
    %195 = arith.addf %194, %193 : vector<32x256xf32>
    %196 = vector.extract_strided_slice %189 {offsets = [1, 0], sizes = [32, 96], strides = [1, 1]} : vector<34x96xbf16> to vector<32x96xbf16>
    %c1_132 = arith.constant 1 : index
    %c0_133 = arith.constant 0 : index
    %c0_134 = arith.constant 0 : index
    %197 = vector.load %arg8[%c1_132, %c0_133, %c0_134] : memref<3x96x256xbf16, #tpu.memory_space<vmem>>, vector<1x96x256xbf16>
    %198 = vector.shape_cast %197 : vector<1x96x256xbf16> to vector<96x256xbf16>
    %cst_135 = arith.constant dense<0.000000e+00> : vector<32x256xf32>
    %199 = tpu.matmul %196, %198, %cst_135 {dimension_numbers = #tpu.dot_dimension_numbers<[1], [0], [0], [1], [0, 0, 1, 1], [], []>} : vector<32x96xbf16>, vector<96x256xbf16>, vector<32x256xf32> -> vector<32x256xf32>
    %200 = arith.addf %195, %199 : vector<32x256xf32>
    %201 = vector.extract_strided_slice %189 {offsets = [2, 0], sizes = [32, 96], strides = [1, 1]} : vector<34x96xbf16> to vector<32x96xbf16>
    %c2_136 = arith.constant 2 : index
    %c0_137 = arith.constant 0 : index
    %c0_138 = arith.constant 0 : index
    %202 = vector.load %arg8[%c2_136, %c0_137, %c0_138] : memref<3x96x256xbf16, #tpu.memory_space<vmem>>, vector<1x96x256xbf16>
    %203 = vector.shape_cast %202 : vector<1x96x256xbf16> to vector<96x256xbf16>
    %cst_139 = arith.constant dense<0.000000e+00> : vector<32x256xf32>
    %204 = tpu.matmul %201, %203, %cst_139 {dimension_numbers = #tpu.dot_dimension_numbers<[1], [0], [0], [1], [0, 0, 1, 1], [], []>} : vector<32x96xbf16>, vector<96x256xbf16>, vector<32x256xf32> -> vector<32x256xf32>
    %205 = arith.addf %200, %204 : vector<32x256xf32>
    %cst_140 = arith.constant 0.000000e+00 : f32
    %206 = vector.broadcast %cst_140 : f32 to vector<32x256xf32>
    %207 = arith.maximumf %205, %206 : vector<32x256xf32>
    %c0_141 = arith.constant 0 : index
    %c1024 = arith.constant 1024 : index
    %208 = vector.load %arg15[%c0_141, %c1024] : memref<1x2944xf32, #tpu.memory_space<vmem>>, vector<1x256xf32>
    %209 = arith.truncf %207 : vector<32x256xf32> to vector<32x256xbf16>
    %cst_142 = arith.constant 0.000000e+00 : bf16
    %210 = vector.broadcast %cst_142 : bf16 to vector<1x256xbf16>
    %211 = tpu.concatenate %210, %209, %210 in 0 : vector<1x256xbf16>, vector<32x256xbf16>, vector<1x256xbf16> -> vector<34x256xbf16>
    %212 = vector.extract_strided_slice %211 {offsets = [0, 0], sizes = [32, 256], strides = [1, 1]} : vector<34x256xbf16> to vector<32x256xbf16>
    %c0_143 = arith.constant 0 : index
    %c0_144 = arith.constant 0 : index
    %c0_145 = arith.constant 0 : index
    %213 = vector.load %arg9[%c0_143, %c0_144, %c0_145] : memref<3x256x256xbf16, #tpu.memory_space<vmem>>, vector<1x256x256xbf16>
    %214 = vector.shape_cast %213 : vector<1x256x256xbf16> to vector<256x256xbf16>
    %cst_146 = arith.constant dense<0.000000e+00> : vector<32x256xf32>
    %215 = tpu.matmul %212, %214, %cst_146 {dimension_numbers = #tpu.dot_dimension_numbers<[1], [0], [0], [1], [0, 0, 1, 1], [], []>} : vector<32x256xbf16>, vector<256x256xbf16>, vector<32x256xf32> -> vector<32x256xf32>
    %216 = vector.broadcast %208 : vector<1x256xf32> to vector<32x256xf32>
    %217 = arith.addf %216, %215 : vector<32x256xf32>
    %218 = vector.extract_strided_slice %211 {offsets = [1, 0], sizes = [32, 256], strides = [1, 1]} : vector<34x256xbf16> to vector<32x256xbf16>
    %c1_147 = arith.constant 1 : index
    %c0_148 = arith.constant 0 : index
    %c0_149 = arith.constant 0 : index
    %219 = vector.load %arg9[%c1_147, %c0_148, %c0_149] : memref<3x256x256xbf16, #tpu.memory_space<vmem>>, vector<1x256x256xbf16>
    %220 = vector.shape_cast %219 : vector<1x256x256xbf16> to vector<256x256xbf16>
    %cst_150 = arith.constant dense<0.000000e+00> : vector<32x256xf32>
    %221 = tpu.matmul %218, %220, %cst_150 {dimension_numbers = #tpu.dot_dimension_numbers<[1], [0], [0], [1], [0, 0, 1, 1], [], []>} : vector<32x256xbf16>, vector<256x256xbf16>, vector<32x256xf32> -> vector<32x256xf32>
    %222 = arith.addf %217, %221 : vector<32x256xf32>
    %223 = vector.extract_strided_slice %211 {offsets = [2, 0], sizes = [32, 256], strides = [1, 1]} : vector<34x256xbf16> to vector<32x256xbf16>
    %c2_151 = arith.constant 2 : index
    %c0_152 = arith.constant 0 : index
    %c0_153 = arith.constant 0 : index
    %224 = vector.load %arg9[%c2_151, %c0_152, %c0_153] : memref<3x256x256xbf16, #tpu.memory_space<vmem>>, vector<1x256x256xbf16>
    %225 = vector.shape_cast %224 : vector<1x256x256xbf16> to vector<256x256xbf16>
    %cst_154 = arith.constant dense<0.000000e+00> : vector<32x256xf32>
    %226 = tpu.matmul %223, %225, %cst_154 {dimension_numbers = #tpu.dot_dimension_numbers<[1], [0], [0], [1], [0, 0, 1, 1], [], []>} : vector<32x256xbf16>, vector<256x256xbf16>, vector<32x256xf32> -> vector<32x256xf32>
    %227 = arith.addf %222, %226 : vector<32x256xf32>
    %cst_155 = arith.constant 0.000000e+00 : f32
    %228 = vector.broadcast %cst_155 : f32 to vector<32x256xf32>
    %229 = arith.maximumf %227, %228 : vector<32x256xf32>
    %c0_156 = arith.constant 0 : index
    %c1280 = arith.constant 1280 : index
    %230 = vector.load %arg15[%c0_156, %c1280] : memref<1x2944xf32, #tpu.memory_space<vmem>>, vector<1x512xf32>
    %231 = arith.truncf %229 : vector<32x256xf32> to vector<32x256xbf16>
    %cst_157 = arith.constant 0.000000e+00 : bf16
    %232 = vector.broadcast %cst_157 : bf16 to vector<1x256xbf16>
    %233 = tpu.concatenate %232, %231, %232 in 0 : vector<1x256xbf16>, vector<32x256xbf16>, vector<1x256xbf16> -> vector<34x256xbf16>
    %234 = vector.extract_strided_slice %233 {offsets = [0, 0], sizes = [32, 256], strides = [1, 1]} : vector<34x256xbf16> to vector<32x256xbf16>
    %c0_158 = arith.constant 0 : index
    %c0_159 = arith.constant 0 : index
    %c0_160 = arith.constant 0 : index
    %235 = vector.load %arg10[%c0_158, %c0_159, %c0_160] : memref<3x256x512xbf16, #tpu.memory_space<vmem>>, vector<1x256x512xbf16>
    %236 = vector.shape_cast %235 : vector<1x256x512xbf16> to vector<256x512xbf16>
    %cst_161 = arith.constant dense<0.000000e+00> : vector<32x512xf32>
    %237 = tpu.matmul %234, %236, %cst_161 {dimension_numbers = #tpu.dot_dimension_numbers<[1], [0], [0], [1], [0, 0, 1, 1], [], []>} : vector<32x256xbf16>, vector<256x512xbf16>, vector<32x512xf32> -> vector<32x512xf32>
    %238 = vector.broadcast %230 : vector<1x512xf32> to vector<32x512xf32>
    %239 = arith.addf %238, %237 : vector<32x512xf32>
    %240 = vector.extract_strided_slice %233 {offsets = [1, 0], sizes = [32, 256], strides = [1, 1]} : vector<34x256xbf16> to vector<32x256xbf16>
    %c1_162 = arith.constant 1 : index
    %c0_163 = arith.constant 0 : index
    %c0_164 = arith.constant 0 : index
    %241 = vector.load %arg10[%c1_162, %c0_163, %c0_164] : memref<3x256x512xbf16, #tpu.memory_space<vmem>>, vector<1x256x512xbf16>
    %242 = vector.shape_cast %241 : vector<1x256x512xbf16> to vector<256x512xbf16>
    %cst_165 = arith.constant dense<0.000000e+00> : vector<32x512xf32>
    %243 = tpu.matmul %240, %242, %cst_165 {dimension_numbers = #tpu.dot_dimension_numbers<[1], [0], [0], [1], [0, 0, 1, 1], [], []>} : vector<32x256xbf16>, vector<256x512xbf16>, vector<32x512xf32> -> vector<32x512xf32>
    %244 = arith.addf %239, %243 : vector<32x512xf32>
    %245 = vector.extract_strided_slice %233 {offsets = [2, 0], sizes = [32, 256], strides = [1, 1]} : vector<34x256xbf16> to vector<32x256xbf16>
    %c2_166 = arith.constant 2 : index
    %c0_167 = arith.constant 0 : index
    %c0_168 = arith.constant 0 : index
    %246 = vector.load %arg10[%c2_166, %c0_167, %c0_168] : memref<3x256x512xbf16, #tpu.memory_space<vmem>>, vector<1x256x512xbf16>
    %247 = vector.shape_cast %246 : vector<1x256x512xbf16> to vector<256x512xbf16>
    %cst_169 = arith.constant dense<0.000000e+00> : vector<32x512xf32>
    %248 = tpu.matmul %245, %247, %cst_169 {dimension_numbers = #tpu.dot_dimension_numbers<[1], [0], [0], [1], [0, 0, 1, 1], [], []>} : vector<32x256xbf16>, vector<256x512xbf16>, vector<32x512xf32> -> vector<32x512xf32>
    %249 = arith.addf %244, %248 : vector<32x512xf32>
    %cst_170 = arith.constant 0.000000e+00 : f32
    %250 = vector.broadcast %cst_170 : f32 to vector<32x512xf32>
    %251 = arith.maximumf %249, %250 : vector<32x512xf32>
    %c0_171 = arith.constant 0 : index
    %c1792 = arith.constant 1792 : index
    %252 = vector.load %arg15[%c0_171, %c1792] : memref<1x2944xf32, #tpu.memory_space<vmem>>, vector<1x512xf32>
    %253 = arith.truncf %251 : vector<32x512xf32> to vector<32x512xbf16>
    %cst_172 = arith.constant 0.000000e+00 : bf16
    %254 = vector.broadcast %cst_172 : bf16 to vector<1x512xbf16>
    %255 = tpu.concatenate %254, %253, %254 in 0 : vector<1x512xbf16>, vector<32x512xbf16>, vector<1x512xbf16> -> vector<34x512xbf16>
    %256 = vector.extract_strided_slice %255 {offsets = [0, 0], sizes = [32, 512], strides = [1, 1]} : vector<34x512xbf16> to vector<32x512xbf16>
    %c0_173 = arith.constant 0 : index
    %c0_174 = arith.constant 0 : index
    %c0_175 = arith.constant 0 : index
    %257 = vector.load %arg11[%c0_173, %c0_174, %c0_175] : memref<3x512x512xbf16, #tpu.memory_space<vmem>>, vector<1x512x512xbf16>
    %258 = vector.shape_cast %257 : vector<1x512x512xbf16> to vector<512x512xbf16>
    %cst_176 = arith.constant dense<0.000000e+00> : vector<32x512xf32>
    %259 = tpu.matmul %256, %258, %cst_176 {dimension_numbers = #tpu.dot_dimension_numbers<[1], [0], [0], [1], [0, 0, 1, 1], [], []>} : vector<32x512xbf16>, vector<512x512xbf16>, vector<32x512xf32> -> vector<32x512xf32>
    %260 = vector.broadcast %252 : vector<1x512xf32> to vector<32x512xf32>
    %261 = arith.addf %260, %259 : vector<32x512xf32>
    %262 = vector.extract_strided_slice %255 {offsets = [1, 0], sizes = [32, 512], strides = [1, 1]} : vector<34x512xbf16> to vector<32x512xbf16>
    %c1_177 = arith.constant 1 : index
    %c0_178 = arith.constant 0 : index
    %c0_179 = arith.constant 0 : index
    %263 = vector.load %arg11[%c1_177, %c0_178, %c0_179] : memref<3x512x512xbf16, #tpu.memory_space<vmem>>, vector<1x512x512xbf16>
    %264 = vector.shape_cast %263 : vector<1x512x512xbf16> to vector<512x512xbf16>
    %cst_180 = arith.constant dense<0.000000e+00> : vector<32x512xf32>
    %265 = tpu.matmul %262, %264, %cst_180 {dimension_numbers = #tpu.dot_dimension_numbers<[1], [0], [0], [1], [0, 0, 1, 1], [], []>} : vector<32x512xbf16>, vector<512x512xbf16>, vector<32x512xf32> -> vector<32x512xf32>
    %266 = arith.addf %261, %265 : vector<32x512xf32>
    %267 = vector.extract_strided_slice %255 {offsets = [2, 0], sizes = [32, 512], strides = [1, 1]} : vector<34x512xbf16> to vector<32x512xbf16>
    %c2_181 = arith.constant 2 : index
    %c0_182 = arith.constant 0 : index
    %c0_183 = arith.constant 0 : index
    %268 = vector.load %arg11[%c2_181, %c0_182, %c0_183] : memref<3x512x512xbf16, #tpu.memory_space<vmem>>, vector<1x512x512xbf16>
    %269 = vector.shape_cast %268 : vector<1x512x512xbf16> to vector<512x512xbf16>
    %cst_184 = arith.constant dense<0.000000e+00> : vector<32x512xf32>
    %270 = tpu.matmul %267, %269, %cst_184 {dimension_numbers = #tpu.dot_dimension_numbers<[1], [0], [0], [1], [0, 0, 1, 1], [], []>} : vector<32x512xbf16>, vector<512x512xbf16>, vector<32x512xf32> -> vector<32x512xf32>
    %271 = arith.addf %266, %270 : vector<32x512xf32>
    %cst_185 = arith.constant 0.000000e+00 : f32
    %272 = vector.broadcast %cst_185 : f32 to vector<32x512xf32>
    %273 = arith.maximumf %271, %272 : vector<32x512xf32>
    %c0_186 = arith.constant 0 : index
    %c2304 = arith.constant 2304 : index
    %274 = vector.load %arg15[%c0_186, %c2304] : memref<1x2944xf32, #tpu.memory_space<vmem>>, vector<1x512xf32>
    %275 = arith.truncf %273 : vector<32x512xf32> to vector<32x512xbf16>
    %cst_187 = arith.constant 0.000000e+00 : bf16
    %276 = vector.broadcast %cst_187 : bf16 to vector<1x512xbf16>
    %277 = tpu.concatenate %276, %275, %276 in 0 : vector<1x512xbf16>, vector<32x512xbf16>, vector<1x512xbf16> -> vector<34x512xbf16>
    %278 = vector.extract_strided_slice %277 {offsets = [0, 0], sizes = [32, 512], strides = [1, 1]} : vector<34x512xbf16> to vector<32x512xbf16>
    %c0_188 = arith.constant 0 : index
    %c0_189 = arith.constant 0 : index
    %c0_190 = arith.constant 0 : index
    %279 = vector.load %arg12[%c0_188, %c0_189, %c0_190] : memref<3x512x512xbf16, #tpu.memory_space<vmem>>, vector<1x512x512xbf16>
    %280 = vector.shape_cast %279 : vector<1x512x512xbf16> to vector<512x512xbf16>
    %cst_191 = arith.constant dense<0.000000e+00> : vector<32x512xf32>
    %281 = tpu.matmul %278, %280, %cst_191 {dimension_numbers = #tpu.dot_dimension_numbers<[1], [0], [0], [1], [0, 0, 1, 1], [], []>} : vector<32x512xbf16>, vector<512x512xbf16>, vector<32x512xf32> -> vector<32x512xf32>
    %282 = vector.broadcast %274 : vector<1x512xf32> to vector<32x512xf32>
    %283 = arith.addf %282, %281 : vector<32x512xf32>
    %284 = vector.extract_strided_slice %277 {offsets = [1, 0], sizes = [32, 512], strides = [1, 1]} : vector<34x512xbf16> to vector<32x512xbf16>
    %c1_192 = arith.constant 1 : index
    %c0_193 = arith.constant 0 : index
    %c0_194 = arith.constant 0 : index
    %285 = vector.load %arg12[%c1_192, %c0_193, %c0_194] : memref<3x512x512xbf16, #tpu.memory_space<vmem>>, vector<1x512x512xbf16>
    %286 = vector.shape_cast %285 : vector<1x512x512xbf16> to vector<512x512xbf16>
    %cst_195 = arith.constant dense<0.000000e+00> : vector<32x512xf32>
    %287 = tpu.matmul %284, %286, %cst_195 {dimension_numbers = #tpu.dot_dimension_numbers<[1], [0], [0], [1], [0, 0, 1, 1], [], []>} : vector<32x512xbf16>, vector<512x512xbf16>, vector<32x512xf32> -> vector<32x512xf32>
    %288 = arith.addf %283, %287 : vector<32x512xf32>
    %289 = vector.extract_strided_slice %277 {offsets = [2, 0], sizes = [32, 512], strides = [1, 1]} : vector<34x512xbf16> to vector<32x512xbf16>
    %c2_196 = arith.constant 2 : index
    %c0_197 = arith.constant 0 : index
    %c0_198 = arith.constant 0 : index
    %290 = vector.load %arg12[%c2_196, %c0_197, %c0_198] : memref<3x512x512xbf16, #tpu.memory_space<vmem>>, vector<1x512x512xbf16>
    %291 = vector.shape_cast %290 : vector<1x512x512xbf16> to vector<512x512xbf16>
    %cst_199 = arith.constant dense<0.000000e+00> : vector<32x512xf32>
    %292 = tpu.matmul %289, %291, %cst_199 {dimension_numbers = #tpu.dot_dimension_numbers<[1], [0], [0], [1], [0, 0, 1, 1], [], []>} : vector<32x512xbf16>, vector<512x512xbf16>, vector<32x512xf32> -> vector<32x512xf32>
    %293 = arith.addf %288, %292 : vector<32x512xf32>
    %cst_200 = arith.constant 0.000000e+00 : f32
    %294 = vector.broadcast %cst_200 : f32 to vector<32x512xf32>
    %295 = arith.maximumf %293, %294 : vector<32x512xf32>
    %c0_201 = arith.constant 0 : index
    %c0_202 = arith.constant 0 : index
    %296 = vector.load %arg13[%c0_201, %c0_202] : memref<512x16xf32, #tpu.memory_space<vmem>>, vector<512x16xf32>
    %cst_203 = arith.constant dense<0.000000e+00> : vector<32x16xf32>
    %297 = tpu.matmul %295, %296, %cst_203 {dimension_numbers = #tpu.dot_dimension_numbers<[1], [0], [0], [1], [0, 0, 1, 1], [], []>} : vector<32x512xf32>, vector<512x16xf32>, vector<32x16xf32> -> vector<32x16xf32>
    %cst_204 = arith.constant dense<0.000000e+00> : vector<16xf32>
    %298 = vector.multi_reduction <add>, %297, %cst_204 [0] : vector<32x16xf32> to vector<16xf32>
    %299 = vector.shape_cast %298 : vector<16xf32> to vector<1x16xf32>
    %c0_205 = arith.constant 0 : index
    %c0_206 = arith.constant 0 : index
    %300 = vector.load %arg14[%c0_205, %c0_206] : memref<16x10xf32, #tpu.memory_space<vmem>>, vector<16x10xf32>
    %cst_207 = arith.constant dense<0.000000e+00> : vector<32x10xf32>
    %301 = tpu.matmul %297, %300, %cst_207 {dimension_numbers = #tpu.dot_dimension_numbers<[1], [0], [0], [1], [0, 0, 1, 1], [], []>} : vector<32x16xf32>, vector<16x10xf32>, vector<32x10xf32> -> vector<32x10xf32>
    %cst_208 = arith.constant dense<0.000000e+00> : vector<10xf32>
    %302 = vector.multi_reduction <add>, %301, %cst_208 [0] : vector<32x10xf32> to vector<10xf32>
    %303 = vector.shape_cast %302 : vector<10xf32> to vector<1x10xf32>
    %c0_209 = arith.constant 0 : index
    %c2816 = arith.constant 2816 : index
    %304 = vector.load %arg15[%c0_209, %c2816] : memref<1x2944xf32, #tpu.memory_space<vmem>>, vector<1x10xf32>
    %305 = arith.addf %303, %304 : vector<1x10xf32>
    %c0_210 = arith.constant 0 : index
    %c0_211 = arith.constant 0 : index
    %c0_212 = arith.constant 0 : index
    %306 = vector.load %arg17[%c0_210, %c0_211, %c0_212] : memref<1x1x16xf32, #tpu.memory_space<vmem>>, vector<1x1x16xf32>
    %307 = vector.shape_cast %306 : vector<1x1x16xf32> to vector<1x16xf32>
    %308 = vector.shape_cast %299 : vector<1x16xf32> to vector<1x1x16xf32>
    tpu.vector_store %arg17[%c0_210, %c0_211, %c0_212], %308 {strides = array<i32>} : memref<1x1x16xf32, #tpu.memory_space<vmem>>, vector<1x1x16xf32>,
    %c0_213 = arith.constant 0 : index
    %c0_214 = arith.constant 0 : index
    %c0_215 = arith.constant 0 : index
    %309 = vector.load %arg16[%c0_213, %c0_214, %c0_215] : memref<1x1x10xf32, #tpu.memory_space<vmem>>, vector<1x1x10xf32>
    %310 = vector.shape_cast %309 : vector<1x1x10xf32> to vector<1x10xf32>
    %311 = vector.shape_cast %305 : vector<1x10xf32> to vector<1x1x10xf32>
    tpu.vector_store %arg16[%c0_213, %c0_214, %c0_215], %311 {strides = array<i32>} : memref<1x1x10xf32, #tpu.memory_space<vmem>>, vector<1x1x10xf32>,
    return
  }
  func.func @transform_0(%arg0: i32) -> (i32, i32, i32) {
    %c0_i32 = arith.constant 0 : i32
    %c0_i32_0 = arith.constant 0 : i32
    %c0_i32_1 = arith.constant 0 : i32
    return %arg0, %c0_i32, %c0_i32_0 : i32, i32, i32
  }
  func.func @transform_1(%arg0: i32) -> (i32, i32) {
    %c0_i32 = arith.constant 0 : i32
    %c0_i32_0 = arith.constant 0 : i32
    %c0_i32_1 = arith.constant 0 : i32
    return %c0_i32, %c0_i32_0 : i32, i32
  }
  func.func @transform_2(%arg0: i32) -> (i32, i32) {
    %c0_i32 = arith.constant 0 : i32
    %c0_i32_0 = arith.constant 0 : i32
    %c0_i32_1 = arith.constant 0 : i32
    return %c0_i32, %c0_i32_0 : i32, i32
  }
  func.func @transform_3(%arg0: i32) -> (i32, i32, i32) {
    %c0_i32 = arith.constant 0 : i32
    %c0_i32_0 = arith.constant 0 : i32
    %c0_i32_1 = arith.constant 0 : i32
    %c0_i32_2 = arith.constant 0 : i32
    return %c0_i32, %c0_i32_0, %c0_i32_1 : i32, i32, i32
  }
  func.func @transform_4(%arg0: i32) -> (i32, i32, i32) {
    %c0_i32 = arith.constant 0 : i32
    %c0_i32_0 = arith.constant 0 : i32
    %c0_i32_1 = arith.constant 0 : i32
    %c0_i32_2 = arith.constant 0 : i32
    return %c0_i32, %c0_i32_0, %c0_i32_1 : i32, i32, i32
  }
  func.func @transform_5(%arg0: i32) -> (i32, i32, i32) {
    %c0_i32 = arith.constant 0 : i32
    %c0_i32_0 = arith.constant 0 : i32
    %c0_i32_1 = arith.constant 0 : i32
    %c0_i32_2 = arith.constant 0 : i32
    return %c0_i32, %c0_i32_0, %c0_i32_1 : i32, i32, i32
  }
  func.func @transform_6(%arg0: i32) -> (i32, i32, i32) {
    %c0_i32 = arith.constant 0 : i32
    %c0_i32_0 = arith.constant 0 : i32
    %c0_i32_1 = arith.constant 0 : i32
    %c0_i32_2 = arith.constant 0 : i32
    return %c0_i32, %c0_i32_0, %c0_i32_1 : i32, i32, i32
  }
  func.func @transform_7(%arg0: i32) -> (i32, i32, i32) {
    %c0_i32 = arith.constant 0 : i32
    %c0_i32_0 = arith.constant 0 : i32
    %c0_i32_1 = arith.constant 0 : i32
    %c0_i32_2 = arith.constant 0 : i32
    return %c0_i32, %c0_i32_0, %c0_i32_1 : i32, i32, i32
  }
  func.func @transform_8(%arg0: i32) -> (i32, i32, i32) {
    %c0_i32 = arith.constant 0 : i32
    %c0_i32_0 = arith.constant 0 : i32
    %c0_i32_1 = arith.constant 0 : i32
    %c0_i32_2 = arith.constant 0 : i32
    return %c0_i32, %c0_i32_0, %c0_i32_1 : i32, i32, i32
  }
  func.func @transform_9(%arg0: i32) -> (i32, i32, i32) {
    %c0_i32 = arith.constant 0 : i32
    %c0_i32_0 = arith.constant 0 : i32
    %c0_i32_1 = arith.constant 0 : i32
    %c0_i32_2 = arith.constant 0 : i32
    return %c0_i32, %c0_i32_0, %c0_i32_1 : i32, i32, i32
  }
  func.func @transform_10(%arg0: i32) -> (i32, i32, i32) {
    %c0_i32 = arith.constant 0 : i32
    %c0_i32_0 = arith.constant 0 : i32
    %c0_i32_1 = arith.constant 0 : i32
    %c0_i32_2 = arith.constant 0 : i32
    return %c0_i32, %c0_i32_0, %c0_i32_1 : i32, i32, i32
  }
  func.func @transform_11(%arg0: i32) -> (i32, i32, i32) {
    %c0_i32 = arith.constant 0 : i32
    %c0_i32_0 = arith.constant 0 : i32
    %c0_i32_1 = arith.constant 0 : i32
    %c0_i32_2 = arith.constant 0 : i32
    return %c0_i32, %c0_i32_0, %c0_i32_1 : i32, i32, i32
  }
  func.func @transform_12(%arg0: i32) -> (i32, i32) {
    %c0_i32 = arith.constant 0 : i32
    %c0_i32_0 = arith.constant 0 : i32
    %c0_i32_1 = arith.constant 0 : i32
    return %c0_i32, %c0_i32_0 : i32, i32
  }
  func.func @transform_13(%arg0: i32) -> (i32, i32) {
    %c0_i32 = arith.constant 0 : i32
    %c0_i32_0 = arith.constant 0 : i32
    %c0_i32_1 = arith.constant 0 : i32
    return %c0_i32, %c0_i32_0 : i32, i32
  }
  func.func @transform_14(%arg0: i32) -> (i32, i32) {
    %c0_i32 = arith.constant 0 : i32
    %c0_i32_0 = arith.constant 0 : i32
    %c0_i32_1 = arith.constant 0 : i32
    return %c0_i32, %c0_i32_0 : i32, i32
  }
  func.func @transform_15(%arg0: i32) -> (i32, i32, i32) {
    %c0_i32 = arith.constant 0 : i32
    %c0_i32_0 = arith.constant 0 : i32
    %c0_i32_1 = arith.constant 0 : i32
    return %arg0, %c0_i32, %c0_i32_0 : i32, i32, i32
  }
  func.func @transform_16(%arg0: i32) -> (i32, i32, i32) {
    %c0_i32 = arith.constant 0 : i32
    %c0_i32_0 = arith.constant 0 : i32
    %c0_i32_1 = arith.constant 0 : i32
    return %arg0, %c0_i32, %c0_i32_0 : i32, i32, i32
  }
}

</mosaic_0001>

<bundles_post_ra>
// kernel: squeeze.5
= control target key start
LH: loop header
LB: loop body
LE: loop exit
PB: predicated region body
PF: predicated region fallthrough
CT: control target
= control target key end

     0   :  { %s66_s8 = smov 116   ;;  %vm7_vm0 = vcmask 31744   ;;  %s67_s11 = smov 120   ;;  %s117_s0 = inlined_call_operand.vmem [shape: f32[2,32], index: 0, kind: input, shape index: {}]   ;;  %s118_s1 = inlined_call_operand.vmem [shape: f32[2,8,4], index: 1, kind: output, shape index: {}]  }
   0x1   :  { %v4_v0 = vld [vmem:[%s117_s0] sm:$0x3]  ;;  %s65_s0 = smov 124   ;;  %s68_s12 = smov 112  }
   0x2   :  { %5 = vst [vmem:[#allocation0] sm:$0x3] %v4_v0  ;;  %s69_s13 = smov 108   ;;  %s70_s14 = smov 104  }
   0x3   :  { %s71_s15 = smov 100  }
   0x9   :  { %v9_v1 = vld [vmem:[#allocation0] sm:$0x3]  }
   0xa   :  { %v21_v2 = vld [vmem:[#allocation0] sm:$0x3]   ;;  %10 = vrot.lane.b32.xlu0 %v9_v1, %s65_s0 }
   0xb   :  { %22 = vrot.lane.b32.xlu1 %v21_v2, %s66_s8  ;;  %v15_v3 = vld [vmem:[#allocation0] sm:$0x3]  }
   0xc   :  { %v27_v4 = vld [vmem:[#allocation0] sm:$0x3]  }
   0xd   :  { %v6_v5 = vld [vmem:[#allocation0] sm:$0x3]  }
   0xe   :  { %8 = vst.msk [vmem:[%s118_s1] ss:$8 sm:$0x3] %vm7_vm0, %v6_v5   ;;  %16 = vrot.lane.b32.xlu0 %v15_v3, %s67_s11  ;;  %v33_v6 = vld [vmem:[#allocation0] sm:$0x3]  }
   0xf   :  { %28 = vrot.lane.b32.xlu1 %v27_v4, %s68_s12  ;;  %v39_v7 = vld [vmem:[#allocation0] sm:$0x3]  }
  0x10   :  { %v45_v8 = vld [vmem:[#allocation0] sm:$0x3]  }
  0x12   :  { %34 = vrot.lane.b32.xlu0 %v33_v6, %s69_s13 }
  0x13   :  { %40 = vrot.lane.b32.xlu1 %v39_v7, %s70_s14 }
  0x16   :  { %46 = vrot.lane.b32.xlu0 %v45_v8, %s71_s15 }
  0x7c   :  { %v11_v9 = vpop.permute.xlu0 %10  }
  0x7d   :  { %v23_v10 = vpop.permute.xlu1 %22   ;;  %51 = vst.msk [vmem:[%s118_s1 + $0x1] ss:$8 sm:$0x3] %vm7_vm0, %v11_v9  }
  0x7e   :  { %53 = vst.msk [vmem:[%s118_s1 + $0x3] ss:$8 sm:$0x3] %vm7_vm0, %v23_v10  }
  0x80   :  { %v17_v11 = vpop.permute.xlu0 %16  }
  0x81   :  { %v29_v12 = vpop.permute.xlu1 %28   ;;  %52 = vst.msk [vmem:[%s118_s1 + $0x2] ss:$8 sm:$0x3] %vm7_vm0, %v17_v11  }
  0x82   :  { %54 = vst.msk [vmem:[%s118_s1 + $0x4] ss:$8 sm:$0x3] %vm7_vm0, %v29_v12  }
  0x84   :  { %v35_v13 = vpop.permute.xlu0 %34  }
  0x85   :  { %v41_v14 = vpop.permute.xlu1 %40   ;;  %55 = vst.msk [vmem:[%s118_s1 + $0x5] ss:$8 sm:$0x3] %vm7_vm0, %v35_v13  }
  0x86   :  { %56 = vst.msk [vmem:[%s118_s1 + $0x6] ss:$8 sm:$0x3] %vm7_vm0, %v41_v14  }
  0x88   :  { %v47_v15 = vpop.permute.xlu0 %46  }
  0x89   :  { %57 = vst.msk [vmem:[%s118_s1 + $0x7] ss:$8 sm:$0x3] %vm7_vm0, %v47_v15  }

// kernel: squeeze.4
= control target key start
LH: loop header
LB: loop body
LE: loop exit
PB: predicated region body
PF: predicated region fallthrough
CT: control target
= control target key end

     0   :  { %s130_s8 = smov 122   ;;  %s131_s9 = smov 124   ;;  %vm7_vm0 = vcmask 15360   ;;  %s221_s0 = inlined_call_operand.vmem [shape: f32[2,32], index: 0, kind: input, shape index: {}]   ;;  %s222_s1 = inlined_call_operand.vmem [shape: f32[2,16,2], index: 1, kind: output, shape index: {}]  }
   0x1   :  { %v4_v0 = vld [vmem:[%s221_s0] sm:$0x3]  ;;  %s129_s0 = smov 126   ;;  %s132_s10 = smov 120  }
   0x2   :  { %5 = vst [vmem:[#allocation0] sm:$0x3] %v4_v0  ;;  %s133_s11 = smov 118   ;;  %s134_s12 = smov 116  }
   0x3   :  { %s135_s13 = smov 114   ;;  %s136_s14 = smov 112  }
   0x4   :  { %s137_s17 = smov 110   ;;  %s138_s18 = smov 108  }
   0x5   :  { %s139_s19 = smov 106   ;;  %s140_s20 = smov 104  }
   0x6   :  { %s141_s21 = smov 102   ;;  %s142_s22 = smov 100  }
   0x7   :  { %s143_s23 = smov 98  }
   0x9   :  { %v9_v1 = vld [vmem:[#allocation0] sm:$0x3]  }
   0xa   :  { %v21_v2 = vld [vmem:[#allocation0] sm:$0x3]   ;;  %10 = vrot.lane.b32.xlu0 %v9_v1, %s129_s0 }
   0xb   :  { %22 = vrot.lane.b32.xlu1 %v21_v2, %s130_s8  ;;  %v15_v3 = vld [vmem:[#allocation0] sm:$0x3]  }
   0xc   :  { %v27_v4 = vld [vmem:[#allocation0] sm:$0x3]  }
   0xd   :  { %v33_v5 = vld [vmem:[#allocation0] sm:$0x3]  }
   0xe   :  { %16 = vrot.lane.b32.xlu0 %v15_v3, %s131_s9  ;;  %v39_v6 = vld [vmem:[#allocation0] sm:$0x3]  }
   0xf   :  { %28 = vrot.lane.b32.xlu1 %v27_v4, %s132_s10  ;;  %v45_v7 = vld [vmem:[#allocation0] sm:$0x3]  }
  0x10   :  { %v51_v8 = vld [vmem:[#allocation0] sm:$0x3]  }
  0x11   :  { %v57_v9 = vld [vmem:[#allocation0] sm:$0x3]  }
  0x12   :  { %34 = vrot.lane.b32.xlu0 %v33_v5, %s133_s11  ;;  %v63_v10 = vld [vmem:[#allocation0] sm:$0x3]  }
  0x13   :  { %40 = vrot.lane.b32.xlu1 %v39_v6, %s134_s12  ;;  %v6_v11 = vld [vmem:[#allocation0] sm:$0x3]  }
  0x14   :  { %8 = vst.msk [vmem:[%s222_s1] ss:$16 sm:$0x3] %vm7_vm0, %v6_v11   ;;  %v69_v12 = vld [vmem:[#allocation0] sm:$0x3]  }
  0x15   :  { %v75_v13 = vld [vmem:[#allocation0] sm:$0x3]  }
  0x16   :  { %46 = vrot.lane.b32.xlu0 %v45_v7, %s135_s13  ;;  %v81_v14 = vld [vmem:[#allocation0] sm:$0x3]  }
  0x17   :  { %52 = vrot.lane.b32.xlu1 %v51_v8, %s136_s14  ;;  %v87_v15 = vld [vmem:[#allocation0] sm:$0x3]  }
  0x18   :  { %v93_v16 = vld [vmem:[#allocation0] sm:$0x3]  }
  0x1a   :  { %58 = vrot.lane.b32.xlu0 %v57_v9, %s137_s17 }
  0x1b   :  { %64 = vrot.lane.b32.xlu1 %v63_v10, %s138_s18 }
  0x1e   :  { %70 = vrot.lane.b32.xlu0 %v69_v12, %s139_s19 }
  0x1f   :  { %76 = vrot.lane.b32.xlu1 %v75_v13, %s140_s20 }
  0x22   :  { %82 = vrot.lane.b32.xlu0 %v81_v14, %s141_s21 }
  0x23   :  { %88 = vrot.lane.b32.xlu1 %v87_v15, %s142_s22 }
  0x26   :  { %94 = vrot.lane.b32.xlu0 %v93_v16, %s143_s23 }
  0x7c   :  { %v11_v17 = vpop.permute.xlu0 %10  }
  0x7d   :  { %v23_v18 = vpop.permute.xlu1 %22   ;;  %99 = vst.msk [vmem:[%s222_s1 + $0x1] ss:$16 sm:$0x3] %vm7_vm0, %v11_v17  }
  0x7e   :  { %101 = vst.msk [vmem:[%s222_s1 + $0x3] ss:$16 sm:$0x3] %vm7_vm0, %v23_v18  }
  0x80   :  { %v17_v19 = vpop.permute.xlu0 %16  }
  0x81   :  { %v29_v20 = vpop.permute.xlu1 %28   ;;  %100 = vst.msk [vmem:[%s222_s1 + $0x2] ss:$16 sm:$0x3] %vm7_vm0, %v17_v19  }
  0x82   :  { %102 = vst.msk [vmem:[%s222_s1 + $0x4] ss:$16 sm:$0x3] %vm7_vm0, %v29_v20  }
  0x84   :  { %v35_v21 = vpop.permute.xlu0 %34  }
  0x85   :  { %v41_v22 = vpop.permute.xlu1 %40   ;;  %103 = vst.msk [vmem:[%s222_s1 + $0x5] ss:$16 sm:$0x3] %vm7_vm0, %v35_v21  }
  0x86   :  { %104 = vst.msk [vmem:[%s222_s1 + $0x6] ss:$16 sm:$0x3] %vm7_vm0, %v41_v22  }
  0x88   :  { %v47_v23 = vpop.permute.xlu0 %46  }
  0x89   :  { %v53_v24 = vpop.permute.xlu1 %52   ;;  %105 = vst.msk [vmem:[%s222_s1 + $0x7] ss:$16 sm:$0x3] %vm7_vm0, %v47_v23  }
  0x8a   :  { %106 = vst.msk [vmem:[%s222_s1 + $0x8] ss:$16 sm:$0x3] %vm7_vm0, %v53_v24  }
  0x8c   :  { %v59_v25 = vpop.permute.xlu0 %58  }
  0x8d   :  { %v65_v26 = vpop.permute.xlu1 %64   ;;  %107 = vst.msk [vmem:[%s222_s1 + $0x9] ss:$16 sm:$0x3] %vm7_vm0, %v59_v25  }
  0x8e   :  { %108 = vst.msk [vmem:[%s222_s1 + $0xa] ss:$16 sm:$0x3] %vm7_vm0, %v65_v26  }
  0x90   :  { %v71_v27 = vpop.permute.xlu0 %70  }
  0x91   :  { %v77_v28 = vpop.permute.xlu1 %76   ;;  %109 = vst.msk [vmem:[%s222_s1 + $0xb] ss:$16 sm:$0x3] %vm7_vm0, %v71_v27  }
  0x92   :  { %110 = vst.msk [vmem:[%s222_s1 + $0xc] ss:$16 sm:$0x3] %vm7_vm0, %v77_v28  }
  0x94   :  { %v83_v29 = vpop.permute.xlu0 %82  }
  0x95   :  { %v89_v30 = vpop.permute.xlu1 %88   ;;  %111 = vst.msk [vmem:[%s222_s1 + $0xd] ss:$16 sm:$0x3] %vm7_vm0, %v83_v29  }
  0x96   :  { %112 = vst.msk [vmem:[%s222_s1 + $0xe] ss:$16 sm:$0x3] %vm7_vm0, %v89_v30  }
  0x98   :  { %v95_v31 = vpop.permute.xlu0 %94  }
  0x99   :  { %113 = vst.msk [vmem:[%s222_s1 + $0xf] ss:$16 sm:$0x3] %vm7_vm0, %v95_v31  }

// kernel: auto_contrast_2d_forward.1
= control target key start
LH: loop header
LB: loop body
LE: loop exit
PB: predicated region body
PF: predicated region fallthrough
CT: control target
= control target key end

     0   :  { %s25666_s0 = inlined_call_operand.vmem [shape: f32[2,32,3], index: 0, kind: input, shape index: {}]   ;;  %s25667_s1 = inlined_call_operand.vmem [shape: f32[3,96], index: 1, kind: input, shape index: {}]   ;;  %s25668_s2 = inlined_call_operand.hbm [shape: f32[32,96], index: 2, kind: input, shape index: {}]   ;;  %s25669_s3 = inlined_call_operand.vmem [shape: bf16[7,3,12], index: 3, kind: input, shape index: {}]   ;;  %s25670_s4 = inlined_call_operand.vmem [shape: bf16[7,12,3], index: 4, kind: input, shape index: {}]   ;;  %s25671_s5 = inlined_call_operand.hbm [shape: bf16[7,96,384], index: 5, kind: input, shape index: {}]   ;;  %s25672_s6 = inlined_call_operand.vmem [shape: bf16[7,384,96], index: 6, kind: input, shape index: {}]   ;;  %s25673_s7 = inlined_call_operand.vmem [shape: bf16[3,96,256], index: 7, kind: input, shape index: {}]   ;;  %s25674_s8 = inlined_call_operand.hbm [shape: bf16[3,256,256], index: 8, kind: input, shape index: {}]   ;;  %s25675_s9 = inlined_call_operand.hbm [shape: bf16[3,256,512], index: 9, kind: input, shape index: {}]   ;;  %s25676_s10 = inlined_call_operand.vmem [shape: bf16[3,512,512], index: 10, kind: input, shape index: {}]   ;;  %s25677_s11 = inlined_call_operand.hbm [shape: bf16[3,512,512], index: 11, kind: input, shape index: {}]   ;;  %s25678_s12 = inlined_call_operand.vmem [shape: f32[512,16], index: 12, kind: input, shape index: {}]   ;;  %s25679_s13 = inlined_call_operand.vmem [shape: f32[16,10], index: 13, kind: input, shape index: {}]   ;;  %s25680_s14 = inlined_call_operand.hbm [shape: f32[1,2944], index: 14, kind: input, shape index: {}]   ;;  %s25681_s15 = inlined_call_operand.hbm [shape: f32[2,1,10], index: 15, kind: output, shape index: {0}]   ;;  %s25682_s16 = inlined_call_operand.hbm [shape: f32[2,1,16], index: 16, kind: output, shape index: {1}]  }
   0x1   :  { %25700 = sst [smem:[#allocation30_spill]] %s25666_s0 }
   0x2   :  { %25701 = sst [smem:[#allocation31_spill]] %s25671_s5 }
   0x3   :  { %25702 = sst [smem:[#allocation32_spill]] %s25675_s9 }
   0x4   :  { %25703 = sst [smem:[#allocation33_spill]] %s25679_s13 }
   0x5   :  { %25704 = sst [smem:[#allocation34_spill]] %s25681_s15 }
   0x6   :  { %25705 = sst [smem:[#allocation35_spill]] %s25682_s16 }
   0x7   :  { %22 = vsyncpa [#allocation3], 0 }
   0x8   :  { %23 = vsyncpa [#allocation6], 0 }
   0x9   :  { %24 = vsyncpa [#allocation9], 0 }
   0xa   :  { %25 = vsyncpa [#allocation12], 0 }
   0xb   :  { %26 = vsyncpa [#allocation4], 0 }
   0xc   :  { %28 = vsyncpa [#allocation4 + $0x1], 0 }
   0xd   :  { %29 = vsyncpa [#allocation15], 0 }
   0xe   :  { %31 = vsyncpa [#allocation15 + $0x1], 0  ;;  %s22127_s21 = smov 0   ;;  %s22129_s22 = smov 0  }
   0xf   :  { %s22131_s23 = smov 0   ;;  %s22133_s24 = smov 0  }
  0x10 LB: > { %25706 = sst [smem:[#allocation22_spill]] %s22012_s21  ;;  %s22148_s25 = sadd.s32 4294967295, %s22024_s24   ;;  %s22024_s24 = sphi %s22133_s24, %s25748_s24   ;;  %s22020_s23 = sphi %s22131_s23, %s25751_s23   ;;  %s22016_s22 = sphi %s22129_s22, %s25750_s22   ;;  %s22012_s21 = sphi %s22127_s21, %s25749_s21  }
  0x11   : > { %25707 = sst [smem:[#allocation23_spill]] %s22016_s22  ;;  %s16156_s26 = sadd.s32 4294967294, %s22024_s24  }
  0x12   : > { %25708 = sst [smem:[#allocation24_spill]] %s22020_s23  ;;  %s22152_s27 = sadd.s32 1, %s22024_s24  }
  0x13   : > { %25709 = sst [smem:[#allocation25_spill]] %s22024_s24  ;;  %s364_s28 = sadd.s32 1, %s22020_s23 }
  0x14   : > { %25710 = sst [smem:[#allocation26_spill]] %s22152_s27  ;;  %s361_s29 = ssub.s32 %s22024_s24, %s22152_s27 }
  0x15   : > { %p374_p0 = scmp.ne.s32.totalorder %s22020_s23, %s22016_s22  ;;  %p362_p1 = scmp.eq.s32.totalorder %s361_s29, 0 }
  0x16   : > { %p375_p2 = scmp.eq.s32.totalorder %s22148_s25, 1  ;;  %p380_p3 = scmp.ne.s32.totalorder %s22016_s22, %s22012_s21 }
  0x17   : > { %p381_p4 = scmp.eq.s32.totalorder %s16156_s26, 1  ;;  %p16157_p7 = scmp.ge.s32.totalorder %s22024_s24, 1 }
  0x18   : > { %s22163_s30 = scalar_select %p362_p1, %s22020_s23, %s364_s28  }
  0x19   : > { %p22165_p5 = por %p375_p2, %p374_p0  ;;  %p22169_p6 = por %p381_p4, %p380_p3 }
  0x1a   : > { %25711 = sst [smem:[#allocation27_spill]] %s22163_s30  ;;  %p414_p8 = scmp.lt.s32.totalorder %s22024_s24, 3 }
  0x1b   : > { %s25712_s0 = scalar_select %p22165_p5, 1, 0 }
  0x1c   : > { %s25714_s17 = scalar_select %p22169_p6, 1, 0 }
  0x1d   : > { %25713 = sst [smem:[#allocation28_spill]] %s25712_s0  ;;  %p25689_p9 = scmp.eq.s32.totalorder %s22148_s25, 0 }
  0x1e   : > { %25715 = sst [smem:[#allocation29_spill]] %s25714_s17  ;;  %p22176_p10 = pnand %p16157_p7, %p414_p8 }
  0x1f   : > { %s22026_s19 = smov [#allocation5]   ;;  %s22027_s28 = smov [#allocation8]  }
  0x20   : > { %s25716_s18 = scalar_select %p22176_p10, 1, 0 }
  0x21   : > { %s448_s20 = sshll.u32 %s22026_s19, 4  ;;  %p19644_p11 = pneg %p22176_p10  ;;  %s449_s20 = int_to_ptr.vmem [resolvable:$true] %s448_s20 }
  0x22   : > { %s480_s29 = sshll.u32 %s22027_s28, 4  ;;  %s25718_s5 = sld [smem:[#allocation31_spill]]  ;;  %s22188_s29 = int_to_ptr.vmem [resolvable:$true] %s480_s29 }
  0x23   : > { %p22184_p12 = pnand %p25689_p9, %p19644_p11 }
  0x25   : > { %p22198_p0 = pneg %p22184_p12 }
  0x28   : > { %s21746_s27 = scalar_lea.hbm %s25718_s5, 16128 }
  0x29   : > { %p21747_p13 = scmp.ne.s32.totalorder %s25718_s5, %s21746_s27  ;;  %p21753_p3 = scmp.lt.u32.totalorder %s21746_s27, %s25718_s5 }
  0x2b   : > { %p21749_p1 = pnand %p22198_p0, %p21747_p13 }
  0x2d   : > { %p21750_p2 = pneg %p21749_p1 }
  0x2f   : > { %p21755_p4 = pnand %p21753_p3, %p21750_p2 }
  0x31   : > { %21758 = shalt.err (!%p21755_p4)
}
  0x32   : > { %s21759_s23 = scalar_lea.vmem %s449_s20, 16128  ;;  %p21767_p9 = scmp.lt.s32.totalorder %s449_s20, %s449_s20 }
  0x33   : > { %p21760_p7 = scmp.ne.s32.totalorder %s449_s20, %s21759_s23  ;;  %p21768_p6 = scmp.lt.s32.totalorder %s21759_s23, %s21759_s23 }
  0x35   : > { %p21762_p8 = pnand %p21760_p7, %p22198_p0  ;;  %p21769_p5 = por %p21768_p6, %p21767_p9 }
  0x37   : > { %p21763_p11 = pneg %p21762_p8 }
  0x39   : > { %p21770_p10 = pnand %p21769_p5, %p21763_p11 }
  0x3b   : > { %21773 = shalt.err (!%p21770_p10)
}
  0x3c   : > { %s22028_s21 = smov 192   ;;  %s22029_s30 = smov 12  }
  0x3d   : > { %19650 = dma.hbm_to_vmem [thread:$0]  (!%p22184_p12), %s25718_s5, 16128, %s449_s20, [#allocation6], %s22028_s21, %s22028_s21, %s22029_s30  }
  0x3e   : > { %s25720_s9 = sld [smem:[#allocation32_spill]] }
  0x44   : > { %s21774_s15 = scalar_lea.hbm %s25720_s9, 24576 }
  0x45   : > { %p21775_p13 = scmp.ne.s32.totalorder %s25720_s9, %s21774_s15  ;;  %p21781_p9 = scmp.lt.u32.totalorder %s21774_s15, %s25720_s9 }
  0x47   : > { %p21777_p5 = pnand %p21775_p13, %p22198_p0 }
  0x49   : > { %p21778_p6 = pneg %p21777_p5 }
  0x4b   : > { %p21783_p10 = pnand %p21781_p9, %p21778_p6 }
  0x4d   : > { %21786 = shalt.err (!%p21783_p10)
}
  0x4e   : > { %s21787_s20 = scalar_lea.vmem %s22188_s29, 24576  ;;  %p21795_p4 = scmp.lt.s32.totalorder %s22188_s29, %s22188_s29 }
  0x4f   : > { %p21788_p1 = scmp.ne.s32.totalorder %s22188_s29, %s21787_s20  ;;  %p21796_p7 = scmp.lt.s32.totalorder %s21787_s20, %s21787_s20 }
  0x51   : > { %p21790_p2 = pnand %p21788_p1, %p22198_p0  ;;  %p21797_p8 = por %p21796_p7, %p21795_p4 }
  0x53   : > { %p21791_p3 = pneg %p21790_p2 }
  0x55   : > { %p21798_p11 = pnand %p21797_p8, %p21791_p3 }
  0x57   : > { %21801 = shalt.err (!%p21798_p11)
}
  0x58   : > { %s25697_s16 = smov 256   ;;  %s25698_s15 = smov 16  }
  0x59   : > { %19656 = dma.hbm_to_vmem [thread:$0]  (!%p22184_p12), %s25720_s9, 24576, %s22188_s29, [#allocation9], %s25697_s16, %s25697_s16, %s25698_s15  }
  0x5a   : > { %s22032_s21 = smov [#allocation2]   ;;  %s21802_s17 = scalar_lea.hbm %s25668_s2, 512 }
  0x5b   : > { %s429_s30 = sshll.u32 %s22032_s21, 4  ;;  %p21803_p13 = scmp.ne.s32.totalorder %s25668_s2, %s21802_s17  ;;  %s430_s30 = int_to_ptr.vmem [resolvable:$true] %s429_s30 }
  0x5c   : > { %p21809_p9 = scmp.lt.u32.totalorder %s21802_s17, %s25668_s2 }
  0x5d   : > { %p21805_p5 = pnand %p21803_p13, %p22198_p0 }
  0x5f   : > { %p21806_p6 = pneg %p21805_p5 }
  0x61   : > { %p21811_p10 = pnand %p21809_p9, %p21806_p6 }
  0x63   : > { %21814 = shalt.err (!%p21811_p10)
}
  0x64   : > { %s21815_s29 = scalar_lea.vmem %s430_s30, 512  ;;  %p21823_p4 = scmp.lt.s32.totalorder %s430_s30, %s430_s30 }
  0x65   : > { %p21816_p1 = scmp.ne.s32.totalorder %s430_s30, %s21815_s29  ;;  %p21824_p7 = scmp.lt.s32.totalorder %s21815_s29, %s21815_s29 }
  0x67   : > { %p21818_p2 = pnand %p21816_p1, %p22198_p0  ;;  %p21825_p8 = por %p21824_p7, %p21823_p4 }
  0x69   : > { %p21819_p3 = pneg %p21818_p2 }
  0x6b   : > { %p21826_p11 = pnand %p21825_p8, %p21819_p3 }
  0x6d   : > { %21829 = shalt.err (!%p21826_p11)
}
  0x6e   : > { %s22033_s22 = smov 128   ;;  %s22034_s0 = smov 8  }
  0x6f   : > { %19647 = dma.hbm_to_vmem [thread:$0]  (!%p22184_p12), %s25668_s2, 512, %s430_s30, [#allocation3], %s22033_s22, %s22033_s22, %s22034_s0  }
  0x70   : > { %s22035_s24 = smov [#allocation7]   ;;  %s22036_s17 = smov [#allocation10]  }
  0x71   : > { %s467_s27 = sshll.u32 %s22035_s24, 4  ;;  %s496_s28 = sshll.u32 %s22036_s17, 4  ;;  %s468_s27 = int_to_ptr.vmem [resolvable:$true] %s467_s27  ;;  %s497_s28 = int_to_ptr.vmem [resolvable:$true] %s496_s28 }
  0x72   : > { %s21830_s29 = scalar_lea.hbm %s25674_s8, 12288 }
  0x73   : > { %p21831_p13 = scmp.ne.s32.totalorder %s25674_s8, %s21830_s29  ;;  %p21837_p9 = scmp.lt.u32.totalorder %s21830_s29, %s25674_s8 }
  0x75   : > { %p21833_p5 = pnand %p21831_p13, %p22198_p0 }
  0x77   : > { %p21834_p6 = pneg %p21833_p5 }
  0x79   : > { %p21839_p10 = pnand %p21837_p9, %p21834_p6 }
  0x7b   : > { %21842 = shalt.err (!%p21839_p10)
}
  0x7c   : > { %s21843_s30 = scalar_lea.vmem %s468_s27, 12288  ;;  %p21851_p4 = scmp.lt.s32.totalorder %s468_s27, %s468_s27 }
  0x7d   : > { %p21844_p1 = scmp.ne.s32.totalorder %s468_s27, %s21843_s30  ;;  %p21852_p7 = scmp.lt.s32.totalorder %s21843_s30, %s21843_s30 }
  0x7f   : > { %p21846_p2 = pnand %p21844_p1, %p22198_p0  ;;  %p21853_p8 = por %p21852_p7, %p21851_p4 }
  0x81   : > { %p21847_p3 = pneg %p21846_p2 }
  0x83   : > { %p21854_p11 = pnand %p21853_p8, %p21847_p3 }
  0x85   : > { %21857 = shalt.err (!%p21854_p11)
}
  0x86   : > { %19653 = dma.hbm_to_vmem [thread:$0]  (!%p22184_p12), %s25674_s8, 12288, %s468_s27, [#allocation6], %s22033_s22, %s22033_s22, %s22034_s0  }
  0x87   : > { %s21858_s5 = scalar_lea.hbm %s25677_s11, 49152 }
  0x88   : > { %p21859_p13 = scmp.ne.s32.totalorder %s25677_s11, %s21858_s5  ;;  %p21865_p9 = scmp.lt.u32.totalorder %s21858_s5, %s25677_s11 }
  0x8a   : > { %p21861_p5 = pnand %p21859_p13, %p22198_p0 }
  0x8c   : > { %p21862_p6 = pneg %p21861_p5 }
  0x8e   : > { %p21867_p10 = pnand %p21865_p9, %p21862_p6 }
  0x90   : > { %21870 = shalt.err (!%p21867_p10)
}
  0x91   : > { %s21871_s20 = scalar_lea.vmem %s497_s28, 49152  ;;  %p21879_p4 = scmp.lt.s32.totalorder %s497_s28, %s497_s28 }
  0x92   : > { %p21872_p1 = scmp.ne.s32.totalorder %s497_s28, %s21871_s20  ;;  %p21880_p7 = scmp.lt.s32.totalorder %s21871_s20, %s21871_s20 }
  0x94   : > { %p21874_p2 = pnand %p21872_p1, %p22198_p0  ;;  %p21881_p8 = por %p21880_p7, %p21879_p4 }
  0x96   : > { %p21875_p3 = pneg %p21874_p2 }
  0x98   : > { %p21882_p11 = pnand %p21881_p8, %p21875_p3 }
  0x9a   : > { %21885 = shalt.err (!%p21882_p11)
}
  0x9b   : > { %s25721_s22 = smov 16   ;;  %s25722_s0 = smov 256  }
  0x9c   : > { %19659 = dma.hbm_to_vmem [thread:$0]  (!%p22184_p12), %s25677_s11, 49152, %s497_s28, [#allocation9], %s25722_s0, %s25722_s0, %s25721_s22  }
  0x9d   : > { %s22037_s30 = smov [#allocation11]   ;;  %s21886_s13 = scalar_lea.hbm %s25680_s14, 368 }
  0x9e   : > { %s516_s16 = sshll.u32 %s22037_s30, 4  ;;  %p21887_p13 = scmp.ne.s32.totalorder %s25680_s14, %s21886_s13  ;;  %s517_s16 = int_to_ptr.vmem [resolvable:$true] %s516_s16 }
  0x9f   : > { %p21893_p9 = scmp.lt.u32.totalorder %s21886_s13, %s25680_s14 }
  0xa0   : > { %p21889_p5 = pnand %p21887_p13, %p22198_p0 }
  0xa2   : > { %p21890_p6 = pneg %p21889_p5 }
  0xa4   : > { %p21895_p10 = pnand %p21893_p9, %p21890_p6 }
  0xa6   : > { %21898 = shalt.err (!%p21895_p10)
}
  0xa7   : > { %s21899_s28 = scalar_lea.vmem %s517_s16, 368  ;;  %s21906_s23 = scalar_lea.vmem %s517_s16, 384 }
  0xa8   : > { %p21900_p1 = scmp.ne.s32.totalorder %s517_s16, %s21899_s28  ;;  %p21907_p4 = scmp.lt.s32.totalorder %s517_s16, %s517_s16 }
  0xa9   : > { %p21908_p7 = scmp.lt.s32.totalorder %s21906_s23, %s21899_s28 }
  0xaa   : > { %p21902_p2 = pnand %p21900_p1, %p22198_p0 }
  0xab   : > { %p21909_p8 = por %p21908_p7, %p21907_p4 }
  0xac   : > { %p21903_p3 = pneg %p21902_p2 }
  0xae   : > { %p21910_p11 = pnand %p21909_p8, %p21903_p3 }
  0xb0   : > { %21913 = shalt.err (!%p21910_p11)
}
  0xb1   : > { %19662 = dma.hbm_to_vmem [thread:$0]  (!%p22184_p12), %s25680_s14, 368, %s517_s16, [#allocation12]  }
  0xb2   : > { %p25723_p13 = scmp.ne.s32.totalorder %s25716_s18, 0 }
  0xb3   : > { %p25724_p5 = scmp.eq.s32.totalorder (!%p25723_p13), %s22148_s25, 0 }
  0xb4   : > { %537 = sbr.rel (%p25723_p13) target bundleno = 5247 (0x147f), region = 80 }
  0xbb   : > { %21987 = dma.done.wait (%p25724_p5), [#allocation3], 512   ;;  %p25725_p0 = pmov %p25724_p5 }
  0xbd   : > { %21989 = vsyncadd (%p25725_p0), [#allocation3], 4294966784  ;;  %p25726_p6 = pmov %p25725_p0 }
  0xbe   : > { %p25727_p9 = pmov %p25725_p0 }
  0xbf   : > { %21991 = dma.done.wait (%p25726_p6), [#allocation6], 28416  }
  0xc0   : > { %21993 = vsyncadd (%p25727_p9), [#allocation6], 4294938880  ;;  %p25728_p10 = pmov %p25725_p0 }
  0xc1   : > { %p25729_p12 = pmov %p25725_p0 }
  0xc2   : > { %21995 = dma.done.wait (%p25728_p10), [#allocation9], 73728  }
  0xc3   : > { %21997 = vsyncadd (%p25729_p12), [#allocation9], 4294893568  ;;  %p25730_p1 = pmov %p25725_p0 }
  0xc4   : > { %p25731_p2 = pmov %p25725_p0 }
  0xc5   : > { %21999 = dma.done.wait (%p25730_p1), [#allocation12], 368  }
  0xc6   : > { %22001 = vsyncadd (%p25731_p2), [#allocation12], 4294966928  ;;  %vm655_vm0 = vcmask 1040384   ;;  %p610_p3 = scmp.lt.s32.totalorder %s22148_s25, 1  ;;  %vm643_vm1 = vcmask 1041408   ;;  %v22038_v0 = vmov 65535  }
  0xc7   : > { %v657_v1 = vsel %vm655_vm0, 4294967295, %v22038_v0  ;;  %s25732_s27 = sld [smem:[#allocation30_spill]]  ;;  %v647_v3 = vld [vmem:[%s25669_s3] sm:$0x3]  ;;  %v16177_v8 = vld [vmem:[%s25669_s3 + $0x2] sm:$0x3] }
  0xc8   : > { %s611_s18 = scalar_select %p610_p3, %s22148_s25, 1  ;;  %v22337_v2 = vsel %vm643_vm1, %v657_v1, 0  ;;  %vm623_vm2 = vsmask.f32 1280  ;;  %vm648_vm3 = vcmask 23552   ;;  %vm808_vm6 = vcmask 1046528  }
  0xc9   : > { %v660_v6 = vand.u32 %v22337_v2, %v647_v3  ;;  %v749_v11 = vand.u32 %v16177_v8, %v22337_v2  ;;  %v16180_v17 = vld [vmem:[%s25669_s3 + $0x4] sm:$0x3]  ;;  %vm22361_vm4 = vmand %vm643_vm1, %vm623_vm2  ;;  %vm723_vm5 = vsmask.f32 7424  ;;  %v16183_v40 = vld [vmem:[%s25669_s3 + $0x6] sm:$0x3] }
  0xca   : > { %s18239_s26 = sshll.u32 %s611_s18, 5  ;;  %v821_v26 = vand.u32 %v16180_v17, %v22337_v2  ;;  %v899_v45 = vand.u32 %v16183_v40, %v22337_v2  ;;  %v16186_v51 = vld [vmem:[%s25669_s3 + $0x8] sm:$0x3]  ;;  %vm878_vm7 = vsmask.f32 6400  ;;  %vm956_vm8 = vcmask 1045504  }
  0xcb   : > { %18703 = vmatprep.subr.bf16.mxu0 %v660_v6  ;;  %v969_v57 = vand.u32 %v16186_v51, %v22337_v2  ;;  %v16189_v61 = vld [vmem:[%s25669_s3 + $0xa] sm:$0x3]  ;;  %vm1026_vm9 = vsmask.f32 5376  ;;  %vm1102_vm10 = vcmask 1044480   ;;  %vm1205_vm11 = vcmask 97280  }
  0xcc   : > { %18704 = vmatpush3.bf16.msra.mxu0 %v660_v6  ;;  %v1045_v3 = vand.u32 %v16189_v61, %v22337_v2  ;;  %vm1795_vm12 = vcmask 1042432   ;;  %vm1892_vm13 = vcmask 785408   ;;  %vm6100_vm14 = vsmask.f32 256  ;;  %s25737_s24 = sld [smem:[#allocation33_spill]]  ;;  %s25739_s20 = sld [smem:[#allocation23_spill]] }
  0xcd   : > { %s22342_s29 = scalar_lea.vmem %s25732_s27, %s18239_s26  ;;  %18709 = vmatprep.subr.bf16.mxu0 %v749_v11  ;;  %vm23571_vm15 = vmand %vm655_vm0, %vm6100_vm14  ;;  %vm15850_vm0 = vcmask 130048   ;;  %vm15979_vm1 = vcmask 122880   ;;  %s18235_s26 = sshll.u32 %s22148_s25, 4 }
  0xce   : > { %v616_v4 = vld [vmem:[%s22342_s29] sm:$0xff]  ;;  %v617_v5 = vld [vmem:[%s22342_s29 + $0x8] sm:$0xff]  ;;  %v618_v9 = vld [vmem:[%s22342_s29 + $0x10] sm:$0xff]  ;;  %s25741_s27 = sld [smem:[#allocation35_spill]]  ;;  %s22040_s13 = smov [#allocation14]  }
  0xcf   : > { %v621_v7 = vpack.c.bf16 %v617_v5, %v616_v4  ;;  %v619_v10 = vld [vmem:[%s22342_s29 + $0x18] sm:$0xff]  ;;  %s21918_s5 = sshll.u32 %s22040_s13, 4  ;;  %s21919_s5 = int_to_ptr.vmem [resolvable:$false] %s21918_s5 }
  0xd0   : > { %v622_v12 = vpack.c.bf16 %v619_v10, %v618_v9  ;;  %v16192_v9 = vld [vmem:[%s25669_s3 + $0xc] sm:$0x3]  ;;  %s21920_s21 = scalar_lea.vmem %s21919_s5, 32 }
  0xd1   : > { %v625_v13 = vshrl.u32 %v621_v7, 16  ;;  %v628_v14 = vshll.u32 %v621_v7, 16 }
  0xd2   : > { %v633_v15 = vshrl.u32 %v622_v12, 16  ;;  %v636_v16 = vshll.u32 %v622_v12, 16  ;;  %s25738_s17 = smov %s25737_s24  ;;  %s25588_s22 = sand.u32 1, %s25739_s20  }
  0xd3   : > { %v627_v18 = vrot.slane %v625_v13, 6  ;;  %v630_v19 = vrot.slane %v628_v14, 7  ;;  %v1115_v14 = vand.u32 %v16192_v9, %v22337_v2  ;;  %s609_s18 = scalar_lea.vmem [#allocation14], %s25588_s22  ;;  %s15988_s15 = scalar_lea.sflag [#allocation15], %s25588_s22 }
  0xd4   : > { %v635_v21 = vrot.slane %v633_v15, 6  ;;  %v638_v22 = vrot.slane %v636_v16, 7  ;;  %s25597_s30 = scalar_lea.hbm %s25741_s27, %s18235_s26  ;;  %s16013_s16 = sshll.u32 %s609_s18, 4  ;;  %s16014_s16 = int_to_ptr.vmem [resolvable:$true] %s16013_s16 }
  0xd5   : > { %v631_v23 = vor.u32 %v630_v19, %v627_v18  ;;  %s21914_s9 = scalar_lea.vmem %s16014_s16, 16  ;;  %p21921_p13 = scmp.lt.s32.totalorder %s16014_s16, %s21919_s5 }
  0xd6   : > { %v639_v24 = vor.u32 %v638_v22, %v635_v21  ;;  %p21915_p4 = scmp.ne.s32.totalorder %s16014_s16, %s21914_s9  ;;  %p21922_p5 = scmp.lt.s32.totalorder %s21920_s21, %s21914_s9 }
  0xd7   : > { %v22367_v25 = vsel %vm22361_vm4, 0, %v631_v23 }
  0xd8   : > { %18705 = vmatprep.mubr.msk.bf16.mxu0 %vm648_vm3, %v22367_v25  ;;  %v22373_v27 = vsel %vm623_vm2, %v631_v23, %v639_v24  ;;  %v22377_v28 = vsel %vm22361_vm4, %v639_v24, 0  ;;  %v22380_v29 = vshrl.u32 %v22367_v25, 16  ;;  %v22383_v30 = vshll.u32 %v22367_v25, 16  ;;  %v19729_v24 = vld [vmem:[%s25670_s4] sm:$0x3f]   ;;  %p21923_p0 = por %p21922_p5, %p21921_p13 }
  0xd9   : > { %18706 = vmatmul.mubr.msk.bf16.vlgmr.msra.gmra.mrb[0].mxu0 %vm648_vm3, %v22373_v27  ;;  %v22388_v31 = vshll.u32 %v22373_v27, 16  ;;  %v734_v33 = vshrl.u32 %v22373_v27, 16  ;;  %v22393_v34 = vshll.u32 %v22377_v28, 16  ;;  %v809_v41 = vrot.slane %v22367_v25, 1  ;;  %19609 = vmatprep.subr.msk.bf16.mxu1 %vm956_vm8, %v19729_v24 }
  0xda   : > { %18710 = vmatpush3.bf16.msra.mxu0 %v749_v11  ;;  %v728_v32 = vrot.slane %v22383_v30, 1  ;;  %v810_v42 = vrot.slane %v22373_v27, 1  ;;  %v879_v46 = vrot.slane %v22380_v29, 1  ;;  %v880_v47 = vrot.slane %v22383_v30, 2 }
  0xdb   : > { %v732_v35 = vrot.slane %v22388_v31, 1  ;;  %18715 = vmatprep.subr.bf16.mxu0 %v821_v26  ;;  %v740_v39 = vrot.slane %v22393_v34, 1  ;;  %v882_v48 = vrot.slane %v734_v33, 1  ;;  %v883_v49 = vrot.slane %v22388_v31, 2 }
  0xdc   : > { %v729_v36 = vor.u32 %v728_v32, %v22380_v29  ;;  %v811_v44 = vsel %vm808_vm6, %v809_v41, %v810_v42  ;;  %v812_v50 = vrot.slane %v22377_v28, 1  ;;  %v881_v52 = vor.u32 %v880_v47, %v879_v46 }
  0xdd   : > { %v736_v38 = vor.u32 %v734_v33, %v732_v35  ;;  %v884_v53 = vor.u32 %v883_v49, %v882_v48  ;;  %v886_v55 = vshrl.u32 %v22377_v28, 16  ;;  %v889_v58 = vrot.slane %v22393_v34, 2 }
  0xde   : > { %v733_v37 = vsel %vm723_vm5, %v729_v36, %v732_v35  ;;  %v813_v54 = vsel %vm808_vm6, %v810_v42, %v812_v50  ;;  %v957_v62 = vrot.slane %v22367_v25, 2  ;;  %v958_v63 = vrot.slane %v22373_v27, 2 }
  0xdf   : > { %18711 = vmatprep.mubr.msk.bf16.mxu0 %vm648_vm3, %v733_v37  ;;  %v741_v43 = vsel %vm723_vm5, %v736_v38, %v740_v39  ;;  %v885_v56 = vsel %vm878_vm7, %v881_v52, %v884_v53  ;;  %v888_v59 = vrot.slane %v886_v55, 1  ;;  %v1027_v4 = vrot.slane %v22380_v29, 2  ;;  %v19731_v52 = vld [vmem:[%s25670_s4 + $0x10] sm:$0x3f]  }
  0xe0   : > { %v959_v1 = vsel %vm956_vm8, %v957_v62, %v958_v63  ;;  %v1028_v5 = vrot.slane %v22383_v30, 3  ;;  %v1030_v6 = vrot.slane %v734_v33, 2  ;;  %v1031_v7 = vrot.slane %v22388_v31, 3 }
  0xe1   : > { %v890_v60 = vor.u32 %v889_v58, %v888_v59  ;;  %v960_v8 = vrot.slane %v22377_v28, 2  ;;  %v1034_v15 = vrot.slane %v886_v55, 2  ;;  %v1035_v16 = vrot.slane %v22393_v34, 3 }
  0xe2   : > { %v1029_v10 = vor.u32 %v1028_v5, %v1027_v4  ;;  %v1032_v11 = vor.u32 %v1031_v7, %v1030_v6  ;;  %v1103_v17 = vrot.slane %v22367_v25, 3  ;;  %v1104_v18 = vrot.slane %v22373_v27, 3  ;;  %v16176_v27 = vld [vmem:[#allocation11] ss:$0 sm:$0xff] }
  0xe3   : > { %v891_v0 = vsel %vm878_vm7, %v884_v53, %v890_v60  ;;  %v961_v12 = vsel %vm956_vm8, %v958_v63, %v960_v8  ;;  %v1106_v19 = vrot.slane %v22377_v28, 3  ;;  %v1036_v21 = vor.u32 %v1035_v16, %v1034_v15 }
  0xe4   : > { %v1033_v13 = vsel %vm1026_vm9, %v1029_v10, %v1032_v11  ;;  %v1105_v2 = vsel %vm1102_vm10, %v1103_v17, %v1104_v18  ;;  %v1214_v25 = vsel %vm956_vm8, %v19729_v24, 0 }
  0xe5   : > { %18712 = vmatmul.mubr.msk.bf16.vlgmr.msra.gmra.mrb[0].mxu0 %vm648_vm3, %v741_v43  ;;  %v1037_v22 = vsel %vm1026_vm9, %v1032_v11, %v1036_v21  ;;  %v1107_v23 = vsel %vm1102_vm10, %v1104_v18, %v1106_v19  ;;  %18746 = vmatpush3.bf16.msra.mxu1 %v1214_v25 }
  0xe6   : > { %18716 = vmatpush3.bf16.msra.mxu0 %v821_v26  ;;  %18717 = vmatprep.mubr.msk.bf16.mxu0 %vm648_vm3, %v811_v44  ;;  %v19730_v26 = vld [vmem:[%s25670_s4 + $0x8] sm:$0x3f]  }
  0xe7   : > { %18721 = vmatprep.subr.bf16.mxu0 %v899_v45  ;;  %19610 = vmatprep.subr.msk.bf16.mxu1 %vm956_vm8, %v19730_v26 }
  0xf1   : > { %18718 = vmatmul.mubr.msk.bf16.vlgmr.msra.gmra.mrb[0].mxu0 %vm648_vm3, %v813_v54  ;;  %v1308_v54 = vsel %vm956_vm8, %v19730_v26, 0 }
  0xf2   : > { %18722 = vmatpush3.bf16.msra.mxu0 %v899_v45  ;;  %18723 = vmatprep.mubr.msk.bf16.mxu0 %vm648_vm3, %v885_v56 }
  0xf3   : > { %18727 = vmatprep.subr.bf16.mxu0 %v969_v57 }
  0xfd   : > { %18724 = vmatmul.mubr.msk.bf16.vlgmr.msra.gmra.mrb[0].mxu0 %vm648_vm3, %v891_v0 }
  0xfe   : > { %18728 = vmatpush3.bf16.msra.mxu0 %v969_v57  ;;  %18729 = vmatprep.mubr.msk.bf16.mxu0 %vm648_vm3, %v959_v1 }
  0xff   : > { %18733 = vmatprep.subr.bf16.mxu0 %v1045_v3 }
 0x109   : > { %18730 = vmatmul.mubr.msk.bf16.vlgmr.msra.gmra.mrb[0].mxu0 %vm648_vm3, %v961_v12 }
 0x10a   : > { %18734 = vmatpush3.bf16.msra.mxu0 %v1045_v3  ;;  %18735 = vmatprep.mubr.msk.bf16.mxu0 %vm648_vm3, %v1033_v13 }
 0x10b   : > { %18739 = vmatprep.subr.bf16.mxu0 %v1115_v14 }
 0x115   : > { %18736 = vmatmul.mubr.msk.bf16.vlgmr.msra.gmra.mrb[0].mxu0 %vm648_vm3, %v1037_v22 }
 0x116   : > { %18740 = vmatpush3.bf16.msra.mxu0 %v1115_v14  ;;  %18741 = vmatprep.mubr.msk.bf16.mxu0 %vm648_vm3, %v1105_v2 }
 0x121   : > { %18742 = vmatmul.mubr.msk.bf16.vlgmr.msra.gmra.mrb[0].mxu0 %vm648_vm3, %v1107_v23 }
 0x1f4   : > { %v18743_v28 = vpop.f32.mrb[0].mxu0 }
 0x1f5   : > { %v19125_v29 = vadd.f32 %v18743_v28, %v16176_v27  ;;  %v1151_v30 = vpop.f32.mrb[1].mxu0 }
 0x1f6   : > { %v19126_v31 = vadd.f32 %v16176_v27, %v1151_v30  ;;  %v18744_v32 = vpop.f32.mrb[2].mxu0 }
 0x1f7   : > { %v19127_v33 = vadd.f32 %v18744_v32, %v16176_v27  ;;  %v1154_v34 = vpop.f32.mrb[3].mxu0  ;;  %v1172_v36 = vmax.f32 %v19125_v29, 0.0  ;;  %v19732_v32 = vld [vmem:[%s25670_s4 + $0x18] sm:$0x3f]  }
 0x1f8   : > { %v19128_v35 = vadd.f32 %v16176_v27, %v1154_v34  ;;  %v1170_v38 = vmax.f32 %v19126_v31, 0.0 }
 0x1f9   : > { %v1173_v37 = vmax.f32 %v19127_v33, 0.0 }
 0x1fa   : > { %v1171_v39 = vmax.f32 %v19128_v35, 0.0 }
 0x1fb   : > { %v1176_v40 = vpack.c.bf16 %v1173_v37, %v1172_v36 }
 0x1fc   : > { %v1175_v41 = vpack.c.bf16 %v1171_v39, %v1170_v38 }
 0x1fd   : > { %v1186_v42 = vshrl.u32 %v1176_v40, 16  ;;  %v1189_v43 = vshll.u32 %v1176_v40, 16  ;;  %v1385_v40 = vsel %vm956_vm8, %v19731_v52, 0 }
 0x1fe   : > { %v1178_v44 = vshrl.u32 %v1175_v41, 16  ;;  %v1181_v45 = vshll.u32 %v1175_v41, 16 }
 0x1ff   : > { %v1188_v46 = vrot.slane %v1186_v42, 6  ;;  %v1191_v47 = vrot.slane %v1189_v43, 7 }
 0x200   : > { %v1180_v48 = vrot.slane %v1178_v44, 6  ;;  %v1183_v49 = vrot.slane %v1181_v45, 7 }
 0x201   : > { %v1192_v50 = vor.u32 %v1191_v47, %v1188_v46  ;;  %v19733_v46 = vld [vmem:[%s25670_s4 + $0x20] sm:$0x3f]   ;;  %v1468_v47 = vsel %vm956_vm8, %v19732_v32, 0 }
 0x202   : > { %v1184_v51 = vor.u32 %v1183_v49, %v1180_v48  ;;  %v19734_v48 = vld [vmem:[%s25670_s4 + $0x28] sm:$0x3f]   ;;  %v1543_v49 = vsel %vm956_vm8, %v19733_v46, 0 }
 0x203   : > { %v1197_v53 = vsel %vm22361_vm4, %v1192_v50, 0 }
 0x204   : > { %v1196_v55 = vsel %vm22361_vm4, 0, %v1184_v51  ;;  %v1193_v56 = vsel %vm623_vm2, %v1184_v51, %v1192_v50  ;;  %v1292_v57 = vshll.u32 %v1197_v53, 16  ;;  %v1371_v58 = vrot.slane %v1197_v53, 1  ;;  %v19735_v50 = vld [vmem:[%s25670_s4 + $0x30] sm:$0x3f]  }
 0x205   : > { %18747 = vmatprep.mubr.msk.bf16.mxu1 %vm1205_vm11, %v1196_v55  ;;  %v1278_v59 = vshrl.u32 %v1196_v55, 16  ;;  %v1280_v60 = vshll.u32 %v1196_v55, 16  ;;  %v1284_v61 = vshll.u32 %v1193_v56, 16  ;;  %v1288_v62 = vshrl.u32 %v1193_v56, 16 }
 0x206   : > { %18748 = vmatmul.mubr.msk.bf16.vlgmr.msra.gmra.mrb[0].mxu1 %vm1205_vm11, %v1193_v56  ;;  %v1294_v63 = vrot.slane %v1292_v57, 1  ;;  %v1368_v0 = vrot.slane %v1196_v55, 1  ;;  %v1369_v1 = vrot.slane %v1193_v56, 1  ;;  %v1450_v3 = vshrl.u32 %v1197_v53, 16 }
 0x207   : > { %18752 = vmatpush3.bf16.msra.mxu1 %v1308_v54  ;;  %v1282_v4 = vrot.slane %v1280_v60, 1  ;;  %v1286_v5 = vrot.slane %v1284_v61, 1  ;;  %v1443_v6 = vrot.slane %v1278_v59, 1  ;;  %v1444_v7 = vrot.slane %v1280_v60, 2  ;;  %v16198_v54 = vld [vmem:[#allocation11 + $0x1] ss:$0 sm:$0xff] }
 0x208   : > { %19611 = vmatprep.subr.msk.bf16.mxu1 %vm956_vm8, %v19731_v52  ;;  %v1370_v8 = vsel %vm808_vm6, %v1368_v0, %v1369_v1  ;;  %v1372_v9 = vsel %vm808_vm6, %v1369_v1, %v1371_v58  ;;  %v1446_v10 = vrot.slane %v1288_v62, 1  ;;  %v1447_v11 = vrot.slane %v1284_v61, 2 }
 0x209   : > { %v1283_v12 = vor.u32 %v1282_v4, %v1278_v59  ;;  %v1290_v13 = vor.u32 %v1288_v62, %v1286_v5  ;;  %v1445_v14 = vor.u32 %v1444_v7, %v1443_v6  ;;  %v1452_v15 = vrot.slane %v1450_v3, 1 }
 0x20a   : > { %v1448_v16 = vor.u32 %v1447_v11, %v1446_v10  ;;  %v1453_v17 = vrot.slane %v1292_v57, 2  ;;  %v1526_v18 = vrot.slane %v1196_v55, 2  ;;  %v1527_v19 = vrot.slane %v1193_v56, 2 }
 0x20b   : > { %v1287_v21 = vsel %vm723_vm5, %v1283_v12, %v1286_v5  ;;  %v1295_v22 = vsel %vm723_vm5, %v1290_v13, %v1294_v63  ;;  %v1529_v2 = vrot.slane %v1197_v53, 2  ;;  %v1601_v23 = vrot.slane %v1278_v59, 2 }
 0x20c   : > { %18753 = vmatprep.mubr.msk.bf16.mxu1 %vm1205_vm11, %v1287_v21  ;;  %v1449_v24 = vsel %vm878_vm7, %v1445_v14, %v1448_v16  ;;  %v1454_v25 = vor.u32 %v1453_v17, %v1452_v15  ;;  %v1528_v26 = vsel %vm956_vm8, %v1526_v18, %v1527_v19  ;;  %v1602_v27 = vrot.slane %v1280_v60, 3  ;;  %v21742_v14 = vld [vmem:[%s22342_s29] sm:$0xff]  ;;  %v21743_v17 = vld [vmem:[%s22342_s29 + $0x8] sm:$0xff]  ;;  %v21744_v21 = vld [vmem:[%s22342_s29 + $0x10] sm:$0xff] }
 0x20d   : > { %v1530_v28 = vsel %vm956_vm8, %v1527_v19, %v1529_v2  ;;  %v1604_v29 = vrot.slane %v1288_v62, 2  ;;  %v1605_v30 = vrot.slane %v1284_v61, 3  ;;  %v1608_v31 = vrot.slane %v1450_v3, 2  ;;  %v21745_v2 = vld [vmem:[%s22342_s29 + $0x18] sm:$0xff]  ;;  %s25740_s29 = sld [smem:[#allocation28_spill]] }
 0x20e   : > { %v1455_v33 = vsel %vm878_vm7, %v1448_v16, %v1454_v25  ;;  %v1603_v34 = vor.u32 %v1602_v27, %v1601_v23  ;;  %v1609_v35 = vrot.slane %v1292_v57, 3  ;;  %v1682_v36 = vrot.slane %v1196_v55, 3  ;;  %v19736_v25 = vld [vmem:[#allocation5] ss:$12 sps:$4 sm:$0xff]   ;;  %v19739_v27 = vld [vmem:[#allocation5 + $0x18] ss:$12 sps:$4 sm:$0xff]  }
 0x20f   : > { %v1606_v37 = vor.u32 %v1605_v30, %v1604_v29  ;;  %v1683_v38 = vrot.slane %v1193_v56, 3  ;;  %v1685_v39 = vrot.slane %v1197_v53, 3  ;;  %v1624_v51 = vsel %vm956_vm8, %v19734_v48, 0  ;;  %v1782_v53 = vld [vmem:[%s25667_s1] sm:$0x7] }
 0x210   : > { %v1610_v41 = vor.u32 %v1609_v35, %v1608_v31  ;;  %v1699_v52 = vsel %vm956_vm8, %v19735_v50, 0  ;;  %18787 = vmatprep.subr.msk.mxu0 %vm1795_vm12, %v1782_v53  ;;  %v19742_v29 = vld [vmem:[#allocation5 + $0x90] ss:$12 sps:$4 sm:$0xff]   ;;  %v19747_v30 = vld [vmem:[#allocation5 + $0x34] ss:$12 sps:$4 sm:$0xff]  }
 0x211   : > { %v1607_v42 = vsel %vm1026_vm9, %v1603_v34, %v1606_v37  ;;  %v1684_v43 = vsel %vm1102_vm10, %v1682_v36, %v1683_v38  ;;  %v1686_v44 = vsel %vm1102_vm10, %v1683_v38, %v1685_v39  ;;  %18788 = vmatpush3.msk.msra.mxu0 %vm1795_vm12, %v1782_v53  ;;  %v19745_v31 = vld [vmem:[#allocation5 + $0x30] ss:$12 sps:$4 sm:$0xff]   ;;  %v19753_v34 = vld [vmem:[#allocation5 + $0x4c] ss:$12 sps:$4 sm:$0xff]   ;;  %v19751_v35 = vld [vmem:[#allocation5 + $0x48] ss:$12 sps:$4 sm:$0xff]  }
 0x212   : > { %18754 = vmatmul.mubr.msk.bf16.vlgmr.msra.gmra.mrb[0].mxu1 %vm1205_vm11, %v1295_v22  ;;  %v1611_v45 = vsel %vm1026_vm9, %v1606_v37, %v1610_v41  ;;  %v19754_v36 = vld [vmem:[#allocation5 + $0xc0] ss:$12 sps:$4 sm:$0xff]   ;;  %v19756_v37 = vld [vmem:[#allocation5 + $0xc4] ss:$12 sps:$4 sm:$0xff]   ;;  %v19765_v41 = vld [vmem:[#allocation5 + $0x7c] ss:$12 sps:$4 sm:$0xff]  }
 0x213   : > { %18758 = vmatpush3.bf16.msra.mxu1 %v1385_v40  ;;  %18759 = vmatprep.mubr.msk.bf16.mxu1 %vm1205_vm11, %v1370_v8  ;;  %v19757_v38 = vld [vmem:[#allocation5 + $0x60] ss:$12 sps:$4 sm:$0xff]   ;;  %v19759_v39 = vld [vmem:[#allocation5 + $0x64] ss:$12 sps:$4 sm:$0xff]   ;;  %v19762_v40 = vld [vmem:[#allocation5 + $0xdc] ss:$12 sps:$4 sm:$0xff]  }
 0x214   : > { %19612 = vmatprep.subr.msk.bf16.mxu1 %vm956_vm8, %v19732_v32  ;;  %v19750_v32 = vld [vmem:[#allocation5 + $0xac] ss:$12 sps:$4 sm:$0xff]   ;;  %p25742_p7 = scmp.ne.s32.totalorder %s25740_s29, 0 }
 0x216   : > { %p21916_p8 = pnand %p21915_p4, %p25742_p7 }
 0x218   : > { %p21917_p11 = pneg %p21916_p8 }
 0x21a   : > { %p21924_p6 = pnand %p21923_p0, %p21917_p11 }
 0x21e   : > { %18760 = vmatmul.mubr.msk.bf16.vlgmr.msra.gmra.mrb[0].mxu1 %vm1205_vm11, %v1372_v9 }
 0x21f   : > { %18764 = vmatpush3.bf16.msra.mxu1 %v1468_v47  ;;  %18765 = vmatprep.mubr.msk.bf16.mxu1 %vm1205_vm11, %v1449_v24  ;;  %v19738_v24 = vld [vmem:[#allocation5 + $0x4] ss:$12 sps:$4 sm:$0xff]  }
 0x220   : > { %19613 = vmatprep.subr.msk.bf16.mxu1 %vm956_vm8, %v19733_v46  ;;  %2060 = vmatprep.subr.bf16.mxu0 %v19738_v24  ;;  %v19769_v46 = vld [vmem:[#allocation5 + $0x8] ss:$12 sps:$4 sm:$0xff]   ;;  %v19766_v47 = vld [vmem:[#allocation5 + $0xf0] ss:$12 sps:$4 sm:$0xff]  }
 0x22a   : > { %18766 = vmatmul.mubr.msk.bf16.vlgmr.msra.gmra.mrb[0].mxu1 %vm1205_vm11, %v1455_v33  ;;  %v19748_v33 = vld [vmem:[#allocation5 + $0xa8] ss:$12 sps:$4 sm:$0xff]  }
 0x22b   : > { %18770 = vmatpush3.bf16.msra.mxu1 %v1543_v49  ;;  %18771 = vmatprep.mubr.msk.bf16.mxu1 %vm1205_vm11, %v1528_v26  ;;  %v19741_v26 = vld [vmem:[#allocation5 + $0x1c] ss:$12 sps:$4 sm:$0xff]  }
 0x22c   : > { %19614 = vmatprep.subr.msk.bf16.mxu1 %vm956_vm8, %v19734_v48  ;;  %v19772_v48 = vld [vmem:[#allocation5 + $0x10c] ss:$12 sps:$4 sm:$0xff]   ;;  %v19770_v49 = vld [vmem:[#allocation5 + $0x108] ss:$12 sps:$4 sm:$0xff]  }
 0x236   : > { %18772 = vmatmul.mubr.msk.bf16.vlgmr.msra.gmra.mrb[0].mxu1 %vm1205_vm11, %v1530_v28  ;;  %v19744_v28 = vld [vmem:[#allocation5 + $0x94] ss:$12 sps:$4 sm:$0xff]  }
 0x237   : > { %18776 = vmatpush3.bf16.msra.mxu1 %v1624_v51  ;;  %18777 = vmatprep.mubr.msk.bf16.mxu1 %vm1205_vm11, %v1607_v42  ;;  %v19760_v42 = vld [vmem:[#allocation5 + $0xd8] ss:$12 sps:$4 sm:$0xff]   ;;  %v1885_v51 = vld [vmem:[#allocation2 + $0x8] sm:$0xff] }
 0x238   : > { %19615 = vmatprep.subr.msk.bf16.mxu1 %vm956_vm8, %v19735_v50  ;;  %v19776_v50 = vld [vmem:[#allocation5 + $0x124] ss:$12 sps:$4 sm:$0xff]  }
 0x242   : > { %18778 = vmatmul.mubr.msk.bf16.vlgmr.msra.gmra.mrb[0].mxu1 %vm1205_vm11, %v1611_v45  ;;  %v22039_v45 = vmov 0  }
 0x243   : > { %18782 = vmatpush3.bf16.msra.mxu1 %v1699_v52  ;;  %18783 = vmatprep.mubr.msk.bf16.mxu1 %vm1205_vm11, %v1684_v43  ;;  %v19763_v43 = vld [vmem:[#allocation5 + $0x78] ss:$12 sps:$4 sm:$0xff]  }
 0x244   : > { %2335 = vmatprep.subr.bf16.mxu1 %v19744_v28  ;;  %v1884_v52 = vld [vmem:[#allocation2] sm:$0xff] }
 0x24e   : > { %18784 = vmatmul.mubr.msk.bf16.vlgmr.msra.gmra.mrb[0].mxu1 %vm1205_vm11, %v1686_v44  ;;  %v19768_v44 = vld [vmem:[#allocation5 + $0xf4] ss:$12 sps:$4 sm:$0xff]  }
 0x24f   : > { %2336 = vmatpush1.bf16.msra.mxu1 %v19742_v29  ;;  %2367 = vmatprep.mubr.bf16.mxu1 %v22039_v45  ;;  %v19773_v29 = vld [vmem:[#allocation5 + $0x20] ss:$12 sps:$4 sm:$0xff]  }
 0x250   : > { %2337 = vmatprep.subr.bf16.mxu1 %v19750_v32 }
 0x253   : > { %2338 = vmatpush1.bf16.msra.mxu1 %v19748_v33 }
 0x254   : > { %2339 = vmatprep.subr.bf16.mxu1 %v19756_v37 }
 0x257   : > { %2340 = vmatpush1.bf16.msra.mxu1 %v19754_v36 }
 0x258   : > { %2341 = vmatprep.subr.bf16.mxu1 %v19762_v40 }
 0x25b   : > { %2342 = vmatpush1.bf16.msra.mxu1 %v19760_v42 }
 0x25c   : > { %2343 = vmatprep.subr.bf16.mxu1 %v19768_v44 }
 0x25f   : > { %2344 = vmatpush1.bf16.msra.mxu1 %v19766_v47 }
 0x260   : > { %2345 = vmatprep.subr.bf16.mxu1 %v19772_v48  ;;  %v19780_v48 = vld [vmem:[#allocation5 + $0x13c] ss:$12 sps:$4 sm:$0xff]  }
 0x263   : > { %2346 = vmatpush1.bf16.msra.mxu1 %v19770_v49  ;;  %v19781_v49 = vld [vmem:[#allocation5 + $0x50] ss:$12 sps:$4 sm:$0xff]  }
 0x264   : > { %2583 = vmatprep.subr.bf16.mxu1 %v19776_v50 }
 0x321   : > { %v18785_v55 = vpop.f32.mrb[0].mxu1 }
 0x322   : > { %v19129_v56 = vadd.f32 %v18785_v55, %v16198_v54  ;;  %v1735_v57 = vpop.f32.mrb[1].mxu1 }
 0x323   : > { %v19130_v58 = vadd.f32 %v16198_v54, %v1735_v57  ;;  %v18786_v59 = vpop.f32.mrb[2].mxu1 }
 0x324   : > { %v16231_v60 = vmul.f32 -1.442695, %v19129_v56  ;;  %v19131_v61 = vadd.f32 %v18786_v59, %v16198_v54  ;;  %v1738_v62 = vpop.f32.mrb[3].mxu1  ;;  %v1886_v59 = vld [vmem:[#allocation2 + $0x10] sm:$0xff] }
 0x325   : > { %v16229_v63 = vmul.f32 -1.442695, %v19130_v58  ;;  %v19132_v0 = vadd.f32 %v16198_v54, %v1738_v62  ;;  %v1887_v58 = vld [vmem:[#allocation2 + $0x18] sm:$0xff] }
 0x326   : > { %21710 = vpow2.f32 %v16231_v60  ;;  %v16232_v1 = vmul.f32 -1.442695, %v19131_v61 }
 0x327   : > { %21712 = vpow2.f32 %v16229_v63  ;;  %v16230_v3 = vmul.f32 -1.442695, %v19132_v0 }
 0x328   : > { %21714 = vpow2.f32 %v16232_v1 }
 0x329   : > { %21716 = vpow2.f32 %v16230_v3 }
 0x330   : > { %v21711_v4 = vpop.eup %21710 }
 0x331   : > { %v21713_v5 = vpop.eup %21712  ;;  %v1768_v6 = vadd.f32 1.0, %v21711_v4 }
 0x332   : > { %v21715_v7 = vpop.eup %21714  ;;  %v1766_v8 = vadd.f32 1.0, %v21713_v5 }
 0x333   : > { %v21717_v9 = vpop.eup %21716  ;;  %v1769_v10 = vadd.f32 1.0, %v21715_v7 }
 0x334   : > { %21718 = vrcp.f32 %v1766_v8  ;;  %v1767_v11 = vadd.f32 1.0, %v21717_v9 }
 0x335   : > { %21720 = vrcp.f32 %v1768_v6 }
 0x336   : > { %21722 = vrcp.f32 %v1767_v11 }
 0x337   : > { %21724 = vrcp.f32 %v1769_v10 }
 0x33e   : > { %v21719_v12 = vpop.eup %21718 }
 0x33f   : > { %v21721_v13 = vpop.eup %21720  ;;  %v1778_v15 = vmul.f32 %v21742_v14, %v21719_v12 }
 0x340   : > { %v21723_v16 = vpop.eup %21722  ;;  %v1780_v22 = vmul.f32 %v21744_v21, %v21721_v13 }
 0x341   : > { %18789 = vmatprep.mubr.msk.f32.mxu0 %vm648_vm3, %v1778_v15  ;;  %v1779_v18 = vmul.f32 %v21743_v17, %v21723_v16  ;;  %v21725_v19 = vpop.eup %21724 }
 0x342   : > { %v1781_v23 = vmul.f32 %v21745_v2, %v21725_v19 }
 0x343   : > { %18790 = vmatmul.mubr.msk.f32.vlgmr.msra.gmra.mrb[4].mxu0 %vm648_vm3, %v1779_v18 }
 0x344   : > { %18792 = vmatprep.mubr.msk.f32.mxu0 %vm648_vm3, %v1780_v22  ;;  %2061 = vmatpush1.bf16.msra.mxu0 %v19736_v25 }
 0x345   : > { %2062 = vmatprep.subr.bf16.mxu0 %v19741_v26 }
 0x347   : > { %18793 = vmatmul.mubr.msk.f32.gmra.mrb[6].mxu0 %vm648_vm3, %v1781_v23 }
 0x348   : > { %2063 = vmatpush1.bf16.msra.mxu0 %v19739_v27  ;;  %2092 = vmatprep.mubr.bf16.mxu0 %v22039_v45 }
 0x349   : > { %2064 = vmatprep.subr.bf16.mxu0 %v19747_v30 }
 0x34c   : > { %2065 = vmatpush1.bf16.msra.mxu0 %v19745_v31 }
 0x34d   : > { %2066 = vmatprep.subr.bf16.mxu0 %v19753_v34 }
 0x350   : > { %2067 = vmatpush1.bf16.msra.mxu0 %v19751_v35  ;;  %v19777_v35 = vld [vmem:[#allocation5 + $0x38] ss:$12 sps:$4 sm:$0xff]  }
 0x351   : > { %2068 = vmatprep.subr.bf16.mxu0 %v19759_v39 }
 0x354   : > { %2069 = vmatpush1.bf16.msra.mxu0 %v19757_v38  ;;  %v19774_v38 = vld [vmem:[#allocation5 + $0x120] ss:$12 sps:$4 sm:$0xff]  }
 0x355   : > { %2070 = vmatprep.subr.bf16.mxu0 %v19765_v41 }
 0x358   : > { %2071 = vmatpush1.bf16.msra.mxu0 %v19763_v43 }
 0x359   : > { %18795 = vmatprep.subr.bf16.mxu0 %v19769_v46 }
 0x416   : > { %v18791_v53 = vpop.f32.mrb[4].mxu0 }
 0x417   : > { %v1889_v54 = vmul.f32 %v18791_v53, %v1885_v51  ;;  %v1865_v55 = vpop.f32.mrb[5].mxu0 }
 0x418   : > { %v1888_v56 = vmul.f32 %v1884_v52, %v1865_v55 }
 0x419   : > { %v1894_v57 = vsel %vm1892_vm13, %v1889_v54, 0.0  ;;  %v19778_v54 = vld [vmem:[#allocation5 + $0x138] ss:$12 sps:$4 sm:$0xff]  }
 0x41a   : > { %v1893_v60 = vsel %vm1892_vm13, %v1888_v56, 0.0  ;;  %v18794_v61 = vpop.f32.mrb[6].mxu0 }
 0x41b   : > { %v1895_v62 = vadd.f32 %v1894_v57, %v1893_v60  ;;  %v1875_v63 = vpop.f32.mrb[7].mxu0  ;;  %v1891_v0 = vmul.f32 %v18794_v61, %v1887_v58  ;;  %v19784_v58 = vld [vmem:[#allocation5 + $0x154] ss:$12 sps:$4 sm:$0xff]  }
 0x41c   : > { %v1890_v1 = vmul.f32 %v1886_v59, %v1875_v63 }
 0x41d   : > { %v1898_v5 = vsel %vm1892_vm13, %v1891_v0, 0.0 }
 0x41e   : > { %v1896_v3 = vsel %vm1892_vm13, %v1890_v1, 0.0 }
 0x41f   : > { %v1897_v4 = vadd.f32 %v1896_v3, %v1895_v62 }
 0x421   : > { %v1899_v6 = vadd.f32 %v1898_v5, %v1897_v4 }
 0x423   : > { %v1900_v7 = vrot.slane %v1899_v6, 4 }
 0x425   : > { %v1901_v8 = vadd.f32 %v1900_v7, %v1899_v6  ;;  %v19782_v6 = vld [vmem:[#allocation5 + $0x150] ss:$12 sps:$4 sm:$0xff]  }
 0x427   : > { %v1902_v9 = vrot.slane %v1901_v8, 2 }
 0x429   : > { %v1903_v10 = vadd.f32 %v1902_v9, %v1901_v8 }
 0x42b   : > { %v1904_v11 = vrot.slane %v1903_v10, 1 }
 0x42d   : > { %v1905_v12 = vadd.f32 %v1904_v11, %v1903_v10  ;;  %v19788_v11 = vld [vmem:[#allocation5 + $0x16c] ss:$12 sps:$4 sm:$0xff]  }
 0x42f   : > { %v22539_v13 = vmul.f32 %v1905_v12, %v1865_v55  ;;  %v22541_v14 = vmul.f32 %v18791_v53, %v1905_v12  ;;  %v22543_v15 = vmul.f32 %v1905_v12, %v1875_v63  ;;  %v22545_v16 = vmul.f32 %v18794_v61, %v1905_v12  ;;  %v19785_v63 = vld [vmem:[#allocation5 + $0x68] ss:$12 sps:$4 sm:$0xff]  }
 0x431   : > { %v1911_v17 = vpack.c.bf16 %v22541_v14, %v22539_v13  ;;  %v1912_v18 = vpack.c.bf16 %v22545_v16, %v22543_v15 }
 0x433   : > { %v1914_v19 = vshrl.u32 %v1911_v17, 16  ;;  %v1917_v21 = vshll.u32 %v1911_v17, 16  ;;  %v1922_v22 = vshrl.u32 %v1912_v18, 16  ;;  %v1925_v2 = vshll.u32 %v1912_v18, 16  ;;  %v19789_v18 = vld [vmem:[#allocation5 + $0x80] ss:$12 sps:$4 sm:$0xff]  }
 0x435   : > { %v1916_v23 = vrot.slane %v1914_v19, 6  ;;  %v1919_v24 = vrot.slane %v1917_v21, 7  ;;  %v1924_v25 = vrot.slane %v1922_v22, 6  ;;  %v1927_v26 = vrot.slane %v1925_v2, 7  ;;  %v19786_v19 = vld [vmem:[#allocation5 + $0x168] ss:$12 sps:$4 sm:$0xff]  }
 0x436   : > { %v19792_v21 = vld [vmem:[#allocation5 + $0x184] ss:$12 sps:$4 sm:$0xff]   ;;  %v19790_v2 = vld [vmem:[#allocation5 + $0x180] ss:$12 sps:$4 sm:$0xff]  }
 0x437   : > { %v1920_v27 = vor.u32 %v1919_v24, %v1916_v23  ;;  %v1928_v28 = vor.u32 %v1927_v26, %v1924_v25  ;;  %v19793_v22 = vld [vmem:[#allocation5 + $0x98] ss:$12 sps:$4 sm:$0xff]   ;;  %v19796_v23 = vld [vmem:[#allocation5 + $0x19c] ss:$12 sps:$4 sm:$0xff]   ;;  %v19800_v26 = vld [vmem:[#allocation5 + $0x1b4] ss:$12 sps:$4 sm:$0xff]  }
 0x438   : > { %v19797_v24 = vld [vmem:[#allocation5 + $0xb0] ss:$12 sps:$4 sm:$0xff]   ;;  %v19794_v25 = vld [vmem:[#allocation5 + $0x198] ss:$12 sps:$4 sm:$0xff]  }
 0x439   : > { %v22552_v30 = vsel %vm623_vm2, %v1920_v27, %v1928_v28  ;;  %v22556_v31 = vsel %vm22361_vm4, 0, %v1920_v27  ;;  %v22569_v34 = vsel %vm22361_vm4, %v1928_v28, 0 }
 0x43a   : > { %16256 = vmatmul.mubr.msk.bf16.vlgmr.msra.gmra.mrb[8].mxu0 %vm1892_vm13, %v22556_v31  ;;  %v22561_v32 = vshll.u32 %v22556_v31, 16  ;;  %v22564_v33 = vshll.u32 %v22552_v30, 16  ;;  %v22572_v36 = vshrl.u32 %v22556_v31, 16  ;;  %v22578_v41 = vshrl.u32 %v22552_v30, 16 }
 0x43b   : > { %18796 = vmatpush3.bf16.msra.mxu0 %v19769_v46  ;;  %2102 = vmatprep.mubr.bf16.mxu0 %v22039_v45  ;;  %v22581_v42 = vshll.u32 %v22569_v34, 16  ;;  %v2729_v43 = vshrl.u32 %v22569_v34, 16  ;;  %v2976_v44 = vrot.slane %v22556_v31, 2  ;;  %v2977_v46 = vrot.slane %v22552_v30, 2 }
 0x43c   : > { %18797 = vmatprep.subr.bf16.mxu0 %v19773_v29  ;;  %v2219_v37 = vrot.slane %v22561_v32, 1  ;;  %v2223_v40 = vrot.slane %v22564_v33, 1  ;;  %v2979_v50 = vrot.slane %v22569_v34, 2  ;;  %v3222_v52 = vrot.slane %v22572_v36, 2 }
 0x43d   : > { %v22593_v51 = vsel %vm956_vm8, %v2976_v44, %v2977_v46  ;;  %v3223_v53 = vrot.slane %v22561_v32, 3  ;;  %v3225_v56 = vrot.slane %v22578_v41, 2  ;;  %v3226_v57 = vrot.slane %v22564_v33, 3  ;;  %v19809_v44 = vld [vmem:[#allocation5 + $0xf8] ss:$12 sps:$4 sm:$0xff]  }
 0x43e   : > { %v2220_v39 = vor.u32 %v2219_v37, %v22572_v36  ;;  %v22600_v55 = vsel %vm956_vm8, %v2977_v46, %v2979_v50  ;;  %v2227_v59 = vor.u32 %v22578_v41, %v2223_v40  ;;  %v3229_v61 = vrot.slane %v2729_v43, 2  ;;  %v19804_v37 = vld [vmem:[#allocation5 + $0x1cc] ss:$12 sps:$4 sm:$0xff]  }
 0x43f   : > { %18798 = vmatpush3.bf16.msra.mxu0 %v19773_v29  ;;  %v3224_v60 = vor.u32 %v3223_v53, %v3222_v52  ;;  %v3230_v62 = vrot.slane %v22581_v42, 3  ;;  %v3227_v0 = vor.u32 %v3226_v57, %v3225_v56  ;;  %v3474_v1 = vrot.slane %v22556_v31, 3  ;;  %v19801_v29 = vld [vmem:[#allocation5 + $0xc8] ss:$12 sps:$4 sm:$0xff]   ;;  %v19806_v46 = vld [vmem:[#allocation5 + $0x1e0] ss:$12 sps:$4 sm:$0xff]  }
 0x440   : > { %18799 = vmatprep.subr.bf16.mxu0 %v19777_v35  ;;  %v22587_v47 = vsel %vm723_vm5, %v2220_v39, %v2223_v40  ;;  %v3475_v3 = vrot.slane %v22552_v30, 3  ;;  %v3477_v4 = vrot.slane %v22569_v34, 3  ;;  %v2231_v7 = vrot.slane %v22581_v42, 1  ;;  %v19805_v39 = vld [vmem:[#allocation5 + $0xe0] ss:$12 sps:$4 sm:$0xff]  }
 0x441   : > { %16278 = vmatmul.mubr.msk.bf16.vlgmr.msra.gmra.mrb[4].mxu1 %vm1892_vm13, %v22587_v47  ;;  %v3231_v5 = vor.u32 %v3230_v62, %v3229_v61  ;;  %v22616_v8 = vsel %vm1026_vm9, %v3224_v60, %v3227_v0  ;;  %v2476_v27 = vrot.slane %v22556_v31, 1  ;;  %v2477_v28 = vrot.slane %v22552_v30, 1  ;;  %v19802_v40 = vld [vmem:[#allocation5 + $0x1c8] ss:$12 sps:$4 sm:$0xff]   ;;  %v19810_v50 = vld [vmem:[#allocation5 + $0x1f8] ss:$12 sps:$4 sm:$0xff]  }
 0x442   : > { %2584 = vmatpush1.bf16.msra.mxu1 %v19774_v38  ;;  %16257 = vmatmul.mubr.msk.bf16.gmra.mrb[12].mxu0 %vm1892_vm13, %v22552_v30  ;;  %v22619_v9 = vsel %vm1102_vm10, %v3474_v1, %v3475_v3  ;;  %v22622_v10 = vsel %vm1102_vm10, %v3475_v3, %v3477_v4  ;;  %v22628_v17 = vsel %vm723_vm5, %v2227_v59, %v2231_v7  ;;  %v19816_v52 = vld [vmem:[#allocation5 + $0x214] ss:$12 sps:$4 sm:$0xff]   ;;  %v19820_v56 = vld [vmem:[#allocation5 + $0x22c] ss:$12 sps:$4 sm:$0xff]   ;;  %v2723_v59 = vrot.slane %v22561_v32, 2 }
 0x443   : > { %18800 = vmatpush3.bf16.msra.mxu0 %v19777_v35  ;;  %18807 = vmatprep.mubr.msk.bf16.mxu0 %vm1892_vm13, %v22556_v31  ;;  %v22625_v12 = vsel %vm1026_vm9, %v3227_v0, %v3231_v5  ;;  %v19798_v35 = vld [vmem:[#allocation5 + $0x1b0] ss:$12 sps:$4 sm:$0xff]   ;;  %v2478_v38 = vsel %vm808_vm6, %v2476_v27, %v2477_v28  ;;  %v19817_v53 = vld [vmem:[#allocation5 + $0x128] ss:$12 sps:$4 sm:$0xff]   ;;  %v19821_v57 = vld [vmem:[#allocation5 + $0x140] ss:$12 sps:$4 sm:$0xff]  }
 0x444   : > { %2585 = vmatprep.subr.bf16.mxu1 %v19780_v48  ;;  %18801 = vmatprep.subr.bf16.mxu0 %v19781_v49  ;;  %v19808_v31 = vld [vmem:[#allocation5 + $0x1e4] ss:$12 sps:$4 sm:$0xff]   ;;  %v2725_v60 = vrot.slane %v22578_v41, 1  ;;  %v2726_v61 = vrot.slane %v22564_v33, 2  ;;  %v19818_v62 = vld [vmem:[#allocation5 + $0x228] ss:$12 sps:$4 sm:$0xff]  }
 0x445   : > { %2377 = vmatprep.mubr.bf16.mxu1 %v22039_v45  ;;  %v19822_v32 = vld [vmem:[#allocation5 + $0x240] ss:$12 sps:$4 sm:$0xff]   ;;  %v19828_v41 = vld [vmem:[#allocation5 + $0x25c] ss:$12 sps:$4 sm:$0xff]   ;;  %v2731_v4 = vrot.slane %v2729_v43, 1  ;;  %v2732_v5 = vrot.slane %v22581_v42, 2 }
 0x446   : > { %2586 = vmatpush1.bf16.msra.mxu1 %v19778_v54  ;;  %v19814_v54 = vld [vmem:[#allocation5 + $0x210] ss:$12 sps:$4 sm:$0xff]   ;;  %v2727_v1 = vor.u32 %v2726_v61, %v2725_v60  ;;  %v19832_v7 = vld [vmem:[#allocation5 + $0x274] ss:$12 sps:$4 sm:$0xff]  }
 0x447   : > { %18802 = vmatpush3.bf16.msra.mxu0 %v19781_v49  ;;  %2587 = vmatprep.subr.bf16.mxu1 %v19784_v58  ;;  %v19813_v49 = vld [vmem:[#allocation5 + $0x110] ss:$12 sps:$4 sm:$0xff]   ;;  %v2722_v58 = vrot.slane %v22572_v36, 1  ;;  %v19825_v36 = vld [vmem:[#allocation5 + $0x158] ss:$12 sps:$4 sm:$0xff]  }
 0x448   : > { %18803 = vmatprep.subr.bf16.mxu0 %v19785_v63  ;;  %v19829_v3 = vld [vmem:[#allocation5 + $0x170] ss:$12 sps:$4 sm:$0xff]   ;;  %v19837_v42 = vld [vmem:[#allocation5 + $0x1a0] ss:$12 sps:$4 sm:$0xff]   ;;  %v19849_v27 = vld [vmem:[#allocation5 + $0x1e8] ss:$12 sps:$4 sm:$0xff]  }
 0x449   : > { %16279 = vmatmul.mubr.msk.bf16.gmra.mrb[8].mxu1 %vm1892_vm13, %v22628_v17  ;;  %v2724_v0 = vor.u32 %v2723_v59, %v2722_v58  ;;  %v19877_v58 = vld [vmem:[#allocation5 + $0x290] ss:$12 sps:$4 sm:$0xff]   ;;  %v19874_v59 = vld [vmem:[#allocation5 + $0x378] ss:$12 sps:$4 sm:$0xff]   ;;  %v19881_v60 = vld [vmem:[#allocation5 + $0x2a8] ss:$12 sps:$4 sm:$0xff]  }
 0x44a   : > { %2588 = vmatpush1.bf16.msra.mxu1 %v19782_v6  ;;  %2615 = vmatprep.mubr.bf16.mxu1 %v22039_v45  ;;  %v19826_v6 = vld [vmem:[#allocation5 + $0x258] ss:$12 sps:$4 sm:$0xff]   ;;  %v19878_v61 = vld [vmem:[#allocation5 + $0x390] ss:$12 sps:$4 sm:$0xff]  }
 0x44b   : > { %18804 = vmatpush3.bf16.msra.mxu0 %v19785_v63  ;;  %2589 = vmatprep.subr.bf16.mxu1 %v19788_v11  ;;  %v19824_v63 = vld [vmem:[#allocation5 + $0x244] ss:$12 sps:$4 sm:$0xff]   ;;  %v2728_v33 = vsel %vm878_vm7, %v2724_v0, %v2727_v1  ;;  %v2733_v11 = vor.u32 %v2732_v5, %v2731_v4  ;;  %v19882_v0 = vld [vmem:[#allocation5 + $0x3a8] ss:$12 sps:$4 sm:$0xff]  }
 0x44c   : > { %18805 = vmatprep.subr.bf16.mxu0 %v19789_v18  ;;  %v19904_v4 = vld [vmem:[%s25672_s6 + $0x40] sm:$0xff]   ;;  %v19894_v5 = vld [vmem:[#allocation5 + $0x308] ss:$12 sps:$4 sm:$0xff]  }
 0x44d   : > { %v22663_v43 = vsel %vm878_vm7, %v2727_v1, %v2733_v11  ;;  %v19888_v1 = vld [vmem:[#allocation5 + $0x3c4] ss:$12 sps:$4 sm:$0xff]  }
 0x44e   : > { %2590 = vmatpush1.bf16.msra.mxu1 %v19786_v19  ;;  %v19834_v19 = vld [vmem:[#allocation5 + $0x288] ss:$12 sps:$4 sm:$0xff]  }
 0x44f   : > { %18806 = vmatpush3.bf16.msra.mxu0 %v19789_v18  ;;  %2591 = vmatprep.subr.bf16.mxu1 %v19792_v21  ;;  %v19830_v18 = vld [vmem:[#allocation5 + $0x270] ss:$12 sps:$4 sm:$0xff]  }
 0x450   : > { %18811 = vmatprep.subr.bf16.mxu0 %v19793_v22  ;;  %v19840_v21 = vld [vmem:[#allocation5 + $0x2a4] ss:$12 sps:$4 sm:$0xff]  }
 0x451   : > { %v19908_v11 = vld [vmem:[%s25672_s6 + $0x50] sm:$0xff]  }
 0x452   : > { %18808 = vmatmul.mubr.msk.bf16.vlgmr.msra.gmra.mrb[16].mxu0 %vm1892_vm13, %v22552_v30  ;;  %2592 = vmatpush1.bf16.msra.mxu1 %v19790_v2  ;;  %v2479_v30 = vrot.slane %v22569_v34, 1  ;;  %v19836_v34 = vld [vmem:[#allocation5 + $0x28c] ss:$12 sps:$4 sm:$0xff]  }
 0x453   : > { %18812 = vmatpush3.bf16.msra.mxu0 %v19793_v22  ;;  %18823 = vmatprep.mubr.msk.bf16.mxu0 %vm1892_vm13, %v22587_v47  ;;  %v19812_v47 = vld [vmem:[#allocation5 + $0x1fc] ss:$12 sps:$4 sm:$0xff]   ;;  %v19841_v22 = vld [vmem:[#allocation5 + $0x1b8] ss:$12 sps:$4 sm:$0xff]   ;;  %v19838_v2 = vld [vmem:[#allocation5 + $0x2a0] ss:$12 sps:$4 sm:$0xff]  }
 0x454   : > { %2593 = vmatprep.subr.bf16.mxu1 %v19796_v23  ;;  %18813 = vmatprep.subr.bf16.mxu0 %v19797_v24  ;;  %v22644_v48 = vsel %vm808_vm6, %v2477_v28, %v2479_v30  ;;  %v19844_v23 = vld [vmem:[#allocation5 + $0x2bc] ss:$12 sps:$4 sm:$0xff]  }
 0x455   : > { %v19846_v28 = vld [vmem:[#allocation5 + $0x2d0] ss:$12 sps:$4 sm:$0xff]  }
 0x456   : > { %2594 = vmatpush1.bf16.msra.mxu1 %v19794_v25  ;;  %v19842_v25 = vld [vmem:[#allocation5 + $0x2b8] ss:$12 sps:$4 sm:$0xff]   ;;  %v19861_v30 = vld [vmem:[#allocation5 + $0x230] ss:$12 sps:$4 sm:$0xff]  }
 0x457   : > { %18814 = vmatpush3.bf16.msra.mxu0 %v19797_v24  ;;  %2837 = vmatprep.subr.bf16.mxu1 %v19800_v26  ;;  %v19845_v24 = vld [vmem:[#allocation5 + $0x1d0] ss:$12 sps:$4 sm:$0xff]   ;;  %v19848_v26 = vld [vmem:[#allocation5 + $0x2d4] ss:$12 sps:$4 sm:$0xff]  }
 0x458   : > { %18815 = vmatprep.subr.bf16.mxu0 %v19801_v29 }
 0x459   : > { %16300 = vmatmul.mubr.msk.bf16.vlgmr.msra.gmra.mrb[4].mxu1 %vm1892_vm13, %v2478_v38 }
 0x45a   : > { %2838 = vmatpush1.bf16.msra.mxu1 %v19798_v35  ;;  %2625 = vmatprep.mubr.bf16.mxu1 %v22039_v45  ;;  %v19853_v35 = vld [vmem:[#allocation5 + $0x200] ss:$12 sps:$4 sm:$0xff]  }
 0x45b   : > { %18816 = vmatpush3.bf16.msra.mxu0 %v19801_v29  ;;  %2839 = vmatprep.subr.bf16.mxu1 %v19804_v37  ;;  %v19852_v29 = vld [vmem:[#allocation5 + $0x2ec] ss:$12 sps:$4 sm:$0xff]   ;;  %v19850_v37 = vld [vmem:[#allocation5 + $0x2e8] ss:$12 sps:$4 sm:$0xff]  }
 0x45c   : > { %18817 = vmatprep.subr.bf16.mxu0 %v19805_v39 }
 0x45e   : > { %2840 = vmatpush1.bf16.msra.mxu1 %v19802_v40  ;;  %v19854_v40 = vld [vmem:[#allocation5 + $0x300] ss:$12 sps:$4 sm:$0xff]  }
 0x45f   : > { %18818 = vmatpush3.bf16.msra.mxu0 %v19805_v39  ;;  %2841 = vmatprep.subr.bf16.mxu1 %v19808_v31  ;;  %v19857_v39 = vld [vmem:[#allocation5 + $0x218] ss:$12 sps:$4 sm:$0xff]   ;;  %v19860_v31 = vld [vmem:[#allocation5 + $0x31c] ss:$12 sps:$4 sm:$0xff]  }
 0x460   : > { %18819 = vmatprep.subr.bf16.mxu0 %v19809_v44 }
 0x461   : > { %16301 = vmatmul.mubr.msk.bf16.gmra.mrb[8].mxu1 %vm1892_vm13, %v22644_v48 }
 0x462   : > { %2842 = vmatpush1.bf16.msra.mxu1 %v19806_v46  ;;  %2869 = vmatprep.mubr.bf16.mxu1 %v22039_v45  ;;  %v19864_v46 = vld [vmem:[#allocation5 + $0x334] ss:$12 sps:$4 sm:$0xff]  }
 0x463   : > { %18820 = vmatpush3.bf16.msra.mxu0 %v19809_v44  ;;  %2843 = vmatprep.subr.bf16.mxu1 %v19812_v47  ;;  %v19858_v44 = vld [vmem:[#allocation5 + $0x318] ss:$12 sps:$4 sm:$0xff]   ;;  %v19865_v47 = vld [vmem:[#allocation5 + $0x248] ss:$12 sps:$4 sm:$0xff]  }
 0x464   : > { %18821 = vmatprep.subr.bf16.mxu0 %v19813_v49 }
 0x466   : > { %2844 = vmatpush1.bf16.msra.mxu1 %v19810_v50  ;;  %v19869_v50 = vld [vmem:[#allocation5 + $0x260] ss:$12 sps:$4 sm:$0xff]  }
 0x467   : > { %18822 = vmatpush3.bf16.msra.mxu0 %v19813_v49  ;;  %2845 = vmatprep.subr.bf16.mxu1 %v19816_v52  ;;  %v19868_v49 = vld [vmem:[#allocation5 + $0x34c] ss:$12 sps:$4 sm:$0xff]   ;;  %v19866_v52 = vld [vmem:[#allocation5 + $0x348] ss:$12 sps:$4 sm:$0xff]  }
 0x468   : > { %18827 = vmatprep.subr.bf16.mxu0 %v19817_v53 }
 0x46a   : > { %18824 = vmatmul.mubr.msk.bf16.vlgmr.msra.gmra.mrb[16].mxu0 %vm1892_vm13, %v22628_v17  ;;  %2846 = vmatpush1.bf16.msra.mxu1 %v19814_v54  ;;  %v19833_v17 = vld [vmem:[#allocation5 + $0x188] ss:$12 sps:$4 sm:$0xff]   ;;  %v19873_v54 = vld [vmem:[#allocation5 + $0x278] ss:$12 sps:$4 sm:$0xff]  }
 0x46b   : > { %18828 = vmatpush3.bf16.msra.mxu0 %v19817_v53  ;;  %18839 = vmatprep.mubr.msk.bf16.mxu0 %vm1892_vm13, %v2478_v38  ;;  %v19856_v38 = vld [vmem:[#allocation5 + $0x304] ss:$12 sps:$4 sm:$0xff]  }
 0x46c   : > { %2847 = vmatprep.subr.bf16.mxu1 %v19820_v56  ;;  %18829 = vmatprep.subr.bf16.mxu0 %v19821_v57  ;;  %v19872_v53 = vld [vmem:[#allocation5 + $0x364] ss:$12 sps:$4 sm:$0xff]   ;;  %v19870_v56 = vld [vmem:[#allocation5 + $0x360] ss:$12 sps:$4 sm:$0xff]  }
 0x46e   : > { %2848 = vmatpush1.bf16.msra.mxu1 %v19818_v62  ;;  %v19884_v62 = vld [vmem:[#allocation5 + $0x3ac] ss:$12 sps:$4 sm:$0xff]  }
 0x46f   : > { %18830 = vmatpush3.bf16.msra.mxu0 %v19821_v57  ;;  %3083 = vmatprep.subr.bf16.mxu1 %v19824_v63  ;;  %v19876_v57 = vld [vmem:[#allocation5 + $0x37c] ss:$12 sps:$4 sm:$0xff]   ;;  %v19885_v63 = vld [vmem:[#allocation5 + $0x2c0] ss:$12 sps:$4 sm:$0xff]  }
 0x470   : > { %18831 = vmatprep.subr.bf16.mxu0 %v19825_v36 }
 0x471   : > { %16322 = vmatmul.mubr.msk.bf16.vlgmr.msra.gmra.mrb[4].mxu1 %vm1892_vm13, %v2728_v33 }
 0x472   : > { %3084 = vmatpush1.bf16.msra.mxu1 %v19822_v32  ;;  %2879 = vmatprep.mubr.bf16.mxu1 %v22039_v45  ;;  %v19886_v32 = vld [vmem:[#allocation5 + $0x3c0] ss:$12 sps:$4 sm:$0xff]  }
 0x473   : > { %18832 = vmatpush3.bf16.msra.mxu0 %v19825_v36  ;;  %3085 = vmatprep.subr.bf16.mxu1 %v19828_v41  ;;  %v19889_v36 = vld [vmem:[#allocation5 + $0x2d8] ss:$12 sps:$4 sm:$0xff]   ;;  %v19892_v41 = vld [vmem:[#allocation5 + $0x3dc] ss:$12 sps:$4 sm:$0xff]  }
 0x474   : > { %18833 = vmatprep.subr.bf16.mxu0 %v19829_v3 }
 0x476   : > { %3086 = vmatpush1.bf16.msra.mxu1 %v19826_v6  ;;  %v19905_v6 = vld [vmem:[%s25672_s6] sm:$0xff]  }
 0x477   : > { %18834 = vmatpush3.bf16.msra.mxu0 %v19829_v3  ;;  %3087 = vmatprep.subr.bf16.mxu1 %v19832_v7  ;;  %v19890_v3 = vld [vmem:[#allocation5 + $0x3d8] ss:$12 sps:$4 sm:$0xff]   ;;  %v19907_v7 = vld [vmem:[%s25672_s6 + $0x8] sm:$0xff]  }
 0x478   : > { %18835 = vmatprep.subr.bf16.mxu0 %v19833_v17 }
 0x479   : > { %16323 = vmatmul.mubr.msk.bf16.gmra.mrb[8].mxu1 %vm1892_vm13, %v22663_v43 }
 0x47a   : > { %3088 = vmatpush1.bf16.msra.mxu1 %v19830_v18  ;;  %3115 = vmatprep.mubr.bf16.mxu1 %v22039_v45  ;;  %v19909_v18 = vld [vmem:[%s25672_s6 + $0x10] sm:$0xff]  }
 0x47b   : > { %18836 = vmatpush3.bf16.msra.mxu0 %v19833_v17  ;;  %3089 = vmatprep.subr.bf16.mxu1 %v19836_v34  ;;  %v19896_v17 = vld [vmem:[#allocation5 + $0x338] ss:$12 sps:$4 sm:$0xff]  }
 0x47c   : > { %18837 = vmatprep.subr.bf16.mxu0 %v19837_v42  ;;  %v19910_v34 = vld [vmem:[%s25672_s6 + $0x58] sm:$0xff]  }
 0x47e   : > { %3090 = vmatpush1.bf16.msra.mxu1 %v19834_v19  ;;  %v19898_v19 = vld [vmem:[#allocation5 + $0x368] ss:$12 sps:$4 sm:$0xff]  }
 0x47f   : > { %18838 = vmatpush3.bf16.msra.mxu0 %v19837_v42  ;;  %3091 = vmatprep.subr.bf16.mxu1 %v19840_v21  ;;  %v19911_v42 = vld [vmem:[%s25672_s6 + $0x18] sm:$0xff]   ;;  %v19899_v21 = vld [vmem:[#allocation5 + $0x380] ss:$12 sps:$4 sm:$0xff]  }
 0x480   : > { %18843 = vmatprep.subr.bf16.mxu0 %v19841_v22 }
 0x482   : > { %18840 = vmatmul.mubr.msk.bf16.vlgmr.msra.gmra.mrb[16].mxu0 %vm1892_vm13, %v22644_v48  ;;  %3092 = vmatpush1.bf16.msra.mxu1 %v19838_v2  ;;  %v19862_v48 = vld [vmem:[#allocation5 + $0x330] ss:$12 sps:$4 sm:$0xff]  }
 0x483   : > { %18844 = vmatpush3.bf16.msra.mxu0 %v19841_v22  ;;  %18855 = vmatprep.mubr.msk.bf16.mxu0 %vm1892_vm13, %v2728_v33  ;;  %v19893_v33 = vld [vmem:[#allocation5 + $0x2f0] ss:$12 sps:$4 sm:$0xff]   ;;  %v19900_v22 = vld [vmem:[#allocation5 + $0x398] ss:$12 sps:$4 sm:$0xff]  }
 0x484   : > { %3093 = vmatprep.subr.bf16.mxu1 %v19844_v23  ;;  %18845 = vmatprep.subr.bf16.mxu0 %v19845_v24  ;;  %v19901_v2 = vld [vmem:[#allocation5 + $0x3b0] ss:$12 sps:$4 sm:$0xff]   ;;  %v19902_v23 = vld [vmem:[#allocation5 + $0x3c8] ss:$12 sps:$4 sm:$0xff]  }
 0x486   : > { %3094 = vmatpush1.bf16.msra.mxu1 %v19842_v25 }
 0x487   : > { %18846 = vmatpush3.bf16.msra.mxu0 %v19845_v24  ;;  %3335 = vmatprep.subr.bf16.mxu1 %v19848_v26  ;;  %v19903_v24 = vld [vmem:[#allocation5 + $0x3e0] ss:$12 sps:$4 sm:$0xff]  }
 0x488   : > { %18847 = vmatprep.subr.bf16.mxu0 %v19849_v27 }
 0x489   : > { %16344 = vmatmul.mubr.msk.bf16.vlgmr.msra.gmra.mrb[4].mxu1 %vm1892_vm13, %v22593_v51 }
 0x48a   : > { %3336 = vmatpush1.bf16.msra.mxu1 %v19846_v28  ;;  %3125 = vmatprep.mubr.bf16.mxu1 %v22039_v45 }
 0x48b   : > { %18848 = vmatpush3.bf16.msra.mxu0 %v19849_v27  ;;  %3337 = vmatprep.subr.bf16.mxu1 %v19852_v29  ;;  %v19912_v27 = vld [vmem:[%s25672_s6 + $0x60] sm:$0xff]  }
 0x48c   : > { %18849 = vmatprep.subr.bf16.mxu0 %v19853_v35 }
 0x48e   : > { %3338 = vmatpush1.bf16.msra.mxu1 %v19850_v37 }
 0x48f   : > { %18850 = vmatpush3.bf16.msra.mxu0 %v19853_v35  ;;  %3339 = vmatprep.subr.bf16.mxu1 %v19856_v38  ;;  %v19913_v35 = vld [vmem:[%s25672_s6 + $0x20] sm:$0xff]   ;;  %v19914_v38 = vld [vmem:[%s25672_s6 + $0x68] sm:$0xff]  }
 0x490   : > { %18851 = vmatprep.subr.bf16.mxu0 %v19857_v39 }
 0x491   : > { %16345 = vmatmul.mubr.msk.bf16.gmra.mrb[8].mxu1 %vm1892_vm13, %v22600_v55 }
 0x492   : > { %3340 = vmatpush1.bf16.msra.mxu1 %v19854_v40  ;;  %3367 = vmatprep.mubr.bf16.mxu1 %v22039_v45  ;;  %v19916_v40 = vld [vmem:[%s25672_s6 + $0x70] sm:$0xff]  }
 0x493   : > { %18852 = vmatpush3.bf16.msra.mxu0 %v19857_v39  ;;  %3341 = vmatprep.subr.bf16.mxu1 %v19860_v31  ;;  %v19915_v39 = vld [vmem:[%s25672_s6 + $0x28] sm:$0xff]   ;;  %v19917_v31 = vld [vmem:[%s25672_s6 + $0x30] sm:$0xff]  }
 0x494   : > { %18853 = vmatprep.subr.bf16.mxu0 %v19861_v30 }
 0x496   : > { %3342 = vmatpush1.bf16.msra.mxu1 %v19858_v44  ;;  %v19919_v44 = vld [vmem:[%s25672_s6 + $0x38] sm:$0xff]  }
 0x497   : > { %18854 = vmatpush3.bf16.msra.mxu0 %v19861_v30  ;;  %3343 = vmatprep.subr.bf16.mxu1 %v19864_v46  ;;  %v19918_v30 = vld [vmem:[%s25672_s6 + $0x78] sm:$0xff]   ;;  %v19920_v46 = vld [vmem:[%s25672_s6 + $0x100] sm:$0xff]  }
 0x498   : > { %18859 = vmatprep.subr.bf16.mxu0 %v19865_v47 }
 0x49a   : > { %18856 = vmatmul.mubr.msk.bf16.vlgmr.msra.gmra.mrb[16].mxu0 %vm1892_vm13, %v22663_v43  ;;  %3344 = vmatpush1.bf16.msra.mxu1 %v19862_v48  ;;  %v19897_v43 = vld [vmem:[#allocation5 + $0x350] ss:$12 sps:$4 sm:$0xff]   ;;  %v19928_v48 = vld [vmem:[%s25672_s6 + $0x88] sm:$0xff]  }
 0x49b   : > { %18860 = vmatpush3.bf16.msra.mxu0 %v19865_v47  ;;  %18871 = vmatprep.mubr.msk.bf16.mxu0 %vm1892_vm13, %v22593_v51  ;;  %v19880_v51 = vld [vmem:[#allocation5 + $0x394] ss:$12 sps:$4 sm:$0xff]  }
 0x49c   : > { %3345 = vmatprep.subr.bf16.mxu1 %v19868_v49  ;;  %18861 = vmatprep.subr.bf16.mxu0 %v19869_v50  ;;  %v19925_v47 = vld [vmem:[%s25672_s6 + $0x80] sm:$0xff]   ;;  %v19931_v49 = vld [vmem:[%s25672_s6 + $0x90] sm:$0xff]  }
 0x49e   : > { %3346 = vmatpush1.bf16.msra.mxu1 %v19866_v52  ;;  %v19937_v52 = vld [vmem:[%s25672_s6 + $0xa0] sm:$0xff]  }
 0x49f   : > { %18862 = vmatpush3.bf16.msra.mxu0 %v19869_v50  ;;  %3581 = vmatprep.subr.bf16.mxu1 %v19872_v53  ;;  %v19934_v50 = vld [vmem:[%s25672_s6 + $0x98] sm:$0xff]   ;;  %v19940_v53 = vld [vmem:[%s25672_s6 + $0xa8] sm:$0xff]  }
 0x4a0   : > { %18863 = vmatprep.subr.bf16.mxu0 %v19873_v54 }
 0x4a1   : > { %16366 = vmatmul.mubr.msk.bf16.vlgmr.msra.gmra.mrb[4].mxu1 %vm1892_vm13, %v22616_v8 }
 0x4a2   : > { %3582 = vmatpush1.bf16.msra.mxu1 %v19870_v56  ;;  %3377 = vmatprep.mubr.bf16.mxu1 %v22039_v45  ;;  %v19946_v56 = vld [vmem:[%s25672_s6 + $0xb8] sm:$0xff]  }
 0x4a3   : > { %18864 = vmatpush3.bf16.msra.mxu0 %v19873_v54  ;;  %3583 = vmatprep.subr.bf16.mxu1 %v19876_v57  ;;  %v19943_v54 = vld [vmem:[%s25672_s6 + $0xb0] sm:$0xff]   ;;  %v22788_v57 = vld [vmem:[%s25672_s6 + $0x140] sm:$0xff]  }
 0x4a4   : > { %18865 = vmatprep.subr.bf16.mxu0 %v19877_v58 }
 0x4a6   : > { %3584 = vmatpush1.bf16.msra.mxu1 %v19874_v59 }
 0x4a7   : > { %18866 = vmatpush3.bf16.msra.mxu0 %v19877_v58  ;;  %3585 = vmatprep.subr.bf16.mxu1 %v19880_v51  ;;  %v2163_v58 = vlaneseq }
 0x4a8   : > { %18867 = vmatprep.subr.bf16.mxu0 %v19881_v60 }
 0x4a9   : > { %16367 = vmatmul.mubr.msk.bf16.gmra.mrb[8].mxu1 %vm1892_vm13, %v22625_v12  ;;  %v22791_v59 = vshrl.u32 %v2163_v58, 7 }
 0x4aa   : > { %3586 = vmatpush1.bf16.msra.mxu1 %v19878_v61  ;;  %3613 = vmatprep.mubr.bf16.mxu1 %v22039_v45 }
 0x4ab   : > { %18868 = vmatpush3.bf16.msra.mxu0 %v19881_v60  ;;  %3587 = vmatprep.subr.bf16.mxu1 %v19884_v62  ;;  %v22794_v51 = vsub.s32 0, %v22791_v59  ;;  %v1910_v60 = vld [vmem:[#allocation11 + $0x2] sm:$0x7]  ;;  %v22797_v61 = vsub.s32 1, %v22791_v59 }
 0x4ac   : > { %18869 = vmatprep.subr.bf16.mxu0 %v19885_v63 }
 0x4ad   : > { %v2166_v62 = vrot.slane %v1910_v60, %v22794_v51 }
 0x4ae   : > { %3588 = vmatpush1.bf16.msra.mxu1 %v19882_v0 }
 0x4af   : > { %18870 = vmatpush3.bf16.msra.mxu0 %v19885_v63  ;;  %3589 = vmatprep.subr.bf16.mxu1 %v19888_v1  ;;  %v2170_v63 = vrot.slane %v1910_v60, %v22797_v61 }
 0x4b0   : > { %18875 = vmatprep.subr.bf16.mxu0 %v19889_v36 }
 0x4b2   : > { %18872 = vmatmul.mubr.msk.bf16.vlgmr.msra.gmra.mrb[16].mxu0 %vm1892_vm13, %v22600_v55  ;;  %3590 = vmatpush1.bf16.msra.mxu1 %v19886_v32  ;;  %v19906_v55 = vld [vmem:[%s25672_s6 + $0x48] sm:$0xff]  }
 0x4b3   : > { %18876 = vmatpush3.bf16.msra.mxu0 %v19889_v36  ;;  %18887 = vmatprep.mubr.msk.bf16.mxu0 %vm1892_vm13, %v22616_v8  ;;  %v19895_v8 = vld [vmem:[#allocation5 + $0x320] ss:$12 sps:$4 sm:$0xff]  }
 0x4b4   : > { %3591 = vmatprep.subr.bf16.mxu1 %v19892_v41  ;;  %18877 = vmatprep.subr.bf16.mxu0 %v19893_v33 }
 0x4b6   : > { %3592 = vmatpush1.bf16.msra.mxu1 %v19890_v3 }
 0x4b7   : > { %18878 = vmatpush3.bf16.msra.mxu0 %v19893_v33  ;;  %18343 = vmatprep.subr.bf16.mxu1 %v19904_v4 }
 0x4b8   : > { %18879 = vmatprep.subr.bf16.mxu0 %v19894_v5 }
 0x4b9   : > { %16388 = vmatmul.mubr.msk.bf16.vlgmr.msra.gmra.mrb[4].mxu1 %vm1892_vm13, %v22619_v9 }
 0x4ba   : > { %3623 = vmatprep.mubr.bf16.mxu1 %v22039_v45  ;;  %18344 = vmatpush3.bf16.msra.mxu1 %v19905_v6 }
 0x4bb   : > { %18880 = vmatpush3.bf16.msra.mxu0 %v19894_v5  ;;  %18345 = vmatprep.subr.bf16.mxu1 %v19906_v55 }
 0x4bc   : > { %18881 = vmatprep.subr.bf16.mxu0 %v19895_v8 }
 0x4be   : > { %18346 = vmatpush3.bf16.msra.mxu1 %v19907_v7 }
 0x4bf   : > { %18882 = vmatpush3.bf16.msra.mxu0 %v19895_v8  ;;  %18347 = vmatprep.subr.bf16.mxu1 %v19908_v11 }
 0x4c0   : > { %18883 = vmatprep.subr.bf16.mxu0 %v19896_v17 }
 0x4c1   : > { %16389 = vmatmul.mubr.msk.bf16.gmra.mrb[8].mxu1 %vm1892_vm13, %v22622_v10 }
 0x4c2   : > { %18348 = vmatpush3.bf16.msra.mxu1 %v19909_v18 }
 0x4c3   : > { %18884 = vmatpush3.bf16.msra.mxu0 %v19896_v17  ;;  %18349 = vmatprep.subr.bf16.mxu1 %v19910_v34 }
 0x4c4   : > { %18885 = vmatprep.subr.bf16.mxu0 %v19897_v43 }
 0x4c6   : > { %18350 = vmatpush3.bf16.msra.mxu1 %v19911_v42 }
 0x4c7   : > { %18886 = vmatpush3.bf16.msra.mxu0 %v19897_v43  ;;  %18351 = vmatprep.subr.bf16.mxu1 %v19912_v27 }
 0x4c8   : > { %18891 = vmatprep.subr.bf16.mxu0 %v19898_v19 }
 0x4ca   : > { %18888 = vmatmul.mubr.msk.bf16.vlgmr.msra.gmra.mrb[16].mxu0 %vm1892_vm13, %v22625_v12  ;;  %18352 = vmatpush3.bf16.msra.mxu1 %v19913_v35 }
 0x4cb   : > { %18892 = vmatpush3.bf16.msra.mxu0 %v19898_v19  ;;  %18903 = vmatprep.mubr.msk.bf16.mxu0 %vm1892_vm13, %v22619_v9 }
 0x4cc   : > { %18893 = vmatprep.subr.bf16.mxu0 %v19899_v21  ;;  %18353 = vmatprep.subr.bf16.mxu1 %v19914_v38 }
 0x4ce   : > { %18354 = vmatpush3.bf16.msra.mxu1 %v19915_v39 }
 0x4cf   : > { %18894 = vmatpush3.bf16.msra.mxu0 %v19899_v21  ;;  %18355 = vmatprep.subr.bf16.mxu1 %v19916_v40 }
 0x4d0   : > { %18895 = vmatprep.subr.bf16.mxu0 %v19900_v22 }
 0x4d2   : > { %18356 = vmatpush3.bf16.msra.mxu1 %v19917_v31 }
 0x4d3   : > { %18896 = vmatpush3.bf16.msra.mxu0 %v19900_v22  ;;  %18357 = vmatprep.subr.bf16.mxu1 %v19918_v30 }
 0x4d4   : > { %18897 = vmatprep.subr.bf16.mxu0 %v19901_v2 }
 0x4d6   : > { %18358 = vmatpush3.bf16.msra.mxu1 %v19919_v44 }
 0x4d7   : > { %18898 = vmatpush3.bf16.msra.mxu0 %v19901_v2  ;;  %18381 = vmatprep.subr.bf16.mxu1 %v19920_v46 }
 0x4d8   : > { %18899 = vmatprep.subr.bf16.mxu0 %v19902_v23 }
 0x4db   : > { %18900 = vmatpush3.bf16.msra.mxu0 %v19902_v23 }
 0x4dc   : > { %18901 = vmatprep.subr.bf16.mxu0 %v19903_v24 }
 0x4df   : > { %18902 = vmatpush3.bf16.msra.mxu0 %v19903_v24 }
 0x4e0   : > { %18907 = vmatprep.subr.bf16.mxu0 %v19925_v47 }
 0x4e2   : > { %18904 = vmatmul.mubr.msk.bf16.vlgmr.msra.gmra.mrb[16].mxu0 %vm1892_vm13, %v22622_v10 }
 0x4e3   : > { %18908 = vmatpush3.bf16.msra.mxu0 %v19925_v47 }
 0x4e4   : > { %18909 = vmatprep.subr.bf16.mxu0 %v19928_v48 }
 0x4e7   : > { %18910 = vmatpush3.bf16.msra.mxu0 %v19928_v48 }
 0x4e8   : > { %18911 = vmatprep.subr.bf16.mxu0 %v19931_v49 }
 0x4eb   : > { %18912 = vmatpush3.bf16.msra.mxu0 %v19931_v49 }
 0x4ec   : > { %18913 = vmatprep.subr.bf16.mxu0 %v19934_v50 }
 0x4ef   : > { %18914 = vmatpush3.bf16.msra.mxu0 %v19934_v50 }
 0x4f0   : > { %18915 = vmatprep.subr.bf16.mxu0 %v19937_v52 }
 0x4f3   : > { %18916 = vmatpush3.bf16.msra.mxu0 %v19937_v52 }
 0x4f4   : > { %18917 = vmatprep.subr.bf16.mxu0 %v19940_v53 }
 0x4f7   : > { %18918 = vmatpush3.bf16.msra.mxu0 %v19940_v53  ;;  %v19921_v53 = vld [vmem:[%s25672_s6 + $0xc0] sm:$0xff]  }
 0x4f8   : > { %18919 = vmatprep.subr.bf16.mxu0 %v19943_v54 }
 0x4fb   : > { %18920 = vmatpush3.bf16.msra.mxu0 %v19943_v54 }
 0x4fc   : > { %18921 = vmatprep.subr.bf16.mxu0 %v19946_v56 }
 0x4ff   : > { %18922 = vmatpush3.bf16.msra.mxu0 %v19946_v56 }
 0x500   : > { %18927 = vmatprep.subr.bf16.mxu0 %v22788_v57 }
 0x50d   : > { %v2094_v12 = vpop.f32.mrb[8].mxu0 }
 0x50e   : > { %v2096_v25 = vpop.f32.mrb[9].mxu0  ;;  %v2178_v0 = vadd.f32 %v2166_v62, %v2094_v12 }
 0x50f   : > { %v2098_v9 = vpop.f32.mrb[10].mxu0  ;;  %v2179_v1 = vadd.f32 %v2170_v63, %v2096_v25 }
 0x510   : > { %v2100_v26 = vpop.f32.mrb[11].mxu0  ;;  %v2181_v32 = vadd.f32 %v2166_v62, %v2098_v9 }
 0x511   : > { %v2182_v3 = vadd.f32 %v2170_v63, %v2100_v26 }
 0x515   : > { %v22729_v28 = vpop.f32.mrb[12].mxu0 }
 0x516   : > { %v22731_v29 = vpop.f32.mrb[13].mxu0  ;;  %v2184_v34 = vadd.f32 %v2166_v62, %v22729_v28 }
 0x517   : > { %v22736_v37 = vpop.f32.mrb[14].mxu0  ;;  %v2185_v42 = vadd.f32 %v2170_v63, %v22731_v29  ;;  %v22806_v29 = vsub.s32 2, %v22791_v59 }
 0x518   : > { %v22738_v10 = vpop.f32.mrb[15].mxu0  ;;  %v2187_v22 = vadd.f32 %v2166_v62, %v22736_v37  ;;  %v19922_v62 = vld [vmem:[%s25672_s6 + $0x108] sm:$0xff]  }
 0x519   : > { %v2188_v25 = vadd.f32 %v2170_v63, %v22738_v10  ;;  %v22816_v54 = vrot.slane %v1910_v60, %v22806_v29 }
 0x58c   : > { %v3615_v36 = vpop.f32.mrb[4].mxu1 }
 0x58d   : > { %v19134_v41 = vadd.f32 %v3615_v36, %v2178_v0  ;;  %v3617_v33 = vpop.f32.mrb[5].mxu1 }
 0x58e   : > { %v19136_v4 = vadd.f32 %v3617_v33, %v2179_v1  ;;  %v3619_v5 = vpop.f32.mrb[6].mxu1 }
 0x58f   : > { %v19138_v6 = vadd.f32 %v3619_v5, %v2181_v32  ;;  %v3621_v55 = vpop.f32.mrb[7].mxu1  ;;  %v3695_v7 = vmax.f32 %v19134_v41, 0.0 }
 0x590   : > { %v19140_v8 = vadd.f32 %v3621_v55, %v2182_v3  ;;  %v3696_v17 = vmax.f32 %v19136_v4, 0.0  ;;  %v19923_v55 = vld [vmem:[%s25672_s6 + $0xc8] sm:$0xff]  }
 0x591   : > { %v3698_v11 = vmax.f32 %v19138_v6, 0.0 }
 0x592   : > { %v3699_v18 = vmax.f32 %v19140_v8, 0.0 }
 0x593   : > { %v3708_v43 = vpack.c.bf16 %v3698_v11, %v3695_v7 }
 0x594   : > { %v3709_v19 = vpack.c.bf16 %v3699_v18, %v3696_v17  ;;  %v3625_v21 = vpop.f32.mrb[8].mxu1  ;;  %v19924_v18 = vld [vmem:[%s25672_s6 + $0x110] sm:$0xff]  }
 0x595   : > { %v3715_v2 = vshrl.u32 %v3708_v43, 16  ;;  %v3718_v23 = vshll.u32 %v3708_v43, 16  ;;  %v19142_v24 = vadd.f32 %v3625_v21, %v2184_v34  ;;  %v3627_v12 = vpop.f32.mrb[9].mxu1 }
 0x596   : > { %v3723_v9 = vshrl.u32 %v3709_v19, 16  ;;  %v3726_v26 = vshll.u32 %v3709_v19, 16  ;;  %v19144_v27 = vadd.f32 %v3627_v12, %v2185_v42  ;;  %v3629_v35 = vpop.f32.mrb[10].mxu1 }
 0x597   : > { %v3717_v38 = vrot.slane %v3715_v2, 6  ;;  %v3720_v39 = vrot.slane %v3718_v23, 7  ;;  %v19146_v28 = vadd.f32 %v3629_v35, %v2187_v22  ;;  %v3631_v40 = vpop.f32.mrb[11].mxu1  ;;  %v3701_v46 = vmax.f32 %v19142_v24, 0.0 }
 0x598   : > { %v3725_v31 = vrot.slane %v3723_v9, 6  ;;  %v3728_v30 = vrot.slane %v3726_v26, 7  ;;  %v19148_v37 = vadd.f32 %v3631_v40, %v2188_v25  ;;  %v3702_v49 = vmax.f32 %v19144_v27, 0.0  ;;  %v19926_v26 = vld [vmem:[%s25672_s6 + $0xd0] sm:$0xff]  }
 0x599   : > { %v3721_v44 = vor.u32 %v3720_v39, %v3717_v38  ;;  %v3704_v47 = vmax.f32 %v19146_v28, 0.0  ;;  %v19927_v28 = vld [vmem:[%s25672_s6 + $0x118] sm:$0xff]  }
 0x59a   : > { %v3729_v48 = vor.u32 %v3728_v30, %v3725_v31  ;;  %v3705_v10 = vmax.f32 %v19148_v37, 0.0 }
 0x59b   : > { %v3711_v50 = vpack.c.bf16 %v3704_v47, %v3701_v46  ;;  %v22810_v52 = vsel %vm22361_vm4, 0, %v3721_v44 }
 0x59c   : > { %v3712_v56 = vpack.c.bf16 %v3705_v10, %v3702_v49  ;;  %v22820_v58 = vsel %vm22361_vm4, 0, %v3729_v48  ;;  %v22826_v63 = vshrl.u32 %v22810_v52, 16  ;;  %v22829_v0 = vshll.u32 %v22810_v52, 16 }
 0x59d   : > { %v3739_v1 = vshrl.u32 %v3711_v50, 16  ;;  %v3742_v36 = vshll.u32 %v3711_v50, 16  ;;  %4004 = vmatprep.mubr.bf16.mxu1 %v22820_v58  ;;  %v22833_v60 = vshrl.u32 %v22820_v58, 16  ;;  %v22836_v32 = vshll.u32 %v22820_v58, 16  ;;  %v19929_v50 = vld [vmem:[%s25672_s6 + $0xd8] sm:$0xff]  }
 0x59e   : > { %v3748_v41 = vshrl.u32 %v3712_v56, 16  ;;  %v3751_v33 = vshll.u32 %v3712_v56, 16  ;;  %4005 = vmatmul.mubr.bf16.vlgmr.msra.gmra.mrb[12].mxu1 %v22810_v52  ;;  %v4134_v3 = vrot.slane %v22829_v0, 1  ;;  %v4499_v4 = vrot.slane %v22820_v58, 1 }
 0x59f   : > { %v3741_v5 = vrot.slane %v3739_v1, 6  ;;  %v3744_v6 = vrot.slane %v3742_v36, 7  ;;  %18382 = vmatpush3.bf16.msra.mxu1 %v19921_v53  ;;  %v4146_v8 = vrot.slane %v22836_v32, 1  ;;  %v4496_v7 = vrot.slane %v22810_v52, 1  ;;  %v19930_v36 = vld [vmem:[%s25672_s6 + $0x120] sm:$0xff]  }
 0x5a0   : > { %v3750_v11 = vrot.slane %v3748_v41, 6  ;;  %v3753_v17 = vrot.slane %v3751_v33, 7  ;;  %18383 = vmatprep.subr.bf16.mxu1 %v19922_v62  ;;  %v4135_v34 = vor.u32 %v4134_v3, %v22826_v63  ;;  %v4819_v43 = vrot.slane %v22833_v60, 1 }
 0x5a1   : > { %v3745_v42 = vor.u32 %v3744_v6, %v3741_v5  ;;  %v4147_v19 = vor.u32 %v4146_v8, %v22833_v60  ;;  %v4820_v21 = vrot.slane %v22836_v32, 2  ;;  %v4812_v22 = vrot.slane %v22826_v63, 1 }
 0x5a2   : > { %v3754_v2 = vor.u32 %v3753_v17, %v3750_v11  ;;  %v4813_v23 = vrot.slane %v22829_v0, 2  ;;  %v5155_v24 = vrot.slane %v22820_v58, 2  ;;  %v5152_v12 = vrot.slane %v22810_v52, 2 }
 0x5a3   : > { %v22859_v25 = vsel %vm22361_vm4, %v3745_v42, 0  ;;  %18384 = vmatpush3.bf16.msra.mxu1 %v19923_v55  ;;  %v22862_v9 = vsel %vm623_vm2, %v3721_v44, %v3745_v42  ;;  %v4821_v27 = vor.u32 %v4820_v21, %v4819_v43  ;;  %v5475_v35 = vrot.slane %v22833_v60, 2  ;;  %v19939_v60 = vld [vmem:[%s25672_s6 + $0x138] sm:$0xff]  }
 0x5a4   : > { %v22870_v38 = vsel %vm22361_vm4, %v3754_v2, 0  ;;  %v22873_v39 = vsel %vm623_vm2, %v3729_v48, %v3754_v2  ;;  %18385 = vmatprep.subr.bf16.mxu1 %v19924_v18  ;;  %v22879_v40 = vshll.u32 %v22862_v9, 16  ;;  %v22882_v31 = vshrl.u32 %v22862_v9, 16  ;;  %v19933_v2 = vld [vmem:[%s25672_s6 + $0x128] sm:$0xff]  }
 0x5a5   : > { %4012 = vmatprep.mubr.bf16.mxu1 %v22873_v39  ;;  %v22886_v30 = vshll.u32 %v22873_v39, 16  ;;  %v22889_v37 = vshrl.u32 %v22873_v39, 16  ;;  %v22892_v44 = vshll.u32 %v22870_v38, 16  ;;  %v22895_v46 = vshll.u32 %v22859_v25, 16 }
 0x5a6   : > { %4013 = vmatmul.mubr.bf16.gmra.mrb[16].mxu1 %v22862_v9  ;;  %v4139_v47 = vrot.slane %v22879_v40, 1  ;;  %v4500_v48 = vrot.slane %v22873_v39, 1  ;;  %v4497_v49 = vrot.slane %v22862_v9, 1  ;;  %v4507_v10 = vrot.slane %v22870_v38, 1 }
 0x5a7   : > { %18386 = vmatpush3.bf16.msra.mxu1 %v19926_v26  ;;  %v4151_v53 = vrot.slane %v22886_v30, 1  ;;  %v4179_v56 = vrot.slane %v22892_v44, 1  ;;  %v4171_v62 = vrot.slane %v22895_v46, 1  ;;  %v4505_v1 = vrot.slane %v22859_v25, 1 }
 0x5a8   : > { %18387 = vmatprep.subr.bf16.mxu1 %v19927_v28  ;;  %v22913_v41 = vsel %vm723_vm5, %v4135_v34, %v4139_v47  ;;  %v4167_v33 = vor.u32 %v22882_v31, %v4139_v47  ;;  %v22917_v3 = vsel %vm808_vm6, %v4499_v4, %v4500_v48  ;;  %v22920_v5 = vsel %vm808_vm6, %v4496_v7, %v4497_v49  ;;  %v19932_v34 = vld [vmem:[%s25672_s6 + $0xe0] sm:$0xff]  }
 0x5a9   : > { %v4152_v6 = vsel %vm723_vm5, %v4147_v19, %v4151_v53  ;;  %v4175_v55 = vor.u32 %v22889_v37, %v4151_v53  ;;  %v22925_v8 = vsel %vm808_vm6, %v4500_v48, %v4507_v10  ;;  %v22928_v11 = vsel %vm808_vm6, %v4497_v49, %v4505_v1  ;;  %v19935_v1 = vld [vmem:[%s25672_s6 + $0xe8] sm:$0xff]  }
 0x5aa   : > { %4371 = vmatprep.mubr.bf16.mxu1 %v4152_v6  ;;  %v22931_v17 = vsel %vm723_vm5, %v4167_v33, %v4171_v62  ;;  %v4822_v4 = vrot.slane %v22889_v37, 1  ;;  %v4823_v18 = vrot.slane %v22886_v30, 2  ;;  %v4814_v7 = vor.u32 %v4813_v23, %v4812_v22 }
 0x5ab   : > { %18388 = vmatpush3.bf16.msra.mxu1 %v19929_v50  ;;  %v22939_v43 = vsel %vm723_vm5, %v4175_v55, %v4179_v56  ;;  %v4815_v42 = vrot.slane %v22882_v31, 1  ;;  %v4816_v19 = vrot.slane %v22879_v40, 2  ;;  %v4839_v21 = vshrl.u32 %v22870_v38, 16  ;;  %v19936_v55 = vld [vmem:[%s25672_s6 + $0x130] sm:$0xff]  }
 0x5ac   : > { %18389 = vmatprep.subr.bf16.mxu1 %v19930_v36  ;;  %v4824_v22 = vor.u32 %v4823_v18, %v4822_v4  ;;  %v4842_v23 = vrot.slane %v22892_v44, 2  ;;  %v4833_v26 = vshrl.u32 %v22859_v25, 16  ;;  %v4836_v28 = vrot.slane %v22895_v46, 2 }
 0x5ad   : > { %v4817_v47 = vor.u32 %v4816_v19, %v4815_v42  ;;  %v4841_v48 = vrot.slane %v4839_v21, 1  ;;  %v5156_v49 = vrot.slane %v22873_v39, 2  ;;  %v5153_v10 = vrot.slane %v22862_v9, 2 }
 0x5ae   : > { %v22953_v50 = vsel %vm878_vm7, %v4821_v27, %v4824_v22  ;;  %v4835_v53 = vrot.slane %v4833_v26, 1  ;;  %v5163_v56 = vrot.slane %v22870_v38, 2  ;;  %v5161_v62 = vrot.slane %v22859_v25, 2 }
 0x5af   : > { %18390 = vmatpush3.bf16.msra.mxu1 %v19932_v34  ;;  %v22961_v36 = vsel %vm878_vm7, %v4814_v7, %v4817_v47  ;;  %v4843_v33 = vor.u32 %v4842_v23, %v4841_v48  ;;  %v22966_v6 = vsel %vm956_vm8, %v5155_v24, %v5156_v49  ;;  %v22971_v27 = vsel %vm956_vm8, %v5152_v12, %v5153_v10 }
 0x5b0   : > { %18391 = vmatprep.subr.bf16.mxu1 %v19933_v2  ;;  %v4837_v4 = vor.u32 %v4836_v28, %v4835_v53  ;;  %v22977_v18 = vsel %vm956_vm8, %v5156_v49, %v5163_v56  ;;  %v22980_v7 = vsel %vm956_vm8, %v5153_v10, %v5161_v62  ;;  %v5476_v24 = vrot.slane %v22836_v32, 3  ;;  %v19938_v32 = vld [vmem:[%s25672_s6 + $0xf0] sm:$0xff]  }
 0x5b1   : > { %v22984_v34 = vsel %vm878_vm7, %v4824_v22, %v4843_v33  ;;  %v5478_v12 = vrot.slane %v22889_v37, 2  ;;  %v5479_v42 = vrot.slane %v22886_v30, 3  ;;  %v5468_v19 = vrot.slane %v22826_v63, 2  ;;  %v19941_v33 = vld [vmem:[%s25672_s6 + $0xf8] sm:$0xff]  }
 0x5b2   : > { %v22990_v2 = vsel %vm878_vm7, %v4817_v47, %v4837_v4  ;;  %v5477_v23 = vor.u32 %v5476_v24, %v5475_v35  ;;  %v5469_v28 = vrot.slane %v22829_v0, 3  ;;  %v5471_v48 = vrot.slane %v22882_v31, 2  ;;  %v19942_v24 = vld [vmem:[%s25672_s6 + $0x1c0] sm:$0xff]  }
 0x5b3   : > { %18392 = vmatpush3.bf16.msra.mxu1 %v19935_v1  ;;  %v5480_v37 = vor.u32 %v5479_v42, %v5478_v12  ;;  %v5472_v30 = vrot.slane %v22879_v40, 3  ;;  %v5493_v22 = vrot.slane %v4839_v21, 2  ;;  %v5494_v63 = vrot.slane %v22892_v44, 3 }
 0x5b4   : > { %18393 = vmatprep.subr.bf16.mxu1 %v19936_v55  ;;  %v5470_v35 = vor.u32 %v5469_v28, %v5468_v19  ;;  %v5489_v0 = vrot.slane %v4833_v26, 2  ;;  %v5490_v31 = vrot.slane %v22895_v46, 3  ;;  %v5805_v47 = vrot.slane %v22820_v58, 3 }
 0x5b5   : > { %v18905_v49 = vpop.f32.mrb[16].mxu0  ;;  %v23007_v10 = vsel %vm1026_vm9, %v5477_v23, %v5480_v37  ;;  %v5473_v53 = vor.u32 %v5472_v30, %v5471_v48  ;;  %v5495_v40 = vor.u32 %v5494_v63, %v5493_v22  ;;  %v5806_v21 = vrot.slane %v22873_v39, 3  ;;  %v19944_v22 = vld [vmem:[%s25672_s6 + $0x180] sm:$0xff]  }
 0x5b6   : > { %v19149_v44 = vadd.f32 %v18905_v49, %v22816_v54  ;;  %v3668_v56 = vpop.f32.mrb[17].mxu0  ;;  %v5491_v62 = vor.u32 %v5490_v31, %v5489_v0  ;;  %v5802_v1 = vrot.slane %v22810_v52, 3  ;;  %v5803_v26 = vrot.slane %v22862_v9, 3  ;;  %v19947_v49 = vld [vmem:[%s25672_s6 + $0x188] sm:$0xff]  }
 0x5b7   : > { %v19150_v46 = vadd.f32 %v3668_v56, %v22816_v54  ;;  %18394 = vmatpush3.bf16.msra.mxu1 %v19938_v32  ;;  %v18906_v58 = vpop.f32.mrb[18].mxu0  ;;  %v23018_v55 = vsel %vm1026_vm9, %v5470_v35, %v5473_v53  ;;  %v23021_v39 = vsel %vm1026_vm9, %v5480_v37, %v5495_v40  ;;  %v23024_v4 = vsel %vm1102_vm10, %v5805_v47, %v5806_v21 }
 0x5b8   : > { %v19151_v52 = vadd.f32 %v18906_v58, %v22816_v54  ;;  %v3671_v9 = vpop.f32.mrb[19].mxu0  ;;  %18395 = vmatprep.subr.bf16.mxu1 %v19939_v60  ;;  %v23031_v12 = vsel %vm1026_vm9, %v5473_v53, %v5491_v62  ;;  %v23034_v42 = vsel %vm1102_vm10, %v5802_v1, %v5803_v26  ;;  %v5813_v23 = vrot.slane %v22870_v38, 3 }
 0x5b9   : > { %v19152_v19 = vadd.f32 %v3671_v9, %v22816_v54  ;;  %v5811_v28 = vrot.slane %v22859_v25, 3  ;;  %v3703_v48 = vmax.f32 %v19149_v44, 0.0  ;;  %v3697_v37 = vmax.f32 %v19150_v46, 0.0  ;;  %v19945_v25 = vld [vmem:[%s25672_s6 + $0x1c8] sm:$0xff]  }
 0x5ba   : > { %v3706_v32 = vmax.f32 %v19151_v52, 0.0  ;;  %v23043_v63 = vsel %vm1102_vm10, %v5806_v21, %v5813_v23  ;;  %v19948_v21 = vld [vmem:[%s25672_s6 + $0x1d0] sm:$0xff]   ;;  %v19952_v9 = vld [vmem:[%s25672_s6 + $0x148] sm:$0xff]  }
 0x5bb   : > { %v3700_v30 = vmax.f32 %v19152_v19, 0.0  ;;  %18396 = vmatpush3.bf16.msra.mxu1 %v19941_v33  ;;  %v23046_v60 = vsel %vm1102_vm10, %v5803_v26, %v5811_v28  ;;  %v19951_v26 = vld [vmem:[%s25672_s6 + $0x1d8] sm:$0xff]  }
 0x5bc   : > { %v3713_v54 = vpack.c.bf16 %v3706_v32, %v3703_v48  ;;  %18419 = vmatprep.subr.bf16.mxu1 %v19942_v24 }
 0x5bd   : > { %v3710_v38 = vpack.c.bf16 %v3700_v30, %v3697_v37 }
 0x5be   : > { %v3757_v35 = vshrl.u32 %v3713_v54, 16  ;;  %v3760_v0 = vshll.u32 %v3713_v54, 16  ;;  %4372 = vmatmul.mubr.bf16.vlgmr.msra.gmra.mrb[20].mxu1 %v22913_v41 }
 0x5bf   : > { %v3731_v31 = vshrl.u32 %v3710_v38, 16  ;;  %v3734_v47 = vshll.u32 %v3710_v38, 16  ;;  %4379 = vmatprep.mubr.bf16.mxu1 %v22939_v43  ;;  %18420 = vmatpush3.bf16.msra.mxu1 %v19944_v22  ;;  %v19950_v43 = vld [vmem:[%s25672_s6 + $0x190] sm:$0xff]  }
 0x5c0   : > { %v3759_v53 = vrot.slane %v3757_v35, 6  ;;  %v3762_v40 = vrot.slane %v3760_v0, 7  ;;  %18421 = vmatprep.subr.bf16.mxu1 %v19945_v25 }
 0x5c1   : > { %v3733_v44 = vrot.slane %v3731_v31, 6  ;;  %v3736_v56 = vrot.slane %v3734_v47, 7 }
 0x5c2   : > { %v3763_v62 = vor.u32 %v3762_v40, %v3759_v53 }
 0x5c3   : > { %v3737_v41 = vor.u32 %v3736_v56, %v3733_v44  ;;  %18422 = vmatpush3.bf16.msra.mxu1 %v19947_v49  ;;  %v19955_v49 = vld [vmem:[%s25672_s6 + $0x150] sm:$0xff]  }
 0x5c4   : > { %v23064_v1 = vsel %vm22361_vm4, %v3763_v62, 0  ;;  %18423 = vmatprep.subr.bf16.mxu1 %v19948_v21 }
 0x5c5   : > { %v23071_v46 = vsel %vm22361_vm4, 0, %v3737_v41  ;;  %v23074_v58 = vsel %vm623_vm2, %v3737_v41, %v3763_v62  ;;  %v23077_v33 = vshll.u32 %v23064_v1, 16  ;;  %v4509_v52 = vrot.slane %v23064_v1, 1 }
 0x5c6   : > { %4380 = vmatmul.mubr.bf16.gmra.mrb[24].mxu1 %v22931_v17  ;;  %18923 = vmatprep.mubr.bf16.mxu0 %v23071_v46  ;;  %v4154_v20 = vshrl.u32 %v23071_v46, 16  ;;  %v4156_v24 = vshll.u32 %v23071_v46, 16  ;;  %v4161_v19 = vshll.u32 %v23074_v58, 16  ;;  %v4181_v23 = vshrl.u32 %v23074_v58, 16  ;;  %v19953_v17 = vld [vmem:[%s25672_s6 + $0x198] sm:$0xff]  }
 0x5c7   : > { %18424 = vmatpush3.bf16.msra.mxu1 %v19950_v43  ;;  %4693 = vmatprep.mubr.bf16.mxu1 %v22917_v3  ;;  %v4187_v28 = vrot.slane %v23077_v33, 1  ;;  %v4502_v48 = vrot.slane %v23071_v46, 1  ;;  %v4503_v32 = vrot.slane %v23074_v58, 1  ;;  %v4845_v37 = vshrl.u32 %v23064_v1, 16  ;;  %v19954_v3 = vld [vmem:[%s25672_s6 + $0x1e0] sm:$0xff]  }
 0x5c8   : > { %18924 = vmatmul.mubr.bf16.vlgmr.msra.gmra.mrb[20].mxu0 %v23074_v58  ;;  %18425 = vmatprep.subr.bf16.mxu1 %v19951_v26  ;;  %v4158_v30 = vrot.slane %v4156_v24, 1  ;;  %v4163_v22 = vrot.slane %v4161_v19, 1  ;;  %v4826_v54 = vrot.slane %v4154_v20, 1  ;;  %v4827_v25 = vrot.slane %v4156_v24, 2  ;;  %v19957_v26 = vld [vmem:[%s25672_s6 + $0x1e8] sm:$0xff]  }
 0x5c9   : > { %18928 = vmatpush3.bf16.msra.mxu0 %v22788_v57  ;;  %v23103_v38 = vsel %vm808_vm6, %v4502_v48, %v4503_v32  ;;  %v23106_v35 = vsel %vm808_vm6, %v4503_v32, %v4509_v52  ;;  %v4829_v0 = vrot.slane %v4181_v23, 1  ;;  %v4830_v31 = vrot.slane %v4161_v19, 2  ;;  %v19956_v57 = vld [vmem:[%s25672_s6 + $0x1a0] sm:$0xff]  }
 0x5ca   : > { %18929 = vmatprep.subr.bf16.mxu0 %v19952_v9  ;;  %v4159_v47 = vor.u32 %v4158_v30, %v4154_v20  ;;  %v4183_v53 = vor.u32 %v4181_v23, %v4163_v22  ;;  %v4828_v40 = vor.u32 %v4827_v25, %v4826_v54  ;;  %v4847_v21 = vrot.slane %v4845_v37, 1 }
 0x5cb   : > { %18426 = vmatpush3.bf16.msra.mxu1 %v19953_v17  ;;  %v4831_v44 = vor.u32 %v4830_v31, %v4829_v0  ;;  %v4848_v56 = vrot.slane %v23077_v33, 2  ;;  %v5158_v62 = vrot.slane %v23071_v46, 2  ;;  %v5159_v41 = vrot.slane %v23074_v58, 2  ;;  %v19959_v0 = vld [vmem:[%s25672_s6 + $0x1a8] sm:$0xff]  }
 0x5cc   : > { %v4164_v43 = vsel %vm723_vm5, %v4159_v47, %v4163_v22  ;;  %18427 = vmatprep.subr.bf16.mxu1 %v19954_v3  ;;  %v23122_v52 = vsel %vm723_vm5, %v4183_v53, %v4187_v28  ;;  %v5165_v17 = vrot.slane %v23064_v1, 2  ;;  %v5482_v48 = vrot.slane %v4154_v20, 2  ;;  %v19958_v3 = vld [vmem:[%s25672_s6 + $0x158] sm:$0xff]  }
 0x5cd   : > { %18930 = vmatpush3.bf16.msra.mxu0 %v19952_v9  ;;  %18943 = vmatprep.mubr.bf16.mxu0 %v4164_v43  ;;  %v23126_v32 = vsel %vm878_vm7, %v4828_v40, %v4831_v44  ;;  %v4849_v30 = vor.u32 %v4848_v56, %v4847_v21  ;;  %v23129_v54 = vsel %vm956_vm8, %v5158_v62, %v5159_v41  ;;  %v5483_v22 = vrot.slane %v4156_v24, 3  ;;  %v19964_v56 = vld [vmem:[%s25672_s6 + $0x168] sm:$0xff]   ;;  %v19965_v62 = vld [vmem:[%s25672_s6 + $0x1b8] sm:$0xff]   ;;  %v19967_v43 = vld [vmem:[%s25672_s6 + $0x170] sm:$0xff]  }
 0x5ce   : > { %18931 = vmatprep.subr.bf16.mxu0 %v19955_v49  ;;  %v23135_v28 = vsel %vm956_vm8, %v5159_v41, %v5165_v17  ;;  %v5485_v25 = vrot.slane %v4181_v23, 2  ;;  %v5486_v20 = vrot.slane %v4161_v19, 3  ;;  %v5497_v9 = vrot.slane %v4845_v37, 2  ;;  %v19960_v23 = vld [vmem:[%s25672_s6 + $0x1f0] sm:$0xff]   ;;  %v19966_v41 = vld [vmem:[%s25672_s6 + $0x280] sm:$0xff]   ;;  %v19969_v17 = vld [vmem:[%s25672_s6 + $0x288] sm:$0xff]  }
 0x5cf   : > { %18428 = vmatpush3.bf16.msra.mxu1 %v19956_v57  ;;  %v23141_v31 = vsel %vm878_vm7, %v4831_v44, %v4849_v30  ;;  %v5484_v24 = vor.u32 %v5483_v22, %v5482_v48  ;;  %v5498_v47 = vrot.slane %v23077_v33, 3  ;;  %v5808_v53 = vrot.slane %v23071_v46, 3  ;;  %v19961_v57 = vld [vmem:[%s25672_s6 + $0x160] sm:$0xff]   ;;  %v19970_v48 = vld [vmem:[%s25672_s6 + $0x178] sm:$0xff]   ;;  %v19971_v30 = vld [vmem:[%s25672_s6 + $0x248] sm:$0xff]  }
 0x5d0   : > { %18429 = vmatprep.subr.bf16.mxu1 %v19957_v26  ;;  %v5487_v19 = vor.u32 %v5486_v20, %v5485_v25  ;;  %v5809_v37 = vrot.slane %v23074_v58, 3  ;;  %v5815_v40 = vrot.slane %v23064_v1, 3  ;;  %v19962_v1 = vld [vmem:[%s25672_s6 + $0x1b0] sm:$0xff]   ;;  %v19968_v26 = vld [vmem:[%s25672_s6 + $0x240] sm:$0xff]   ;;  %v19976_v25 = vld [vmem:[%s25672_s6 + $0x208] sm:$0xff]  }
 0x5d1   : > { %18932 = vmatpush3.bf16.msra.mxu0 %v19955_v49  ;;  %v5499_v21 = vor.u32 %v5498_v47, %v5497_v9  ;;  %v19963_v49 = vld [vmem:[%s25672_s6 + $0x1f8] sm:$0xff]   ;;  %v19972_v22 = vld [vmem:[%s25672_s6 + $0x290] sm:$0xff]   ;;  %v19978_v9 = vld [vmem:[%s25672_s6 + $0x2a0] sm:$0xff]  }
 0x5d2   : > { %18933 = vmatprep.subr.bf16.mxu0 %v19958_v3  ;;  %v23154_v33 = vsel %vm1026_vm9, %v5484_v24, %v5487_v19  ;;  %v23157_v46 = vsel %vm1102_vm10, %v5808_v53, %v5809_v37  ;;  %v23160_v44 = vsel %vm1102_vm10, %v5809_v37, %v5815_v40  ;;  %v19977_v20 = vld [vmem:[%s25672_s6 + $0x258] sm:$0xff]   ;;  %v19984_v24 = vld [vmem:[%s25672_s6 + $0x2b0] sm:$0xff]   ;;  %v19985_v47 = vld [vmem:[%s25672_s6 + $0x220] sm:$0xff]  }
 0x5d3   : > { %18430 = vmatpush3.bf16.msra.mxu1 %v19959_v0  ;;  %v23166_v58 = vsel %vm1026_vm9, %v5487_v19, %v5499_v21  ;;  %v19983_v0 = vld [vmem:[%s25672_s6 + $0x268] sm:$0xff]   ;;  %v19986_v53 = vld [vmem:[%s25672_s6 + $0x270] sm:$0xff]   ;;  %v19989_v37 = vld [vmem:[%s25672_s6 + $0x278] sm:$0xff]  }
 0x5d4   : > { %18431 = vmatprep.subr.bf16.mxu1 %v19960_v23  ;;  %v19987_v23 = vld [vmem:[%s25672_s6 + $0x2b8] sm:$0xff]   ;;  %v19988_v19 = vld [vmem:[%s25672_s6 + $0x228] sm:$0xff]   ;;  %v19990_v40 = vld [vmem:[%s25672_s6 + $0x340] sm:$0xff]  }
 0x5d5   : > { %18934 = vmatpush3.bf16.msra.mxu0 %v19958_v3  ;;  %v19975_v3 = vld [vmem:[%s25672_s6 + $0x298] sm:$0xff]   ;;  %v19991_v21 = vld [vmem:[%s25672_s6 + $0x230] sm:$0xff]  }
 0x5d6   : > { %18935 = vmatprep.subr.bf16.mxu0 %v19961_v57 }
 0x5d7   : > { %18432 = vmatpush3.bf16.msra.mxu1 %v19962_v1  ;;  %v19993_v1 = vld [vmem:[%s25672_s6 + $0x348] sm:$0xff]  }
 0x5d8   : > { %18433 = vmatprep.subr.bf16.mxu1 %v19963_v49  ;;  %v19994_v49 = vld [vmem:[%s25672_s6 + $0x238] sm:$0xff]  }
 0x5d9   : > { %18936 = vmatpush3.bf16.msra.mxu0 %v19961_v57  ;;  %v19992_v57 = vld [vmem:[%s25672_s6 + $0x300] sm:$0xff]  }
 0x5da   : > { %18937 = vmatprep.subr.bf16.mxu0 %v19964_v56 }
 0x5db   : > { %18434 = vmatpush3.bf16.msra.mxu1 %v19965_v62  ;;  %v19996_v62 = vld [vmem:[%s25672_s6 + $0x350] sm:$0xff]  }
 0x5dc   : > { %18457 = vmatprep.subr.bf16.mxu1 %v19966_v41  ;;  %v19999_v41 = vld [vmem:[%s25672_s6 + $0x358] sm:$0xff]  }
 0x5dd   : > { %18938 = vmatpush3.bf16.msra.mxu0 %v19964_v56  ;;  %v19995_v56 = vld [vmem:[%s25672_s6 + $0x308] sm:$0xff]  }
 0x5de   : > { %4694 = vmatmul.mubr.bf16.vlgmr.msra.gmra.mrb[28].mxu1 %v22920_v5  ;;  %18939 = vmatprep.subr.bf16.mxu0 %v19967_v43  ;;  %v19973_v5 = vld [vmem:[%s25672_s6 + $0x200] sm:$0xff]  }
 0x5df   : > { %4701 = vmatprep.mubr.bf16.mxu1 %v22925_v8  ;;  %18458 = vmatpush3.bf16.msra.mxu1 %v19968_v26  ;;  %v19974_v8 = vld [vmem:[%s25672_s6 + $0x250] sm:$0xff]   ;;  %v20001_v26 = vld [vmem:[%s25672_s6 + $0x318] sm:$0xff]  }
 0x5e0   : > { %18459 = vmatprep.subr.bf16.mxu1 %v19969_v17  ;;  %v20002_v17 = vld [vmem:[%s25672_s6 + $0x360] sm:$0xff]  }
 0x5e1   : > { %18940 = vmatpush3.bf16.msra.mxu0 %v19967_v43  ;;  %v20000_v43 = vld [vmem:[%s25672_s6 + $0x2c8] sm:$0xff]  }
 0x5e2   : > { %18941 = vmatprep.subr.bf16.mxu0 %v19970_v48 }
 0x5e3   : > { %18460 = vmatpush3.bf16.msra.mxu1 %v19971_v30  ;;  %v20008_v30 = vld [vmem:[%s25672_s6 + $0x370] sm:$0xff]  }
 0x5e4   : > { %18461 = vmatprep.subr.bf16.mxu1 %v19972_v22  ;;  %v20009_v22 = vld [vmem:[%s25672_s6 + $0x2e0] sm:$0xff]  }
 0x5e5   : > { %18942 = vmatpush3.bf16.msra.mxu0 %v19970_v48  ;;  %v20007_v48 = vld [vmem:[%s25672_s6 + $0x328] sm:$0xff]  }
 0x5e6   : > { %4702 = vmatmul.mubr.bf16.gmra.mrb[32].mxu1 %v22928_v11  ;;  %18947 = vmatprep.subr.bf16.mxu0 %v19973_v5  ;;  %v19979_v11 = vld [vmem:[%s25672_s6 + $0x210] sm:$0xff]  }
 0x5e7   : > { %18462 = vmatpush3.bf16.msra.mxu1 %v19974_v8  ;;  %5033 = vmatprep.mubr.bf16.mxu1 %v22953_v50  ;;  %v19980_v50 = vld [vmem:[%s25672_s6 + $0x260] sm:$0xff]   ;;  %v20011_v8 = vld [vmem:[%s25672_s6 + $0x378] sm:$0xff]  }
 0x5e8   : > { %18944 = vmatmul.mubr.bf16.vlgmr.msra.gmra.mrb[20].mxu0 %v23122_v52  ;;  %18463 = vmatprep.subr.bf16.mxu1 %v19975_v3  ;;  %v19981_v52 = vld [vmem:[%s25672_s6 + $0x2a8] sm:$0xff]  }
 0x5e9   : > { %18948 = vmatpush3.bf16.msra.mxu0 %v19973_v5  ;;  %18963 = vmatprep.mubr.bf16.mxu0 %v23103_v38  ;;  %v19982_v38 = vld [vmem:[%s25672_s6 + $0x218] sm:$0xff]   ;;  %v20010_v5 = vld [vmem:[%s25672_s6 + $0x330] sm:$0xff]   ;;  %v20012_v3 = vld [vmem:[%s25672_s6 + $0x2e8] sm:$0xff]  }
 0x5ea   : > { %18949 = vmatprep.subr.bf16.mxu0 %v19976_v25 }
 0x5eb   : > { %18464 = vmatpush3.bf16.msra.mxu1 %v19977_v20  ;;  %v20014_v20 = vld [vmem:[%s25672_s6 + $0x400] sm:$0xff]  }
 0x5ec   : > { %18465 = vmatprep.subr.bf16.mxu1 %v19978_v9  ;;  %v20015_v9 = vld [vmem:[%s25672_s6 + $0x2f0] sm:$0xff]  }
 0x5ed   : > { %18950 = vmatpush3.bf16.msra.mxu0 %v19976_v25  ;;  %v20013_v25 = vld [vmem:[%s25672_s6 + $0x338] sm:$0xff]  }
 0x5ee   : > { %18951 = vmatprep.subr.bf16.mxu0 %v19979_v11 }
 0x5ef   : > { %18466 = vmatpush3.bf16.msra.mxu1 %v19980_v50  ;;  %v20017_v50 = vld [vmem:[%s25672_s6 + $0x408] sm:$0xff]  }
 0x5f0   : > { %18467 = vmatprep.subr.bf16.mxu1 %v19981_v52  ;;  %v20018_v52 = vld [vmem:[%s25672_s6 + $0x2f8] sm:$0xff]  }
 0x5f1   : > { %18952 = vmatpush3.bf16.msra.mxu0 %v19979_v11  ;;  %v20016_v11 = vld [vmem:[%s25672_s6 + $0x3c0] sm:$0xff]  }
 0x5f2   : > { %18953 = vmatprep.subr.bf16.mxu0 %v19982_v38 }
 0x5f3   : > { %18468 = vmatpush3.bf16.msra.mxu1 %v19983_v0  ;;  %v20020_v0 = vld [vmem:[%s25672_s6 + $0x410] sm:$0xff]  }
 0x5f4   : > { %18469 = vmatprep.subr.bf16.mxu1 %v19984_v24  ;;  %v20023_v24 = vld [vmem:[%s25672_s6 + $0x418] sm:$0xff]  }
 0x5f5   : > { %18954 = vmatpush3.bf16.msra.mxu0 %v19982_v38  ;;  %v20019_v38 = vld [vmem:[%s25672_s6 + $0x3c8] sm:$0xff]  }
 0x5f6   : > { %18955 = vmatprep.subr.bf16.mxu0 %v19985_v47 }
 0x5f7   : > { %18470 = vmatpush3.bf16.msra.mxu1 %v19986_v53  ;;  %v20025_v53 = vld [vmem:[%s25672_s6 + $0x3d8] sm:$0xff]  }
 0x5f8   : > { %18471 = vmatprep.subr.bf16.mxu1 %v19987_v23  ;;  %v20026_v23 = vld [vmem:[%s25672_s6 + $0x420] sm:$0xff]  }
 0x5f9   : > { %18956 = vmatpush3.bf16.msra.mxu0 %v19985_v47  ;;  %v20024_v47 = vld [vmem:[%s25672_s6 + $0x388] sm:$0xff]  }
 0x5fa   : > { %18957 = vmatprep.subr.bf16.mxu0 %v19988_v19 }
 0x5fb   : > { %18472 = vmatpush3.bf16.msra.mxu1 %v19989_v37  ;;  %v20032_v37 = vld [vmem:[%s25672_s6 + $0x430] sm:$0xff]  }
 0x5fc   : > { %18495 = vmatprep.subr.bf16.mxu1 %v19990_v40  ;;  %v20033_v40 = vld [vmem:[%s25672_s6 + $0x3a0] sm:$0xff]  }
 0x5fd   : > { %18958 = vmatpush3.bf16.msra.mxu0 %v19988_v19  ;;  %v20031_v19 = vld [vmem:[%s25672_s6 + $0x3e8] sm:$0xff]  }
 0x5fe   : > { %5034 = vmatmul.mubr.bf16.vlgmr.msra.gmra.mrb[36].mxu1 %v22961_v36  ;;  %18959 = vmatprep.subr.bf16.mxu0 %v19991_v21  ;;  %v19997_v36 = vld [vmem:[%s25672_s6 + $0x2c0] sm:$0xff]  }
 0x5ff   : > { %5041 = vmatprep.mubr.bf16.mxu1 %v22984_v34  ;;  %18496 = vmatpush3.bf16.msra.mxu1 %v19992_v57  ;;  %v19998_v34 = vld [vmem:[%s25672_s6 + $0x310] sm:$0xff]   ;;  %v20035_v57 = vld [vmem:[%s25672_s6 + $0x438] sm:$0xff]  }
 0x600   : > { %18497 = vmatprep.subr.bf16.mxu1 %v19993_v1  ;;  %v20036_v1 = vld [vmem:[%s25672_s6 + $0x3a8] sm:$0xff]  }
 0x601   : > { %18960 = vmatpush3.bf16.msra.mxu0 %v19991_v21  ;;  %v20034_v21 = vld [vmem:[%s25672_s6 + $0x3f0] sm:$0xff]  }
 0x602   : > { %18961 = vmatprep.subr.bf16.mxu0 %v19994_v49 }
 0x603   : > { %18498 = vmatpush3.bf16.msra.mxu1 %v19995_v56  ;;  %v20038_v56 = vld [vmem:[%s25672_s6 + $0x4c0] sm:$0xff]  }
 0x604   : > { %18499 = vmatprep.subr.bf16.mxu1 %v19996_v62  ;;  %v20039_v62 = vld [vmem:[%s25672_s6 + $0x3b0] sm:$0xff]  }
 0x605   : > { %18962 = vmatpush3.bf16.msra.mxu0 %v19994_v49  ;;  %v20037_v49 = vld [vmem:[%s25672_s6 + $0x3f8] sm:$0xff]  }
 0x606   : > { %5042 = vmatmul.mubr.bf16.gmra.mrb[40].mxu1 %v22990_v2  ;;  %18967 = vmatprep.subr.bf16.mxu0 %v19997_v36  ;;  %v20003_v2 = vld [vmem:[%s25672_s6 + $0x2d0] sm:$0xff]  }
 0x607   : > { %18500 = vmatpush3.bf16.msra.mxu1 %v19998_v34  ;;  %5349 = vmatprep.mubr.bf16.mxu1 %v22966_v6  ;;  %v20004_v6 = vld [vmem:[%s25672_s6 + $0x320] sm:$0xff]   ;;  %v20041_v34 = vld [vmem:[%s25672_s6 + $0x4c8] sm:$0xff]  }
 0x608   : > { %18964 = vmatmul.mubr.bf16.vlgmr.msra.gmra.mrb[20].mxu0 %v23106_v35  ;;  %18501 = vmatprep.subr.bf16.mxu1 %v19999_v41  ;;  %v20005_v35 = vld [vmem:[%s25672_s6 + $0x368] sm:$0xff]   ;;  %v20042_v41 = vld [vmem:[%s25672_s6 + $0x3b8] sm:$0xff]  }
 0x609   : > { %18968 = vmatpush3.bf16.msra.mxu0 %v19997_v36  ;;  %18983 = vmatprep.mubr.bf16.mxu0 %v23126_v32  ;;  %v20006_v32 = vld [vmem:[%s25672_s6 + $0x2d8] sm:$0xff]   ;;  %v20040_v36 = vld [vmem:[%s25672_s6 + $0x480] sm:$0xff]  }
 0x60a   : > { %18969 = vmatprep.subr.bf16.mxu0 %v20000_v43 }
 0x60b   : > { %18502 = vmatpush3.bf16.msra.mxu1 %v20001_v26  ;;  %v20044_v26 = vld [vmem:[%s25672_s6 + $0x4d0] sm:$0xff]  }
 0x60c   : > { %18503 = vmatprep.subr.bf16.mxu1 %v20002_v17  ;;  %v20047_v17 = vld [vmem:[%s25672_s6 + $0x4d8] sm:$0xff]  }
 0x60d   : > { %18970 = vmatpush3.bf16.msra.mxu0 %v20000_v43  ;;  %v20043_v43 = vld [vmem:[%s25672_s6 + $0x488] sm:$0xff]  }
 0x60e   : > { %18971 = vmatprep.subr.bf16.mxu0 %v20003_v2 }
 0x60f   : > { %18504 = vmatpush3.bf16.msra.mxu1 %v20004_v6  ;;  %v20049_v6 = vld [vmem:[%s25672_s6 + $0x498] sm:$0xff]  }
 0x610   : > { %18505 = vmatprep.subr.bf16.mxu1 %v20005_v35  ;;  %v20050_v35 = vld [vmem:[%s25672_s6 + $0x4e0] sm:$0xff]  }
 0x611   : > { %18972 = vmatpush3.bf16.msra.mxu0 %v20003_v2  ;;  %v20048_v2 = vld [vmem:[%s25672_s6 + $0x448] sm:$0xff]  }
 0x612   : > { %18973 = vmatprep.subr.bf16.mxu0 %v20006_v32 }
 0x613   : > { %18506 = vmatpush3.bf16.msra.mxu1 %v20007_v48  ;;  %v20056_v48 = vld [vmem:[%s25672_s6 + $0x4f0] sm:$0xff]  }
 0x614   : > { %18507 = vmatprep.subr.bf16.mxu1 %v20008_v30  ;;  %v20057_v30 = vld [vmem:[%s25672_s6 + $0x460] sm:$0xff]  }
 0x615   : > { %18974 = vmatpush3.bf16.msra.mxu0 %v20006_v32  ;;  %v20055_v32 = vld [vmem:[%s25672_s6 + $0x4a8] sm:$0xff]  }
 0x616   : > { %18975 = vmatprep.subr.bf16.mxu0 %v20009_v22 }
 0x617   : > { %18508 = vmatpush3.bf16.msra.mxu1 %v20010_v5  ;;  %v20059_v5 = vld [vmem:[%s25672_s6 + $0x4f8] sm:$0xff]  }
 0x618   : > { %18509 = vmatprep.subr.bf16.mxu1 %v20011_v8  ;;  %v20060_v8 = vld [vmem:[%s25672_s6 + $0x468] sm:$0xff]  }
 0x619   : > { %18976 = vmatpush3.bf16.msra.mxu0 %v20009_v22  ;;  %v20058_v22 = vld [vmem:[%s25672_s6 + $0x4b0] sm:$0xff]  }
 0x61a   : > { %18977 = vmatprep.subr.bf16.mxu0 %v20012_v3 }
 0x61b   : > { %18510 = vmatpush3.bf16.msra.mxu1 %v20013_v25  ;;  %v20062_v25 = vld [vmem:[%s25672_s6 + $0x470] sm:$0xff]  }
 0x61c   : > { %18533 = vmatprep.subr.bf16.mxu1 %v20014_v20  ;;  %v20063_v20 = vld [vmem:[%s25672_s6 + $0x478] sm:$0xff]  }
 0x61d   : > { %18978 = vmatpush3.bf16.msra.mxu0 %v20012_v3  ;;  %v20061_v3 = vld [vmem:[%s25672_s6 + $0x4b8] sm:$0xff]  }
 0x61e   : > { %5350 = vmatmul.mubr.bf16.vlgmr.msra.gmra.mrb[44].mxu1 %v22971_v27  ;;  %18979 = vmatprep.subr.bf16.mxu0 %v20015_v9  ;;  %v20021_v27 = vld [vmem:[%s25672_s6 + $0x380] sm:$0xff]  }
 0x61f   : > { %5357 = vmatprep.mubr.bf16.mxu1 %v22977_v18  ;;  %18534 = vmatpush3.bf16.msra.mxu1 %v20016_v11  ;;  %v20022_v18 = vld [vmem:[%s25672_s6 + $0x3d0] sm:$0xff]  }
 0x620   : > { %18535 = vmatprep.subr.bf16.mxu1 %v20017_v50 }
 0x621   : > { %18980 = vmatpush3.bf16.msra.mxu0 %v20015_v9  ;;  %v20064_v9 = vld [vmem:[%s25672_s6 + $0x500] sm:$0xff]  }
 0x622   : > { %18981 = vmatprep.subr.bf16.mxu0 %v20018_v52 }
 0x623   : > { %18536 = vmatpush3.bf16.msra.mxu1 %v20019_v38 }
 0x624   : > { %18537 = vmatprep.subr.bf16.mxu1 %v20020_v0 }
 0x625   : > { %18982 = vmatpush3.bf16.msra.mxu0 %v20018_v52 }
 0x626   : > { %5358 = vmatmul.mubr.bf16.gmra.mrb[48].mxu1 %v22980_v7  ;;  %18987 = vmatprep.subr.bf16.mxu0 %v20021_v27  ;;  %v20027_v7 = vld [vmem:[%s25672_s6 + $0x390] sm:$0xff]  }
 0x627   : > { %18538 = vmatpush3.bf16.msra.mxu1 %v20022_v18  ;;  %5683 = vmatprep.mubr.bf16.mxu1 %v23007_v10  ;;  %v20028_v10 = vld [vmem:[%s25672_s6 + $0x3e0] sm:$0xff]  }
 0x628   : > { %18984 = vmatmul.mubr.bf16.vlgmr.msra.gmra.mrb[20].mxu0 %v23141_v31  ;;  %18539 = vmatprep.subr.bf16.mxu1 %v20023_v24  ;;  %v20029_v31 = vld [vmem:[%s25672_s6 + $0x428] sm:$0xff]  }
 0x629   : > { %18988 = vmatpush3.bf16.msra.mxu0 %v20021_v27  ;;  %19003 = vmatprep.mubr.bf16.mxu0 %v23129_v54  ;;  %v20030_v54 = vld [vmem:[%s25672_s6 + $0x398] sm:$0xff]   ;;  %v20069_v27 = vld [vmem:[%s25672_s6 + $0x528] sm:$0xff]  }
 0x62a   : > { %18989 = vmatprep.subr.bf16.mxu0 %v20024_v47 }
 0x62b   : > { %18540 = vmatpush3.bf16.msra.mxu1 %v20025_v53 }
 0x62c   : > { %18541 = vmatprep.subr.bf16.mxu1 %v20026_v23 }
 0x62d   : > { %18990 = vmatpush3.bf16.msra.mxu0 %v20024_v47  ;;  %v20070_v47 = vld [vmem:[%s25672_s6 + $0x530] sm:$0xff]  }
 0x62e   : > { %18991 = vmatprep.subr.bf16.mxu0 %v20027_v7 }
 0x62f   : > { %18542 = vmatpush3.bf16.msra.mxu1 %v20028_v10 }
 0x630   : > { %18543 = vmatprep.subr.bf16.mxu1 %v20029_v31  ;;  %v20071_v31 = vld [vmem:[%s25672_s6 + $0x538] sm:$0xff]  }
 0x631   : > { %18992 = vmatpush3.bf16.msra.mxu0 %v20027_v7 }
 0x632   : > { %18993 = vmatprep.subr.bf16.mxu0 %v20030_v54 }
 0x633   : > { %18544 = vmatpush3.bf16.msra.mxu1 %v20031_v19 }
 0x634   : > { %18545 = vmatprep.subr.bf16.mxu1 %v20032_v37 }
 0x635   : > { %18994 = vmatpush3.bf16.msra.mxu0 %v20030_v54  ;;  %v16416_v54 = vld [vmem:[#allocation11 + $0x5] ss:$0 sm:$0xff] }
 0x636   : > { %18995 = vmatprep.subr.bf16.mxu0 %v20033_v40 }
 0x637   : > { %18546 = vmatpush3.bf16.msra.mxu1 %v20034_v21 }
 0x638   : > { %18547 = vmatprep.subr.bf16.mxu1 %v20035_v57 }
 0x639   : > { %18996 = vmatpush3.bf16.msra.mxu0 %v20033_v40 }
 0x63a   : > { %18997 = vmatprep.subr.bf16.mxu0 %v20036_v1 }
 0x63b   : > { %18548 = vmatpush3.bf16.msra.mxu1 %v20037_v49 }
 0x63c   : > { %18571 = vmatprep.subr.bf16.mxu1 %v20038_v56 }
 0x63d   : > { %18998 = vmatpush3.bf16.msra.mxu0 %v20036_v1 }
 0x63e   : > { %5684 = vmatmul.mubr.bf16.vlgmr.msra.gmra.mrb[52].mxu1 %v23018_v55  ;;  %18999 = vmatprep.subr.bf16.mxu0 %v20039_v62  ;;  %v20045_v55 = vld [vmem:[%s25672_s6 + $0x440] sm:$0xff]  }
 0x63f   : > { %5691 = vmatprep.mubr.bf16.mxu1 %v23021_v39  ;;  %18572 = vmatpush3.bf16.msra.mxu1 %v20040_v36  ;;  %v20046_v39 = vld [vmem:[%s25672_s6 + $0x490] sm:$0xff]  }
 0x640   : > { %18573 = vmatprep.subr.bf16.mxu1 %v20041_v34 }
 0x641   : > { %19000 = vmatpush3.bf16.msra.mxu0 %v20039_v62 }
 0x642   : > { %19001 = vmatprep.subr.bf16.mxu0 %v20042_v41 }
 0x643   : > { %18574 = vmatpush3.bf16.msra.mxu1 %v20043_v43 }
 0x644   : > { %18575 = vmatprep.subr.bf16.mxu1 %v20044_v26 }
 0x645   : > { %19002 = vmatpush3.bf16.msra.mxu0 %v20042_v41 }
 0x646   : > { %5692 = vmatmul.mubr.bf16.gmra.mrb[56].mxu1 %v23031_v12  ;;  %19007 = vmatprep.subr.bf16.mxu0 %v20045_v55  ;;  %v20051_v12 = vld [vmem:[%s25672_s6 + $0x450] sm:$0xff]  }
 0x647   : > { %18576 = vmatpush3.bf16.msra.mxu1 %v20046_v39  ;;  %5999 = vmatprep.mubr.bf16.mxu1 %v23024_v4  ;;  %v20052_v4 = vld [vmem:[%s25672_s6 + $0x4a0] sm:$0xff]  }
 0x648   : > { %19004 = vmatmul.mubr.bf16.vlgmr.msra.gmra.mrb[20].mxu0 %v23135_v28  ;;  %18577 = vmatprep.subr.bf16.mxu1 %v20047_v17  ;;  %v20053_v28 = vld [vmem:[%s25672_s6 + $0x4e8] sm:$0xff]  }
 0x649   : > { %19008 = vmatpush3.bf16.msra.mxu0 %v20045_v55  ;;  %19023 = vmatprep.mubr.bf16.mxu0 %v23154_v33  ;;  %v20054_v33 = vld [vmem:[%s25672_s6 + $0x458] sm:$0xff]  }
 0x64a   : > { %19009 = vmatprep.subr.bf16.mxu0 %v20048_v2 }
 0x64b   : > { %18578 = vmatpush3.bf16.msra.mxu1 %v20049_v6 }
 0x64c   : > { %18579 = vmatprep.subr.bf16.mxu1 %v20050_v35 }
 0x64d   : > { %19010 = vmatpush3.bf16.msra.mxu0 %v20048_v2 }
 0x64e   : > { %19011 = vmatprep.subr.bf16.mxu0 %v20051_v12 }
 0x64f   : > { %18580 = vmatpush3.bf16.msra.mxu1 %v20052_v4 }
 0x650   : > { %18581 = vmatprep.subr.bf16.mxu1 %v20053_v28 }
 0x651   : > { %19012 = vmatpush3.bf16.msra.mxu0 %v20051_v12 }
 0x652   : > { %19013 = vmatprep.subr.bf16.mxu0 %v20054_v33 }
 0x653   : > { %18582 = vmatpush3.bf16.msra.mxu1 %v20055_v32 }
 0x654   : > { %18583 = vmatprep.subr.bf16.mxu1 %v20056_v48 }
 0x655   : > { %19014 = vmatpush3.bf16.msra.mxu0 %v20054_v33 }
 0x656   : > { %19015 = vmatprep.subr.bf16.mxu0 %v20057_v30 }
 0x657   : > { %18584 = vmatpush3.bf16.msra.mxu1 %v20058_v22 }
 0x658   : > { %18585 = vmatprep.subr.bf16.mxu1 %v20059_v5 }
 0x659   : > { %19016 = vmatpush3.bf16.msra.mxu0 %v20057_v30 }
 0x65a   : > { %19017 = vmatprep.subr.bf16.mxu0 %v20060_v8 }
 0x65b   : > { %18586 = vmatpush3.bf16.msra.mxu1 %v20061_v3 }
 0x65d   : > { %19018 = vmatpush3.bf16.msra.mxu0 %v20060_v8 }
 0x65e   : > { %6000 = vmatmul.mubr.bf16.vlgmr.msra.gmra.mrb[60].mxu1 %v23034_v42  ;;  %19019 = vmatprep.subr.bf16.mxu0 %v20062_v25  ;;  %v20065_v42 = vld [vmem:[%s25672_s6 + $0x508] sm:$0xff]  }
 0x65f   : > { %6007 = vmatprep.mubr.bf16.mxu1 %v23043_v63  ;;  %v20066_v63 = vld [vmem:[%s25672_s6 + $0x510] sm:$0xff]  }
 0x661   : > { %19020 = vmatpush3.bf16.msra.mxu0 %v20062_v25 }
 0x662   : > { %19021 = vmatprep.subr.bf16.mxu0 %v20063_v20 }
 0x665   : > { %19022 = vmatpush3.bf16.msra.mxu0 %v20063_v20 }
 0x666   : > { %6008 = vmatmul.mubr.bf16.gmra.mrb[64].mxu1 %v23046_v60  ;;  %19027 = vmatprep.subr.bf16.mxu0 %v20064_v9  ;;  %v20067_v60 = vld [vmem:[%s25672_s6 + $0x518] sm:$0xff]  }
 0x667   : > { %6232 = vmatprep.mubr.bf16.mxu1 %v22039_v45 }
 0x668   : > { %19024 = vmatmul.mubr.bf16.vlgmr.msra.gmra.mrb[20].mxu0 %v23166_v58  ;;  %v20068_v58 = vld [vmem:[%s25672_s6 + $0x520] sm:$0xff]  }
 0x669   : > { %19028 = vmatpush3.bf16.msra.mxu0 %v20064_v9  ;;  %19043 = vmatprep.mubr.bf16.mxu0 %v23157_v46 }
 0x66a   : > { %19029 = vmatprep.subr.bf16.mxu0 %v20065_v42 }
 0x66d   : > { %19030 = vmatpush3.bf16.msra.mxu0 %v20065_v42 }
 0x66e   : > { %19031 = vmatprep.subr.bf16.mxu0 %v20066_v63 }
 0x671   : > { %19032 = vmatpush3.bf16.msra.mxu0 %v20066_v63  ;;  %v18359_v11 = vpop.f32.mrb[12].mxu1 }
 0x672   : > { %v18360_v50 = vpop.f32.mrb[13].mxu1  ;;  %19033 = vmatprep.subr.bf16.mxu0 %v20067_v60 }
 0x673   : > { %v18361_v46 = vadd.f32 %v18360_v50, %v18359_v11  ;;  %v18362_v52 = vpop.f32.mrb[14].mxu1 }
 0x674   : > { %v18363_v38 = vpop.f32.mrb[15].mxu1 }
 0x675   : > { %19034 = vmatpush3.bf16.msra.mxu0 %v20067_v60  ;;  %v18364_v0 = vadd.f32 %v18363_v38, %v18362_v52  ;;  %v19161_v40 = vadd.f32 %v18361_v46, %v16416_v54 }
 0x676   : > { %19035 = vmatprep.subr.bf16.mxu0 %v20068_v58 }
 0x677   : > { %v19177_v49 = vadd.f32 %v18364_v0, %v16416_v54 }
 0x679   : > { %19036 = vmatpush3.bf16.msra.mxu0 %v20068_v58  ;;  %v18365_v18 = vpop.f32.mrb[16].mxu1 }
 0x67a   : > { %v18366_v24 = vpop.f32.mrb[17].mxu1  ;;  %19037 = vmatprep.subr.bf16.mxu0 %v20069_v27 }
 0x67b   : > { %v18367_v53 = vadd.f32 %v18366_v24, %v18365_v18  ;;  %v18368_v23 = vpop.f32.mrb[18].mxu1 }
 0x67c   : > { %v18369_v7 = vpop.f32.mrb[19].mxu1 }
 0x67d   : > { %19038 = vmatpush3.bf16.msra.mxu0 %v20069_v27  ;;  %v18370_v10 = vadd.f32 %v18369_v7, %v18368_v23  ;;  %v19153_v43 = vadd.f32 %v18367_v53, %v16416_v54 }
 0x67e   : > { %19039 = vmatprep.subr.bf16.mxu0 %v20070_v47 }
 0x67f   : > { %v19169_v17 = vadd.f32 %v18370_v10, %v16416_v54 }
 0x681   : > { %19040 = vmatpush3.bf16.msra.mxu0 %v20070_v47 }
 0x682   : > { %19041 = vmatprep.subr.bf16.mxu0 %v20071_v31 }
 0x685   : > { %19042 = vmatpush3.bf16.msra.mxu0 %v20071_v31 }
 0x688   : > { %19044 = vmatmul.mubr.bf16.vlgmr.msra.gmra.mrb[20].mxu0 %v23160_v44 }
 0x691   : > { %v18397_v19 = vpop.f32.mrb[20].mxu1 }
 0x692   : > { %v18398_v37 = vpop.f32.mrb[21].mxu1 }
 0x693   : > { %v18399_v21 = vadd.f32 %v18398_v37, %v18397_v19  ;;  %v18400_v57 = vpop.f32.mrb[22].mxu1 }
 0x694   : > { %v18401_v1 = vpop.f32.mrb[23].mxu1 }
 0x695   : > { %v19162_v56 = vadd.f32 %v19161_v40, %v18399_v21  ;;  %v18402_v62 = vadd.f32 %v18401_v1, %v18400_v57 }
 0x697   : > { %v19178_v36 = vadd.f32 %v19177_v49, %v18402_v62 }
 0x699   : > { %v18403_v34 = vpop.f32.mrb[24].mxu1 }
 0x69a   : > { %v18404_v41 = vpop.f32.mrb[25].mxu1 }
 0x69b   : > { %v18405_v26 = vadd.f32 %v18404_v41, %v18403_v34  ;;  %v18406_v55 = vpop.f32.mrb[26].mxu1  ;;  %v20074_v34 = vld [vmem:[%s25673_s7 + $0x4] ss:$8 sps:$4 sm:$0xff]  }
 0x69c   : > { %v18407_v39 = vpop.f32.mrb[27].mxu1  ;;  %6200 = vmatprep.subr.bf16.mxu1 %v20074_v34  ;;  %v20135_v34 = vld [vmem:[#allocation7 + $0x30] ss:$8 sps:$4 sm:$0xff]  }
 0x69d   : > { %v19154_v2 = vadd.f32 %v19153_v43, %v18405_v26  ;;  %v18408_v44 = vadd.f32 %v18407_v39, %v18406_v55  ;;  %v20077_v43 = vld [vmem:[%s25673_s7 + $0x14] ss:$8 sps:$4 sm:$0xff]   ;;  %v20075_v39 = vld [vmem:[%s25673_s7 + $0x10] ss:$8 sps:$4 sm:$0xff]  }
 0x69f   : > { %v19170_v6 = vadd.f32 %v19169_v17, %v18408_v44  ;;  %v20078_v44 = vld [vmem:[%s25673_s7 + $0x20] ss:$8 sps:$4 sm:$0xff]  }
 0x6b1   : > { %v18435_v35 = vpop.f32.mrb[28].mxu1 }
 0x6b2   : > { %v18436_v12 = vpop.f32.mrb[29].mxu1 }
 0x6b3   : > { %v18437_v4 = vadd.f32 %v18436_v12, %v18435_v35  ;;  %v18438_v28 = vpop.f32.mrb[30].mxu1  ;;  %v20081_v35 = vld [vmem:[%s25673_s7 + $0x30] ss:$8 sps:$4 sm:$0xff]   ;;  %v20086_v12 = vld [vmem:[%s25673_s7 + $0x44] ss:$8 sps:$4 sm:$0xff]  }
 0x6b4   : > { %v18439_v33 = vpop.f32.mrb[31].mxu1 }
 0x6b5   : > { %v19163_v32 = vadd.f32 %v19162_v56, %v18437_v4  ;;  %v18440_v48 = vadd.f32 %v18439_v33, %v18438_v28  ;;  %v20084_v4 = vld [vmem:[%s25673_s7 + $0x40] ss:$8 sps:$4 sm:$0xff]   ;;  %v20089_v28 = vld [vmem:[%s25673_s7 + $0x54] ss:$8 sps:$4 sm:$0xff]   ;;  %v20087_v33 = vld [vmem:[%s25673_s7 + $0x50] ss:$8 sps:$4 sm:$0xff]  }
 0x6b7   : > { %v19179_v30 = vadd.f32 %v19178_v36, %v18440_v48  ;;  %v20072_v36 = vld [vmem:[%s25673_s7] ss:$8 sps:$4 sm:$0xff]  }
 0x6b8   : > { %6201 = vmatpush1.bf16.msra.mxu1 %v20072_v36  ;;  %v20137_v36 = vld [vmem:[#allocation7 + $0x34] ss:$8 sps:$4 sm:$0xff]  }
 0x6b9   : > { %v18441_v22 = vpop.f32.mrb[32].mxu1  ;;  %6202 = vmatprep.subr.bf16.mxu1 %v20077_v43  ;;  %v20138_v43 = vld [vmem:[#allocation7 + $0x40] ss:$8 sps:$4 sm:$0xff]  }
 0x6ba   : > { %v18442_v5 = vpop.f32.mrb[33].mxu1 }
 0x6bb   : > { %v18443_v8 = vadd.f32 %v18442_v5, %v18441_v22  ;;  %v18444_v3 = vpop.f32.mrb[34].mxu1 }
 0x6bc   : > { %v18445_v25 = vpop.f32.mrb[35].mxu1  ;;  %6203 = vmatpush1.bf16.msra.mxu1 %v20075_v39  ;;  %v20146_v39 = vld [vmem:[#allocation7 + $0x64] ss:$8 sps:$4 sm:$0xff]  }
 0x6bd   : > { %v19155_v20 = vadd.f32 %v19154_v2, %v18443_v8  ;;  %v18446_v9 = vadd.f32 %v18445_v25, %v18444_v3  ;;  %v20080_v2 = vld [vmem:[%s25673_s7 + $0x24] ss:$8 sps:$4 sm:$0xff]  }
 0x6be   : > { %6204 = vmatprep.subr.bf16.mxu1 %v20080_v2  ;;  %v20149_v2 = vld [vmem:[#allocation7 + $0x74] ss:$8 sps:$4 sm:$0xff]  }
 0x6bf   : > { %v19171_v42 = vadd.f32 %v19170_v6, %v18446_v9  ;;  %v20083_v6 = vld [vmem:[%s25673_s7 + $0x34] ss:$8 sps:$4 sm:$0xff]  }
 0x6c0   : > { %6205 = vmatpush1.bf16.msra.mxu1 %v20078_v44  ;;  %v20147_v44 = vld [vmem:[#allocation7 + $0x70] ss:$8 sps:$4 sm:$0xff]  }
 0x6c1   : > { %6206 = vmatprep.subr.bf16.mxu1 %v20083_v6  ;;  %v20152_v6 = vld [vmem:[#allocation7 + $0x84] ss:$8 sps:$4 sm:$0xff]  }
 0x6c4   : > { %6207 = vmatpush1.bf16.msra.mxu1 %v20081_v35 }
 0x6c5   : > { %6208 = vmatprep.subr.bf16.mxu1 %v20086_v12 }
 0x6c8   : > { %6209 = vmatpush1.bf16.msra.mxu1 %v20084_v4 }
 0x6c9   : > { %6210 = vmatprep.subr.bf16.mxu1 %v20089_v28 }
 0x6cc   : > { %6211 = vmatpush1.bf16.msra.mxu1 %v20087_v33 }
 0x6d1   : > { %v18473_v63 = vpop.f32.mrb[36].mxu1 }
 0x6d2   : > { %v18474_v60 = vpop.f32.mrb[37].mxu1 }
 0x6d3   : > { %v18475_v11 = vadd.f32 %v18474_v60, %v18473_v63  ;;  %v18476_v50 = vpop.f32.mrb[38].mxu1 }
 0x6d4   : > { %v18477_v58 = vpop.f32.mrb[39].mxu1 }
 0x6d5   : > { %v19164_v46 = vadd.f32 %v19163_v32, %v18475_v11  ;;  %v18478_v52 = vadd.f32 %v18477_v58, %v18476_v50  ;;  %v20092_v32 = vld [vmem:[%s25673_s7 + $0x64] ss:$8 sps:$4 sm:$0xff]  }
 0x6d6   : > { %6369 = vmatprep.subr.bf16.mxu1 %v20092_v32  ;;  %v20150_v32 = vld [vmem:[#allocation7 + $0x80] ss:$8 sps:$4 sm:$0xff]  }
 0x6d7   : > { %v19180_v38 = vadd.f32 %v19179_v30, %v18478_v52 }
 0x6d9   : > { %v18479_v0 = vpop.f32.mrb[40].mxu1 }
 0x6da   : > { %v18480_v27 = vpop.f32.mrb[41].mxu1 }
 0x6db   : > { %v18481_v18 = vadd.f32 %v18480_v27, %v18479_v0  ;;  %v18482_v24 = vpop.f32.mrb[42].mxu1 }
 0x6dc   : > { %v18483_v47 = vpop.f32.mrb[43].mxu1 }
 0x6dd   : > { %v19156_v53 = vadd.f32 %v19155_v20, %v18481_v18  ;;  %v18484_v23 = vadd.f32 %v18483_v47, %v18482_v24 }
 0x6df   : > { %v19172_v7 = vadd.f32 %v19171_v42, %v18484_v23 }
 0x6f1   : > { %v18511_v10 = vpop.f32.mrb[44].mxu1 }
 0x6f2   : > { %v18512_v31 = vpop.f32.mrb[45].mxu1 }
 0x6f3   : > { %v18513_v54 = vadd.f32 %v18512_v31, %v18511_v10  ;;  %v18514_v19 = vpop.f32.mrb[46].mxu1 }
 0x6f4   : > { %v18515_v37 = vpop.f32.mrb[47].mxu1 }
 0x6f5   : > { %v19165_v40 = vadd.f32 %v19164_v46, %v18513_v54  ;;  %v18516_v21 = vadd.f32 %v18515_v37, %v18514_v19 }
 0x6f7   : > { %v19181_v57 = vadd.f32 %v19180_v38, %v18516_v21  ;;  %v20128_v21 = vld [vmem:[#allocation7 + $0x4] ss:$8 sps:$4 sm:$0xff]  }
 0x6f8   : > { %6822 = vmatprep.subr.bf16.mxu0 %v20128_v21 }
 0x6f9   : > { %v18517_v1 = vpop.f32.mrb[48].mxu1 }
 0x6fa   : > { %v18518_v49 = vpop.f32.mrb[49].mxu1 }
 0x6fb   : > { %v18519_v56 = vadd.f32 %v18518_v49, %v18517_v1  ;;  %v18520_v62 = vpop.f32.mrb[50].mxu1  ;;  %v20131_v1 = vld [vmem:[#allocation7 + $0x14] ss:$8 sps:$4 sm:$0xff]   ;;  %v20129_v49 = vld [vmem:[#allocation7 + $0x10] ss:$8 sps:$4 sm:$0xff]  }
 0x6fc   : > { %v18521_v41 = vpop.f32.mrb[51].mxu1 }
 0x6fd   : > { %v19157_v26 = vadd.f32 %v19156_v53, %v18519_v56  ;;  %v18522_v55 = vadd.f32 %v18521_v41, %v18520_v62  ;;  %v20134_v56 = vld [vmem:[#allocation7 + $0x24] ss:$8 sps:$4 sm:$0xff]   ;;  %v20132_v62 = vld [vmem:[#allocation7 + $0x20] ss:$8 sps:$4 sm:$0xff]  }
 0x6fe   : > { %v20140_v41 = vld [vmem:[#allocation7 + $0x44] ss:$8 sps:$4 sm:$0xff]  }
 0x6ff   : > { %v19173_v17 = vadd.f32 %v19172_v7, %v18522_v55  ;;  %v20141_v55 = vld [vmem:[#allocation7 + $0x50] ss:$8 sps:$4 sm:$0xff]  }
 0x711   : > { %v18549_v48 = vpop.f32.mrb[52].mxu1 }
 0x712   : > { %v18550_v30 = vpop.f32.mrb[53].mxu1 }
 0x713   : > { %v18551_v22 = vadd.f32 %v18550_v30, %v18549_v48  ;;  %v18552_v5 = vpop.f32.mrb[54].mxu1 }
 0x714   : > { %v18553_v8 = vpop.f32.mrb[55].mxu1 }
 0x715   : > { %v19166_v3 = vadd.f32 %v19165_v40, %v18551_v22  ;;  %v18554_v25 = vadd.f32 %v18553_v8, %v18552_v5  ;;  %v20126_v40 = vld [vmem:[#allocation7] ss:$8 sps:$4 sm:$0xff]   ;;  %v20155_v5 = vld [vmem:[#allocation7 + $0x94] ss:$8 sps:$4 sm:$0xff]  }
 0x716   : > { %6823 = vmatpush1.bf16.msra.mxu0 %v20126_v40 }
 0x717   : > { %v19182_v20 = vadd.f32 %v19181_v57, %v18554_v25  ;;  %6824 = vmatprep.subr.bf16.mxu0 %v20131_v1 }
 0x719   : > { %v18555_v9 = vpop.f32.mrb[56].mxu1 }
 0x71a   : > { %v18556_v42 = vpop.f32.mrb[57].mxu1  ;;  %6825 = vmatpush1.bf16.msra.mxu0 %v20129_v49 }
 0x71b   : > { %v18557_v63 = vadd.f32 %v18556_v42, %v18555_v9  ;;  %v18558_v60 = vpop.f32.mrb[58].mxu1  ;;  %6826 = vmatprep.subr.bf16.mxu0 %v20134_v56  ;;  %v20153_v9 = vld [vmem:[#allocation7 + $0x90] ss:$8 sps:$4 sm:$0xff]   ;;  %v20158_v42 = vld [vmem:[#allocation7 + $0xa4] ss:$8 sps:$4 sm:$0xff]  }
 0x71c   : > { %v18559_v11 = vpop.f32.mrb[59].mxu1 }
 0x71d   : > { %v19158_v50 = vadd.f32 %v19157_v26, %v18557_v63  ;;  %v18560_v58 = vadd.f32 %v18559_v11, %v18558_v60  ;;  %v20143_v26 = vld [vmem:[#allocation7 + $0x54] ss:$8 sps:$4 sm:$0xff]   ;;  %v20156_v63 = vld [vmem:[#allocation7 + $0xa0] ss:$8 sps:$4 sm:$0xff]   ;;  %v20159_v11 = vld [vmem:[#allocation7 + $0xb0] ss:$8 sps:$4 sm:$0xff]  }
 0x71e   : > { %6827 = vmatpush1.bf16.msra.mxu0 %v20132_v62  ;;  %v20161_v60 = vld [vmem:[#allocation7 + $0xb4] ss:$8 sps:$4 sm:$0xff]  }
 0x71f   : > { %v19174_v46 = vadd.f32 %v19173_v17, %v18560_v58  ;;  %6828 = vmatprep.subr.bf16.mxu0 %v20137_v36  ;;  %v20144_v17 = vld [vmem:[#allocation7 + $0x60] ss:$8 sps:$4 sm:$0xff]   ;;  %v20095_v36 = vld [vmem:[%s25673_s7 + $0x74] ss:$8 sps:$4 sm:$0xff]  }
 0x722   : > { %6829 = vmatpush1.bf16.msra.mxu0 %v20135_v34 }
 0x723   : > { %6830 = vmatprep.subr.bf16.mxu0 %v20140_v41 }
 0x726   : > { %6831 = vmatpush1.bf16.msra.mxu0 %v20138_v43 }
 0x727   : > { %6832 = vmatprep.subr.bf16.mxu0 %v20143_v26 }
 0x72a   : > { %6833 = vmatpush1.bf16.msra.mxu0 %v20141_v55 }
 0x72b   : > { %6834 = vmatprep.subr.bf16.mxu0 %v20146_v39 }
 0x72e   : > { %6835 = vmatpush1.bf16.msra.mxu0 %v20144_v17 }
 0x72f   : > { %6836 = vmatprep.subr.bf16.mxu0 %v20149_v2 }
 0x731   : > { %v18587_v52 = vpop.f32.mrb[60].mxu1 }
 0x732   : > { %v18588_v38 = vpop.f32.mrb[61].mxu1  ;;  %6837 = vmatpush1.bf16.msra.mxu0 %v20147_v44  ;;  %v20093_v44 = vld [vmem:[%s25673_s7 + $0x70] ss:$8 sps:$4 sm:$0xff]  }
 0x733   : > { %v18589_v0 = vadd.f32 %v18588_v38, %v18587_v52  ;;  %v18590_v27 = vpop.f32.mrb[62].mxu1  ;;  %6838 = vmatprep.subr.bf16.mxu0 %v20152_v6 }
 0x734   : > { %v18591_v18 = vpop.f32.mrb[63].mxu1 }
 0x735   : > { %v18592_v24 = vadd.f32 %v18591_v18, %v18590_v27  ;;  %v19167_v47 = vadd.f32 %v19166_v3, %v18589_v0 }
 0x736   : > { %6839 = vmatpush1.bf16.msra.mxu0 %v20150_v32 }
 0x737   : > { %v19183_v53 = vadd.f32 %v19182_v20, %v18592_v24  ;;  %6840 = vmatprep.subr.bf16.mxu0 %v20155_v5  ;;  %v20096_v5 = vld [vmem:[%s25673_s7 + $0x80] ss:$8 sps:$4 sm:$0xff]  }
 0x739   : > { %v18593_v23 = vpop.f32.mrb[64].mxu1 }
 0x73a   : > { %v18594_v7 = vpop.f32.mrb[65].mxu1  ;;  %6841 = vmatpush1.bf16.msra.mxu0 %v20153_v9  ;;  %v20104_v9 = vld [vmem:[%s25673_s7 + $0xa4] ss:$8 sps:$4 sm:$0xff]  }
 0x73b   : > { %v18595_v10 = vadd.f32 %v18594_v7, %v18593_v23  ;;  %v18596_v31 = vpop.f32.mrb[66].mxu1  ;;  %6842 = vmatprep.subr.bf16.mxu0 %v20158_v42  ;;  %v20102_v42 = vld [vmem:[%s25673_s7 + $0xa0] ss:$8 sps:$4 sm:$0xff]  }
 0x73c   : > { %v18597_v54 = vpop.f32.mrb[67].mxu1 }
 0x73d   : > { %v18598_v19 = vadd.f32 %v18597_v54, %v18596_v31  ;;  %v19159_v37 = vadd.f32 %v19158_v50, %v18595_v10 }
 0x73e   : > { %6843 = vmatpush1.bf16.msra.mxu0 %v20156_v63  ;;  %v20107_v63 = vld [vmem:[%s25673_s7 + $0xb4] ss:$8 sps:$4 sm:$0xff]  }
 0x73f   : > { %v19175_v57 = vadd.f32 %v19174_v46, %v18598_v19  ;;  %6844 = vmatprep.subr.bf16.mxu0 %v20161_v60  ;;  %v20105_v60 = vld [vmem:[%s25673_s7 + $0xb0] ss:$8 sps:$4 sm:$0xff]  }
 0x742   : > { %6845 = vmatpush1.bf16.msra.mxu0 %v20159_v11  ;;  %v20110_v11 = vld [vmem:[%s25673_s7 + $0xc4] ss:$8 sps:$4 sm:$0xff]  }
 0x75b   : > { %v19045_v35 = vpop.f32.mrb[20].mxu0 }
 0x75c   : > { %v19160_v12 = vadd.f32 %v19159_v37, %v19045_v35  ;;  %v6050_v4 = vpop.f32.mrb[21].mxu0 }
 0x75d   : > { %v19168_v28 = vadd.f32 %v19167_v47, %v6050_v4  ;;  %v19046_v33 = vpop.f32.mrb[22].mxu0 }
 0x75e   : > { %v16851_v48 = vmul.f32 -1.442695, %v19160_v12  ;;  %v19176_v30 = vadd.f32 %v19175_v57, %v19046_v33  ;;  %v6053_v22 = vpop.f32.mrb[23].mxu0  ;;  %v20098_v33 = vld [vmem:[%s25673_s7 + $0x84] ss:$8 sps:$4 sm:$0xff]  }
 0x75f   : > { %v16849_v8 = vmul.f32 -1.442695, %v19168_v28  ;;  %v19184_v3 = vadd.f32 %v19183_v53, %v6053_v22 }
 0x760   : > { %21726 = vpow2.f32 %v16851_v48  ;;  %v16852_v25 = vmul.f32 -1.442695, %v19176_v30 }
 0x761   : > { %21728 = vpow2.f32 %v16849_v8  ;;  %v16850_v20 = vmul.f32 -1.442695, %v19184_v3  ;;  %v20101_v3 = vld [vmem:[%s25673_s7 + $0x94] ss:$8 sps:$4 sm:$0xff]  }
 0x762   : > { %21730 = vpow2.f32 %v16852_v25 }
 0x763   : > { %21732 = vpow2.f32 %v16850_v20  ;;  %v20099_v20 = vld [vmem:[%s25673_s7 + $0x90] ss:$8 sps:$4 sm:$0xff]  }
 0x76a   : > { %v21727_v50 = vpop.eup %21726 }
 0x76b   : > { %v21729_v58 = vpop.eup %21728  ;;  %v6083_v46 = vadd.f32 1.0, %v21727_v50  ;;  %v20108_v50 = vld [vmem:[%s25673_s7 + $0xc0] ss:$8 sps:$4 sm:$0xff]  }
 0x76c   : > { %v21731_v52 = vpop.eup %21730  ;;  %v6081_v38 = vadd.f32 1.0, %v21729_v58  ;;  %v20113_v58 = vld [vmem:[%s25673_s7 + $0xd4] ss:$8 sps:$4 sm:$0xff]  }
 0x76d   : > { %v21733_v0 = vpop.eup %21732  ;;  %21734 = vrcp.f32 %v6083_v46  ;;  %v6084_v27 = vadd.f32 1.0, %v21731_v52  ;;  %v20111_v46 = vld [vmem:[%s25673_s7 + $0xd0] ss:$8 sps:$4 sm:$0xff]   ;;  %v20116_v52 = vld [vmem:[%s25673_s7 + $0xe4] ss:$8 sps:$4 sm:$0xff]  }
 0x76e   : > { %21736 = vrcp.f32 %v6081_v38  ;;  %v6082_v18 = vadd.f32 1.0, %v21733_v0  ;;  %v20114_v38 = vld [vmem:[%s25673_s7 + $0xe0] ss:$8 sps:$4 sm:$0xff]   ;;  %v20119_v0 = vld [vmem:[%s25673_s7 + $0xf4] ss:$8 sps:$4 sm:$0xff]  }
 0x76f   : > { %21738 = vrcp.f32 %v6084_v27  ;;  %v20117_v27 = vld [vmem:[%s25673_s7 + $0xf0] ss:$8 sps:$4 sm:$0xff]  }
 0x770   : > { %21740 = vrcp.f32 %v6082_v18  ;;  %v20122_v18 = vld [vmem:[%s25673_s7 + $0x104] ss:$8 sps:$4 sm:$0xff]  }
 0x777   : > { %v21735_v24 = vpop.eup %21734 }
 0x778   : > { %v21737_v47 = vpop.eup %21736  ;;  %v6095_v7 = vmul.f32 %v21735_v24, %v22543_v15  ;;  %v20120_v24 = vld [vmem:[%s25673_s7 + $0x100] ss:$8 sps:$4 sm:$0xff]  }
 0x779   : > { %v21739_v53 = vpop.eup %21738  ;;  %v6093_v31 = vmul.f32 %v21737_v47, %v22539_v13  ;;  %v20125_v47 = vld [vmem:[%s25673_s7 + $0x114] ss:$8 sps:$4 sm:$0xff]  }
 0x77a   : > { %v21741_v23 = vpop.eup %21740  ;;  %v6096_v10 = vmul.f32 %v21739_v53, %v22545_v16  ;;  %v20123_v53 = vld [vmem:[%s25673_s7 + $0x110] ss:$8 sps:$4 sm:$0xff]  }
 0x77b   : > { %v6094_v54 = vmul.f32 %v21741_v23, %v22541_v14  ;;  %v20090_v14 = vld [vmem:[%s25673_s7 + $0x60] ss:$8 sps:$4 sm:$0xff]   ;;  %v20162_v23 = vld [vmem:[#allocation7 + $0xc0] ss:$8 sps:$4 sm:$0xff]  }
 0x77c   : > { %v6099_v19 = vpack.c.bf16 %v6096_v10, %v6095_v7  ;;  %v20164_v7 = vld [vmem:[#allocation7 + $0xc4] ss:$8 sps:$4 sm:$0xff]   ;;  %v20165_v10 = vld [vmem:[#allocation7 + $0xd0] ss:$8 sps:$4 sm:$0xff]  }
 0x77d   : > { %v6098_v37 = vpack.c.bf16 %v6094_v54, %v6093_v31  ;;  %6846 = vmatprep.subr.bf16.mxu0 %v20164_v7  ;;  %v20167_v31 = vld [vmem:[#allocation7 + $0xd4] ss:$8 sps:$4 sm:$0xff]   ;;  %v20170_v54 = vld [vmem:[#allocation7 + $0xe4] ss:$8 sps:$4 sm:$0xff]  }
 0x77e   : > { %v6109_v40 = vshrl.u32 %v6099_v19, 16  ;;  %v6112_v49 = vshll.u32 %v6099_v19, 16  ;;  %6847 = vmatpush1.bf16.msra.mxu0 %v20162_v23  ;;  %v20168_v19 = vld [vmem:[#allocation7 + $0xe0] ss:$8 sps:$4 sm:$0xff]   ;;  %v20177_v23 = vld [vmem:[#allocation7 + $0x110] ss:$8 sps:$4 sm:$0xff]  }
 0x77f   : > { %v6102_v57 = vshrl.u32 %v6098_v37, 16  ;;  %v6105_v56 = vshll.u32 %v6098_v37, 16  ;;  %6848 = vmatprep.subr.bf16.mxu0 %v20167_v31  ;;  %v20171_v37 = vld [vmem:[#allocation7 + $0xf0] ss:$8 sps:$4 sm:$0xff]   ;;  %v20182_v31 = vld [vmem:[#allocation7 + $0x124] ss:$8 sps:$4 sm:$0xff]  }
 0x780   : > { %v6111_v1 = vrot.slane %v6109_v40, 7  ;;  %v20173_v40 = vld [vmem:[#allocation7 + $0xf4] ss:$8 sps:$4 sm:$0xff]  }
 0x781   : > { %v6104_v15 = vrot.slane %v6102_v57, 7  ;;  %v20176_v57 = vld [vmem:[#allocation7 + $0x104] ss:$8 sps:$4 sm:$0xff]  }
 0x782   : > { %v6114_v16 = vor.u32 %v6112_v49, %v6111_v1  ;;  %v6121_v13 = vsel %vm23571_vm15, %v6111_v1, 0  ;;  %6849 = vmatpush1.bf16.msra.mxu0 %v20165_v10 }
 0x783   : > { %v6107_v62 = vor.u32 %v6105_v56, %v6104_v15  ;;  %v6299_v41 = vshll.u32 %v6121_v13, 16  ;;  %v6448_v39 = vrot.slane %v6121_v13, 1  ;;  %6850 = vmatprep.subr.bf16.mxu0 %v20170_v54 }
 0x784   : > { %v6115_v34 = vsel %vm6100_vm14, %v6104_v15, %v6114_v16 }
 0x785   : > { %v6120_v43 = vsel %vm23571_vm15, 0, %v6107_v62  ;;  %v6291_v26 = vshll.u32 %v6115_v34, 16  ;;  %v6446_v55 = vrot.slane %v6115_v34, 1  ;;  %v6295_v35 = vshrl.u32 %v6115_v34, 16 }
 0x786   : > { %16865 = vmatmul.mubr.msk.bf16.vlgmr.msra.gmra.mrb[68].mxu1 %vm1892_vm13, %v6120_v43  ;;  %v6287_v17 = vshll.u32 %v6120_v43, 16  ;;  %v6445_v2 = vrot.slane %v6120_v43, 1  ;;  %v6285_v4 = vshrl.u32 %v6120_v43, 16  ;;  %v6301_v30 = vrot.slane %v6299_v41, 1  ;;  %6851 = vmatpush1.bf16.msra.mxu0 %v20168_v19 }
 0x787   : > { %6370 = vmatpush1.bf16.msra.mxu1 %v20090_v14  ;;  %6242 = vmatprep.mubr.bf16.mxu1 %v22039_v45  ;;  %v6293_v6 = vrot.slane %v6291_v26, 1  ;;  %v6449_v12 = vsel %vm808_vm6, %v6446_v55, %v6448_v39 }
 0x788   : > { %v6289_v28 = vrot.slane %v6287_v17, 1  ;;  %6371 = vmatprep.subr.bf16.mxu1 %v20095_v36  ;;  %v6447_v32 = vsel %vm808_vm6, %v6445_v2, %v6446_v55  ;;  %6852 = vmatprep.subr.bf16.mxu0 %v20173_v40 }
 0x789   : > { %v6297_v48 = vor.u32 %v6295_v35, %v6293_v6 }
 0x78a   : > { %v6290_v22 = vor.u32 %v6289_v28, %v6285_v4  ;;  %6853 = vmatpush1.bf16.msra.mxu0 %v20171_v37 }
 0x78b   : > { %6372 = vmatpush1.bf16.msra.mxu1 %v20093_v44  ;;  %v6302_v8 = vsel %vm723_vm5, %v6297_v48, %v6301_v30  ;;  %7131 = vmatprep.subr.bf16.mxu0 %v20176_v57 }
 0x78c   : > { %6373 = vmatprep.subr.bf16.mxu1 %v20098_v33  ;;  %v6294_v25 = vsel %vm723_vm5, %v6290_v22, %v6293_v6 }
 0x78e   : > { %16866 = vmatmul.mubr.msk.bf16.gmra.mrb[72].mxu1 %vm1892_vm13, %v6115_v34 }
 0x78f   : > { %6374 = vmatpush1.bf16.msra.mxu1 %v20096_v5  ;;  %6401 = vmatprep.mubr.bf16.mxu1 %v22039_v45 }
 0x790   : > { %6375 = vmatprep.subr.bf16.mxu1 %v20101_v3 }
 0x793   : > { %6376 = vmatpush1.bf16.msra.mxu1 %v20099_v20 }
 0x794   : > { %6377 = vmatprep.subr.bf16.mxu1 %v20104_v9 }
 0x797   : > { %6378 = vmatpush1.bf16.msra.mxu1 %v20102_v42 }
 0x798   : > { %6379 = vmatprep.subr.bf16.mxu1 %v20107_v63 }
 0x79b   : > { %6380 = vmatpush1.bf16.msra.mxu1 %v20105_v60 }
 0x79c   : > { %6516 = vmatprep.subr.bf16.mxu1 %v20110_v11  ;;  %v20174_v11 = vld [vmem:[#allocation7 + $0x100] ss:$8 sps:$4 sm:$0xff]  }
 0x79e   : > { %16891 = vmatmul.mubr.msk.bf16.vlgmr.msra.gmra.mrb[68].mxu1 %vm1892_vm13, %v6294_v25 }
 0x79f   : > { %6517 = vmatpush1.bf16.msra.mxu1 %v20108_v50  ;;  %6411 = vmatprep.mubr.bf16.mxu1 %v22039_v45 }
 0x7a0   : > { %6518 = vmatprep.subr.bf16.mxu1 %v20113_v58 }
 0x7a3   : > { %6519 = vmatpush1.bf16.msra.mxu1 %v20111_v46 }
 0x7a4   : > { %6520 = vmatprep.subr.bf16.mxu1 %v20116_v52 }
 0x7a6   : > { %16892 = vmatmul.mubr.msk.bf16.gmra.mrb[72].mxu1 %vm1892_vm13, %v6302_v8 }
 0x7a7   : > { %6521 = vmatpush1.bf16.msra.mxu1 %v20114_v38  ;;  %6548 = vmatprep.mubr.bf16.mxu1 %v22039_v45  ;;  %v20179_v38 = vld [vmem:[#allocation7 + $0x114] ss:$8 sps:$4 sm:$0xff]  }
 0x7a8   : > { %6522 = vmatprep.subr.bf16.mxu1 %v20119_v0 }
 0x7ab   : > { %6523 = vmatpush1.bf16.msra.mxu1 %v20117_v27 }
 0x7ac   : > { %6524 = vmatprep.subr.bf16.mxu1 %v20122_v18 }
 0x7af   : > { %6525 = vmatpush1.bf16.msra.mxu1 %v20120_v24 }
 0x7b0   : > { %6526 = vmatprep.subr.bf16.mxu1 %v20125_v47 }
 0x7b3   : > { %6527 = vmatpush1.bf16.msra.mxu1 %v20123_v53 }
 0x7b6   : > { %16917 = vmatmul.mubr.msk.bf16.vlgmr.msra.gmra.mrb[68].mxu1 %vm1892_vm13, %v6447_v32 }
 0x7b7   : > { %6558 = vmatprep.mubr.bf16.mxu1 %v22039_v45  ;;  %v6097_v45 = vld [vmem:[#allocation11 + $0x6] sm:$0x3] }
 0x7b8   : > { %v6257_v1 = vrot.slane %v6097_v45, %v22794_v51  ;;  %v6261_v49 = vrot.slane %v6097_v45, %v22797_v61 }
 0x7be   : > { %16918 = vmatmul.mubr.msk.bf16.gmra.mrb[72].mxu1 %vm1892_vm13, %v6449_v12 }
 0x889   : > { %v6550_v15 = vpop.f32.mrb[68].mxu1 }
 0x88a   : > { %v19185_v56 = vadd.f32 %v6550_v15, %v6257_v1  ;;  %v6552_v16 = vpop.f32.mrb[69].mxu1 }
 0x88b   : > { %v19186_v13 = vadd.f32 %v6552_v16, %v6261_v49  ;;  %v6554_v14 = vpop.f32.mrb[70].mxu1 }
 0x88c   : > { %v19187_v62 = vadd.f32 %v6554_v14, %v6257_v1  ;;  %v6556_v36 = vpop.f32.mrb[71].mxu1  ;;  %v6577_v41 = vmax.f32 %v19185_v56, 0.0  ;;  %v20180_v56 = vld [vmem:[#allocation7 + $0x120] ss:$8 sps:$4 sm:$0xff]  }
 0x88d   : > { %v19188_v34 = vadd.f32 %v6556_v36, %v6261_v49  ;;  %v6578_v26 = vmax.f32 %v19186_v13, 0.0 }
 0x88e   : > { %v6579_v43 = vmax.f32 %v19187_v62, 0.0 }
 0x88f   : > { %v6580_v55 = vmax.f32 %v19188_v34, 0.0 }
 0x890   : > { %v6586_v39 = vpack.c.bf16 %v6579_v43, %v6577_v41  ;;  %v20185_v41 = vld [vmem:[#allocation7 + $0x134] ss:$8 sps:$4 sm:$0xff]  }
 0x891   : > { %v6587_v17 = vpack.c.bf16 %v6580_v55, %v6578_v26  ;;  %v6560_v2 = vpop.f32.mrb[72].mxu1 }
 0x892   : > { %v6591_v44 = vshrl.u32 %v6586_v39, 16  ;;  %v19189_v6 = vadd.f32 %v6560_v2, %v6257_v1  ;;  %v6562_v35 = vpop.f32.mrb[73].mxu1  ;;  %v6594_v32 = vshll.u32 %v6586_v39, 16 }
 0x893   : > { %v6598_v12 = vshrl.u32 %v6587_v17, 16  ;;  %v19190_v4 = vadd.f32 %v6562_v35, %v6261_v49  ;;  %v6564_v28 = vpop.f32.mrb[74].mxu1  ;;  %v6601_v5 = vshll.u32 %v6587_v17, 16 }
 0x894   : > { %v6593_v33 = vrot.slane %v6591_v44, 7  ;;  %v19191_v48 = vadd.f32 %v6564_v28, %v6257_v1  ;;  %v6566_v30 = vpop.f32.mrb[75].mxu1  ;;  %v6581_v3 = vmax.f32 %v19189_v6, 0.0 }
 0x895   : > { %v6600_v22 = vrot.slane %v6598_v12, 7  ;;  %v19192_v8 = vadd.f32 %v6566_v30, %v6261_v49  ;;  %v6582_v9 = vmax.f32 %v19190_v4, 0.0  ;;  %v20270_v12 = vld [vmem:[#allocation8 + $0x8] ss:$16 sps:$4 sm:$0xff]   ;;  %v20272_v4 = vld [vmem:[#allocation8 + $0xc] ss:$16 sps:$4 sm:$0xff]  }
 0x896   : > { %v6583_v25 = vmax.f32 %v19191_v48, 0.0  ;;  %v6596_v20 = vor.u32 %v6594_v32, %v6593_v33  ;;  %7954 = vmatprep.subr.bf16.mxu1 %v20272_v4  ;;  %v20336_v4 = vld [vmem:[#allocation8 + $0x168] ss:$16 sps:$4 sm:$0xff]  }
 0x897   : > { %v6584_v42 = vmax.f32 %v19192_v8, 0.0  ;;  %v6603_v63 = vor.u32 %v6601_v5, %v6600_v22  ;;  %7955 = vmatpush1.bf16.msra.mxu1 %v20270_v12  ;;  %v20218_v12 = vld [vmem:[#allocation7 + $0x1e4] ss:$8 sps:$4 sm:$0xff]  }
 0x898   : > { %v6588_v60 = vpack.c.bf16 %v6583_v25, %v6581_v3  ;;  %v6626_v50 = vsel %vm23571_vm15, 0, %v6596_v20  ;;  %v20278_v20 = vld [vmem:[#allocation8 + $0x2c] ss:$16 sps:$4 sm:$0xff]  }
 0x899   : > { %v6589_v58 = vpack.c.bf16 %v6584_v42, %v6582_v9  ;;  %v6627_v46 = vsel %vm23571_vm15, 0, %v6603_v63  ;;  %v6930_v52 = vshll.u32 %v6626_v50, 16  ;;  %v6928_v40 = vshrl.u32 %v6626_v50, 16  ;;  %7956 = vmatprep.subr.bf16.mxu1 %v20278_v20  ;;  %v20230_v20 = vld [vmem:[#allocation7 + $0x224] ss:$8 sps:$4 sm:$0xff]  }
 0x89a   : > { %v6605_v0 = vshrl.u32 %v6588_v60, 16  ;;  %6854 = vmatprep.mubr.bf16.mxu0 %v6627_v46  ;;  %v6942_v18 = vshll.u32 %v6627_v46, 16  ;;  %v6608_v47 = vshll.u32 %v6588_v60, 16  ;;  %v6940_v37 = vshrl.u32 %v6627_v46, 16 }
 0x89b   : > { %v6613_v27 = vshrl.u32 %v6589_v58, 16  ;;  %6855 = vmatmul.mubr.bf16.vlgmr.msra.gmra.mrb[24].mxu0 %v6626_v50  ;;  %v6932_v53 = vrot.slane %v6930_v52, 1  ;;  %v6616_v10 = vshll.u32 %v6589_v58, 16  ;;  %v7229_v49 = vrot.slane %v6626_v50, 1  ;;  %v20186_v50 = vld [vmem:[#allocation7 + $0x140] ss:$8 sps:$4 sm:$0xff]  }
 0x89c   : > { %v6607_v24 = vrot.slane %v6605_v0, 7  ;;  %7132 = vmatpush1.bf16.msra.mxu0 %v20174_v11  ;;  %v6944_v1 = vrot.slane %v6942_v18, 1  ;;  %v7232_v14 = vrot.slane %v6627_v46, 1  ;;  %v20276_v11 = vld [vmem:[#allocation8 + $0x28] ss:$16 sps:$4 sm:$0xff]  }
 0x89d   : > { %v6615_v7 = vrot.slane %v6613_v27, 7  ;;  %7133 = vmatprep.subr.bf16.mxu0 %v20179_v38  ;;  %v6933_v15 = vor.u32 %v6932_v53, %v6928_v40  ;;  %v20284_v46 = vld [vmem:[#allocation8 + $0x4c] ss:$16 sps:$4 sm:$0xff]   ;;  %7957 = vmatpush1.bf16.msra.mxu1 %v20276_v11  ;;  %v20282_v38 = vld [vmem:[#allocation8 + $0x48] ss:$16 sps:$4 sm:$0xff]  }
 0x89e   : > { %v6610_v54 = vor.u32 %v6608_v47, %v6607_v24  ;;  %v6628_v19 = vsel %vm23571_vm15, %v6607_v24, 0  ;;  %v6945_v32 = vor.u32 %v6944_v1, %v6940_v37  ;;  %v20191_v52 = vld [vmem:[#allocation7 + $0x154] ss:$8 sps:$4 sm:$0xff]   ;;  %v20189_v0 = vld [vmem:[#allocation7 + $0x150] ss:$8 sps:$4 sm:$0xff]   ;;  %7958 = vmatprep.subr.bf16.mxu1 %v20284_v46 }
 0x89f   : > { %v6618_v57 = vor.u32 %v6616_v10, %v6615_v7  ;;  %v6629_v45 = vsel %vm23571_vm15, %v6615_v7, 0  ;;  %v6955_v13 = vshll.u32 %v6628_v19, 16  ;;  %v7235_v43 = vrot.slane %v6628_v19, 1  ;;  %v20290_v27 = vld [vmem:[#allocation8 + $0x6c] ss:$16 sps:$4 sm:$0xff]  }
 0x8a0   : > { %7134 = vmatpush1.bf16.msra.mxu0 %v20177_v23  ;;  %v6611_v16 = vsel %vm6100_vm14, %v6593_v33, %v6610_v54  ;;  %v6963_v39 = vshll.u32 %v6629_v45, 16  ;;  %v7237_v17 = vrot.slane %v6629_v45, 1  ;;  %v20183_v33 = vld [vmem:[#allocation7 + $0x130] ss:$8 sps:$4 sm:$0xff]   ;;  %v20194_v18 = vld [vmem:[#allocation7 + $0x164] ss:$8 sps:$4 sm:$0xff]  }
 0x8a1   : > { %v6619_v62 = vsel %vm6100_vm14, %v6600_v22, %v6618_v57  ;;  %7135 = vmatprep.subr.bf16.mxu0 %v20182_v31  ;;  %v6935_v36 = vshll.u32 %v6611_v16, 16  ;;  %v7230_v34 = vrot.slane %v6611_v16, 1  ;;  %v6951_v26 = vshrl.u32 %v6611_v16, 16  ;;  %v20188_v22 = vld [vmem:[#allocation7 + $0x144] ss:$8 sps:$4 sm:$0xff]   ;;  %7959 = vmatpush1.bf16.msra.mxu1 %v20282_v38 }
 0x8a2   : > { %6864 = vmatprep.mubr.bf16.mxu0 %v6619_v62  ;;  %v6947_v55 = vshll.u32 %v6619_v62, 16  ;;  %v7233_v44 = vrot.slane %v6619_v62, 1  ;;  %v6959_v28 = vshrl.u32 %v6619_v62, 16  ;;  %v6957_v30 = vrot.slane %v6955_v13, 1  ;;  %v20288_v24 = vld [vmem:[#allocation8 + $0x68] ss:$16 sps:$4 sm:$0xff]   ;;  %7960 = vmatprep.subr.bf16.mxu1 %v20290_v27 }
 0x8a3   : > { %6865 = vmatmul.mubr.bf16.gmra.mrb[28].mxu0 %v6611_v16  ;;  %v6937_v2 = vrot.slane %v6935_v36, 1  ;;  %v23677_v6 = vsel %vm808_vm6, %v7229_v49, %v7230_v34  ;;  %v23680_v35 = vsel %vm808_vm6, %v7230_v34, %v7235_v43  ;;  %v6965_v63 = vrot.slane %v6963_v39, 1  ;;  %v20192_v47 = vld [vmem:[#allocation7 + $0x160] ss:$8 sps:$4 sm:$0xff]   ;;  %v20296_v53 = vld [vmem:[#allocation8 + $0x8c] ss:$16 sps:$4 sm:$0xff]  }
 0x8a4   : > { %7136 = vmatpush1.bf16.msra.mxu0 %v20180_v56  ;;  %v6949_v48 = vrot.slane %v6947_v55, 1  ;;  %v23686_v3 = vsel %vm808_vm6, %v7232_v14, %v7233_v44  ;;  %v23689_v25 = vsel %vm808_vm6, %v7233_v44, %v7237_v17  ;;  %v20197_v23 = vld [vmem:[#allocation7 + $0x174] ss:$8 sps:$4 sm:$0xff]   ;;  %v20294_v7 = vld [vmem:[#allocation8 + $0x88] ss:$16 sps:$4 sm:$0xff]  }
 0x8a5   : > { %7137 = vmatprep.subr.bf16.mxu0 %v20185_v41  ;;  %v23683_v5 = vsel %vm723_vm5, %v6933_v15, %v6937_v2  ;;  %v6953_v8 = vor.u32 %v6951_v26, %v6937_v2  ;;  %7961 = vmatpush1.bf16.msra.mxu1 %v20288_v24  ;;  %v20195_v10 = vld [vmem:[#allocation7 + $0x170] ss:$8 sps:$4 sm:$0xff]   ;;  %v20302_v31 = vld [vmem:[#allocation8 + $0xac] ss:$16 sps:$4 sm:$0xff]   ;;  %v20198_v37 = vld [vmem:[#allocation7 + $0x180] ss:$8 sps:$4 sm:$0xff]  }
 0x8a6   : > { %v6950_v9 = vsel %vm723_vm5, %v6945_v32, %v6949_v48  ;;  %v6961_v42 = vor.u32 %v6959_v28, %v6949_v48  ;;  %7962 = vmatprep.subr.bf16.mxu1 %v20296_v53  ;;  %v20200_v54 = vld [vmem:[#allocation7 + $0x184] ss:$8 sps:$4 sm:$0xff]   ;;  %v20300_v19 = vld [vmem:[#allocation8 + $0xa8] ss:$16 sps:$4 sm:$0xff]   ;;  %v20203_v57 = vld [vmem:[#allocation7 + $0x194] ss:$8 sps:$4 sm:$0xff]  }
 0x8a7   : > { %7163 = vmatprep.mubr.bf16.mxu0 %v6950_v9  ;;  %v23693_v60 = vsel %vm723_vm5, %v6953_v8, %v6957_v30  ;;  %v20308_v40 = vld [vmem:[#allocation8 + $0xcc] ss:$16 sps:$4 sm:$0xff]   ;;  %v20306_v45 = vld [vmem:[#allocation8 + $0xc8] ss:$16 sps:$4 sm:$0xff]  }
 0x8a8   : > { %7138 = vmatpush1.bf16.msra.mxu0 %v20183_v33  ;;  %v23696_v58 = vsel %vm723_vm5, %v6961_v42, %v6965_v63  ;;  %v20201_v1 = vld [vmem:[#allocation7 + $0x190] ss:$8 sps:$4 sm:$0xff]   ;;  %v20314_v49 = vld [vmem:[#allocation8 + $0xec] ss:$16 sps:$4 sm:$0xff]   ;;  %v20204_v16 = vld [vmem:[#allocation7 + $0x1a0] ss:$8 sps:$4 sm:$0xff]  }
 0x8a9   : > { %7139 = vmatprep.subr.bf16.mxu0 %v20188_v22  ;;  %7963 = vmatpush1.bf16.msra.mxu1 %v20294_v7  ;;  %v20206_v15 = vld [vmem:[#allocation7 + $0x1a4] ss:$8 sps:$4 sm:$0xff]   ;;  %v20312_v56 = vld [vmem:[#allocation8 + $0xe8] ss:$16 sps:$4 sm:$0xff]   ;;  %v20209_v14 = vld [vmem:[#allocation7 + $0x1b4] ss:$8 sps:$4 sm:$0xff]  }
 0x8aa   : > { %7964 = vmatprep.subr.bf16.mxu1 %v20302_v31  ;;  %v20320_v13 = vld [vmem:[#allocation8 + $0x10c] ss:$16 sps:$4 sm:$0xff]   ;;  %v20318_v62 = vld [vmem:[#allocation8 + $0x108] ss:$16 sps:$4 sm:$0xff]  }
 0x8ab   : > { %v20207_v36 = vld [vmem:[#allocation7 + $0x1b0] ss:$8 sps:$4 sm:$0xff]   ;;  %v20326_v34 = vld [vmem:[#allocation8 + $0x12c] ss:$16 sps:$4 sm:$0xff]   ;;  %v20210_v26 = vld [vmem:[#allocation7 + $0x1c0] ss:$8 sps:$4 sm:$0xff]  }
 0x8ac   : > { %7140 = vmatpush1.bf16.msra.mxu0 %v20186_v50  ;;  %v20212_v41 = vld [vmem:[#allocation7 + $0x1c4] ss:$8 sps:$4 sm:$0xff]   ;;  %v20324_v43 = vld [vmem:[#allocation8 + $0x128] ss:$16 sps:$4 sm:$0xff]   ;;  %v20215_v39 = vld [vmem:[#allocation7 + $0x1d4] ss:$8 sps:$4 sm:$0xff]  }
 0x8ad   : > { %7141 = vmatprep.subr.bf16.mxu0 %v20191_v52  ;;  %7965 = vmatpush1.bf16.msra.mxu1 %v20300_v19  ;;  %v20332_v55 = vld [vmem:[#allocation8 + $0x14c] ss:$16 sps:$4 sm:$0xff]   ;;  %v20330_v17 = vld [vmem:[#allocation8 + $0x148] ss:$16 sps:$4 sm:$0xff]  }
 0x8ae   : > { %7966 = vmatprep.subr.bf16.mxu1 %v20308_v40  ;;  %v20213_v2 = vld [vmem:[#allocation7 + $0x1d0] ss:$8 sps:$4 sm:$0xff]   ;;  %v20338_v44 = vld [vmem:[#allocation8 + $0x16c] ss:$16 sps:$4 sm:$0xff]   ;;  %v20216_v28 = vld [vmem:[#allocation7 + $0x1e0] ss:$8 sps:$4 sm:$0xff]  }
 0x8af   : > { %v20221_v33 = vld [vmem:[#allocation7 + $0x1f4] ss:$8 sps:$4 sm:$0xff]   ;;  %v20219_v32 = vld [vmem:[#allocation7 + $0x1f0] ss:$8 sps:$4 sm:$0xff]   ;;  %v20224_v48 = vld [vmem:[#allocation7 + $0x204] ss:$8 sps:$4 sm:$0xff]  }
 0x8b0   : > { %7142 = vmatpush1.bf16.msra.mxu0 %v20189_v0  ;;  %v20222_v30 = vld [vmem:[#allocation7 + $0x200] ss:$8 sps:$4 sm:$0xff]   ;;  %v20227_v22 = vld [vmem:[#allocation7 + $0x214] ss:$8 sps:$4 sm:$0xff]   ;;  %v20225_v8 = vld [vmem:[#allocation7 + $0x210] ss:$8 sps:$4 sm:$0xff]  }
 0x8b1   : > { %7143 = vmatprep.subr.bf16.mxu0 %v20194_v18  ;;  %7967 = vmatpush1.bf16.msra.mxu1 %v20306_v45  ;;  %v20228_v9 = vld [vmem:[#allocation7 + $0x220] ss:$8 sps:$4 sm:$0xff]   ;;  %v20233_v42 = vld [vmem:[#allocation7 + $0x234] ss:$8 sps:$4 sm:$0xff]   ;;  %v20231_v63 = vld [vmem:[#allocation7 + $0x230] ss:$8 sps:$4 sm:$0xff]  }
 0x8b2   : > { %7968 = vmatprep.subr.bf16.mxu1 %v20314_v49  ;;  %v20236_v11 = vld [vmem:[#allocation7 + $0x244] ss:$8 sps:$4 sm:$0xff]   ;;  %v20239_v50 = vld [vmem:[#allocation7 + $0x254] ss:$8 sps:$4 sm:$0xff]   ;;  %v20240_v52 = vld [vmem:[#allocation7 + $0x260] ss:$8 sps:$4 sm:$0xff]  }
 0x8b3   : > { %v20242_v46 = vld [vmem:[#allocation7 + $0x264] ss:$8 sps:$4 sm:$0xff]   ;;  %v20245_v38 = vld [vmem:[#allocation7 + $0x274] ss:$8 sps:$4 sm:$0xff]   ;;  %v20249_v18 = vld [vmem:[#allocation7 + $0x290] ss:$8 sps:$4 sm:$0xff]  }
 0x8b4   : > { %7144 = vmatpush1.bf16.msra.mxu0 %v20192_v47  ;;  %v20248_v0 = vld [vmem:[#allocation7 + $0x284] ss:$8 sps:$4 sm:$0xff]   ;;  %v20251_v27 = vld [vmem:[#allocation7 + $0x294] ss:$8 sps:$4 sm:$0xff]   ;;  %v20252_v47 = vld [vmem:[#allocation7 + $0x2a0] ss:$8 sps:$4 sm:$0xff]  }
 0x8b5   : > { %7145 = vmatprep.subr.bf16.mxu0 %v20197_v23  ;;  %7969 = vmatpush1.bf16.msra.mxu1 %v20312_v56  ;;  %v20254_v24 = vld [vmem:[#allocation7 + $0x2a4] ss:$8 sps:$4 sm:$0xff]   ;;  %v20257_v53 = vld [vmem:[#allocation7 + $0x2b4] ss:$8 sps:$4 sm:$0xff]   ;;  %v20255_v23 = vld [vmem:[#allocation7 + $0x2b0] ss:$8 sps:$4 sm:$0xff]  }
 0x8b6   : > { %7970 = vmatprep.subr.bf16.mxu1 %v20320_v13  ;;  %v20260_v7 = vld [vmem:[#allocation7 + $0x2c4] ss:$8 sps:$4 sm:$0xff]   ;;  %v20263_v31 = vld [vmem:[#allocation7 + $0x2d4] ss:$8 sps:$4 sm:$0xff]  }
 0x8b7   : > { %v20266_v19 = vld [vmem:[#allocation7 + $0x2e4] ss:$8 sps:$4 sm:$0xff]   ;;  %v20269_v40 = vld [vmem:[#allocation7 + $0x2f4] ss:$8 sps:$4 sm:$0xff]  }
 0x8b8   : > { %7146 = vmatpush1.bf16.msra.mxu0 %v20195_v10  ;;  %v20258_v10 = vld [vmem:[#allocation7 + $0x2c0] ss:$8 sps:$4 sm:$0xff]   ;;  %v20275_v45 = vld [vmem:[#allocation8 + $0x4] ss:$16 sps:$4 sm:$0xff]  }
 0x8b9   : > { %7147 = vmatprep.subr.bf16.mxu0 %v20200_v54  ;;  %7971 = vmatpush1.bf16.msra.mxu1 %v20318_v62  ;;  %v20261_v54 = vld [vmem:[#allocation7 + $0x2d0] ss:$8 sps:$4 sm:$0xff]   ;;  %v20281_v49 = vld [vmem:[#allocation8 + $0x24] ss:$16 sps:$4 sm:$0xff]  }
 0x8ba   : > { %7972 = vmatprep.subr.bf16.mxu1 %v20326_v34  ;;  %v20287_v56 = vld [vmem:[#allocation8 + $0x44] ss:$16 sps:$4 sm:$0xff]  }
 0x8bb   : > { %v20293_v13 = vld [vmem:[#allocation8 + $0x64] ss:$16 sps:$4 sm:$0xff]  }
 0x8bc   : > { %7148 = vmatpush1.bf16.msra.mxu0 %v20198_v37  ;;  %v20264_v37 = vld [vmem:[#allocation7 + $0x2e0] ss:$8 sps:$4 sm:$0xff]   ;;  %v20299_v62 = vld [vmem:[#allocation8 + $0x84] ss:$16 sps:$4 sm:$0xff]  }
 0x8bd   : > { %7149 = vmatprep.subr.bf16.mxu0 %v20203_v57  ;;  %7973 = vmatpush1.bf16.msra.mxu1 %v20324_v43  ;;  %v20267_v57 = vld [vmem:[#allocation7 + $0x2f0] ss:$8 sps:$4 sm:$0xff]   ;;  %v20311_v34 = vld [vmem:[#allocation8 + $0xc4] ss:$16 sps:$4 sm:$0xff]  }
 0x8be   : > { %7974 = vmatprep.subr.bf16.mxu1 %v20332_v55  ;;  %v20317_v43 = vld [vmem:[#allocation8 + $0xe4] ss:$16 sps:$4 sm:$0xff]   ;;  %v20321_v55 = vld [vmem:[#allocation8 + $0x100] ss:$16 sps:$4 sm:$0xff]  }
 0x8c0   : > { %7150 = vmatpush1.bf16.msra.mxu0 %v20201_v1  ;;  %v20273_v1 = vld [vmem:[#allocation8] ss:$16 sps:$4 sm:$0xff]  }
 0x8c1   : > { %7151 = vmatprep.subr.bf16.mxu0 %v20206_v15  ;;  %7975 = vmatpush1.bf16.msra.mxu1 %v20330_v17  ;;  %v20279_v15 = vld [vmem:[#allocation8 + $0x20] ss:$16 sps:$4 sm:$0xff]  }
 0x8c2   : > { %7976 = vmatprep.subr.bf16.mxu1 %v20338_v44  ;;  %v20327_v17 = vld [vmem:[#allocation8 + $0x120] ss:$16 sps:$4 sm:$0xff]  }
 0x8c3   : > { %v20333_v44 = vld [vmem:[#allocation8 + $0x140] ss:$16 sps:$4 sm:$0xff]  }
 0x8c4   : > { %7152 = vmatpush1.bf16.msra.mxu0 %v20204_v16  ;;  %v20285_v16 = vld [vmem:[#allocation8 + $0x40] ss:$16 sps:$4 sm:$0xff]  }
 0x8c5   : > { %7153 = vmatprep.subr.bf16.mxu0 %v20209_v14  ;;  %7977 = vmatpush1.bf16.msra.mxu1 %v20336_v4  ;;  %v20291_v14 = vld [vmem:[#allocation8 + $0x60] ss:$16 sps:$4 sm:$0xff]  }
 0x8c6   : > { %v20339_v4 = vld [vmem:[#allocation8 + $0x160] ss:$16 sps:$4 sm:$0xff]  }
 0x8c8   : > { %7154 = vmatpush1.bf16.msra.mxu0 %v20207_v36  ;;  %v20297_v36 = vld [vmem:[#allocation8 + $0x80] ss:$16 sps:$4 sm:$0xff]  }
 0x8c9   : > { %7155 = vmatprep.subr.bf16.mxu0 %v20212_v41  ;;  %v20309_v41 = vld [vmem:[#allocation8 + $0xc0] ss:$16 sps:$4 sm:$0xff]  }
 0x8cc   : > { %7156 = vmatpush1.bf16.msra.mxu0 %v20210_v26  ;;  %v20315_v26 = vld [vmem:[#allocation8 + $0xe0] ss:$16 sps:$4 sm:$0xff]  }
 0x8cd   : > { %7157 = vmatprep.subr.bf16.mxu0 %v20215_v39  ;;  %v20329_v39 = vld [vmem:[#allocation8 + $0x124] ss:$16 sps:$4 sm:$0xff]  }
 0x8d0   : > { %7158 = vmatpush1.bf16.msra.mxu0 %v20213_v2  ;;  %v20335_v2 = vld [vmem:[#allocation8 + $0x144] ss:$16 sps:$4 sm:$0xff]  }
 0x8d1   : > { %7159 = vmatprep.subr.bf16.mxu0 %v20218_v12  ;;  %v20341_v12 = vld [vmem:[#allocation8 + $0x164] ss:$16 sps:$4 sm:$0xff]  }
 0x8d4   : > { %7160 = vmatpush1.bf16.msra.mxu0 %v20216_v28  ;;  %v20342_v28 = vld [vmem:[#allocation8 + $0x188] ss:$16 sps:$4 sm:$0xff]  }
 0x8d5   : > { %7161 = vmatprep.subr.bf16.mxu0 %v20221_v33  ;;  %v20344_v33 = vld [vmem:[#allocation8 + $0x18c] ss:$16 sps:$4 sm:$0xff]  }
 0x8d6   : > { %7978 = vmatprep.subr.bf16.mxu1 %v20344_v33  ;;  %v20371_v33 = vld [vmem:[#allocation8 + $0x224] ss:$16 sps:$4 sm:$0xff]  }
 0x8d7   : > { %7979 = vmatpush1.bf16.msra.mxu1 %v20342_v28 }
 0x8d8   : > { %7162 = vmatpush1.bf16.msra.mxu0 %v20219_v32  ;;  %v20345_v32 = vld [vmem:[#allocation8 + $0x180] ss:$16 sps:$4 sm:$0xff]  }
 0x8d9   : > { %7403 = vmatprep.subr.bf16.mxu0 %v20224_v48  ;;  %v20347_v48 = vld [vmem:[#allocation8 + $0x184] ss:$16 sps:$4 sm:$0xff]  }
 0x8db   : > { %7164 = vmatmul.mubr.bf16.vlgmr.msra.gmra.mrb[24].mxu0 %v23683_v5  ;;  %v20234_v5 = vld [vmem:[#allocation7 + $0x240] ss:$8 sps:$4 sm:$0xff]  }
 0x8dc   : > { %7173 = vmatprep.mubr.bf16.mxu0 %v23696_v58  ;;  %7404 = vmatpush1.bf16.msra.mxu0 %v20222_v30  ;;  %v20237_v58 = vld [vmem:[#allocation7 + $0x250] ss:$8 sps:$4 sm:$0xff]  }
 0x8dd   : > { %7405 = vmatprep.subr.bf16.mxu0 %v20227_v22  ;;  %v20348_v30 = vld [vmem:[#allocation8 + $0x1a8] ss:$16 sps:$4 sm:$0xff]   ;;  %v20350_v22 = vld [vmem:[#allocation8 + $0x1ac] ss:$16 sps:$4 sm:$0xff]  }
 0x8de   : > { %7980 = vmatprep.subr.bf16.mxu1 %v20350_v22 }
 0x8df   : > { %7981 = vmatpush1.bf16.msra.mxu1 %v20348_v30 }
 0x8e0   : > { %7406 = vmatpush1.bf16.msra.mxu0 %v20225_v8  ;;  %v20353_v8 = vld [vmem:[#allocation8 + $0x1a4] ss:$16 sps:$4 sm:$0xff]  }
 0x8e1   : > { %7407 = vmatprep.subr.bf16.mxu0 %v20230_v20  ;;  %v20356_v20 = vld [vmem:[#allocation8 + $0x1cc] ss:$16 sps:$4 sm:$0xff]  }
 0x8e2   : > { %7982 = vmatprep.subr.bf16.mxu1 %v20356_v20  ;;  %v20369_v20 = vld [vmem:[#allocation8 + $0x220] ss:$16 sps:$4 sm:$0xff]  }
 0x8e3   : > { %7174 = vmatmul.mubr.bf16.gmra.mrb[28].mxu0 %v23693_v60  ;;  %v20243_v60 = vld [vmem:[#allocation7 + $0x270] ss:$8 sps:$4 sm:$0xff]  }
 0x8e4   : > { %7408 = vmatpush1.bf16.msra.mxu0 %v20228_v9  ;;  %7435 = vmatprep.mubr.bf16.mxu0 %v23686_v3  ;;  %v20246_v3 = vld [vmem:[#allocation7 + $0x280] ss:$8 sps:$4 sm:$0xff]  }
 0x8e5   : > { %7409 = vmatprep.subr.bf16.mxu0 %v20233_v42  ;;  %v20351_v9 = vld [vmem:[#allocation8 + $0x1a0] ss:$16 sps:$4 sm:$0xff]   ;;  %v20354_v42 = vld [vmem:[#allocation8 + $0x1c8] ss:$16 sps:$4 sm:$0xff]  }
 0x8e6   : > { %7983 = vmatpush1.bf16.msra.mxu1 %v20354_v42 }
 0x8e8   : > { %7410 = vmatpush1.bf16.msra.mxu0 %v20231_v63  ;;  %v20357_v63 = vld [vmem:[#allocation8 + $0x1c0] ss:$16 sps:$4 sm:$0xff]  }
 0x8e9   : > { %7411 = vmatprep.subr.bf16.mxu0 %v20236_v11  ;;  %v20359_v11 = vld [vmem:[#allocation8 + $0x1c4] ss:$16 sps:$4 sm:$0xff]  }
 0x8ec   : > { %7412 = vmatpush1.bf16.msra.mxu0 %v20234_v5  ;;  %v20360_v5 = vld [vmem:[#allocation8 + $0x1e8] ss:$16 sps:$4 sm:$0xff]  }
 0x8ed   : > { %7413 = vmatprep.subr.bf16.mxu0 %v20239_v50  ;;  %v20362_v50 = vld [vmem:[#allocation8 + $0x1ec] ss:$16 sps:$4 sm:$0xff]  }
 0x8ee   : > { %7984 = vmatprep.subr.bf16.mxu1 %v20362_v50 }
 0x8ef   : > { %7985 = vmatpush1.bf16.msra.mxu1 %v20360_v5 }
 0x8f0   : > { %7414 = vmatpush1.bf16.msra.mxu0 %v20237_v58  ;;  %v20365_v58 = vld [vmem:[#allocation8 + $0x1e4] ss:$16 sps:$4 sm:$0xff]  }
 0x8f1   : > { %7415 = vmatprep.subr.bf16.mxu0 %v20242_v46  ;;  %v20368_v46 = vld [vmem:[#allocation8 + $0x204] ss:$16 sps:$4 sm:$0xff]  }
 0x8f2   : > { %8473 = vmatprep.subr.bf16.mxu1 %v20368_v46 }
 0x8f4   : > { %7416 = vmatpush1.bf16.msra.mxu0 %v20240_v52  ;;  %v20363_v52 = vld [vmem:[#allocation8 + $0x1e0] ss:$16 sps:$4 sm:$0xff]  }
 0x8f5   : > { %7417 = vmatprep.subr.bf16.mxu0 %v20245_v38  ;;  %v6585_v38 = vld [vmem:[#allocation11 + $0x8] sm:$0x3] }
 0x8f8   : > { %7418 = vmatpush1.bf16.msra.mxu0 %v20243_v60  ;;  %v6879_v60 = vrot.slane %v6585_v38, %v22794_v51 }
 0x8f9   : > { %7419 = vmatprep.subr.bf16.mxu0 %v20248_v0  ;;  %v6883_v0 = vrot.slane %v6585_v38, %v22797_v61 }
 0x8fc   : > { %7420 = vmatpush1.bf16.msra.mxu0 %v20246_v3 }
 0x8fd   : > { %7421 = vmatprep.subr.bf16.mxu0 %v20251_v27 }
 0x900   : > { %7422 = vmatpush1.bf16.msra.mxu0 %v20249_v18 }
 0x901   : > { %7423 = vmatprep.subr.bf16.mxu0 %v20254_v24 }
 0x904   : > { %7424 = vmatpush1.bf16.msra.mxu0 %v20252_v47 }
 0x905   : > { %7425 = vmatprep.subr.bf16.mxu0 %v20257_v53 }
 0x908   : > { %7426 = vmatpush1.bf16.msra.mxu0 %v20255_v23 }
 0x909   : > { %7427 = vmatprep.subr.bf16.mxu0 %v20260_v7 }
 0x90c   : > { %7428 = vmatpush1.bf16.msra.mxu0 %v20258_v10 }
 0x90d   : > { %7429 = vmatprep.subr.bf16.mxu0 %v20263_v31 }
 0x910   : > { %7430 = vmatpush1.bf16.msra.mxu0 %v20261_v54 }
 0x911   : > { %7431 = vmatprep.subr.bf16.mxu0 %v20266_v19 }
 0x914   : > { %7432 = vmatpush1.bf16.msra.mxu0 %v20264_v37 }
 0x915   : > { %7433 = vmatprep.subr.bf16.mxu0 %v20269_v40 }
 0x918   : > { %7434 = vmatpush1.bf16.msra.mxu0 %v20267_v57 }
 0x919   : > { %7901 = vmatprep.subr.bf16.mxu0 %v20275_v45 }
 0x91b   : > { %7436 = vmatmul.mubr.bf16.vlgmr.msra.gmra.mrb[24].mxu0 %v23677_v6  ;;  %v20305_v6 = vld [vmem:[#allocation8 + $0xa4] ss:$16 sps:$4 sm:$0xff]  }
 0x91c   : > { %7445 = vmatprep.mubr.bf16.mxu0 %v23689_v25  ;;  %7902 = vmatpush1.bf16.msra.mxu0 %v20273_v1  ;;  %v20303_v25 = vld [vmem:[#allocation8 + $0xa0] ss:$16 sps:$4 sm:$0xff]  }
 0x91d   : > { %7903 = vmatprep.subr.bf16.mxu0 %v20281_v49 }
 0x920   : > { %7904 = vmatpush1.bf16.msra.mxu0 %v20279_v15 }
 0x921   : > { %7905 = vmatprep.subr.bf16.mxu0 %v20287_v56 }
 0x923   : > { %7446 = vmatmul.mubr.bf16.gmra.mrb[28].mxu0 %v23680_v35  ;;  %v20323_v35 = vld [vmem:[#allocation8 + $0x104] ss:$16 sps:$4 sm:$0xff]  }
 0x924   : > { %7906 = vmatpush1.bf16.msra.mxu0 %v20285_v16 }
 0x925   : > { %7907 = vmatprep.subr.bf16.mxu0 %v20293_v13 }
 0x928   : > { %7908 = vmatpush1.bf16.msra.mxu0 %v20291_v14 }
 0x929   : > { %7909 = vmatprep.subr.bf16.mxu0 %v20299_v62 }
 0x92c   : > { %7910 = vmatpush1.bf16.msra.mxu0 %v20297_v36 }
 0x92d   : > { %7911 = vmatprep.subr.bf16.mxu0 %v20305_v6 }
 0x930   : > { %7912 = vmatpush1.bf16.msra.mxu0 %v20303_v25 }
 0x931   : > { %7913 = vmatprep.subr.bf16.mxu0 %v20311_v34 }
 0x934   : > { %7914 = vmatpush1.bf16.msra.mxu0 %v20309_v41 }
 0x935   : > { %7915 = vmatprep.subr.bf16.mxu0 %v20317_v43 }
 0x938   : > { %7916 = vmatpush1.bf16.msra.mxu0 %v20315_v26 }
 0x939   : > { %7917 = vmatprep.subr.bf16.mxu0 %v20323_v35 }
 0x93c   : > { %7918 = vmatpush1.bf16.msra.mxu0 %v20321_v55 }
 0x93d   : > { %7919 = vmatprep.subr.bf16.mxu0 %v20329_v39 }
 0x940   : > { %7920 = vmatpush1.bf16.msra.mxu0 %v20327_v17 }
 0x941   : > { %7921 = vmatprep.subr.bf16.mxu0 %v20335_v2  ;;  %v20366_v2 = vld [vmem:[#allocation8 + $0x200] ss:$16 sps:$4 sm:$0xff]  }
 0x944   : > { %7922 = vmatpush1.bf16.msra.mxu0 %v20333_v44 }
 0x945   : > { %7923 = vmatprep.subr.bf16.mxu0 %v20341_v12 }
 0x948   : > { %7924 = vmatpush1.bf16.msra.mxu0 %v20339_v4 }
 0x949   : > { %7925 = vmatprep.subr.bf16.mxu0 %v20347_v48 }
 0x94c   : > { %7926 = vmatpush1.bf16.msra.mxu0 %v20345_v32 }
 0x94d   : > { %7927 = vmatprep.subr.bf16.mxu0 %v20353_v8 }
 0x950   : > { %7928 = vmatpush1.bf16.msra.mxu0 %v20351_v9 }
 0x951   : > { %7929 = vmatprep.subr.bf16.mxu0 %v20359_v11  ;;  %v20374_v11 = vld [vmem:[#allocation8 + $0x244] ss:$16 sps:$4 sm:$0xff]  }
 0x954   : > { %7930 = vmatpush1.bf16.msra.mxu0 %v20357_v63 }
 0x955   : > { %7931 = vmatprep.subr.bf16.mxu0 %v20365_v58 }
 0x958   : > { %7932 = vmatpush1.bf16.msra.mxu0 %v20363_v52 }
 0x9ee   : > { %v7437_v3 = vpop.f32.mrb[24].mxu0 }
 0x9ef   : > { %v19193_v27 = vadd.f32 %v7437_v3, %v6879_v60  ;;  %v7439_v18 = vpop.f32.mrb[25].mxu0  ;;  %v20372_v3 = vld [vmem:[#allocation8 + $0x240] ss:$16 sps:$4 sm:$0xff]  }
 0x9f0   : > { %v19194_v24 = vadd.f32 %v7439_v18, %v6883_v0  ;;  %v7441_v47 = vpop.f32.mrb[26].mxu0 }
 0x9f1   : > { %v19195_v53 = vadd.f32 %v7441_v47, %v6879_v60  ;;  %v7443_v23 = vpop.f32.mrb[27].mxu0  ;;  %v7464_v10 = vmax.f32 %v19193_v27, 0.0 }
 0x9f2   : > { %v19196_v7 = vadd.f32 %v7443_v23, %v6883_v0  ;;  %v7465_v54 = vmax.f32 %v19194_v24, 0.0  ;;  %v20377_v23 = vld [vmem:[#allocation8 + $0x264] ss:$16 sps:$4 sm:$0xff]  }
 0x9f3   : > { %v7466_v31 = vmax.f32 %v19195_v53, 0.0 }
 0x9f4   : > { %v7467_v19 = vmax.f32 %v19196_v7, 0.0 }
 0x9f5   : > { %v7473_v37 = vpack.c.bf16 %v7466_v31, %v7464_v10 }
 0x9f6   : > { %v7474_v40 = vpack.c.bf16 %v7467_v19, %v7465_v54  ;;  %v7447_v57 = vpop.f32.mrb[28].mxu0 }
 0x9f7   : > { %v7478_v45 = vshrl.u32 %v7473_v37, 16  ;;  %v19197_v1 = vadd.f32 %v7447_v57, %v6879_v60  ;;  %v7449_v49 = vpop.f32.mrb[29].mxu0  ;;  %v7481_v14 = vshll.u32 %v7473_v37, 16 }
 0x9f8   : > { %v7485_v15 = vshrl.u32 %v7474_v40, 16  ;;  %v19198_v56 = vadd.f32 %v7449_v49, %v6883_v0  ;;  %v7451_v16 = vpop.f32.mrb[30].mxu0  ;;  %v7488_v25 = vshll.u32 %v7474_v40, 16 }
 0x9f9   : > { %v7480_v13 = vrot.slane %v7478_v45, 7  ;;  %v19199_v62 = vadd.f32 %v7451_v16, %v6879_v60  ;;  %v7453_v36 = vpop.f32.mrb[31].mxu0  ;;  %v7468_v43 = vmax.f32 %v19197_v1, 0.0 }
 0x9fa   : > { %v7487_v6 = vrot.slane %v7485_v15, 7  ;;  %v19200_v34 = vadd.f32 %v7453_v36, %v6883_v0  ;;  %v7469_v55 = vmax.f32 %v19198_v56, 0.0  ;;  %v20375_v15 = vld [vmem:[#allocation8 + $0x260] ss:$16 sps:$4 sm:$0xff]  }
 0x9fb   : > { %v7483_v41 = vor.u32 %v7481_v14, %v7480_v13  ;;  %v7470_v26 = vmax.f32 %v19199_v62, 0.0  ;;  %v20380_v62 = vld [vmem:[#allocation8 + $0x284] ss:$16 sps:$4 sm:$0xff]  }
 0x9fc   : > { %v7490_v35 = vor.u32 %v7488_v25, %v7487_v6  ;;  %v7471_v39 = vmax.f32 %v19200_v34, 0.0 }
 0x9fd   : > { %v7475_v17 = vpack.c.bf16 %v7470_v26, %v7468_v43  ;;  %v23709_v44 = vsel %vm23571_vm15, 0, %v7483_v41 }
 0x9fe   : > { %v7476_v12 = vpack.c.bf16 %v7471_v39, %v7469_v55  ;;  %v7514_v4 = vsel %vm23571_vm15, 0, %v7490_v35  ;;  %v8112_v28 = vshll.u32 %v23709_v44, 16  ;;  %v8110_v46 = vshrl.u32 %v23709_v44, 16  ;;  %v20378_v55 = vld [vmem:[#allocation8 + $0x280] ss:$16 sps:$4 sm:$0xff]  }
 0x9ff   : > { %v7492_v32 = vshrl.u32 %v7475_v17, 16  ;;  %7933 = vmatprep.mubr.bf16.mxu0 %v7514_v4  ;;  %7986 = vmatprep.mubr.bf16.mxu1 %v7514_v4  ;;  %v8124_v48 = vshll.u32 %v7514_v4, 16  ;;  %v7495_v8 = vshll.u32 %v7475_v17, 16  ;;  %v8122_v60 = vshrl.u32 %v7514_v4, 16  ;;  %v20383_v17 = vld [vmem:[#allocation8 + $0x2a4] ss:$16 sps:$4 sm:$0xff]  }
 0xa00   : > { %v7500_v30 = vshrl.u32 %v7476_v12, 16  ;;  %7934 = vmatmul.mubr.bf16.vlgmr.msra.gmra.mrb[32].mxu0 %v23709_v44  ;;  %7987 = vmatmul.mubr.bf16.vlgmr.msra.gmra.mrb[76].mxu1 %v23709_v44  ;;  %v8114_v9 = vrot.slane %v8112_v28, 1  ;;  %v7503_v63 = vshll.u32 %v7476_v12, 16  ;;  %v8667_v24 = vrot.slane %v7514_v4, 1  ;;  %v20384_v12 = vld [vmem:[#allocation8 + $0x2c0] ss:$16 sps:$4 sm:$0xff]  }
 0xa01   : > { %v7494_v22 = vrot.slane %v7492_v32, 7  ;;  %8474 = vmatpush1.bf16.msra.mxu1 %v20366_v2  ;;  %v8126_v5 = vrot.slane %v8124_v48, 1  ;;  %v8664_v47 = vrot.slane %v23709_v44, 1  ;;  %v20381_v2 = vld [vmem:[#allocation8 + $0x2a0] ss:$16 sps:$4 sm:$0xff]  }
 0xa02   : > { %v7502_v42 = vrot.slane %v7500_v30, 7  ;;  %8475 = vmatprep.subr.bf16.mxu1 %v20371_v33  ;;  %v8115_v18 = vor.u32 %v8114_v9, %v8110_v46  ;;  %v20386_v44 = vld [vmem:[#allocation8 + $0x2c4] ss:$16 sps:$4 sm:$0xff]   ;;  %v20387_v28 = vld [vmem:[#allocation8 + $0x2e0] ss:$16 sps:$4 sm:$0xff]  }
 0xa03   : > { %v7497_v50 = vor.u32 %v7495_v8, %v7494_v22  ;;  %v7515_v58 = vsel %vm23571_vm15, %v7494_v22, 0  ;;  %v8127_v7 = vor.u32 %v8126_v5, %v8122_v60  ;;  %v20389_v4 = vld [vmem:[#allocation8 + $0x2e4] ss:$16 sps:$4 sm:$0xff]   ;;  %v20390_v32 = vld [vmem:[#allocation8 + $0x300] ss:$16 sps:$4 sm:$0xff]  }
 0xa04   : > { %v7505_v52 = vor.u32 %v7503_v63, %v7502_v42  ;;  %v7516_v38 = vsel %vm23571_vm15, %v7502_v42, 0  ;;  %v8137_v0 = vshll.u32 %v7515_v58, 16  ;;  %v8670_v31 = vrot.slane %v7515_v58, 1  ;;  %v20392_v33 = vld [vmem:[#allocation8 + $0x304] ss:$16 sps:$4 sm:$0xff]  }
 0xa05   : > { %8476 = vmatpush1.bf16.msra.mxu1 %v20369_v20  ;;  %v7498_v27 = vsel %vm6100_vm14, %v7480_v13, %v7497_v50  ;;  %v8145_v19 = vshll.u32 %v7516_v38, 16  ;;  %v8672_v40 = vrot.slane %v7516_v38, 1  ;;  %v20395_v48 = vld [vmem:[#allocation8 + $0x324] ss:$16 sps:$4 sm:$0xff]   ;;  %v20393_v30 = vld [vmem:[#allocation8 + $0x320] ss:$16 sps:$4 sm:$0xff]  }
 0xa06   : > { %v7506_v53 = vsel %vm6100_vm14, %v7487_v6, %v7505_v52  ;;  %8477 = vmatprep.subr.bf16.mxu1 %v20374_v11  ;;  %v8117_v10 = vshll.u32 %v7498_v27, 16  ;;  %v8133_v45 = vshrl.u32 %v7498_v27, 16  ;;  %v8139_v1 = vrot.slane %v8137_v0, 1  ;;  %v20398_v22 = vld [vmem:[#allocation8 + $0x344] ss:$16 sps:$4 sm:$0xff]  }
 0xa07   : > { %7943 = vmatprep.mubr.bf16.mxu0 %v7506_v53  ;;  %7996 = vmatprep.mubr.bf16.mxu1 %v7506_v53  ;;  %v8129_v54 = vshll.u32 %v7506_v53, 16  ;;  %v8668_v37 = vrot.slane %v7506_v53, 1  ;;  %v8665_v49 = vrot.slane %v7498_v27, 1  ;;  %v8141_v16 = vshrl.u32 %v7506_v53, 16  ;;  %v20396_v8 = vld [vmem:[#allocation8 + $0x340] ss:$16 sps:$4 sm:$0xff]  }
 0xa08   : > { %7944 = vmatmul.mubr.bf16.gmra.mrb[36].mxu0 %v7498_v27  ;;  %7997 = vmatmul.mubr.bf16.gmra.mrb[80].mxu1 %v7498_v27  ;;  %v8119_v57 = vrot.slane %v8117_v10, 1  ;;  %v8147_v26 = vrot.slane %v8145_v19, 1  ;;  %v20401_v20 = vld [vmem:[#allocation8 + $0x364] ss:$16 sps:$4 sm:$0xff]   ;;  %v20399_v9 = vld [vmem:[#allocation8 + $0x360] ss:$16 sps:$4 sm:$0xff]  }
 0xa09   : > { %8478 = vmatpush1.bf16.msra.mxu1 %v20372_v3  ;;  %v8131_v56 = vrot.slane %v8129_v54, 1  ;;  %v23725_v13 = vsel %vm808_vm6, %v8667_v24, %v8668_v37  ;;  %v23728_v14 = vsel %vm808_vm6, %v8668_v37, %v8672_v40  ;;  %v23734_v25 = vsel %vm808_vm6, %v8664_v47, %v8665_v49  ;;  %v20404_v42 = vld [vmem:[#allocation8 + $0x384] ss:$16 sps:$4 sm:$0xff]   ;;  %v20402_v63 = vld [vmem:[#allocation8 + $0x380] ss:$16 sps:$4 sm:$0xff]  }
 0xa0a   : > { %8479 = vmatprep.subr.bf16.mxu1 %v20377_v23  ;;  %v23731_v36 = vsel %vm723_vm5, %v8115_v18, %v8119_v57  ;;  %v8135_v6 = vor.u32 %v8133_v45, %v8119_v57  ;;  %v23737_v34 = vsel %vm808_vm6, %v8665_v49, %v8670_v31  ;;  %v20407_v11 = vld [vmem:[#allocation8 + $0x3a4] ss:$16 sps:$4 sm:$0xff]   ;;  %v20405_v5 = vld [vmem:[#allocation8 + $0x3a0] ss:$16 sps:$4 sm:$0xff]   ;;  %v20416_v38 = vld [vmem:[#allocation8 + $0x20c] ss:$16 sps:$4 sm:$0xff]  }
 0xa0b   : > { %v23740_v41 = vsel %vm723_vm5, %v8127_v7, %v8131_v56  ;;  %v8143_v43 = vor.u32 %v8141_v16, %v8131_v56  ;;  %v20410_v50 = vld [vmem:[#allocation8 + $0x3c4] ss:$16 sps:$4 sm:$0xff]   ;;  %v20408_v58 = vld [vmem:[#allocation8 + $0x3c0] ss:$16 sps:$4 sm:$0xff]   ;;  %v20414_v60 = vld [vmem:[#allocation8 + $0x208] ss:$16 sps:$4 sm:$0xff]  }
 0xa0c   : > { %8505 = vmatprep.mubr.bf16.mxu1 %v23740_v41  ;;  %v23744_v35 = vsel %vm723_vm5, %v8135_v6, %v8139_v1  ;;  %v20413_v46 = vld [vmem:[#allocation8 + $0x3e4] ss:$16 sps:$4 sm:$0xff]   ;;  %v20411_v52 = vld [vmem:[#allocation8 + $0x3e0] ss:$16 sps:$4 sm:$0xff]   ;;  %v20419_v0 = vld [vmem:[#allocation8 + $0x22c] ss:$16 sps:$4 sm:$0xff]  }
 0xa0d   : > { %8480 = vmatpush1.bf16.msra.mxu1 %v20375_v15  ;;  %v23747_v39 = vsel %vm723_vm5, %v8143_v43, %v8147_v26  ;;  %v20417_v3 = vld [vmem:[#allocation8 + $0x228] ss:$16 sps:$4 sm:$0xff]   ;;  %v20422_v27 = vld [vmem:[#allocation8 + $0x24c] ss:$16 sps:$4 sm:$0xff]  }
 0xa0e   : > { %8481 = vmatprep.subr.bf16.mxu1 %v20380_v62  ;;  %v20420_v18 = vld [vmem:[#allocation8 + $0x248] ss:$16 sps:$4 sm:$0xff]   ;;  %v20425_v24 = vld [vmem:[#allocation8 + $0x26c] ss:$16 sps:$4 sm:$0xff]  }
 0xa0f   : > { %v20423_v47 = vld [vmem:[#allocation8 + $0x268] ss:$16 sps:$4 sm:$0xff]   ;;  %v20428_v53 = vld [vmem:[#allocation8 + $0x28c] ss:$16 sps:$4 sm:$0xff]  }
 0xa10   : > { %v20426_v23 = vld [vmem:[#allocation8 + $0x288] ss:$16 sps:$4 sm:$0xff]   ;;  %v20431_v7 = vld [vmem:[#allocation8 + $0x2ac] ss:$16 sps:$4 sm:$0xff]  }
 0xa11   : > { %8482 = vmatpush1.bf16.msra.mxu1 %v20378_v55  ;;  %v20429_v10 = vld [vmem:[#allocation8 + $0x2a8] ss:$16 sps:$4 sm:$0xff]   ;;  %v20434_v31 = vld [vmem:[#allocation8 + $0x2cc] ss:$16 sps:$4 sm:$0xff]  }
 0xa12   : > { %8483 = vmatprep.subr.bf16.mxu1 %v20383_v17  ;;  %v20432_v54 = vld [vmem:[#allocation8 + $0x2c8] ss:$16 sps:$4 sm:$0xff]   ;;  %v20437_v19 = vld [vmem:[#allocation8 + $0x2ec] ss:$16 sps:$4 sm:$0xff]  }
 0xa13   : > { %v20435_v37 = vld [vmem:[#allocation8 + $0x2e8] ss:$16 sps:$4 sm:$0xff]   ;;  %v20440_v40 = vld [vmem:[#allocation8 + $0x30c] ss:$16 sps:$4 sm:$0xff]  }
 0xa14   : > { %v20438_v57 = vld [vmem:[#allocation8 + $0x308] ss:$16 sps:$4 sm:$0xff]   ;;  %v20443_v45 = vld [vmem:[#allocation8 + $0x32c] ss:$16 sps:$4 sm:$0xff]  }
 0xa15   : > { %8484 = vmatpush1.bf16.msra.mxu1 %v20381_v2  ;;  %v20441_v1 = vld [vmem:[#allocation8 + $0x328] ss:$16 sps:$4 sm:$0xff]   ;;  %v20446_v49 = vld [vmem:[#allocation8 + $0x34c] ss:$16 sps:$4 sm:$0xff]  }
 0xa16   : > { %8485 = vmatprep.subr.bf16.mxu1 %v20386_v44  ;;  %v20444_v15 = vld [vmem:[#allocation8 + $0x348] ss:$16 sps:$4 sm:$0xff]   ;;  %v20449_v56 = vld [vmem:[#allocation8 + $0x36c] ss:$16 sps:$4 sm:$0xff]   ;;  %v20464_v44 = vld [vmem:[#allocation8 + $0x404] ss:$16 sps:$4 sm:$0xff]  }
 0xa17   : > { %v20447_v16 = vld [vmem:[#allocation8 + $0x368] ss:$16 sps:$4 sm:$0xff]   ;;  %v20452_v62 = vld [vmem:[#allocation8 + $0x38c] ss:$16 sps:$4 sm:$0xff]  }
 0xa18   : > { %v20450_v6 = vld [vmem:[#allocation8 + $0x388] ss:$16 sps:$4 sm:$0xff]   ;;  %v20458_v26 = vld [vmem:[#allocation8 + $0x3cc] ss:$16 sps:$4 sm:$0xff]  }
 0xa19   : > { %8486 = vmatpush1.bf16.msra.mxu1 %v20384_v12  ;;  %v20453_v43 = vld [vmem:[#allocation8 + $0x3a8] ss:$16 sps:$4 sm:$0xff]   ;;  %v20461_v17 = vld [vmem:[#allocation8 + $0x3ec] ss:$16 sps:$4 sm:$0xff]   ;;  %v20462_v12 = vld [vmem:[#allocation8 + $0x400] ss:$16 sps:$4 sm:$0xff]  }
 0xa1a   : > { %8487 = vmatprep.subr.bf16.mxu1 %v20389_v4  ;;  %v20456_v55 = vld [vmem:[#allocation8 + $0x3c8] ss:$16 sps:$4 sm:$0xff]   ;;  %v20467_v4 = vld [vmem:[#allocation8 + $0x424] ss:$16 sps:$4 sm:$0xff]  }
 0xa1b   : > { %v20459_v2 = vld [vmem:[#allocation8 + $0x3e8] ss:$16 sps:$4 sm:$0xff]  }
 0xa1d   : > { %8488 = vmatpush1.bf16.msra.mxu1 %v20387_v28  ;;  %v20465_v28 = vld [vmem:[#allocation8 + $0x420] ss:$16 sps:$4 sm:$0xff]  }
 0xa1e   : > { %8489 = vmatprep.subr.bf16.mxu1 %v20392_v33  ;;  %v20470_v33 = vld [vmem:[#allocation8 + $0x444] ss:$16 sps:$4 sm:$0xff]  }
 0xa21   : > { %8490 = vmatpush1.bf16.msra.mxu1 %v20390_v32  ;;  %v20468_v32 = vld [vmem:[#allocation8 + $0x440] ss:$16 sps:$4 sm:$0xff]  }
 0xa22   : > { %8491 = vmatprep.subr.bf16.mxu1 %v20395_v48  ;;  %v20473_v48 = vld [vmem:[#allocation8 + $0x464] ss:$16 sps:$4 sm:$0xff]  }
 0xa25   : > { %8492 = vmatpush1.bf16.msra.mxu1 %v20393_v30  ;;  %v20558_v30 = vld [vmem:[%s25676_s10] ss:$16 sps:$4 sm:$0xff]  }
 0xa26   : > { %8493 = vmatprep.subr.bf16.mxu1 %v20398_v22  ;;  %v20563_v22 = vld [vmem:[%s25676_s10 + $0x24] ss:$16 sps:$4 sm:$0xff]  }
 0xa29   : > { %8494 = vmatpush1.bf16.msra.mxu1 %v20396_v8  ;;  %v20476_v8 = vld [vmem:[#allocation8 + $0x484] ss:$16 sps:$4 sm:$0xff]  }
 0xa2a   : > { %8495 = vmatprep.subr.bf16.mxu1 %v20401_v20  ;;  %v20566_v20 = vld [vmem:[%s25676_s10 + $0x44] ss:$16 sps:$4 sm:$0xff]  }
 0xa2d   : > { %8496 = vmatpush1.bf16.msra.mxu1 %v20399_v9  ;;  %v20474_v9 = vld [vmem:[#allocation8 + $0x480] ss:$16 sps:$4 sm:$0xff]  }
 0xa2e   : > { %8497 = vmatprep.subr.bf16.mxu1 %v20404_v42  ;;  %v20479_v42 = vld [vmem:[#allocation8 + $0x4a4] ss:$16 sps:$4 sm:$0xff]  }
 0xa31   : > { %8498 = vmatpush1.bf16.msra.mxu1 %v20402_v63  ;;  %v20564_v63 = vld [vmem:[%s25676_s10 + $0x40] ss:$16 sps:$4 sm:$0xff]  }
 0xa32   : > { %8499 = vmatprep.subr.bf16.mxu1 %v20407_v11  ;;  %v20569_v11 = vld [vmem:[%s25676_s10 + $0x64] ss:$16 sps:$4 sm:$0xff]  }
 0xa35   : > { %8500 = vmatpush1.bf16.msra.mxu1 %v20405_v5  ;;  %v20477_v5 = vld [vmem:[#allocation8 + $0x4a0] ss:$16 sps:$4 sm:$0xff]  }
 0xa36   : > { %8501 = vmatprep.subr.bf16.mxu1 %v20410_v50  ;;  %v20482_v50 = vld [vmem:[#allocation8 + $0x4c4] ss:$16 sps:$4 sm:$0xff]  }
 0xa39   : > { %8502 = vmatpush1.bf16.msra.mxu1 %v20408_v58  ;;  %v20567_v58 = vld [vmem:[%s25676_s10 + $0x60] ss:$16 sps:$4 sm:$0xff]  }
 0xa3a   : > { %8503 = vmatprep.subr.bf16.mxu1 %v20413_v46  ;;  %v20572_v46 = vld [vmem:[%s25676_s10 + $0x84] ss:$16 sps:$4 sm:$0xff]  }
 0xa3d   : > { %8504 = vmatpush1.bf16.msra.mxu1 %v20411_v52  ;;  %v20480_v52 = vld [vmem:[#allocation8 + $0x4c0] ss:$16 sps:$4 sm:$0xff]  }
 0xa3e   : > { %8526 = vmatprep.subr.bf16.mxu1 %v20416_v38  ;;  %v20485_v38 = vld [vmem:[#allocation8 + $0x4e4] ss:$16 sps:$4 sm:$0xff]  }
 0xa40   : > { %8506 = vmatmul.mubr.bf16.vlgmr.msra.gmra.mrb[84].mxu1 %v23731_v36 }
 0xa41   : > { %8515 = vmatprep.mubr.bf16.mxu1 %v23747_v39  ;;  %8527 = vmatpush1.bf16.msra.mxu1 %v20414_v60  ;;  %v20570_v60 = vld [vmem:[%s25676_s10 + $0x80] ss:$16 sps:$4 sm:$0xff]  }
 0xa42   : > { %8528 = vmatprep.subr.bf16.mxu1 %v20419_v0  ;;  %v20575_v0 = vld [vmem:[%s25676_s10 + $0xa4] ss:$16 sps:$4 sm:$0xff]  }
 0xa45   : > { %8529 = vmatpush1.bf16.msra.mxu1 %v20417_v3  ;;  %v20483_v3 = vld [vmem:[#allocation8 + $0x4e0] ss:$16 sps:$4 sm:$0xff]  }
 0xa46   : > { %8530 = vmatprep.subr.bf16.mxu1 %v20422_v27  ;;  %v20488_v27 = vld [vmem:[#allocation8 + $0x504] ss:$16 sps:$4 sm:$0xff]  }
 0xa48   : > { %8516 = vmatmul.mubr.bf16.gmra.mrb[88].mxu1 %v23744_v35 }
 0xa49   : > { %8531 = vmatpush1.bf16.msra.mxu1 %v20420_v18  ;;  %8558 = vmatprep.mubr.bf16.mxu1 %v23740_v41  ;;  %v20455_v41 = vld [vmem:[#allocation8 + $0x3ac] ss:$16 sps:$4 sm:$0xff]   ;;  %v20573_v18 = vld [vmem:[%s25676_s10 + $0xa0] ss:$16 sps:$4 sm:$0xff]  }
 0xa4a   : > { %8532 = vmatprep.subr.bf16.mxu1 %v20425_v24  ;;  %v20578_v24 = vld [vmem:[%s25676_s10 + $0xc4] ss:$16 sps:$4 sm:$0xff]  }
 0xa4d   : > { %8533 = vmatpush1.bf16.msra.mxu1 %v20423_v47  ;;  %v20486_v47 = vld [vmem:[#allocation8 + $0x500] ss:$16 sps:$4 sm:$0xff]  }
 0xa4e   : > { %8534 = vmatprep.subr.bf16.mxu1 %v20428_v53  ;;  %v20491_v53 = vld [vmem:[#allocation8 + $0x524] ss:$16 sps:$4 sm:$0xff]  }
 0xa51   : > { %8535 = vmatpush1.bf16.msra.mxu1 %v20426_v23  ;;  %v20576_v23 = vld [vmem:[%s25676_s10 + $0xc0] ss:$16 sps:$4 sm:$0xff]  }
 0xa52   : > { %8536 = vmatprep.subr.bf16.mxu1 %v20431_v7  ;;  %v20581_v7 = vld [vmem:[%s25676_s10 + $0xe4] ss:$16 sps:$4 sm:$0xff]  }
 0xa55   : > { %8537 = vmatpush1.bf16.msra.mxu1 %v20429_v10  ;;  %v20489_v10 = vld [vmem:[#allocation8 + $0x520] ss:$16 sps:$4 sm:$0xff]  }
 0xa56   : > { %8538 = vmatprep.subr.bf16.mxu1 %v20434_v31  ;;  %v20494_v31 = vld [vmem:[#allocation8 + $0x544] ss:$16 sps:$4 sm:$0xff]  }
 0xa59   : > { %8539 = vmatpush1.bf16.msra.mxu1 %v20432_v54  ;;  %v20579_v54 = vld [vmem:[%s25676_s10 + $0xe0] ss:$16 sps:$4 sm:$0xff]  }
 0xa5a   : > { %8540 = vmatprep.subr.bf16.mxu1 %v20437_v19  ;;  %v20584_v19 = vld [vmem:[%s25676_s10 + $0x104] ss:$16 sps:$4 sm:$0xff]  }
 0xa5d   : > { %8541 = vmatpush1.bf16.msra.mxu1 %v20435_v37  ;;  %v20492_v37 = vld [vmem:[#allocation8 + $0x540] ss:$16 sps:$4 sm:$0xff]  }
 0xa5e   : > { %8542 = vmatprep.subr.bf16.mxu1 %v20440_v40  ;;  %v20497_v40 = vld [vmem:[#allocation8 + $0x564] ss:$16 sps:$4 sm:$0xff]  }
 0xa61   : > { %8543 = vmatpush1.bf16.msra.mxu1 %v20438_v57  ;;  %v20582_v57 = vld [vmem:[%s25676_s10 + $0x100] ss:$16 sps:$4 sm:$0xff]  }
 0xa62   : > { %8544 = vmatprep.subr.bf16.mxu1 %v20443_v45  ;;  %v20587_v45 = vld [vmem:[%s25676_s10 + $0x124] ss:$16 sps:$4 sm:$0xff]  }
 0xa65   : > { %8545 = vmatpush1.bf16.msra.mxu1 %v20441_v1  ;;  %v20495_v1 = vld [vmem:[#allocation8 + $0x560] ss:$16 sps:$4 sm:$0xff]  }
 0xa66   : > { %8546 = vmatprep.subr.bf16.mxu1 %v20446_v49  ;;  %v20500_v49 = vld [vmem:[#allocation8 + $0x584] ss:$16 sps:$4 sm:$0xff]  }
 0xa69   : > { %8547 = vmatpush1.bf16.msra.mxu1 %v20444_v15  ;;  %v20585_v15 = vld [vmem:[%s25676_s10 + $0x120] ss:$16 sps:$4 sm:$0xff]  }
 0xa6a   : > { %8548 = vmatprep.subr.bf16.mxu1 %v20449_v56  ;;  %v20590_v56 = vld [vmem:[%s25676_s10 + $0x144] ss:$16 sps:$4 sm:$0xff]  }
 0xa6d   : > { %8549 = vmatpush1.bf16.msra.mxu1 %v20447_v16  ;;  %v20498_v16 = vld [vmem:[#allocation8 + $0x580] ss:$16 sps:$4 sm:$0xff]  }
 0xa6e   : > { %8550 = vmatprep.subr.bf16.mxu1 %v20452_v62  ;;  %v20503_v62 = vld [vmem:[#allocation8 + $0x5a4] ss:$16 sps:$4 sm:$0xff]  }
 0xa71   : > { %8551 = vmatpush1.bf16.msra.mxu1 %v20450_v6  ;;  %v20588_v6 = vld [vmem:[%s25676_s10 + $0x140] ss:$16 sps:$4 sm:$0xff]  }
 0xa72   : > { %8552 = vmatprep.subr.bf16.mxu1 %v20455_v41  ;;  %v20593_v41 = vld [vmem:[%s25676_s10 + $0x164] ss:$16 sps:$4 sm:$0xff]  }
 0xa75   : > { %8553 = vmatpush1.bf16.msra.mxu1 %v20453_v43  ;;  %v20501_v43 = vld [vmem:[#allocation8 + $0x5a0] ss:$16 sps:$4 sm:$0xff]  }
 0xa76   : > { %8554 = vmatprep.subr.bf16.mxu1 %v20458_v26  ;;  %v20506_v26 = vld [vmem:[#allocation8 + $0x5c4] ss:$16 sps:$4 sm:$0xff]  }
 0xa79   : > { %8555 = vmatpush1.bf16.msra.mxu1 %v20456_v55  ;;  %v20591_v55 = vld [vmem:[%s25676_s10 + $0x160] ss:$16 sps:$4 sm:$0xff]  }
 0xa7a   : > { %8556 = vmatprep.subr.bf16.mxu1 %v20461_v17  ;;  %v20504_v17 = vld [vmem:[#allocation8 + $0x5c0] ss:$16 sps:$4 sm:$0xff]  }
 0xa7d   : > { %8557 = vmatpush1.bf16.msra.mxu1 %v20459_v2  ;;  %v20509_v2 = vld [vmem:[#allocation8 + $0x5e4] ss:$16 sps:$4 sm:$0xff]  }
 0xa7e   : > { %8998 = vmatprep.subr.bf16.mxu1 %v20464_v44  ;;  %v20507_v44 = vld [vmem:[#allocation8 + $0x5e0] ss:$16 sps:$4 sm:$0xff]  }
 0xa80   : > { %8559 = vmatmul.mubr.bf16.vlgmr.msra.gmra.mrb[76].mxu1 %v23731_v36  ;;  %v20560_v36 = vld [vmem:[%s25676_s10 + $0x4] ss:$16 sps:$4 sm:$0xff]  }
 0xa81   : > { %8568 = vmatprep.mubr.bf16.mxu1 %v23747_v39  ;;  %8999 = vmatpush1.bf16.msra.mxu1 %v20462_v12  ;;  %v20471_v39 = vld [vmem:[#allocation8 + $0x460] ss:$16 sps:$4 sm:$0xff]   ;;  %v20512_v12 = vld [vmem:[#allocation8 + $0x40c] ss:$16 sps:$4 sm:$0xff]  }
 0xa82   : > { %9000 = vmatprep.subr.bf16.mxu1 %v20467_v4  ;;  %9993 = vmatprep.subr.bf16.mxu0 %v20560_v36  ;;  %v20510_v4 = vld [vmem:[#allocation8 + $0x408] ss:$16 sps:$4 sm:$0xff]  }
 0xa83   : > { %9994 = vmatpush1.bf16.msra.mxu0 %v20558_v30  ;;  %v20521_v30 = vld [vmem:[#allocation8 + $0x46c] ss:$16 sps:$4 sm:$0xff]   ;;  %v20519_v36 = vld [vmem:[#allocation8 + $0x468] ss:$16 sps:$4 sm:$0xff]  }
 0xa84   : > { %9995 = vmatprep.subr.bf16.mxu0 %v20563_v22  ;;  %v20522_v22 = vld [vmem:[#allocation8 + $0x488] ss:$16 sps:$4 sm:$0xff]  }
 0xa85   : > { %9001 = vmatpush1.bf16.msra.mxu1 %v20465_v28  ;;  %v20515_v28 = vld [vmem:[#allocation8 + $0x42c] ss:$16 sps:$4 sm:$0xff]  }
 0xa86   : > { %9002 = vmatprep.subr.bf16.mxu1 %v20470_v33  ;;  %v20513_v33 = vld [vmem:[#allocation8 + $0x428] ss:$16 sps:$4 sm:$0xff]  }
 0xa88   : > { %8569 = vmatmul.mubr.bf16.gmra.mrb[80].mxu1 %v23744_v35  ;;  %v20561_v35 = vld [vmem:[%s25676_s10 + $0x20] ss:$16 sps:$4 sm:$0xff]  }
 0xa89   : > { %9003 = vmatpush1.bf16.msra.mxu1 %v20468_v32  ;;  %9030 = vmatprep.mubr.bf16.mxu1 %v23725_v13  ;;  %v20518_v32 = vld [vmem:[#allocation8 + $0x44c] ss:$16 sps:$4 sm:$0xff]  }
 0xa8a   : > { %9004 = vmatprep.subr.bf16.mxu1 %v20473_v48  ;;  %9996 = vmatpush1.bf16.msra.mxu0 %v20561_v35  ;;  %v20516_v48 = vld [vmem:[#allocation8 + $0x448] ss:$16 sps:$4 sm:$0xff]  }
 0xa8b   : > { %9997 = vmatprep.subr.bf16.mxu0 %v20566_v20  ;;  %v20525_v35 = vld [vmem:[#allocation8 + $0x4a8] ss:$16 sps:$4 sm:$0xff]   ;;  %v20530_v20 = vld [vmem:[#allocation8 + $0x4cc] ss:$16 sps:$4 sm:$0xff]  }
 0xa8d   : > { %9005 = vmatpush1.bf16.msra.mxu1 %v20471_v39  ;;  %v20524_v39 = vld [vmem:[#allocation8 + $0x48c] ss:$16 sps:$4 sm:$0xff]  }
 0xa8e   : > { %9006 = vmatprep.subr.bf16.mxu1 %v20476_v8  ;;  %9998 = vmatpush1.bf16.msra.mxu0 %v20564_v63  ;;  %v20527_v8 = vld [vmem:[#allocation8 + $0x4ac] ss:$16 sps:$4 sm:$0xff]  }
 0xa8f   : > { %9999 = vmatprep.subr.bf16.mxu0 %v20569_v11  ;;  %v20528_v11 = vld [vmem:[#allocation8 + $0x4c8] ss:$16 sps:$4 sm:$0xff]  }
 0xa91   : > { %9007 = vmatpush1.bf16.msra.mxu1 %v20474_v9 }
 0xa92   : > { %9008 = vmatprep.subr.bf16.mxu1 %v20479_v42  ;;  %10000 = vmatpush1.bf16.msra.mxu0 %v20567_v58  ;;  %v20536_v58 = vld [vmem:[#allocation8 + $0x50c] ss:$16 sps:$4 sm:$0xff]  }
 0xa93   : > { %10001 = vmatprep.subr.bf16.mxu0 %v20572_v46 }
 0xa95   : > { %9009 = vmatpush1.bf16.msra.mxu1 %v20477_v5  ;;  %v20533_v5 = vld [vmem:[#allocation8 + $0x4ec] ss:$16 sps:$4 sm:$0xff]  }
 0xa96   : > { %9010 = vmatprep.subr.bf16.mxu1 %v20482_v50  ;;  %10002 = vmatpush1.bf16.msra.mxu0 %v20570_v60  ;;  %v20531_v50 = vld [vmem:[#allocation8 + $0x4e8] ss:$16 sps:$4 sm:$0xff]  }
 0xa97   : > { %10003 = vmatprep.subr.bf16.mxu0 %v20575_v0  ;;  %v20534_v60 = vld [vmem:[#allocation8 + $0x508] ss:$16 sps:$4 sm:$0xff]  }
 0xa99   : > { %9011 = vmatpush1.bf16.msra.mxu1 %v20480_v52 }
 0xa9a   : > { %9012 = vmatprep.subr.bf16.mxu1 %v20485_v38  ;;  %10004 = vmatpush1.bf16.msra.mxu0 %v20573_v18  ;;  %v20542_v18 = vld [vmem:[#allocation8 + $0x54c] ss:$16 sps:$4 sm:$0xff]  }
 0xa9b   : > { %10005 = vmatprep.subr.bf16.mxu0 %v20578_v24  ;;  %v20540_v24 = vld [vmem:[#allocation8 + $0x548] ss:$16 sps:$4 sm:$0xff]  }
 0xa9d   : > { %9013 = vmatpush1.bf16.msra.mxu1 %v20483_v3  ;;  %v20539_v3 = vld [vmem:[#allocation8 + $0x52c] ss:$16 sps:$4 sm:$0xff]  }
 0xa9e   : > { %9014 = vmatprep.subr.bf16.mxu1 %v20488_v27  ;;  %10006 = vmatpush1.bf16.msra.mxu0 %v20576_v23  ;;  %v20537_v27 = vld [vmem:[#allocation8 + $0x528] ss:$16 sps:$4 sm:$0xff]   ;;  %v20548_v23 = vld [vmem:[#allocation8 + $0x58c] ss:$16 sps:$4 sm:$0xff]  }
 0xa9f   : > { %10007 = vmatprep.subr.bf16.mxu0 %v20581_v7  ;;  %v20546_v7 = vld [vmem:[#allocation8 + $0x588] ss:$16 sps:$4 sm:$0xff]  }
 0xaa1   : > { %9015 = vmatpush1.bf16.msra.mxu1 %v20486_v47  ;;  %v20545_v47 = vld [vmem:[#allocation8 + $0x56c] ss:$16 sps:$4 sm:$0xff]  }
 0xaa2   : > { %9016 = vmatprep.subr.bf16.mxu1 %v20491_v53  ;;  %10008 = vmatpush1.bf16.msra.mxu0 %v20579_v54  ;;  %v20543_v53 = vld [vmem:[#allocation8 + $0x568] ss:$16 sps:$4 sm:$0xff]   ;;  %v20554_v54 = vld [vmem:[#allocation8 + $0x5cc] ss:$16 sps:$4 sm:$0xff]  }
 0xaa3   : > { %10009 = vmatprep.subr.bf16.mxu0 %v20584_v19  ;;  %v20552_v19 = vld [vmem:[#allocation8 + $0x5c8] ss:$16 sps:$4 sm:$0xff]  }
 0xaa5   : > { %9017 = vmatpush1.bf16.msra.mxu1 %v20489_v10  ;;  %v20551_v10 = vld [vmem:[#allocation8 + $0x5ac] ss:$16 sps:$4 sm:$0xff]  }
 0xaa6   : > { %9018 = vmatprep.subr.bf16.mxu1 %v20494_v31  ;;  %10010 = vmatpush1.bf16.msra.mxu0 %v20582_v57  ;;  %v20549_v31 = vld [vmem:[#allocation8 + $0x5a8] ss:$16 sps:$4 sm:$0xff]   ;;  %v20594_v57 = vld [vmem:[%s25676_s10 + $0x180] ss:$16 sps:$4 sm:$0xff]  }
 0xaa7   : > { %10011 = vmatprep.subr.bf16.mxu0 %v20587_v45  ;;  %v20596_v45 = vld [vmem:[%s25676_s10 + $0x184] ss:$16 sps:$4 sm:$0xff]  }
 0xaa9   : > { %9019 = vmatpush1.bf16.msra.mxu1 %v20492_v37  ;;  %v20557_v37 = vld [vmem:[#allocation8 + $0x5ec] ss:$16 sps:$4 sm:$0xff]  }
 0xaaa   : > { %9020 = vmatprep.subr.bf16.mxu1 %v20497_v40  ;;  %10012 = vmatpush1.bf16.msra.mxu0 %v20585_v15  ;;  %v20555_v40 = vld [vmem:[#allocation8 + $0x5e8] ss:$16 sps:$4 sm:$0xff]   ;;  %v20605_v15 = vld [vmem:[%s25676_s10 + $0x1e4] ss:$16 sps:$4 sm:$0xff]  }
 0xaab   : > { %10013 = vmatprep.subr.bf16.mxu0 %v20590_v56  ;;  %v20608_v56 = vld [vmem:[%s25676_s10 + $0x204] ss:$16 sps:$4 sm:$0xff]  }
 0xaad   : > { %9021 = vmatpush1.bf16.msra.mxu1 %v20495_v1  ;;  %v20597_v1 = vld [vmem:[%s25676_s10 + $0x1a0] ss:$16 sps:$4 sm:$0xff]  }
 0xaae   : > { %9022 = vmatprep.subr.bf16.mxu1 %v20500_v49  ;;  %10014 = vmatpush1.bf16.msra.mxu0 %v20588_v6  ;;  %v20603_v49 = vld [vmem:[%s25676_s10 + $0x1e0] ss:$16 sps:$4 sm:$0xff]  }
 0xaaf   : > { %10015 = vmatprep.subr.bf16.mxu0 %v20593_v41 }
 0xab1   : > { %9023 = vmatpush1.bf16.msra.mxu1 %v20498_v16  ;;  %v23879_v16 = vld [vmem:[#allocation11 + $0xa] sm:$0xf] }
 0xab2   : > { %9024 = vmatprep.subr.bf16.mxu1 %v20503_v62  ;;  %10016 = vmatpush1.bf16.msra.mxu0 %v20591_v55  ;;  %v8011_v62 = vrot.slane %v23879_v16, %v22794_v51  ;;  %v8015_v6 = vrot.slane %v23879_v16, %v22797_v61 }
 0xab3   : > { %10017 = vmatprep.subr.bf16.mxu0 %v20596_v45 }
 0xab5   : > { %9025 = vmatpush1.bf16.msra.mxu1 %v20501_v43 }
 0xab6   : > { %9026 = vmatprep.subr.bf16.mxu1 %v20506_v26  ;;  %10018 = vmatpush1.bf16.msra.mxu0 %v20594_v57 }
 0xab9   : > { %9027 = vmatpush1.bf16.msra.mxu1 %v20504_v17 }
 0xaba   : > { %9028 = vmatprep.subr.bf16.mxu1 %v20509_v2 }
 0xabd   : > { %9029 = vmatpush1.bf16.msra.mxu1 %v20507_v44 }
 0xabe   : > { %9051 = vmatprep.subr.bf16.mxu1 %v20512_v12 }
 0xac0   : > { %9031 = vmatmul.mubr.bf16.vlgmr.msra.gmra.mrb[84].mxu1 %v23734_v25 }
 0xac1   : > { %9040 = vmatprep.mubr.bf16.mxu1 %v23728_v14  ;;  %9052 = vmatpush1.bf16.msra.mxu1 %v20510_v4 }
 0xac2   : > { %9053 = vmatprep.subr.bf16.mxu1 %v20515_v28 }
 0xac5   : > { %9054 = vmatpush1.bf16.msra.mxu1 %v20513_v33 }
 0xac6   : > { %9055 = vmatprep.subr.bf16.mxu1 %v20518_v32 }
 0xac8   : > { %9041 = vmatmul.mubr.bf16.gmra.mrb[88].mxu1 %v23737_v34 }
 0xac9   : > { %9056 = vmatpush1.bf16.msra.mxu1 %v20516_v48  ;;  %9083 = vmatprep.mubr.bf16.mxu1 %v23725_v13 }
 0xaca   : > { %9057 = vmatprep.subr.bf16.mxu1 %v20521_v30 }
 0xacd   : > { %9058 = vmatpush1.bf16.msra.mxu1 %v20519_v36 }
 0xace   : > { %9059 = vmatprep.subr.bf16.mxu1 %v20524_v39 }
 0xad1   : > { %9060 = vmatpush1.bf16.msra.mxu1 %v20522_v22 }
 0xad2   : > { %9061 = vmatprep.subr.bf16.mxu1 %v20527_v8 }
 0xad3   : > { %v23833_v9 = vpop.f32.mrb[32].mxu0 }
 0xad4   : > { %v23835_v42 = vpop.f32.mrb[33].mxu0  ;;  %v8028_v41 = vadd.f32 %v8011_v62, %v23833_v9 }
 0xad5   : > { %9062 = vmatpush1.bf16.msra.mxu1 %v20525_v35  ;;  %v23837_v63 = vpop.f32.mrb[34].mxu0  ;;  %v8029_v43 = vadd.f32 %v8015_v6, %v23835_v42 }
 0xad6   : > { %v23839_v13 = vpop.f32.mrb[35].mxu0  ;;  %9063 = vmatprep.subr.bf16.mxu1 %v20530_v20  ;;  %v8032_v55 = vadd.f32 %v8011_v62, %v23837_v63 }
 0xad7   : > { %v8033_v44 = vadd.f32 %v8015_v6, %v23839_v13 }
 0xad9   : > { %9064 = vmatpush1.bf16.msra.mxu1 %v20528_v11 }
 0xada   : > { %9065 = vmatprep.subr.bf16.mxu1 %v20533_v5 }
 0xadb   : > { %v23841_v46 = vpop.f32.mrb[36].mxu0 }
 0xadc   : > { %v23843_v52 = vpop.f32.mrb[37].mxu0  ;;  %v8036_v22 = vadd.f32 %v8011_v62, %v23841_v46 }
 0xadd   : > { %9066 = vmatpush1.bf16.msra.mxu1 %v20531_v50  ;;  %v23845_v38 = vpop.f32.mrb[38].mxu0  ;;  %v8037_v35 = vadd.f32 %v8015_v6, %v23843_v52 }
 0xade   : > { %v23847_v0 = vpop.f32.mrb[39].mxu0  ;;  %9067 = vmatprep.subr.bf16.mxu1 %v20536_v58  ;;  %v8040_v42 = vadd.f32 %v8011_v62, %v23845_v38 }
 0xadf   : > { %v8041_v5 = vadd.f32 %v8015_v6, %v23847_v0  ;;  %v20606_v0 = vld [vmem:[%s25676_s10 + $0x200] ss:$16 sps:$4 sm:$0xff]  }
 0xae1   : > { %9068 = vmatpush1.bf16.msra.mxu1 %v20534_v60 }
 0xae2   : > { %9069 = vmatprep.subr.bf16.mxu1 %v20539_v3 }
 0xae5   : > { %9070 = vmatpush1.bf16.msra.mxu1 %v20537_v27 }
 0xae6   : > { %9071 = vmatprep.subr.bf16.mxu1 %v20542_v18 }
 0xae9   : > { %9072 = vmatpush1.bf16.msra.mxu1 %v20540_v24 }
 0xaea   : > { %9073 = vmatprep.subr.bf16.mxu1 %v20545_v47 }
 0xaed   : > { %9074 = vmatpush1.bf16.msra.mxu1 %v20543_v53 }
 0xaee   : > { %9075 = vmatprep.subr.bf16.mxu1 %v20548_v23 }
 0xaf1   : > { %9076 = vmatpush1.bf16.msra.mxu1 %v20546_v7 }
 0xaf2   : > { %9077 = vmatprep.subr.bf16.mxu1 %v20551_v10 }
 0xaf5   : > { %9078 = vmatpush1.bf16.msra.mxu1 %v20549_v31 }
 0xaf6   : > { %9079 = vmatprep.subr.bf16.mxu1 %v20554_v54 }
 0xaf9   : > { %9080 = vmatpush1.bf16.msra.mxu1 %v20552_v19 }
 0xafa   : > { %9081 = vmatprep.subr.bf16.mxu1 %v20557_v37 }
 0xafd   : > { %9082 = vmatpush1.bf16.msra.mxu1 %v20555_v40  ;;  %v20611_v40 = vld [vmem:[%s25676_s10 + $0x224] ss:$16 sps:$4 sm:$0xff]  }
 0xb00   : > { %9084 = vmatmul.mubr.bf16.vlgmr.msra.gmra.mrb[76].mxu1 %v23734_v25  ;;  %v20602_v25 = vld [vmem:[%s25676_s10 + $0x1c4] ss:$16 sps:$4 sm:$0xff]  }
 0xb01   : > { %9093 = vmatprep.mubr.bf16.mxu1 %v23728_v14  ;;  %v20599_v14 = vld [vmem:[%s25676_s10 + $0x1a4] ss:$16 sps:$4 sm:$0xff]  }
 0xb02   : > { %10019 = vmatprep.subr.bf16.mxu0 %v20599_v14 }
 0xb03   : > { %10020 = vmatpush1.bf16.msra.mxu0 %v20597_v1 }
 0xb04   : > { %10021 = vmatprep.subr.bf16.mxu0 %v20602_v25 }
 0xb08   : > { %9094 = vmatmul.mubr.bf16.gmra.mrb[80].mxu1 %v23737_v34  ;;  %v20600_v34 = vld [vmem:[%s25676_s10 + $0x1c0] ss:$16 sps:$4 sm:$0xff]  }
 0xb09   : > { %10022 = vmatpush1.bf16.msra.mxu0 %v20600_v34  ;;  %v20609_v34 = vld [vmem:[%s25676_s10 + $0x220] ss:$16 sps:$4 sm:$0xff]  }
 0xb0a   : > { %10023 = vmatprep.subr.bf16.mxu0 %v20605_v15 }
 0xb0d   : > { %10024 = vmatpush1.bf16.msra.mxu0 %v20603_v49 }
 0xb0e   : > { %10046 = vmatprep.subr.bf16.mxu0 %v20608_v56  ;;  %v20614_v56 = vld [vmem:[%s25676_s10 + $0x244] ss:$16 sps:$4 sm:$0xff]  }
 0xb93   : > { %v9032_v26 = vpop.f32.mrb[84].mxu1 }
 0xb94   : > { %v19202_v17 = vadd.f32 %v9032_v26, %v8028_v41  ;;  %v9034_v2 = vpop.f32.mrb[85].mxu1  ;;  %v20612_v41 = vld [vmem:[%s25676_s10 + $0x240] ss:$16 sps:$4 sm:$0xff]  }
 0xb95   : > { %v19204_v12 = vadd.f32 %v9034_v2, %v8029_v43  ;;  %v9036_v4 = vpop.f32.mrb[86].mxu1  ;;  %v20620_v2 = vld [vmem:[%s25676_s10 + $0x284] ss:$16 sps:$4 sm:$0xff]  }
 0xb96   : > { %v19206_v28 = vadd.f32 %v9036_v4, %v8032_v55  ;;  %v9038_v33 = vpop.f32.mrb[87].mxu1  ;;  %v9120_v48 = vmax.f32 %v19202_v17, 0.0  ;;  %v20617_v55 = vld [vmem:[%s25676_s10 + $0x264] ss:$16 sps:$4 sm:$0xff]   ;;  %v20615_v17 = vld [vmem:[%s25676_s10 + $0x260] ss:$16 sps:$4 sm:$0xff]  }
 0xb97   : > { %v19208_v32 = vadd.f32 %v9038_v33, %v8033_v44  ;;  %v9121_v36 = vmax.f32 %v19204_v12, 0.0  ;;  %v20618_v44 = vld [vmem:[%s25676_s10 + $0x280] ss:$16 sps:$4 sm:$0xff]   ;;  %v20623_v12 = vld [vmem:[%s25676_s10 + $0x2a4] ss:$16 sps:$4 sm:$0xff]  }
 0xb98   : > { %v9124_v30 = vmax.f32 %v19206_v28, 0.0  ;;  %v20621_v4 = vld [vmem:[%s25676_s10 + $0x2a0] ss:$16 sps:$4 sm:$0xff]   ;;  %v20626_v28 = vld [vmem:[%s25676_s10 + $0x2c4] ss:$16 sps:$4 sm:$0xff]  }
 0xb99   : > { %v9125_v39 = vmax.f32 %v19208_v32, 0.0  ;;  %v20624_v33 = vld [vmem:[%s25676_s10 + $0x2c0] ss:$16 sps:$4 sm:$0xff]   ;;  %v20629_v32 = vld [vmem:[%s25676_s10 + $0x2e4] ss:$16 sps:$4 sm:$0xff]  }
 0xb9a   : > { %v9137_v8 = vpack.c.bf16 %v9124_v30, %v9120_v48  ;;  %v20627_v48 = vld [vmem:[%s25676_s10 + $0x2e0] ss:$16 sps:$4 sm:$0xff]   ;;  %v20632_v30 = vld [vmem:[%s25676_s10 + $0x304] ss:$16 sps:$4 sm:$0xff]  }
 0xb9b   : > { %v9138_v20 = vpack.c.bf16 %v9125_v39, %v9121_v36  ;;  %v9042_v9 = vpop.f32.mrb[88].mxu1  ;;  %v20630_v36 = vld [vmem:[%s25676_s10 + $0x300] ss:$16 sps:$4 sm:$0xff]   ;;  %v20635_v39 = vld [vmem:[%s25676_s10 + $0x324] ss:$16 sps:$4 sm:$0xff]  }
 0xb9c   : > { %v9146_v63 = vshrl.u32 %v9137_v8, 16  ;;  %v19210_v11 = vadd.f32 %v9042_v9, %v8036_v22  ;;  %v9044_v13 = vpop.f32.mrb[89].mxu1  ;;  %v9149_v27 = vshll.u32 %v9137_v8, 16  ;;  %v20633_v22 = vld [vmem:[%s25676_s10 + $0x320] ss:$16 sps:$4 sm:$0xff]   ;;  %v23984_v9 = vsub.s32 3, %v22791_v59 }
 0xb9d   : > { %v9153_v50 = vshrl.u32 %v9138_v20, 16  ;;  %v19212_v58 = vadd.f32 %v9044_v13, %v8037_v35  ;;  %v9046_v60 = vpop.f32.mrb[90].mxu1  ;;  %v9156_v47 = vshll.u32 %v9138_v20, 16  ;;  %v20638_v8 = vld [vmem:[%s25676_s10 + $0x344] ss:$16 sps:$4 sm:$0xff]  }
 0xb9e   : > { %v9148_v3 = vrot.slane %v9146_v63, 7  ;;  %v19214_v18 = vadd.f32 %v9046_v60, %v8040_v42  ;;  %v9048_v24 = vpop.f32.mrb[91].mxu1  ;;  %v9128_v23 = vmax.f32 %v19210_v11, 0.0  ;;  %v20636_v35 = vld [vmem:[%s25676_s10 + $0x340] ss:$16 sps:$4 sm:$0xff]   ;;  %v8019_v11 = vrot.slane %v23879_v16, %v22806_v29 }
 0xb9f   : > { %v9155_v46 = vrot.slane %v9153_v50, 7  ;;  %v19216_v53 = vadd.f32 %v9048_v24, %v8041_v5  ;;  %v9129_v38 = vmax.f32 %v19212_v58, 0.0  ;;  %v20641_v20 = vld [vmem:[%s25676_s10 + $0x364] ss:$16 sps:$4 sm:$0xff]   ;;  %v20639_v42 = vld [vmem:[%s25676_s10 + $0x360] ss:$16 sps:$4 sm:$0xff]   ;;  %v8023_v13 = vrot.slane %v23879_v16, %v23984_v9 }
 0xba0   : > { %v9151_v52 = vor.u32 %v9149_v27, %v9148_v3  ;;  %v9132_v7 = vmax.f32 %v19214_v18, 0.0  ;;  %v20644_v63 = vld [vmem:[%s25676_s10 + $0x384] ss:$16 sps:$4 sm:$0xff]   ;;  %v20642_v59 = vld [vmem:[%s25676_s10 + $0x380] ss:$16 sps:$4 sm:$0xff]  }
 0xba1   : > { %v9158_v10 = vor.u32 %v9156_v47, %v9155_v46  ;;  %v9133_v31 = vmax.f32 %v19216_v53, 0.0  ;;  %v20647_v50 = vld [vmem:[%s25676_s10 + $0x3a4] ss:$16 sps:$4 sm:$0xff]   ;;  %v20645_v16 = vld [vmem:[%s25676_s10 + $0x3a0] ss:$16 sps:$4 sm:$0xff]  }
 0xba2   : > { %v9141_v54 = vpack.c.bf16 %v9132_v7, %v9128_v23  ;;  %v23906_v45 = vsel %vm23571_vm15, 0, %v9151_v52  ;;  %v20650_v47 = vld [vmem:[%s25676_s10 + $0x3c4] ss:$16 sps:$4 sm:$0xff]  }
 0xba3   : > { %v9142_v19 = vpack.c.bf16 %v9133_v31, %v9129_v38  ;;  %v23898_v37 = vsel %vm23571_vm15, 0, %v9158_v10  ;;  %v20648_v38 = vld [vmem:[%s25676_s10 + $0x3c0] ss:$16 sps:$4 sm:$0xff]  }
 0xba4   : > { %v9174_v57 = vshrl.u32 %v9141_v54, 16  ;;  %10025 = vmatprep.mubr.bf16.mxu0 %v23898_v37  ;;  %v9177_v25 = vshll.u32 %v9141_v54, 16 }
 0xba5   : > { %v9182_v1 = vshrl.u32 %v9142_v19, 16  ;;  %10026 = vmatmul.mubr.bf16.vlgmr.msra.gmra.mrb[40].mxu0 %v23906_v45  ;;  %v9185_v15 = vshll.u32 %v9142_v19, 16 }
 0xba6   : > { %v23909_v14 = vrot.slane %v9174_v57, 7  ;;  %10047 = vmatpush1.bf16.msra.mxu0 %v20606_v0  ;;  %v20653_v0 = vld [vmem:[%s25676_s10 + $0x3e4] ss:$16 sps:$4 sm:$0xff]  }
 0xba7   : > { %v23914_v49 = vrot.slane %v9182_v1, 7  ;;  %10048 = vmatprep.subr.bf16.mxu0 %v20611_v40 }
 0xba8   : > { %v9179_v62 = vor.u32 %v9177_v25, %v23909_v14 }
 0xba9   : > { %v9187_v6 = vor.u32 %v9185_v15, %v23914_v49 }
 0xbaa   : > { %10049 = vmatpush1.bf16.msra.mxu0 %v20609_v34  ;;  %v23925_v43 = vsel %vm6100_vm14, %v9148_v3, %v9179_v62 }
 0xbab   : > { %v23928_v26 = vsel %vm6100_vm14, %v9155_v46, %v9187_v6  ;;  %10050 = vmatprep.subr.bf16.mxu0 %v20614_v56 }
 0xbac   : > { %10035 = vmatprep.mubr.bf16.mxu0 %v23928_v26 }
 0xbad   : > { %10036 = vmatmul.mubr.bf16.gmra.mrb[44].mxu0 %v23925_v43 }
 0xbae   : > { %10051 = vmatpush1.bf16.msra.mxu0 %v20612_v41  ;;  %v20651_v41 = vld [vmem:[%s25676_s10 + $0x3e0] ss:$16 sps:$4 sm:$0xff]  }
 0xbaf   : > { %10052 = vmatprep.subr.bf16.mxu0 %v20617_v55 }
 0xbb2   : > { %10053 = vmatpush1.bf16.msra.mxu0 %v20615_v17 }
 0xbb3   : > { %10054 = vmatprep.subr.bf16.mxu0 %v20620_v2 }
 0xbb6   : > { %10055 = vmatpush1.bf16.msra.mxu0 %v20618_v44  ;;  %v20656_v44 = vld [vmem:[%s25676_s10 + $0xc] ss:$16 sps:$4 sm:$0xff]  }
 0xbb7   : > { %10056 = vmatprep.subr.bf16.mxu0 %v20623_v12 }
 0xbba   : > { %10057 = vmatpush1.bf16.msra.mxu0 %v20621_v4 }
 0xbbb   : > { %10058 = vmatprep.subr.bf16.mxu0 %v20626_v28 }
 0xbbe   : > { %10059 = vmatpush1.bf16.msra.mxu0 %v20624_v33 }
 0xbbf   : > { %10060 = vmatprep.subr.bf16.mxu0 %v20629_v32 }
 0xbc2   : > { %10061 = vmatpush1.bf16.msra.mxu0 %v20627_v48 }
 0xbc3   : > { %10062 = vmatprep.subr.bf16.mxu0 %v20632_v30 }
 0xbc6   : > { %10063 = vmatpush1.bf16.msra.mxu0 %v20630_v36  ;;  %v20654_v36 = vld [vmem:[%s25676_s10 + $0x8] ss:$16 sps:$4 sm:$0xff]  }
 0xbc7   : > { %10064 = vmatprep.subr.bf16.mxu0 %v20635_v39 }
 0xbca   : > { %10065 = vmatpush1.bf16.msra.mxu0 %v20633_v22 }
 0xbcb   : > { %10066 = vmatprep.subr.bf16.mxu0 %v20638_v8  ;;  %v20659_v8 = vld [vmem:[%s25676_s10 + $0x2c] ss:$16 sps:$4 sm:$0xff]  }
 0xbce   : > { %10067 = vmatpush1.bf16.msra.mxu0 %v20636_v35 }
 0xbcf   : > { %10068 = vmatprep.subr.bf16.mxu0 %v20641_v20 }
 0xbd2   : > { %10069 = vmatpush1.bf16.msra.mxu0 %v20639_v42 }
 0xbd3   : > { %v9085_v5 = vpop.f32.mrb[76].mxu1  ;;  %10070 = vmatprep.subr.bf16.mxu0 %v20644_v63 }
 0xbd4   : > { %v19217_v58 = vadd.f32 %v9085_v5, %v8019_v11  ;;  %v9087_v60 = vpop.f32.mrb[77].mxu1 }
 0xbd5   : > { %v19218_v3 = vadd.f32 %v9087_v60, %v8023_v13  ;;  %v9089_v27 = vpop.f32.mrb[78].mxu1 }
 0xbd6   : > { %v19219_v18 = vadd.f32 %v9089_v27, %v8019_v11  ;;  %10071 = vmatpush1.bf16.msra.mxu0 %v20642_v59  ;;  %v9091_v24 = vpop.f32.mrb[79].mxu1  ;;  %v9122_v53 = vmax.f32 %v19217_v58, 0.0 }
 0xbd7   : > { %v19220_v46 = vadd.f32 %v9091_v24, %v8023_v13  ;;  %10072 = vmatprep.subr.bf16.mxu0 %v20647_v50  ;;  %v9123_v23 = vmax.f32 %v19218_v3, 0.0  ;;  %v20662_v50 = vld [vmem:[%s25676_s10 + $0x4c] ss:$16 sps:$4 sm:$0xff]   ;;  %v20660_v3 = vld [vmem:[%s25676_s10 + $0x48] ss:$16 sps:$4 sm:$0xff]  }
 0xbd8   : > { %v9126_v52 = vmax.f32 %v19219_v18, 0.0  ;;  %v20665_v24 = vld [vmem:[%s25676_s10 + $0x6c] ss:$16 sps:$4 sm:$0xff]  }
 0xbd9   : > { %v9127_v7 = vmax.f32 %v19220_v46, 0.0  ;;  %v20668_v46 = vld [vmem:[%s25676_s10 + $0x8c] ss:$16 sps:$4 sm:$0xff]  }
 0xbda   : > { %v9139_v10 = vpack.c.bf16 %v9126_v52, %v9122_v53  ;;  %10073 = vmatpush1.bf16.msra.mxu0 %v20645_v16  ;;  %v20663_v16 = vld [vmem:[%s25676_s10 + $0x68] ss:$16 sps:$4 sm:$0xff]   ;;  %v20671_v53 = vld [vmem:[%s25676_s10 + $0xac] ss:$16 sps:$4 sm:$0xff]  }
 0xbdb   : > { %v9140_v31 = vpack.c.bf16 %v9127_v7, %v9123_v23  ;;  %v9095_v54 = vpop.f32.mrb[80].mxu1  ;;  %10074 = vmatprep.subr.bf16.mxu0 %v20650_v47  ;;  %v20666_v47 = vld [vmem:[%s25676_s10 + $0x88] ss:$16 sps:$4 sm:$0xff]   ;;  %v20674_v23 = vld [vmem:[%s25676_s10 + $0xcc] ss:$16 sps:$4 sm:$0xff]  }
 0xbdc   : > { %v9160_v19 = vshrl.u32 %v9139_v10, 16  ;;  %v19221_v40 = vadd.f32 %v9095_v54, %v8019_v11  ;;  %v9097_v57 = vpop.f32.mrb[81].mxu1  ;;  %v9163_v56 = vshll.u32 %v9139_v10, 16  ;;  %v20669_v52 = vld [vmem:[%s25676_s10 + $0xa8] ss:$16 sps:$4 sm:$0xff]  }
 0xbdd   : > { %v9167_v1 = vshrl.u32 %v9140_v31, 16  ;;  %v19222_v25 = vadd.f32 %v9097_v57, %v8023_v13  ;;  %v9099_v34 = vpop.f32.mrb[82].mxu1  ;;  %v9170_v17 = vshll.u32 %v9140_v31, 16  ;;  %v20672_v7 = vld [vmem:[%s25676_s10 + $0xc8] ss:$16 sps:$4 sm:$0xff]  }
 0xbde   : > { %v9162_v15 = vrot.slane %v9160_v19, 7  ;;  %v19223_v62 = vadd.f32 %v9099_v34, %v8019_v11  ;;  %10075 = vmatpush1.bf16.msra.mxu0 %v20648_v38  ;;  %v9101_v6 = vpop.f32.mrb[83].mxu1  ;;  %v9130_v4 = vmax.f32 %v19221_v40, 0.0  ;;  %v20677_v10 = vld [vmem:[%s25676_s10 + $0xec] ss:$16 sps:$4 sm:$0xff]  }
 0xbdf   : > { %v9169_v55 = vrot.slane %v9167_v1, 7  ;;  %v19224_v2 = vadd.f32 %v9101_v6, %v8023_v13  ;;  %10076 = vmatprep.subr.bf16.mxu0 %v20653_v0  ;;  %v9131_v32 = vmax.f32 %v19222_v25, 0.0  ;;  %v20657_v13 = vld [vmem:[%s25676_s10 + $0x28] ss:$16 sps:$4 sm:$0xff]   ;;  %v20680_v31 = vld [vmem:[%s25676_s10 + $0x10c] ss:$16 sps:$4 sm:$0xff]  }
 0xbe0   : > { %v9165_v12 = vor.u32 %v9163_v56, %v9162_v15  ;;  %v9134_v28 = vmax.f32 %v19223_v62, 0.0  ;;  %v20675_v38 = vld [vmem:[%s25676_s10 + $0xe8] ss:$16 sps:$4 sm:$0xff]   ;;  %v20683_v0 = vld [vmem:[%s25676_s10 + $0x12c] ss:$16 sps:$4 sm:$0xff]  }
 0xbe1   : > { %v9172_v33 = vor.u32 %v9170_v17, %v9169_v55  ;;  %v9135_v48 = vmax.f32 %v19224_v2, 0.0  ;;  %v20678_v54 = vld [vmem:[%s25676_s10 + $0x108] ss:$16 sps:$4 sm:$0xff]   ;;  %v20686_v40 = vld [vmem:[%s25676_s10 + $0x14c] ss:$16 sps:$4 sm:$0xff]  }
 0xbe2   : > { %v9143_v30 = vpack.c.bf16 %v9134_v28, %v9130_v4  ;;  %10077 = vmatpush1.bf16.msra.mxu0 %v20651_v41  ;;  %v24033_v20 = vsel %vm23571_vm15, 0, %v9165_v12  ;;  %v20681_v19 = vld [vmem:[%s25676_s10 + $0x128] ss:$16 sps:$4 sm:$0xff]   ;;  %v20689_v1 = vld [vmem:[%s25676_s10 + $0x16c] ss:$16 sps:$4 sm:$0xff]  }
 0xbe3   : > { %v9144_v39 = vpack.c.bf16 %v9135_v48, %v9131_v32  ;;  %v24025_v22 = vsel %vm23571_vm15, 0, %v9172_v33  ;;  %10099 = vmatprep.subr.bf16.mxu0 %v20656_v44  ;;  %v20684_v57 = vld [vmem:[%s25676_s10 + $0x148] ss:$16 sps:$4 sm:$0xff]   ;;  %v20692_v34 = vld [vmem:[%s25676_s10 + $0x18c] ss:$16 sps:$4 sm:$0xff]  }
 0xbe4   : > { %v9190_v35 = vshrl.u32 %v9143_v30, 16  ;;  %10078 = vmatprep.mubr.bf16.mxu0 %v24025_v22  ;;  %v9193_v11 = vshll.u32 %v9143_v30, 16  ;;  %v20687_v25 = vld [vmem:[%s25676_s10 + $0x168] ss:$16 sps:$4 sm:$0xff]   ;;  %v20695_v56 = vld [vmem:[%s25676_s10 + $0x1ac] ss:$16 sps:$4 sm:$0xff]  }
 0xbe5   : > { %v9198_v42 = vshrl.u32 %v9144_v39, 16  ;;  %10079 = vmatmul.mubr.bf16.vlgmr.msra.gmra.mrb[40].mxu0 %v24033_v20  ;;  %v9201_v5 = vshll.u32 %v9144_v39, 16  ;;  %v20693_v62 = vld [vmem:[%s25676_s10 + $0x1a8] ss:$16 sps:$4 sm:$0xff]   ;;  %v20698_v6 = vld [vmem:[%s25676_s10 + $0x1cc] ss:$16 sps:$4 sm:$0xff]  }
 0xbe6   : > { %v24036_v63 = vrot.slane %v9190_v35, 7  ;;  %10100 = vmatpush1.bf16.msra.mxu0 %v20654_v36  ;;  %v20696_v41 = vld [vmem:[%s25676_s10 + $0x1c8] ss:$16 sps:$4 sm:$0xff]   ;;  %v20704_v2 = vld [vmem:[%s25676_s10 + $0x20c] ss:$16 sps:$4 sm:$0xff]  }
 0xbe7   : > { %v24041_v59 = vrot.slane %v9198_v42, 7  ;;  %10101 = vmatprep.subr.bf16.mxu0 %v20659_v8  ;;  %v20699_v17 = vld [vmem:[%s25676_s10 + $0x1e8] ss:$16 sps:$4 sm:$0xff]   ;;  %v20707_v12 = vld [vmem:[%s25676_s10 + $0x22c] ss:$16 sps:$4 sm:$0xff]  }
 0xbe8   : > { %v9195_v58 = vor.u32 %v9193_v11, %v24036_v63  ;;  %v20702_v44 = vld [vmem:[%s25676_s10 + $0x208] ss:$16 sps:$4 sm:$0xff]   ;;  %v20710_v28 = vld [vmem:[%s25676_s10 + $0x24c] ss:$16 sps:$4 sm:$0xff]  }
 0xbe9   : > { %v9203_v60 = vor.u32 %v9201_v5, %v24041_v59  ;;  %v20705_v4 = vld [vmem:[%s25676_s10 + $0x228] ss:$16 sps:$4 sm:$0xff]   ;;  %v20713_v32 = vld [vmem:[%s25676_s10 + $0x26c] ss:$16 sps:$4 sm:$0xff]  }
 0xbea   : > { %10102 = vmatpush1.bf16.msra.mxu0 %v20657_v13  ;;  %v24052_v27 = vsel %vm6100_vm14, %v9162_v15, %v9195_v58  ;;  %v20690_v15 = vld [vmem:[%s25676_s10 + $0x188] ss:$16 sps:$4 sm:$0xff]   ;;  %v20716_v30 = vld [vmem:[%s25676_s10 + $0x28c] ss:$16 sps:$4 sm:$0xff]  }
 0xbeb   : > { %v24055_v18 = vsel %vm6100_vm14, %v9169_v55, %v9203_v60  ;;  %10103 = vmatprep.subr.bf16.mxu0 %v20662_v50  ;;  %v20701_v55 = vld [vmem:[%s25676_s10 + $0x1ec] ss:$16 sps:$4 sm:$0xff]   ;;  %v20708_v33 = vld [vmem:[%s25676_s10 + $0x248] ss:$16 sps:$4 sm:$0xff]  }
 0xbec   : > { %10088 = vmatprep.mubr.bf16.mxu0 %v24055_v18  ;;  %v20711_v48 = vld [vmem:[%s25676_s10 + $0x268] ss:$16 sps:$4 sm:$0xff]   ;;  %v20719_v39 = vld [vmem:[%s25676_s10 + $0x2ac] ss:$16 sps:$4 sm:$0xff]  }
 0xbed   : > { %10089 = vmatmul.mubr.bf16.gmra.mrb[44].mxu0 %v24052_v27  ;;  %v20714_v36 = vld [vmem:[%s25676_s10 + $0x288] ss:$16 sps:$4 sm:$0xff]   ;;  %v20722_v35 = vld [vmem:[%s25676_s10 + $0x2cc] ss:$16 sps:$4 sm:$0xff]  }
 0xbee   : > { %10104 = vmatpush1.bf16.msra.mxu0 %v20660_v3  ;;  %10131 = vmatprep.mubr.bf16.mxu0 %v23898_v37  ;;  %v20717_v8 = vld [vmem:[%s25676_s10 + $0x2a8] ss:$16 sps:$4 sm:$0xff]   ;;  %v20725_v11 = vld [vmem:[%s25676_s10 + $0x2ec] ss:$16 sps:$4 sm:$0xff]  }
 0xbef   : > { %10105 = vmatprep.subr.bf16.mxu0 %v20665_v24  ;;  %v20720_v42 = vld [vmem:[%s25676_s10 + $0x2c8] ss:$16 sps:$4 sm:$0xff]   ;;  %v20728_v5 = vld [vmem:[%s25676_s10 + $0x30c] ss:$16 sps:$4 sm:$0xff]  }
 0xbf0   : > { %v20723_v13 = vld [vmem:[%s25676_s10 + $0x2e8] ss:$16 sps:$4 sm:$0xff]   ;;  %v20731_v58 = vld [vmem:[%s25676_s10 + $0x32c] ss:$16 sps:$4 sm:$0xff]  }
 0xbf1   : > { %v20726_v50 = vld [vmem:[%s25676_s10 + $0x308] ss:$16 sps:$4 sm:$0xff]   ;;  %v20734_v3 = vld [vmem:[%s25676_s10 + $0x34c] ss:$16 sps:$4 sm:$0xff]  }
 0xbf2   : > { %10106 = vmatpush1.bf16.msra.mxu0 %v20663_v16  ;;  %v20729_v60 = vld [vmem:[%s25676_s10 + $0x328] ss:$16 sps:$4 sm:$0xff]   ;;  %v20737_v16 = vld [vmem:[%s25676_s10 + $0x36c] ss:$16 sps:$4 sm:$0xff]  }
 0xbf3   : > { %10107 = vmatprep.subr.bf16.mxu0 %v20668_v46  ;;  %v20732_v24 = vld [vmem:[%s25676_s10 + $0x348] ss:$16 sps:$4 sm:$0xff]  }
 0xbf4   : > { %v20735_v46 = vld [vmem:[%s25676_s10 + $0x368] ss:$16 sps:$4 sm:$0xff]  }
 0xbf6   : > { %10108 = vmatpush1.bf16.msra.mxu0 %v20666_v47  ;;  %v20740_v47 = vld [vmem:[%s25676_s10 + $0x38c] ss:$16 sps:$4 sm:$0xff]  }
 0xbf7   : > { %10109 = vmatprep.subr.bf16.mxu0 %v20671_v53  ;;  %v20738_v53 = vld [vmem:[%s25676_s10 + $0x388] ss:$16 sps:$4 sm:$0xff]  }
 0xbfa   : > { %10110 = vmatpush1.bf16.msra.mxu0 %v20669_v52  ;;  %v20743_v52 = vld [vmem:[%s25676_s10 + $0x3ac] ss:$16 sps:$4 sm:$0xff]  }
 0xbfb   : > { %10111 = vmatprep.subr.bf16.mxu0 %v20674_v23  ;;  %v20741_v23 = vld [vmem:[%s25676_s10 + $0x3a8] ss:$16 sps:$4 sm:$0xff]  }
 0xbfe   : > { %10112 = vmatpush1.bf16.msra.mxu0 %v20672_v7  ;;  %v20746_v7 = vld [vmem:[%s25676_s10 + $0x3cc] ss:$16 sps:$4 sm:$0xff]  }
 0xbff   : > { %10113 = vmatprep.subr.bf16.mxu0 %v20677_v10  ;;  %v20744_v10 = vld [vmem:[%s25676_s10 + $0x3c8] ss:$16 sps:$4 sm:$0xff]  }
 0xc02   : > { %10114 = vmatpush1.bf16.msra.mxu0 %v20675_v38  ;;  %v20749_v38 = vld [vmem:[%s25676_s10 + $0x3ec] ss:$16 sps:$4 sm:$0xff]  }
 0xc03   : > { %10115 = vmatprep.subr.bf16.mxu0 %v20680_v31  ;;  %v20747_v31 = vld [vmem:[%s25676_s10 + $0x3e8] ss:$16 sps:$4 sm:$0xff]  }
 0xc06   : > { %10116 = vmatpush1.bf16.msra.mxu0 %v20678_v54  ;;  %v20752_v54 = vld [vmem:[%s25676_s10 + $0x404] ss:$16 sps:$4 sm:$0xff]  }
 0xc07   : > { %10117 = vmatprep.subr.bf16.mxu0 %v20683_v0  ;;  %v20750_v0 = vld [vmem:[%s25676_s10 + $0x400] ss:$16 sps:$4 sm:$0xff]  }
 0xc0a   : > { %10118 = vmatpush1.bf16.msra.mxu0 %v20681_v19  ;;  %v20755_v19 = vld [vmem:[%s25676_s10 + $0x424] ss:$16 sps:$4 sm:$0xff]  }
 0xc0b   : > { %10119 = vmatprep.subr.bf16.mxu0 %v20686_v40  ;;  %v10386_v40 = vshll.u32 %v23898_v37, 16 }
 0xc0e   : > { %10120 = vmatpush1.bf16.msra.mxu0 %v20684_v57  ;;  %v10391_v57 = vshll.u32 %v23928_v26, 16 }
 0xc0f   : > { %10121 = vmatprep.subr.bf16.mxu0 %v20689_v1  ;;  %v20753_v1 = vld [vmem:[%s25676_s10 + $0x420] ss:$16 sps:$4 sm:$0xff]  }
 0xc12   : > { %10122 = vmatpush1.bf16.msra.mxu0 %v20687_v25  ;;  %v20758_v25 = vld [vmem:[%s25676_s10 + $0x444] ss:$16 sps:$4 sm:$0xff]  }
 0xc13   : > { %10123 = vmatprep.subr.bf16.mxu0 %v20692_v34  ;;  %v10388_v34 = vrot.slane %v10386_v40, 1  ;;  %v24367_v40 = vsel %vm23571_vm15, %v23909_v14, 0  ;;  %v20801_v14 = vld [vmem:[%s25676_s10 + $0x620] ss:$16 sps:$4 sm:$0xff]  }
 0xc16   : > { %10124 = vmatpush1.bf16.msra.mxu0 %v20690_v15  ;;  %v10384_v15 = vshrl.u32 %v23898_v37, 16 }
 0xc17   : > { %10125 = vmatprep.subr.bf16.mxu0 %v20695_v56  ;;  %v24258_v56 = vrot.slane %v10391_v57, 1 }
 0xc1a   : > { %10126 = vmatpush1.bf16.msra.mxu0 %v20693_v62  ;;  %v20756_v62 = vld [vmem:[%s25676_s10 + $0x440] ss:$16 sps:$4 sm:$0xff]  }
 0xc1b   : > { %10127 = vmatprep.subr.bf16.mxu0 %v20698_v6  ;;  %v10389_v6 = vor.u32 %v10388_v34, %v10384_v15 }
 0xc1e   : > { %10128 = vmatpush1.bf16.msra.mxu0 %v20696_v41  ;;  %v20761_v41 = vld [vmem:[%s25676_s10 + $0x464] ss:$16 sps:$4 sm:$0xff]  }
 0xc1f   : > { %10129 = vmatprep.subr.bf16.mxu0 %v20701_v55  ;;  %v24269_v55 = vsel %vm723_vm5, %v10389_v6, %v24258_v56  ;;  %v10423_v6 = vshll.u32 %v24367_v40, 16 }
 0xc22   : > { %10130 = vmatpush1.bf16.msra.mxu0 %v20699_v17  ;;  %v20759_v17 = vld [vmem:[%s25676_s10 + $0x460] ss:$16 sps:$4 sm:$0xff]  }
 0xc23   : > { %10152 = vmatprep.subr.bf16.mxu0 %v20704_v2  ;;  %v20764_v2 = vld [vmem:[%s25676_s10 + $0x484] ss:$16 sps:$4 sm:$0xff]  }
 0xc25   : > { %10132 = vmatmul.mubr.bf16.vlgmr.msra.gmra.mrb[48].mxu0 %v23906_v45 }
 0xc26   : > { %10141 = vmatprep.mubr.bf16.mxu0 %v23928_v26  ;;  %10153 = vmatpush1.bf16.msra.mxu0 %v20702_v44  ;;  %v20762_v44 = vld [vmem:[%s25676_s10 + $0x480] ss:$16 sps:$4 sm:$0xff]  }
 0xc27   : > { %10154 = vmatprep.subr.bf16.mxu0 %v20707_v12  ;;  %v20767_v12 = vld [vmem:[%s25676_s10 + $0x4a4] ss:$16 sps:$4 sm:$0xff]  }
 0xc2a   : > { %10155 = vmatpush1.bf16.msra.mxu0 %v20705_v4  ;;  %v20765_v4 = vld [vmem:[%s25676_s10 + $0x4a0] ss:$16 sps:$4 sm:$0xff]  }
 0xc2b   : > { %10156 = vmatprep.subr.bf16.mxu0 %v20710_v28  ;;  %v20770_v28 = vld [vmem:[%s25676_s10 + $0x4c4] ss:$16 sps:$4 sm:$0xff]  }
 0xc2d   : > { %10142 = vmatmul.mubr.bf16.gmra.mrb[52].mxu0 %v23925_v43 }
 0xc2e   : > { %10157 = vmatpush1.bf16.msra.mxu0 %v20708_v33  ;;  %10184 = vmatprep.mubr.bf16.mxu0 %v24025_v22  ;;  %v20768_v33 = vld [vmem:[%s25676_s10 + $0x4c0] ss:$16 sps:$4 sm:$0xff]  }
 0xc2f   : > { %10158 = vmatprep.subr.bf16.mxu0 %v20713_v32  ;;  %v20773_v32 = vld [vmem:[%s25676_s10 + $0x4e4] ss:$16 sps:$4 sm:$0xff]  }
 0xc32   : > { %10159 = vmatpush1.bf16.msra.mxu0 %v20711_v48  ;;  %v20771_v48 = vld [vmem:[%s25676_s10 + $0x4e0] ss:$16 sps:$4 sm:$0xff]  }
 0xc33   : > { %10160 = vmatprep.subr.bf16.mxu0 %v20716_v30  ;;  %v20776_v30 = vld [vmem:[%s25676_s10 + $0x504] ss:$16 sps:$4 sm:$0xff]  }
 0xc36   : > { %10161 = vmatpush1.bf16.msra.mxu0 %v20714_v36  ;;  %v20774_v36 = vld [vmem:[%s25676_s10 + $0x500] ss:$16 sps:$4 sm:$0xff]  }
 0xc37   : > { %10162 = vmatprep.subr.bf16.mxu0 %v20719_v39  ;;  %v20779_v39 = vld [vmem:[%s25676_s10 + $0x524] ss:$16 sps:$4 sm:$0xff]  }
 0xc3a   : > { %10163 = vmatpush1.bf16.msra.mxu0 %v20717_v8  ;;  %v20777_v8 = vld [vmem:[%s25676_s10 + $0x520] ss:$16 sps:$4 sm:$0xff]  }
 0xc3b   : > { %10164 = vmatprep.subr.bf16.mxu0 %v20722_v35  ;;  %v20782_v35 = vld [vmem:[%s25676_s10 + $0x544] ss:$16 sps:$4 sm:$0xff]  }
 0xc3e   : > { %10165 = vmatpush1.bf16.msra.mxu0 %v20720_v42  ;;  %v20780_v42 = vld [vmem:[%s25676_s10 + $0x540] ss:$16 sps:$4 sm:$0xff]  }
 0xc3f   : > { %10166 = vmatprep.subr.bf16.mxu0 %v20725_v11  ;;  %v20785_v11 = vld [vmem:[%s25676_s10 + $0x564] ss:$16 sps:$4 sm:$0xff]  }
 0xc42   : > { %10167 = vmatpush1.bf16.msra.mxu0 %v20723_v13  ;;  %v20783_v13 = vld [vmem:[%s25676_s10 + $0x560] ss:$16 sps:$4 sm:$0xff]  }
 0xc43   : > { %10168 = vmatprep.subr.bf16.mxu0 %v20728_v5  ;;  %v20788_v5 = vld [vmem:[%s25676_s10 + $0x584] ss:$16 sps:$4 sm:$0xff]  }
 0xc46   : > { %10169 = vmatpush1.bf16.msra.mxu0 %v20726_v50  ;;  %v20786_v50 = vld [vmem:[%s25676_s10 + $0x580] ss:$16 sps:$4 sm:$0xff]  }
 0xc47   : > { %10170 = vmatprep.subr.bf16.mxu0 %v20731_v58  ;;  %v20791_v58 = vld [vmem:[%s25676_s10 + $0x5a4] ss:$16 sps:$4 sm:$0xff]  }
 0xc4a   : > { %10171 = vmatpush1.bf16.msra.mxu0 %v20729_v60  ;;  %v20789_v60 = vld [vmem:[%s25676_s10 + $0x5a0] ss:$16 sps:$4 sm:$0xff]  }
 0xc4b   : > { %10172 = vmatprep.subr.bf16.mxu0 %v20734_v3  ;;  %v20794_v3 = vld [vmem:[%s25676_s10 + $0x5c4] ss:$16 sps:$4 sm:$0xff]  }
 0xc4e   : > { %10173 = vmatpush1.bf16.msra.mxu0 %v20732_v24  ;;  %v10374_v24 = vshll.u32 %v23906_v45, 16 }
 0xc4f   : > { %10174 = vmatprep.subr.bf16.mxu0 %v20737_v16  ;;  %v20792_v16 = vld [vmem:[%s25676_s10 + $0x5c0] ss:$16 sps:$4 sm:$0xff]  }
 0xc52   : > { %10175 = vmatpush1.bf16.msra.mxu0 %v20735_v46  ;;  %v20797_v46 = vld [vmem:[%s25676_s10 + $0x5e4] ss:$16 sps:$4 sm:$0xff]  }
 0xc53   : > { %10176 = vmatprep.subr.bf16.mxu0 %v20740_v47  ;;  %v24348_v47 = vsel %vm23571_vm15, %v23914_v49, 0  ;;  %v10372_v49 = vshrl.u32 %v23906_v45, 16 }
 0xc56   : > { %10177 = vmatpush1.bf16.msra.mxu0 %v20738_v53  ;;  %v10379_v53 = vshll.u32 %v23925_v43, 16 }
 0xc57   : > { %10178 = vmatprep.subr.bf16.mxu0 %v20743_v52  ;;  %v20795_v52 = vld [vmem:[%s25676_s10 + $0x5e0] ss:$16 sps:$4 sm:$0xff]  }
 0xc5a   : > { %10179 = vmatpush1.bf16.msra.mxu0 %v20741_v23  ;;  %v10376_v23 = vrot.slane %v10374_v24, 1  ;;  %v20825_v24 = vld [vmem:[%s25676_s10 + $0x720] ss:$16 sps:$4 sm:$0xff]  }
 0xc5b   : > { %10180 = vmatprep.subr.bf16.mxu0 %v20746_v7  ;;  %v20800_v7 = vld [vmem:[%s25676_s10 + $0x604] ss:$16 sps:$4 sm:$0xff]  }
 0xc5e   : > { %10181 = vmatpush1.bf16.msra.mxu0 %v20744_v10  ;;  %v10427_v10 = vshrl.u32 %v23928_v26, 16 }
 0xc5f   : > { %10182 = vmatprep.subr.bf16.mxu0 %v20749_v38  ;;  %v10431_v38 = vshll.u32 %v24348_v47, 16 }
 0xc61   : > { %v10433_v57 = vrot.slane %v10431_v38, 1  ;;  %v20837_v38 = vld [vmem:[%s25676_s10 + $0x7a0] ss:$16 sps:$4 sm:$0xff]  }
 0xc62   : > { %10183 = vmatpush1.bf16.msra.mxu0 %v20747_v31  ;;  %v10381_v31 = vrot.slane %v10379_v53, 1  ;;  %v20833_v53 = vld [vmem:[%s25676_s10 + $0x764] ss:$16 sps:$4 sm:$0xff]  }
 0xc63   : > { %11099 = vmatprep.subr.bf16.mxu0 %v20752_v54  ;;  %v10429_v54 = vor.u32 %v10427_v10, %v24258_v56  ;;  %v10415_v56 = vshll.u32 %v24055_v18, 16  ;;  %v20839_v10 = vld [vmem:[%s25676_s10 + $0x7a4] ss:$16 sps:$4 sm:$0xff]  }
 0xc65   : > { %10185 = vmatmul.mubr.bf16.vlgmr.msra.gmra.mrb[48].mxu0 %v24033_v20  ;;  %v24378_v15 = vsel %vm723_vm5, %v10429_v54, %v10433_v57  ;;  %v20840_v54 = vld [vmem:[%s25676_s10 + $0x7c0] ss:$16 sps:$4 sm:$0xff]   ;;  %v10403_v57 = vshll.u32 %v24052_v27, 16 }
 0xc66   : > { %10194 = vmatprep.mubr.bf16.mxu0 %v24055_v18  ;;  %11100 = vmatpush1.bf16.msra.mxu0 %v20750_v0  ;;  %v10377_v0 = vor.u32 %v10376_v23, %v10372_v49  ;;  %v20836_v23 = vld [vmem:[%s25676_s10 + $0x784] ss:$16 sps:$4 sm:$0xff]  }
 0xc67   : > { %11101 = vmatprep.subr.bf16.mxu0 %v20755_v19  ;;  %v20798_v19 = vld [vmem:[%s25676_s10 + $0x600] ss:$16 sps:$4 sm:$0xff]   ;;  %v20842_v49 = vld [vmem:[%s25676_s10 + $0x7c4] ss:$16 sps:$4 sm:$0xff]  }
 0xc68   : > { %v24374_v34 = vsel %vm723_vm5, %v10377_v0, %v10381_v31  ;;  %v20845_v0 = vld [vmem:[%s25676_s10 + $0x7e4] ss:$16 sps:$4 sm:$0xff]  }
 0xc6a   : > { %11102 = vmatpush1.bf16.msra.mxu0 %v20753_v1  ;;  %v20803_v1 = vld [vmem:[%s25676_s10 + $0x624] ss:$16 sps:$4 sm:$0xff]  }
 0xc6b   : > { %11103 = vmatprep.subr.bf16.mxu0 %v20758_v25  ;;  %v10410_v25 = vshll.u32 %v24025_v22, 16 }
 0xc6d   : > { %10195 = vmatmul.mubr.bf16.gmra.mrb[52].mxu0 %v24052_v27 }
 0xc6e   : > { %11104 = vmatpush1.bf16.msra.mxu0 %v20756_v62  ;;  %11131 = vmatprep.mubr.bf16.mxu0 %v24269_v55  ;;  %v10419_v62 = vshrl.u32 %v23925_v43, 16 }
 0xc6f   : > { %11105 = vmatprep.subr.bf16.mxu0 %v20761_v41  ;;  %v20806_v41 = vld [vmem:[%s25676_s10 + $0x644] ss:$16 sps:$4 sm:$0xff]  }
 0xc72   : > { %11106 = vmatpush1.bf16.msra.mxu0 %v20759_v17  ;;  %v10412_v17 = vrot.slane %v10410_v25, 1 }
 0xc73   : > { %11107 = vmatprep.subr.bf16.mxu0 %v20764_v2  ;;  %v10421_v2 = vor.u32 %v10419_v62, %v10381_v31  ;;  %v10398_v31 = vshll.u32 %v24033_v20, 16 }
 0xc75   : > { %v10400_v25 = vrot.slane %v10398_v31, 1  ;;  %v20879_v31 = vld [vmem:[%s25676_s10 + $0x568] ss:$16 sps:$4 sm:$0xff]  }
 0xc76   : > { %11108 = vmatpush1.bf16.msra.mxu0 %v20762_v44  ;;  %v10408_v44 = vshrl.u32 %v24025_v22, 16 }
 0xc77   : > { %11109 = vmatprep.subr.bf16.mxu0 %v20767_v12  ;;  %v24391_v12 = vrot.slane %v10415_v56, 1  ;;  %v20848_v56 = vld [vmem:[%s25676_s10 + $0x40c] ss:$16 sps:$4 sm:$0xff]  }
 0xc7a   : > { %11110 = vmatpush1.bf16.msra.mxu0 %v20765_v4  ;;  %v10425_v4 = vrot.slane %v10423_v6, 1  ;;  %v10405_v6 = vrot.slane %v10403_v57, 1  ;;  %v20887_v57 = vld [vmem:[%s25676_s10 + $0x5ac] ss:$16 sps:$4 sm:$0xff]  }
 0xc7b   : > { %11111 = vmatprep.subr.bf16.mxu0 %v20770_v28  ;;  %v20804_v28 = vld [vmem:[%s25676_s10 + $0x640] ss:$16 sps:$4 sm:$0xff]  }
 0xc7e   : > { %11112 = vmatpush1.bf16.msra.mxu0 %v20768_v33  ;;  %v10413_v33 = vor.u32 %v10412_v17, %v10408_v44  ;;  %v24503_v44 = vsel %vm23571_vm15, %v24036_v63, 0  ;;  %v20849_v63 = vld [vmem:[%s25676_s10 + $0x428] ss:$16 sps:$4 sm:$0xff]  }
 0xc7f   : > { %11113 = vmatprep.subr.bf16.mxu0 %v20773_v32  ;;  %v20809_v32 = vld [vmem:[%s25676_s10 + $0x664] ss:$16 sps:$4 sm:$0xff]  }
 0xc82   : > { %11114 = vmatpush1.bf16.msra.mxu0 %v20771_v48  ;;  %v24400_v48 = vsel %vm723_vm5, %v10421_v2, %v10425_v4  ;;  %v20846_v2 = vld [vmem:[%s25676_s10 + $0x408] ss:$16 sps:$4 sm:$0xff]  }
 0xc83   : > { %11115 = vmatprep.subr.bf16.mxu0 %v20776_v30  ;;  %v24405_v30 = vsel %vm723_vm5, %v10413_v33, %v24391_v12 }
 0xc86   : > { %11116 = vmatpush1.bf16.msra.mxu0 %v20774_v36  ;;  %v20807_v36 = vld [vmem:[%s25676_s10 + $0x660] ss:$16 sps:$4 sm:$0xff]  }
 0xc87   : > { %11117 = vmatprep.subr.bf16.mxu0 %v20779_v39  ;;  %v20812_v39 = vld [vmem:[%s25676_s10 + $0x684] ss:$16 sps:$4 sm:$0xff]  }
 0xc8a   : > { %11118 = vmatpush1.bf16.msra.mxu0 %v20777_v8  ;;  %v20810_v8 = vld [vmem:[%s25676_s10 + $0x680] ss:$16 sps:$4 sm:$0xff]  }
 0xc8b   : > { %11119 = vmatprep.subr.bf16.mxu0 %v20782_v35  ;;  %v20815_v35 = vld [vmem:[%s25676_s10 + $0x6a4] ss:$16 sps:$4 sm:$0xff]  }
 0xc8e   : > { %11120 = vmatpush1.bf16.msra.mxu0 %v20780_v42  ;;  %v20813_v42 = vld [vmem:[%s25676_s10 + $0x6a0] ss:$16 sps:$4 sm:$0xff]  }
 0xc8f   : > { %11121 = vmatprep.subr.bf16.mxu0 %v20785_v11  ;;  %v20818_v11 = vld [vmem:[%s25676_s10 + $0x6c4] ss:$16 sps:$4 sm:$0xff]  }
 0xc92   : > { %11122 = vmatpush1.bf16.msra.mxu0 %v20783_v13  ;;  %v20816_v13 = vld [vmem:[%s25676_s10 + $0x6c0] ss:$16 sps:$4 sm:$0xff]  }
 0xc93   : > { %11123 = vmatprep.subr.bf16.mxu0 %v20788_v5  ;;  %v20821_v5 = vld [vmem:[%s25676_s10 + $0x6e4] ss:$16 sps:$4 sm:$0xff]  }
 0xc96   : > { %11124 = vmatpush1.bf16.msra.mxu0 %v20786_v50  ;;  %v20819_v50 = vld [vmem:[%s25676_s10 + $0x6e0] ss:$16 sps:$4 sm:$0xff]  }
 0xc97   : > { %11125 = vmatprep.subr.bf16.mxu0 %v20791_v58  ;;  %v20824_v58 = vld [vmem:[%s25676_s10 + $0x704] ss:$16 sps:$4 sm:$0xff]  }
 0xc9a   : > { %11126 = vmatpush1.bf16.msra.mxu0 %v20789_v60  ;;  %v20822_v60 = vld [vmem:[%s25676_s10 + $0x700] ss:$16 sps:$4 sm:$0xff]  }
 0xc9b   : > { %11127 = vmatprep.subr.bf16.mxu0 %v20794_v3  ;;  %v20827_v3 = vld [vmem:[%s25676_s10 + $0x724] ss:$16 sps:$4 sm:$0xff]  }
 0xc9e   : > { %11128 = vmatpush1.bf16.msra.mxu0 %v20792_v16  ;;  %v20830_v16 = vld [vmem:[%s25676_s10 + $0x744] ss:$16 sps:$4 sm:$0xff]  }
 0xc9f   : > { %11129 = vmatprep.subr.bf16.mxu0 %v20797_v46  ;;  %v20828_v46 = vld [vmem:[%s25676_s10 + $0x740] ss:$16 sps:$4 sm:$0xff]  }
 0xca2   : > { %11130 = vmatpush1.bf16.msra.mxu0 %v20795_v52  ;;  %v20831_v52 = vld [vmem:[%s25676_s10 + $0x760] ss:$16 sps:$4 sm:$0xff]  }
 0xca3   : > { %11152 = vmatprep.subr.bf16.mxu0 %v20800_v7  ;;  %v20834_v7 = vld [vmem:[%s25676_s10 + $0x780] ss:$16 sps:$4 sm:$0xff]  }
 0xca5   : > { %11132 = vmatmul.mubr.bf16.vlgmr.msra.gmra.mrb[40].mxu0 %v24374_v34 }
 0xca6   : > { %11141 = vmatprep.mubr.bf16.mxu0 %v24378_v15  ;;  %11153 = vmatpush1.bf16.msra.mxu0 %v20798_v19  ;;  %v24484_v19 = vsel %vm23571_vm15, %v24041_v59, 0  ;;  %v10396_v59 = vshrl.u32 %v24033_v20, 16 }
 0xca7   : > { %11154 = vmatprep.subr.bf16.mxu0 %v20803_v1  ;;  %v20843_v1 = vld [vmem:[%s25676_s10 + $0x7e0] ss:$16 sps:$4 sm:$0xff]   ;;  %v10447_v62 = vshll.u32 %v24484_v19, 16 }
 0xca8   : > { %v10401_v17 = vor.u32 %v10400_v25, %v10396_v59  ;;  %v20890_v25 = vld [vmem:[%s25676_s10 + $0x5cc] ss:$16 sps:$4 sm:$0xff]  }
 0xca9   : > { %v10449_v4 = vrot.slane %v10447_v62, 1  ;;  %v20891_v62 = vld [vmem:[%s25676_s10 + $0x5e8] ss:$16 sps:$4 sm:$0xff]   ;;  %v20896_v59 = vld [vmem:[%s25676_s10 + $0x60c] ss:$16 sps:$4 sm:$0xff]  }
 0xcaa   : > { %11155 = vmatpush1.bf16.msra.mxu0 %v20801_v14  ;;  %v10443_v14 = vshrl.u32 %v24055_v18, 16  ;;  %v24509_v33 = vsel %vm723_vm5, %v10401_v17, %v10405_v6  ;;  %v20897_v17 = vld [vmem:[%s25676_s10 + $0x628] ss:$16 sps:$4 sm:$0xff]  }
 0xcab   : > { %11156 = vmatprep.subr.bf16.mxu0 %v20806_v41 }
 0xcac   : > { %v10445_v41 = vor.u32 %v10443_v14, %v24391_v12  ;;  %v20893_v14 = vld [vmem:[%s25676_s10 + $0x5ec] ss:$16 sps:$4 sm:$0xff]  }
 0xcad   : > { %11142 = vmatmul.mubr.bf16.gmra.mrb[44].mxu0 %v24400_v48 }
 0xcae   : > { %11157 = vmatpush1.bf16.msra.mxu0 %v20804_v28  ;;  %11184 = vmatprep.mubr.bf16.mxu0 %v24405_v30  ;;  %v20851_v28 = vld [vmem:[%s25676_s10 + $0x42c] ss:$16 sps:$4 sm:$0xff]   ;;  %v24513_v12 = vsel %vm723_vm5, %v10445_v41, %v10449_v4  ;;  %v20900_v4 = vld [vmem:[%s25676_s10 + $0x648] ss:$16 sps:$4 sm:$0xff]  }
 0xcaf   : > { %11158 = vmatprep.subr.bf16.mxu0 %v20809_v32  ;;  %v10435_v32 = vshrl.u32 %v24052_v27, 16  ;;  %v20899_v41 = vld [vmem:[%s25676_s10 + $0x62c] ss:$16 sps:$4 sm:$0xff]  }
 0xcb2   : > { %11159 = vmatpush1.bf16.msra.mxu0 %v20807_v36  ;;  %v10439_v36 = vshll.u32 %v24503_v44, 16 }
 0xcb3   : > { %11160 = vmatprep.subr.bf16.mxu0 %v20812_v39  ;;  %v20854_v39 = vld [vmem:[%s25676_s10 + $0x44c] ss:$16 sps:$4 sm:$0xff]  }
 0xcb6   : > { %11161 = vmatpush1.bf16.msra.mxu0 %v20810_v8  ;;  %v10437_v8 = vor.u32 %v10435_v32, %v10405_v6  ;;  %v20894_v6 = vld [vmem:[%s25676_s10 + $0x608] ss:$16 sps:$4 sm:$0xff]   ;;  %v20914_v32 = vld [vmem:[%s25676_s10 + $0x6cc] ss:$16 sps:$4 sm:$0xff]  }
 0xcb7   : > { %11162 = vmatprep.subr.bf16.mxu0 %v20815_v35  ;;  %v10441_v35 = vrot.slane %v10439_v36, 1  ;;  %v20912_v36 = vld [vmem:[%s25676_s10 + $0x6c8] ss:$16 sps:$4 sm:$0xff]  }
 0xcba   : > { %11163 = vmatpush1.bf16.msra.mxu0 %v20813_v42  ;;  %v20852_v42 = vld [vmem:[%s25676_s10 + $0x448] ss:$16 sps:$4 sm:$0xff]  }
 0xcbb   : > { %11164 = vmatprep.subr.bf16.mxu0 %v20818_v11  ;;  %v20857_v11 = vld [vmem:[%s25676_s10 + $0x46c] ss:$16 sps:$4 sm:$0xff]  }
 0xcbe   : > { %11165 = vmatpush1.bf16.msra.mxu0 %v20816_v13  ;;  %v24531_v13 = vsel %vm723_vm5, %v10437_v8, %v10441_v35  ;;  %v20915_v8 = vld [vmem:[%s25676_s10 + $0x6e8] ss:$16 sps:$4 sm:$0xff]   ;;  %v20920_v35 = vld [vmem:[%s25676_s10 + $0x70c] ss:$16 sps:$4 sm:$0xff]  }
 0xcbf   : > { %11166 = vmatprep.subr.bf16.mxu0 %v20821_v5  ;;  %v20855_v5 = vld [vmem:[%s25676_s10 + $0x468] ss:$16 sps:$4 sm:$0xff]  }
 0xcc2   : > { %11167 = vmatpush1.bf16.msra.mxu0 %v20819_v50  ;;  %v20860_v50 = vld [vmem:[%s25676_s10 + $0x48c] ss:$16 sps:$4 sm:$0xff]  }
 0xcc3   : > { %11168 = vmatprep.subr.bf16.mxu0 %v20824_v58  ;;  %v20858_v58 = vld [vmem:[%s25676_s10 + $0x488] ss:$16 sps:$4 sm:$0xff]  }
 0xcc6   : > { %11169 = vmatpush1.bf16.msra.mxu0 %v20822_v60  ;;  %v20863_v60 = vld [vmem:[%s25676_s10 + $0x4ac] ss:$16 sps:$4 sm:$0xff]  }
 0xcc7   : > { %11170 = vmatprep.subr.bf16.mxu0 %v20827_v3  ;;  %v20866_v3 = vld [vmem:[%s25676_s10 + $0x4cc] ss:$16 sps:$4 sm:$0xff]  }
 0xcca   : > { %11171 = vmatpush1.bf16.msra.mxu0 %v20825_v24  ;;  %v20864_v24 = vld [vmem:[%s25676_s10 + $0x4c8] ss:$16 sps:$4 sm:$0xff]  }
 0xccb   : > { %11172 = vmatprep.subr.bf16.mxu0 %v20830_v16  ;;  %v20869_v16 = vld [vmem:[%s25676_s10 + $0x4ec] ss:$16 sps:$4 sm:$0xff]  }
 0xcce   : > { %11173 = vmatpush1.bf16.msra.mxu0 %v20828_v46  ;;  %v20867_v46 = vld [vmem:[%s25676_s10 + $0x4e8] ss:$16 sps:$4 sm:$0xff]  }
 0xccf   : > { %11174 = vmatprep.subr.bf16.mxu0 %v20833_v53  ;;  %v20872_v53 = vld [vmem:[%s25676_s10 + $0x50c] ss:$16 sps:$4 sm:$0xff]  }
 0xcd2   : > { %11175 = vmatpush1.bf16.msra.mxu0 %v20831_v52  ;;  %v20870_v52 = vld [vmem:[%s25676_s10 + $0x508] ss:$16 sps:$4 sm:$0xff]  }
 0xcd3   : > { %11176 = vmatprep.subr.bf16.mxu0 %v20836_v23  ;;  %v20875_v23 = vld [vmem:[%s25676_s10 + $0x52c] ss:$16 sps:$4 sm:$0xff]  }
 0xcd6   : > { %11177 = vmatpush1.bf16.msra.mxu0 %v20834_v7  ;;  %v20873_v7 = vld [vmem:[%s25676_s10 + $0x528] ss:$16 sps:$4 sm:$0xff]  }
 0xcd7   : > { %11178 = vmatprep.subr.bf16.mxu0 %v20839_v10  ;;  %v20878_v10 = vld [vmem:[%s25676_s10 + $0x54c] ss:$16 sps:$4 sm:$0xff]  }
 0xcda   : > { %11179 = vmatpush1.bf16.msra.mxu0 %v20837_v38  ;;  %v20876_v38 = vld [vmem:[%s25676_s10 + $0x548] ss:$16 sps:$4 sm:$0xff]  }
 0xcdb   : > { %11180 = vmatprep.subr.bf16.mxu0 %v20842_v49  ;;  %v20881_v49 = vld [vmem:[%s25676_s10 + $0x56c] ss:$16 sps:$4 sm:$0xff]  }
 0xcde   : > { %11181 = vmatpush1.bf16.msra.mxu0 %v20840_v54  ;;  %v20884_v54 = vld [vmem:[%s25676_s10 + $0x58c] ss:$16 sps:$4 sm:$0xff]  }
 0xcdf   : > { %11182 = vmatprep.subr.bf16.mxu0 %v20845_v0  ;;  %v20882_v0 = vld [vmem:[%s25676_s10 + $0x588] ss:$16 sps:$4 sm:$0xff]  }
 0xce2   : > { %11183 = vmatpush1.bf16.msra.mxu0 %v20843_v1  ;;  %v20885_v1 = vld [vmem:[%s25676_s10 + $0x5a8] ss:$16 sps:$4 sm:$0xff]  }
 0xce3   : > { %11205 = vmatprep.subr.bf16.mxu0 %v20848_v56  ;;  %v20888_v56 = vld [vmem:[%s25676_s10 + $0x5c8] ss:$16 sps:$4 sm:$0xff]  }
 0xce5   : > { %11185 = vmatmul.mubr.bf16.vlgmr.msra.gmra.mrb[40].mxu0 %v24509_v33 }
 0xce6   : > { %11194 = vmatprep.mubr.bf16.mxu0 %v24513_v12  ;;  %11206 = vmatpush1.bf16.msra.mxu0 %v20846_v2  ;;  %v20902_v2 = vld [vmem:[%s25676_s10 + $0x64c] ss:$16 sps:$4 sm:$0xff]  }
 0xce7   : > { %11207 = vmatprep.subr.bf16.mxu0 %v20851_v28  ;;  %v20908_v28 = vld [vmem:[%s25676_s10 + $0x68c] ss:$16 sps:$4 sm:$0xff]  }
 0xcea   : > { %11208 = vmatpush1.bf16.msra.mxu0 %v20849_v63  ;;  %v20906_v63 = vld [vmem:[%s25676_s10 + $0x688] ss:$16 sps:$4 sm:$0xff]  }
 0xceb   : > { %11209 = vmatprep.subr.bf16.mxu0 %v20854_v39  ;;  %v20917_v39 = vld [vmem:[%s25676_s10 + $0x6ec] ss:$16 sps:$4 sm:$0xff]  }
 0xced   : > { %11195 = vmatmul.mubr.bf16.gmra.mrb[44].mxu0 %v24531_v13 }
 0xcee   : > { %11210 = vmatpush1.bf16.msra.mxu0 %v20852_v42  ;;  %11237 = vmatprep.mubr.bf16.mxu0 %v24269_v55  ;;  %v20861_v55 = vld [vmem:[%s25676_s10 + $0x4a8] ss:$16 sps:$4 sm:$0xff]  }
 0xcef   : > { %11211 = vmatprep.subr.bf16.mxu0 %v20857_v11  ;;  %v20918_v42 = vld [vmem:[%s25676_s10 + $0x708] ss:$16 sps:$4 sm:$0xff]   ;;  %v20923_v11 = vld [vmem:[%s25676_s10 + $0x72c] ss:$16 sps:$4 sm:$0xff]  }
 0xcf2   : > { %11212 = vmatpush1.bf16.msra.mxu0 %v20855_v5  ;;  %v20921_v5 = vld [vmem:[%s25676_s10 + $0x728] ss:$16 sps:$4 sm:$0xff]  }
 0xcf3   : > { %11213 = vmatprep.subr.bf16.mxu0 %v20860_v50  ;;  %v20926_v50 = vld [vmem:[%s25676_s10 + $0x74c] ss:$16 sps:$4 sm:$0xff]  }
 0xcf6   : > { %11214 = vmatpush1.bf16.msra.mxu0 %v20858_v58  ;;  %v20924_v58 = vld [vmem:[%s25676_s10 + $0x748] ss:$16 sps:$4 sm:$0xff]  }
 0xcf7   : > { %11215 = vmatprep.subr.bf16.mxu0 %v20863_v60  ;;  %v20929_v60 = vld [vmem:[%s25676_s10 + $0x76c] ss:$16 sps:$4 sm:$0xff]  }
 0xcfa   : > { %11216 = vmatpush1.bf16.msra.mxu0 %v20861_v55  ;;  %v20927_v55 = vld [vmem:[%s25676_s10 + $0x768] ss:$16 sps:$4 sm:$0xff]  }
 0xcfb   : > { %11217 = vmatprep.subr.bf16.mxu0 %v20866_v3  ;;  %v20932_v3 = vld [vmem:[%s25676_s10 + $0x78c] ss:$16 sps:$4 sm:$0xff]  }
 0xcfe   : > { %11218 = vmatpush1.bf16.msra.mxu0 %v20864_v24  ;;  %v20930_v24 = vld [vmem:[%s25676_s10 + $0x788] ss:$16 sps:$4 sm:$0xff]  }
 0xcff   : > { %11219 = vmatprep.subr.bf16.mxu0 %v20869_v16  ;;  %v20935_v16 = vld [vmem:[%s25676_s10 + $0x7ac] ss:$16 sps:$4 sm:$0xff]  }
 0xd02   : > { %11220 = vmatpush1.bf16.msra.mxu0 %v20867_v46  ;;  %v20933_v46 = vld [vmem:[%s25676_s10 + $0x7a8] ss:$16 sps:$4 sm:$0xff]  }
 0xd03   : > { %11221 = vmatprep.subr.bf16.mxu0 %v20872_v53  ;;  %v20938_v53 = vld [vmem:[%s25676_s10 + $0x7cc] ss:$16 sps:$4 sm:$0xff]  }
 0xd06   : > { %11222 = vmatpush1.bf16.msra.mxu0 %v20870_v52  ;;  %v20936_v52 = vld [vmem:[%s25676_s10 + $0x7c8] ss:$16 sps:$4 sm:$0xff]  }
 0xd07   : > { %11223 = vmatprep.subr.bf16.mxu0 %v20875_v23  ;;  %v20941_v23 = vld [vmem:[%s25676_s10 + $0x7ec] ss:$16 sps:$4 sm:$0xff]  }
 0xd0a   : > { %11224 = vmatpush1.bf16.msra.mxu0 %v20873_v7  ;;  %v20939_v7 = vld [vmem:[%s25676_s10 + $0x7e8] ss:$16 sps:$4 sm:$0xff]  }
 0xd0b   : > { %11225 = vmatprep.subr.bf16.mxu0 %v20878_v10  ;;  %v20944_v10 = vld [vmem:[%s25676_s10 + $0x804] ss:$16 sps:$4 sm:$0xff]  }
 0xd0e   : > { %11226 = vmatpush1.bf16.msra.mxu0 %v20876_v38  ;;  %v20942_v38 = vld [vmem:[%s25676_s10 + $0x800] ss:$16 sps:$4 sm:$0xff]  }
 0xd0f   : > { %11227 = vmatprep.subr.bf16.mxu0 %v20881_v49  ;;  %v20947_v49 = vld [vmem:[%s25676_s10 + $0x824] ss:$16 sps:$4 sm:$0xff]  }
 0xd12   : > { %11228 = vmatpush1.bf16.msra.mxu0 %v20879_v31  ;;  %v20945_v31 = vld [vmem:[%s25676_s10 + $0x820] ss:$16 sps:$4 sm:$0xff]  }
 0xd13   : > { %11229 = vmatprep.subr.bf16.mxu0 %v20884_v54  ;;  %v20950_v54 = vld [vmem:[%s25676_s10 + $0x844] ss:$16 sps:$4 sm:$0xff]  }
 0xd16   : > { %11230 = vmatpush1.bf16.msra.mxu0 %v20882_v0  ;;  %v11468_v0 = vrot.slane %v23928_v26, 1  ;;  %v11476_v26 = vrot.slane %v24367_v40, 1 }
 0xd17   : > { %11231 = vmatprep.subr.bf16.mxu0 %v20887_v57  ;;  %v20948_v57 = vld [vmem:[%s25676_s10 + $0x840] ss:$16 sps:$4 sm:$0xff]  }
 0xd1a   : > { %11232 = vmatpush1.bf16.msra.mxu0 %v20885_v1 }
 0xd1b   : > { %11233 = vmatprep.subr.bf16.mxu0 %v20890_v25  ;;  %v20951_v25 = vld [vmem:[%s25676_s10 + $0x860] ss:$16 sps:$4 sm:$0xff]  }
 0xd1e   : > { %11234 = vmatpush1.bf16.msra.mxu0 %v20888_v56  ;;  %v20959_v56 = vld [vmem:[%s25676_s10 + $0x8a4] ss:$16 sps:$4 sm:$0xff]  }
 0xd1f   : > { %11235 = vmatprep.subr.bf16.mxu0 %v20893_v14  ;;  %v20957_v14 = vld [vmem:[%s25676_s10 + $0x8a0] ss:$16 sps:$4 sm:$0xff]  }
 0xd22   : > { %11236 = vmatpush1.bf16.msra.mxu0 %v20891_v62  ;;  %v20962_v62 = vld [vmem:[%s25676_s10 + $0x8c4] ss:$16 sps:$4 sm:$0xff]  }
 0xd23   : > { %11258 = vmatprep.subr.bf16.mxu0 %v20896_v59  ;;  %v20960_v59 = vld [vmem:[%s25676_s10 + $0x8c0] ss:$16 sps:$4 sm:$0xff]  }
 0xd25   : > { %11238 = vmatmul.mubr.bf16.vlgmr.msra.gmra.mrb[48].mxu0 %v24374_v34  ;;  %v20905_v34 = vld [vmem:[%s25676_s10 + $0x66c] ss:$16 sps:$4 sm:$0xff]  }
 0xd26   : > { %11247 = vmatprep.mubr.bf16.mxu0 %v24378_v15  ;;  %11259 = vmatpush1.bf16.msra.mxu0 %v20894_v6  ;;  %v20903_v15 = vld [vmem:[%s25676_s10 + $0x668] ss:$16 sps:$4 sm:$0xff]   ;;  %v20965_v6 = vld [vmem:[%s25676_s10 + $0x8e4] ss:$16 sps:$4 sm:$0xff]  }
 0xd27   : > { %11260 = vmatprep.subr.bf16.mxu0 %v20899_v41  ;;  %v20963_v41 = vld [vmem:[%s25676_s10 + $0x8e0] ss:$16 sps:$4 sm:$0xff]  }
 0xd2a   : > { %11261 = vmatpush1.bf16.msra.mxu0 %v20897_v17  ;;  %v20968_v17 = vld [vmem:[%s25676_s10 + $0x904] ss:$16 sps:$4 sm:$0xff]  }
 0xd2b   : > { %11262 = vmatprep.subr.bf16.mxu0 %v20902_v2  ;;  %v20966_v2 = vld [vmem:[%s25676_s10 + $0x900] ss:$16 sps:$4 sm:$0xff]  }
 0xd2d   : > { %11248 = vmatmul.mubr.bf16.gmra.mrb[52].mxu0 %v24400_v48  ;;  %v20911_v48 = vld [vmem:[%s25676_s10 + $0x6ac] ss:$16 sps:$4 sm:$0xff]  }
 0xd2e   : > { %11263 = vmatpush1.bf16.msra.mxu0 %v20900_v4  ;;  %11290 = vmatprep.mubr.bf16.mxu0 %v24405_v30  ;;  %v20909_v30 = vld [vmem:[%s25676_s10 + $0x6a8] ss:$16 sps:$4 sm:$0xff]   ;;  %v20971_v4 = vld [vmem:[%s25676_s10 + $0x924] ss:$16 sps:$4 sm:$0xff]  }
 0xd2f   : > { %11264 = vmatprep.subr.bf16.mxu0 %v20905_v34  ;;  %v20969_v34 = vld [vmem:[%s25676_s10 + $0x920] ss:$16 sps:$4 sm:$0xff]  }
 0xd32   : > { %11265 = vmatpush1.bf16.msra.mxu0 %v20903_v15  ;;  %v20974_v15 = vld [vmem:[%s25676_s10 + $0x944] ss:$16 sps:$4 sm:$0xff]  }
 0xd33   : > { %11266 = vmatprep.subr.bf16.mxu0 %v20908_v28  ;;  %v20972_v28 = vld [vmem:[%s25676_s10 + $0x940] ss:$16 sps:$4 sm:$0xff]  }
 0xd36   : > { %11267 = vmatpush1.bf16.msra.mxu0 %v20906_v63  ;;  %v20977_v63 = vld [vmem:[%s25676_s10 + $0x964] ss:$16 sps:$4 sm:$0xff]  }
 0xd37   : > { %11268 = vmatprep.subr.bf16.mxu0 %v20911_v48  ;;  %v20975_v48 = vld [vmem:[%s25676_s10 + $0x960] ss:$16 sps:$4 sm:$0xff]  }
 0xd3a   : > { %11269 = vmatpush1.bf16.msra.mxu0 %v20909_v30  ;;  %v20980_v30 = vld [vmem:[%s25676_s10 + $0x984] ss:$16 sps:$4 sm:$0xff]  }
 0xd3b   : > { %11270 = vmatprep.subr.bf16.mxu0 %v20914_v32  ;;  %v20978_v32 = vld [vmem:[%s25676_s10 + $0x980] ss:$16 sps:$4 sm:$0xff]  }
 0xd3e   : > { %11271 = vmatpush1.bf16.msra.mxu0 %v20912_v36  ;;  %v20983_v36 = vld [vmem:[%s25676_s10 + $0x9a4] ss:$16 sps:$4 sm:$0xff]  }
 0xd3f   : > { %11272 = vmatprep.subr.bf16.mxu0 %v20917_v39  ;;  %v20981_v39 = vld [vmem:[%s25676_s10 + $0x9a0] ss:$16 sps:$4 sm:$0xff]  }
 0xd42   : > { %11273 = vmatpush1.bf16.msra.mxu0 %v20915_v8  ;;  %v20986_v8 = vld [vmem:[%s25676_s10 + $0x9c4] ss:$16 sps:$4 sm:$0xff]  }
 0xd43   : > { %11274 = vmatprep.subr.bf16.mxu0 %v20920_v35  ;;  %v20984_v35 = vld [vmem:[%s25676_s10 + $0x9c0] ss:$16 sps:$4 sm:$0xff]  }
 0xd46   : > { %11275 = vmatpush1.bf16.msra.mxu0 %v20918_v42  ;;  %v20989_v42 = vld [vmem:[%s25676_s10 + $0x9e4] ss:$16 sps:$4 sm:$0xff]  }
 0xd47   : > { %11276 = vmatprep.subr.bf16.mxu0 %v20923_v11  ;;  %v20987_v11 = vld [vmem:[%s25676_s10 + $0x9e0] ss:$16 sps:$4 sm:$0xff]  }
 0xd4a   : > { %11277 = vmatpush1.bf16.msra.mxu0 %v20921_v5  ;;  %v20992_v5 = vld [vmem:[%s25676_s10 + $0xa04] ss:$16 sps:$4 sm:$0xff]  }
 0xd4b   : > { %11278 = vmatprep.subr.bf16.mxu0 %v20926_v50  ;;  %v11465_v50 = vrot.slane %v23925_v43, 1  ;;  %v20993_v43 = vld [vmem:[%s25676_s10 + $0xa20] ss:$16 sps:$4 sm:$0xff]  }
 0xd4e   : > { %11279 = vmatpush1.bf16.msra.mxu0 %v20924_v58  ;;  %v11464_v58 = vrot.slane %v23906_v45, 1 }
 0xd4f   : > { %11280 = vmatprep.subr.bf16.mxu0 %v20929_v60  ;;  %v20990_v60 = vld [vmem:[%s25676_s10 + $0xa00] ss:$16 sps:$4 sm:$0xff]  }
 0xd52   : > { %11281 = vmatpush1.bf16.msra.mxu0 %v20927_v55  ;;  %v11478_v55 = vrot.slane %v24348_v47, 1  ;;  %v20998_v47 = vld [vmem:[%s25676_s10 + $0xa44] ss:$16 sps:$4 sm:$0xff]  }
 0xd53   : > { %11282 = vmatprep.subr.bf16.mxu0 %v20932_v3  ;;  %v20995_v3 = vld [vmem:[%s25676_s10 + $0xa24] ss:$16 sps:$4 sm:$0xff]  }
 0xd54   : > { %v24836_v45 = vsel %vm808_vm6, %v11468_v0, %v11478_v55  ;;  %v21142_v55 = vld [vmem:[#allocation10 + $0x44] ss:$16 sps:$4 sm:$0xff]  }
 0xd56   : > { %11283 = vmatpush1.bf16.msra.mxu0 %v20930_v24  ;;  %v24830_v24 = vsel %vm808_vm6, %v11464_v58, %v11465_v50  ;;  %v21052_v58 = vld [vmem:[%s25676_s10 + $0x88c] ss:$16 sps:$4 sm:$0xff]  }
 0xd57   : > { %11284 = vmatprep.subr.bf16.mxu0 %v20935_v16  ;;  %v11474_v16 = vrot.slane %v24055_v18, 1  ;;  %v21044_v18 = vld [vmem:[%s25676_s10 + $0x848] ss:$16 sps:$4 sm:$0xff]  }
 0xd5a   : > { %11285 = vmatpush1.bf16.msra.mxu0 %v20933_v46  ;;  %v20996_v46 = vld [vmem:[%s25676_s10 + $0xa40] ss:$16 sps:$4 sm:$0xff]  }
 0xd5b   : > { %11286 = vmatprep.subr.bf16.mxu0 %v20938_v53  ;;  %v11473_v53 = vrot.slane %v24025_v22, 1  ;;  %v20999_v22 = vld [vmem:[%s25676_s10 + $0xa60] ss:$16 sps:$4 sm:$0xff]  }
 0xd5d   : > { %v24861_v40 = vsel %vm808_vm6, %v11473_v53, %v11474_v16  ;;  %v21148_v53 = vld [vmem:[#allocation10 + $0x84] ss:$16 sps:$4 sm:$0xff]  }
 0xd5e   : > { %11287 = vmatpush1.bf16.msra.mxu0 %v20936_v52  ;;  %v21001_v52 = vld [vmem:[%s25676_s10 + $0xa64] ss:$16 sps:$4 sm:$0xff]  }
 0xd5f   : > { %11288 = vmatprep.subr.bf16.mxu0 %v20941_v23  ;;  %v24855_v23 = vsel %vm808_vm6, %v11465_v50, %v11476_v26  ;;  %v21139_v50 = vld [vmem:[#allocation10 + $0x24] ss:$16 sps:$4 sm:$0xff]   ;;  %v21058_v26 = vld [vmem:[%s25676_s10 + $0x8cc] ss:$16 sps:$4 sm:$0xff]  }
 0xd62   : > { %11289 = vmatpush1.bf16.msra.mxu0 %v20939_v7  ;;  %v21004_v7 = vld [vmem:[%s25676_s10 + $0xa84] ss:$16 sps:$4 sm:$0xff]  }
 0xd63   : > { %12132 = vmatprep.subr.bf16.mxu0 %v20944_v10  ;;  %v21002_v10 = vld [vmem:[%s25676_s10 + $0xa80] ss:$16 sps:$4 sm:$0xff]  }
 0xd65   : > { %11291 = vmatmul.mubr.bf16.vlgmr.msra.gmra.mrb[48].mxu0 %v24509_v33  ;;  %v11467_v33 = vrot.slane %v23898_v37, 1  ;;  %v20956_v37 = vld [vmem:[%s25676_s10 + $0x884] ss:$16 sps:$4 sm:$0xff]  }
 0xd66   : > { %11300 = vmatprep.mubr.bf16.mxu0 %v24513_v12  ;;  %12133 = vmatpush1.bf16.msra.mxu0 %v20942_v38  ;;  %v20953_v12 = vld [vmem:[%s25676_s10 + $0x864] ss:$16 sps:$4 sm:$0xff]  }
 0xd67   : > { %12134 = vmatprep.subr.bf16.mxu0 %v20947_v49  ;;  %v24739_v1 = vsel %vm808_vm6, %v11467_v33, %v11468_v0  ;;  %v21007_v38 = vld [vmem:[%s25676_s10 + $0xaa4] ss:$16 sps:$4 sm:$0xff]   ;;  %v21005_v49 = vld [vmem:[%s25676_s10 + $0xaa0] ss:$16 sps:$4 sm:$0xff]  }
 0xd68   : > { %v21013_v0 = vld [vmem:[%s25676_s10 + $0xae4] ss:$16 sps:$4 sm:$0xff]  }
 0xd69   : > { %v21016_v33 = vld [vmem:[%s25676_s10 + $0xb04] ss:$16 sps:$4 sm:$0xff]  }
 0xd6a   : > { %12135 = vmatpush1.bf16.msra.mxu0 %v20945_v31  ;;  %v21010_v31 = vld [vmem:[%s25676_s10 + $0xac4] ss:$16 sps:$4 sm:$0xff]  }
 0xd6b   : > { %12136 = vmatprep.subr.bf16.mxu0 %v20950_v54  ;;  %v21008_v54 = vld [vmem:[%s25676_s10 + $0xac0] ss:$16 sps:$4 sm:$0xff]  }
 0xd6d   : > { %11301 = vmatmul.mubr.bf16.gmra.mrb[52].mxu0 %v24531_v13  ;;  %v20954_v13 = vld [vmem:[%s25676_s10 + $0x880] ss:$16 sps:$4 sm:$0xff]  }
 0xd6e   : > { %12137 = vmatpush1.bf16.msra.mxu0 %v20948_v57  ;;  %12164 = vmatprep.mubr.bf16.mxu0 %v24739_v1  ;;  %v21011_v57 = vld [vmem:[%s25676_s10 + $0xae0] ss:$16 sps:$4 sm:$0xff]  }
 0xd6f   : > { %12138 = vmatprep.subr.bf16.mxu0 %v20953_v12  ;;  %v21014_v12 = vld [vmem:[%s25676_s10 + $0xb00] ss:$16 sps:$4 sm:$0xff]  }
 0xd72   : > { %12139 = vmatpush1.bf16.msra.mxu0 %v20951_v25  ;;  %v21019_v25 = vld [vmem:[%s25676_s10 + $0xb24] ss:$16 sps:$4 sm:$0xff]  }
 0xd73   : > { %12140 = vmatprep.subr.bf16.mxu0 %v20956_v37  ;;  %v21017_v37 = vld [vmem:[%s25676_s10 + $0xb20] ss:$16 sps:$4 sm:$0xff]  }
 0xd76   : > { %12141 = vmatpush1.bf16.msra.mxu0 %v20954_v13  ;;  %v21022_v13 = vld [vmem:[%s25676_s10 + $0xb44] ss:$16 sps:$4 sm:$0xff]  }
 0xd77   : > { %12142 = vmatprep.subr.bf16.mxu0 %v20959_v56  ;;  %v21020_v56 = vld [vmem:[%s25676_s10 + $0xb40] ss:$16 sps:$4 sm:$0xff]  }
 0xd7a   : > { %12143 = vmatpush1.bf16.msra.mxu0 %v20957_v14  ;;  %v21025_v14 = vld [vmem:[%s25676_s10 + $0xb64] ss:$16 sps:$4 sm:$0xff]  }
 0xd7b   : > { %12144 = vmatprep.subr.bf16.mxu0 %v20962_v62  ;;  %v21023_v62 = vld [vmem:[%s25676_s10 + $0xb60] ss:$16 sps:$4 sm:$0xff]  }
 0xd7e   : > { %12145 = vmatpush1.bf16.msra.mxu0 %v20960_v59  ;;  %v21028_v59 = vld [vmem:[%s25676_s10 + $0xb84] ss:$16 sps:$4 sm:$0xff]  }
 0xd7f   : > { %12146 = vmatprep.subr.bf16.mxu0 %v20965_v6  ;;  %v21026_v6 = vld [vmem:[%s25676_s10 + $0xb80] ss:$16 sps:$4 sm:$0xff]  }
 0xd82   : > { %12147 = vmatpush1.bf16.msra.mxu0 %v20963_v41  ;;  %v21031_v41 = vld [vmem:[%s25676_s10 + $0xba4] ss:$16 sps:$4 sm:$0xff]  }
 0xd83   : > { %12148 = vmatprep.subr.bf16.mxu0 %v20968_v17  ;;  %v21029_v17 = vld [vmem:[%s25676_s10 + $0xba0] ss:$16 sps:$4 sm:$0xff]  }
 0xd86   : > { %12149 = vmatpush1.bf16.msra.mxu0 %v20966_v2  ;;  %v21034_v2 = vld [vmem:[%s25676_s10 + $0xbc4] ss:$16 sps:$4 sm:$0xff]  }
 0xd87   : > { %12150 = vmatprep.subr.bf16.mxu0 %v20971_v4  ;;  %v21032_v4 = vld [vmem:[%s25676_s10 + $0xbc0] ss:$16 sps:$4 sm:$0xff]  }
 0xd8a   : > { %12151 = vmatpush1.bf16.msra.mxu0 %v20969_v34  ;;  %v21037_v34 = vld [vmem:[%s25676_s10 + $0xbe4] ss:$16 sps:$4 sm:$0xff]  }
 0xd8b   : > { %12152 = vmatprep.subr.bf16.mxu0 %v20974_v15  ;;  %v21035_v15 = vld [vmem:[%s25676_s10 + $0xbe0] ss:$16 sps:$4 sm:$0xff]  }
 0xd8e   : > { %12153 = vmatpush1.bf16.msra.mxu0 %v20972_v28  ;;  %v21040_v28 = vld [vmem:[%s25676_s10 + $0x80c] ss:$16 sps:$4 sm:$0xff]  }
 0xd8f   : > { %12154 = vmatprep.subr.bf16.mxu0 %v20977_v63  ;;  %v11471_v63 = vrot.slane %v24052_v27, 1  ;;  %v21041_v27 = vld [vmem:[%s25676_s10 + $0x828] ss:$16 sps:$4 sm:$0xff]  }
 0xd92   : > { %12155 = vmatpush1.bf16.msra.mxu0 %v20975_v48  ;;  %v11470_v48 = vrot.slane %v24033_v20, 1 }
 0xd93   : > { %12156 = vmatprep.subr.bf16.mxu0 %v20980_v30  ;;  %v21038_v30 = vld [vmem:[%s25676_s10 + $0x808] ss:$16 sps:$4 sm:$0xff]  }
 0xd96   : > { %12157 = vmatpush1.bf16.msra.mxu0 %v20978_v32  ;;  %v11482_v32 = vrot.slane %v24484_v19, 1  ;;  %v21046_v19 = vld [vmem:[%s25676_s10 + $0x84c] ss:$16 sps:$4 sm:$0xff]  }
 0xd97   : > { %12158 = vmatprep.subr.bf16.mxu0 %v20983_v36  ;;  %v21043_v36 = vld [vmem:[%s25676_s10 + $0x82c] ss:$16 sps:$4 sm:$0xff]  }
 0xd98   : > { %v24958_v20 = vsel %vm808_vm6, %v11474_v16, %v11482_v32  ;;  %v21053_v16 = vld [vmem:[%s25676_s10 + $0x8a8] ss:$16 sps:$4 sm:$0xff]   ;;  %v21167_v32 = vld [vmem:[#allocation10 + $0x160] ss:$16 sps:$4 sm:$0xff]  }
 0xd9a   : > { %12159 = vmatpush1.bf16.msra.mxu0 %v20981_v39  ;;  %v24952_v39 = vsel %vm808_vm6, %v11470_v48, %v11471_v63  ;;  %v21077_v48 = vld [vmem:[%s25676_s10 + $0x9a8] ss:$16 sps:$4 sm:$0xff]  }
 0xd9b   : > { %12160 = vmatprep.subr.bf16.mxu0 %v20986_v8  ;;  %v11480_v8 = vrot.slane %v24503_v44, 1  ;;  %v21047_v44 = vld [vmem:[%s25676_s10 + $0x868] ss:$16 sps:$4 sm:$0xff]  }
 0xd9e   : > { %12161 = vmatpush1.bf16.msra.mxu0 %v20984_v35  ;;  %v21049_v35 = vld [vmem:[%s25676_s10 + $0x86c] ss:$16 sps:$4 sm:$0xff]  }
 0xd9f   : > { %12162 = vmatprep.subr.bf16.mxu0 %v20989_v42  ;;  %v24975_v42 = vsel %vm808_vm6, %v11471_v63, %v11480_v8  ;;  %v21169_v63 = vld [vmem:[#allocation10 + $0x164] ss:$16 sps:$4 sm:$0xff]   ;;  %v21088_v8 = vld [vmem:[%s25676_s10 + $0xa0c] ss:$16 sps:$4 sm:$0xff]  }
 0xda2   : > { %12163 = vmatpush1.bf16.msra.mxu0 %v20987_v11  ;;  %v21134_v11 = vld [vmem:[#allocation10] ss:$16 sps:$4 sm:$0xff]  }
 0xda3   : > { %12185 = vmatprep.subr.bf16.mxu0 %v20992_v5  ;;  %v21136_v5 = vld [vmem:[#allocation10 + $0x4] ss:$16 sps:$4 sm:$0xff]  }
 0xda4   : > { %13233 = vmatprep.subr.bf16.mxu1 %v21136_v5  ;;  %v21094_v5 = vld [vmem:[%s25676_s10 + $0xa4c] ss:$16 sps:$4 sm:$0xff]  }
 0xda5   : > { %12165 = vmatmul.mubr.bf16.vlgmr.msra.gmra.mrb[40].mxu0 %v24830_v24  ;;  %13234 = vmatpush1.bf16.msra.mxu1 %v21134_v11  ;;  %v21089_v11 = vld [vmem:[%s25676_s10 + $0xa28] ss:$16 sps:$4 sm:$0xff]  }
 0xda6   : > { %12174 = vmatprep.mubr.bf16.mxu0 %v24836_v45  ;;  %12186 = vmatpush1.bf16.msra.mxu0 %v20990_v60  ;;  %v21137_v60 = vld [vmem:[#allocation10 + $0x20] ss:$16 sps:$4 sm:$0xff]  }
 0xda7   : > { %12187 = vmatprep.subr.bf16.mxu0 %v20995_v3  ;;  %13235 = vmatprep.subr.bf16.mxu1 %v21139_v50  ;;  %v21055_v3 = vld [vmem:[%s25676_s10 + $0x8ac] ss:$16 sps:$4 sm:$0xff]  }
 0xda8   : > { %v21100_v50 = vld [vmem:[%s25676_s10 + $0xa8c] ss:$16 sps:$4 sm:$0xff]  }
 0xda9   : > { %13236 = vmatpush1.bf16.msra.mxu1 %v21137_v60  ;;  %v21106_v60 = vld [vmem:[%s25676_s10 + $0xacc] ss:$16 sps:$4 sm:$0xff]  }
 0xdaa   : > { %12188 = vmatpush1.bf16.msra.mxu0 %v20993_v43  ;;  %v21140_v43 = vld [vmem:[#allocation10 + $0x40] ss:$16 sps:$4 sm:$0xff]   ;;  %13237 = vmatprep.subr.bf16.mxu1 %v21142_v55  ;;  %v21104_v55 = vld [vmem:[%s25676_s10 + $0xac8] ss:$16 sps:$4 sm:$0xff]  }
 0xdab   : > { %12189 = vmatprep.subr.bf16.mxu0 %v20998_v47  ;;  %v21145_v47 = vld [vmem:[#allocation10 + $0x64] ss:$16 sps:$4 sm:$0xff]  }
 0xdad   : > { %12175 = vmatmul.mubr.bf16.gmra.mrb[44].mxu0 %v24855_v23  ;;  %13238 = vmatpush1.bf16.msra.mxu1 %v21140_v43  ;;  %v21112_v43 = vld [vmem:[%s25676_s10 + $0xb0c] ss:$16 sps:$4 sm:$0xff]  }
 0xdae   : > { %12190 = vmatpush1.bf16.msra.mxu0 %v20996_v46  ;;  %12217 = vmatprep.mubr.bf16.mxu0 %v24861_v40  ;;  %v21143_v46 = vld [vmem:[#allocation10 + $0x60] ss:$16 sps:$4 sm:$0xff]  }
 0xdaf   : > { %12191 = vmatprep.subr.bf16.mxu0 %v21001_v52  ;;  %13239 = vmatprep.subr.bf16.mxu1 %v21145_v47  ;;  %v21056_v52 = vld [vmem:[%s25676_s10 + $0x8c8] ss:$16 sps:$4 sm:$0xff]  }
 0xdb0   : > { %v21110_v47 = vld [vmem:[%s25676_s10 + $0xb08] ss:$16 sps:$4 sm:$0xff]  }
 0xdb1   : > { %13240 = vmatpush1.bf16.msra.mxu1 %v21143_v46  ;;  %v21172_v46 = vld [vmem:[#allocation10 + $0x184] ss:$16 sps:$4 sm:$0xff]  }
 0xdb2   : > { %12192 = vmatpush1.bf16.msra.mxu0 %v20999_v22  ;;  %v21061_v22 = vld [vmem:[%s25676_s10 + $0x8ec] ss:$16 sps:$4 sm:$0xff]   ;;  %13241 = vmatprep.subr.bf16.mxu1 %v21148_v53  ;;  %v21113_v53 = vld [vmem:[%s25676_s10 + $0xb28] ss:$16 sps:$4 sm:$0xff]  }
 0xdb3   : > { %12193 = vmatprep.subr.bf16.mxu0 %v21004_v7  ;;  %v21146_v7 = vld [vmem:[#allocation10 + $0x80] ss:$16 sps:$4 sm:$0xff]  }
 0xdb5   : > { %13242 = vmatpush1.bf16.msra.mxu1 %v21146_v7  ;;  %v21173_v7 = vld [vmem:[#allocation10 + $0x1a0] ss:$16 sps:$4 sm:$0xff]  }
 0xdb6   : > { %12194 = vmatpush1.bf16.msra.mxu0 %v21002_v10  ;;  %v21151_v10 = vld [vmem:[#allocation10 + $0xa4] ss:$16 sps:$4 sm:$0xff]  }
 0xdb7   : > { %12195 = vmatprep.subr.bf16.mxu0 %v21007_v38  ;;  %v21059_v38 = vld [vmem:[%s25676_s10 + $0x8e8] ss:$16 sps:$4 sm:$0xff]   ;;  %13243 = vmatprep.subr.bf16.mxu1 %v21151_v10 }
 0xdb8   : > { %v21116_v10 = vld [vmem:[%s25676_s10 + $0xb48] ss:$16 sps:$4 sm:$0xff]  }
 0xdba   : > { %12196 = vmatpush1.bf16.msra.mxu0 %v21005_v49  ;;  %v21064_v49 = vld [vmem:[%s25676_s10 + $0x90c] ss:$16 sps:$4 sm:$0xff]  }
 0xdbb   : > { %12197 = vmatprep.subr.bf16.mxu0 %v21010_v31  ;;  %v21149_v31 = vld [vmem:[#allocation10 + $0xa0] ss:$16 sps:$4 sm:$0xff]  }
 0xdbc   : > { %13244 = vmatpush1.bf16.msra.mxu1 %v21149_v31  ;;  %v21178_v31 = vld [vmem:[#allocation10 + $0x1c4] ss:$16 sps:$4 sm:$0xff]  }
 0xdbe   : > { %12198 = vmatpush1.bf16.msra.mxu0 %v21008_v54  ;;  %v21154_v54 = vld [vmem:[#allocation10 + $0xc4] ss:$16 sps:$4 sm:$0xff]  }
 0xdbf   : > { %12199 = vmatprep.subr.bf16.mxu0 %v21013_v0  ;;  %v21062_v0 = vld [vmem:[%s25676_s10 + $0x908] ss:$16 sps:$4 sm:$0xff]   ;;  %13245 = vmatprep.subr.bf16.mxu1 %v21154_v54 }
 0xdc0   : > { %v21119_v54 = vld [vmem:[%s25676_s10 + $0xb68] ss:$16 sps:$4 sm:$0xff]  }
 0xdc2   : > { %12200 = vmatpush1.bf16.msra.mxu0 %v21011_v57  ;;  %v21067_v57 = vld [vmem:[%s25676_s10 + $0x92c] ss:$16 sps:$4 sm:$0xff]  }
 0xdc3   : > { %12201 = vmatprep.subr.bf16.mxu0 %v21016_v33  ;;  %v21152_v33 = vld [vmem:[#allocation10 + $0xc0] ss:$16 sps:$4 sm:$0xff]  }
 0xdc4   : > { %13246 = vmatpush1.bf16.msra.mxu1 %v21152_v33  ;;  %v21179_v33 = vld [vmem:[#allocation10 + $0x1e0] ss:$16 sps:$4 sm:$0xff]  }
 0xdc6   : > { %12202 = vmatpush1.bf16.msra.mxu0 %v21014_v12  ;;  %v21157_v12 = vld [vmem:[#allocation10 + $0xe4] ss:$16 sps:$4 sm:$0xff]  }
 0xdc7   : > { %12203 = vmatprep.subr.bf16.mxu0 %v21019_v25  ;;  %v21065_v25 = vld [vmem:[%s25676_s10 + $0x928] ss:$16 sps:$4 sm:$0xff]   ;;  %13247 = vmatprep.subr.bf16.mxu1 %v21157_v12 }
 0xdc8   : > { %v21122_v12 = vld [vmem:[%s25676_s10 + $0xb88] ss:$16 sps:$4 sm:$0xff]  }
 0xdca   : > { %12204 = vmatpush1.bf16.msra.mxu0 %v21017_v37  ;;  %v21070_v37 = vld [vmem:[%s25676_s10 + $0x94c] ss:$16 sps:$4 sm:$0xff]  }
 0xdcb   : > { %12205 = vmatprep.subr.bf16.mxu0 %v21022_v13  ;;  %v21155_v13 = vld [vmem:[#allocation10 + $0xe0] ss:$16 sps:$4 sm:$0xff]  }
 0xdcc   : > { %13248 = vmatpush1.bf16.msra.mxu1 %v21155_v13  ;;  %v21125_v13 = vld [vmem:[%s25676_s10 + $0xba8] ss:$16 sps:$4 sm:$0xff]  }
 0xdce   : > { %12206 = vmatpush1.bf16.msra.mxu0 %v21020_v56  ;;  %v21160_v56 = vld [vmem:[#allocation10 + $0x104] ss:$16 sps:$4 sm:$0xff]  }
 0xdcf   : > { %12207 = vmatprep.subr.bf16.mxu0 %v21025_v14  ;;  %v21068_v14 = vld [vmem:[%s25676_s10 + $0x948] ss:$16 sps:$4 sm:$0xff]   ;;  %13249 = vmatprep.subr.bf16.mxu1 %v21160_v56  ;;  %v21130_v56 = vld [vmem:[%s25676_s10 + $0xbcc] ss:$16 sps:$4 sm:$0xff]  }
 0xdd2   : > { %12208 = vmatpush1.bf16.msra.mxu0 %v21023_v62  ;;  %v21073_v62 = vld [vmem:[%s25676_s10 + $0x96c] ss:$16 sps:$4 sm:$0xff]  }
 0xdd3   : > { %12209 = vmatprep.subr.bf16.mxu0 %v21028_v59  ;;  %v21158_v59 = vld [vmem:[#allocation10 + $0x100] ss:$16 sps:$4 sm:$0xff]  }
 0xdd4   : > { %13250 = vmatpush1.bf16.msra.mxu1 %v21158_v59  ;;  %v21131_v59 = vld [vmem:[%s25676_s10 + $0xbe8] ss:$16 sps:$4 sm:$0xff]  }
 0xdd6   : > { %12210 = vmatpush1.bf16.msra.mxu0 %v21026_v6  ;;  %v21163_v6 = vld [vmem:[#allocation10 + $0x124] ss:$16 sps:$4 sm:$0xff]  }
 0xdd7   : > { %12211 = vmatprep.subr.bf16.mxu0 %v21031_v41  ;;  %v21071_v41 = vld [vmem:[%s25676_s10 + $0x968] ss:$16 sps:$4 sm:$0xff]   ;;  %13251 = vmatprep.subr.bf16.mxu1 %v21163_v6  ;;  %v25157_v6 = vld [vmem:[#allocation11 + $0xe] sm:$0xf] }
 0xdda   : > { %12212 = vmatpush1.bf16.msra.mxu0 %v21029_v17  ;;  %v21076_v17 = vld [vmem:[%s25676_s10 + $0x98c] ss:$16 sps:$4 sm:$0xff]  }
 0xddb   : > { %12213 = vmatprep.subr.bf16.mxu0 %v21034_v2  ;;  %v21161_v2 = vld [vmem:[#allocation10 + $0x120] ss:$16 sps:$4 sm:$0xff]  }
 0xddc   : > { %13252 = vmatpush1.bf16.msra.mxu1 %v21161_v2 }
 0xdde   : > { %12214 = vmatpush1.bf16.msra.mxu0 %v21032_v4  ;;  %v21166_v4 = vld [vmem:[#allocation10 + $0x144] ss:$16 sps:$4 sm:$0xff]  }
 0xddf   : > { %12215 = vmatprep.subr.bf16.mxu0 %v21037_v34  ;;  %v21074_v34 = vld [vmem:[%s25676_s10 + $0x988] ss:$16 sps:$4 sm:$0xff]   ;;  %13253 = vmatprep.subr.bf16.mxu1 %v21166_v4 }
 0xde2   : > { %12216 = vmatpush1.bf16.msra.mxu0 %v21035_v15  ;;  %v21079_v15 = vld [vmem:[%s25676_s10 + $0x9ac] ss:$16 sps:$4 sm:$0xff]  }
 0xde3   : > { %12238 = vmatprep.subr.bf16.mxu0 %v21040_v28  ;;  %v21164_v28 = vld [vmem:[#allocation10 + $0x140] ss:$16 sps:$4 sm:$0xff]  }
 0xde4   : > { %13254 = vmatpush1.bf16.msra.mxu1 %v21164_v28 }
 0xde5   : > { %12218 = vmatmul.mubr.bf16.vlgmr.msra.gmra.mrb[40].mxu0 %v24952_v39  ;;  %13255 = vmatprep.subr.bf16.mxu1 %v21169_v63 }
 0xde6   : > { %12227 = vmatprep.mubr.bf16.mxu0 %v24958_v20  ;;  %12239 = vmatpush1.bf16.msra.mxu0 %v21038_v30  ;;  %v21082_v30 = vld [vmem:[%s25676_s10 + $0x9cc] ss:$16 sps:$4 sm:$0xff]  }
 0xde7   : > { %12240 = vmatprep.subr.bf16.mxu0 %v21043_v36  ;;  %v21080_v36 = vld [vmem:[%s25676_s10 + $0x9c8] ss:$16 sps:$4 sm:$0xff]  }
 0xde8   : > { %13256 = vmatpush1.bf16.msra.mxu1 %v21167_v32 }
 0xde9   : > { %13257 = vmatprep.subr.bf16.mxu1 %v21172_v46  ;;  %v21182_v46 = vld [vmem:[#allocation10 + $0x200] ss:$16 sps:$4 sm:$0xff]  }
 0xdea   : > { %12241 = vmatpush1.bf16.msra.mxu0 %v21041_v27  ;;  %v21085_v27 = vld [vmem:[%s25676_s10 + $0x9ec] ss:$16 sps:$4 sm:$0xff]  }
 0xdeb   : > { %12242 = vmatprep.subr.bf16.mxu0 %v21046_v19  ;;  %v21083_v19 = vld [vmem:[%s25676_s10 + $0x9e8] ss:$16 sps:$4 sm:$0xff]  }
 0xded   : > { %12228 = vmatmul.mubr.bf16.gmra.mrb[44].mxu0 %v24975_v42 }
 0xdee   : > { %12243 = vmatpush1.bf16.msra.mxu0 %v21044_v18  ;;  %12270 = vmatprep.mubr.bf16.mxu0 %v24739_v1  ;;  %v21050_v1 = vld [vmem:[%s25676_s10 + $0x888] ss:$16 sps:$4 sm:$0xff]  }
 0xdef   : > { %12244 = vmatprep.subr.bf16.mxu0 %v21049_v35  ;;  %v21086_v18 = vld [vmem:[%s25676_s10 + $0xa08] ss:$16 sps:$4 sm:$0xff]   ;;  %v21091_v35 = vld [vmem:[%s25676_s10 + $0xa2c] ss:$16 sps:$4 sm:$0xff]  }
 0xdf2   : > { %12245 = vmatpush1.bf16.msra.mxu0 %v21047_v44  ;;  %v21092_v44 = vld [vmem:[%s25676_s10 + $0xa48] ss:$16 sps:$4 sm:$0xff]  }
 0xdf3   : > { %12246 = vmatprep.subr.bf16.mxu0 %v21052_v58  ;;  %v21098_v58 = vld [vmem:[%s25676_s10 + $0xa88] ss:$16 sps:$4 sm:$0xff]  }
 0xdf6   : > { %12247 = vmatpush1.bf16.msra.mxu0 %v21050_v1  ;;  %v21109_v1 = vld [vmem:[%s25676_s10 + $0xaec] ss:$16 sps:$4 sm:$0xff]  }
 0xdf7   : > { %12248 = vmatprep.subr.bf16.mxu0 %v21055_v3  ;;  %v21107_v3 = vld [vmem:[%s25676_s10 + $0xae8] ss:$16 sps:$4 sm:$0xff]  }
 0xdfa   : > { %12249 = vmatpush1.bf16.msra.mxu0 %v21053_v16  ;;  %v21115_v16 = vld [vmem:[%s25676_s10 + $0xb2c] ss:$16 sps:$4 sm:$0xff]  }
 0xdfb   : > { %12250 = vmatprep.subr.bf16.mxu0 %v21058_v26  ;;  %v21170_v26 = vld [vmem:[#allocation10 + $0x180] ss:$16 sps:$4 sm:$0xff]  }
 0xdfc   : > { %13258 = vmatpush1.bf16.msra.mxu1 %v21170_v26 }
 0xdfe   : > { %12251 = vmatpush1.bf16.msra.mxu0 %v21056_v52  ;;  %v21175_v52 = vld [vmem:[#allocation10 + $0x1a4] ss:$16 sps:$4 sm:$0xff]  }
 0xdff   : > { %12252 = vmatprep.subr.bf16.mxu0 %v21061_v22  ;;  %v21118_v22 = vld [vmem:[%s25676_s10 + $0xb4c] ss:$16 sps:$4 sm:$0xff]   ;;  %13259 = vmatprep.subr.bf16.mxu1 %v21175_v52 }
 0xe00   : > { %13260 = vmatpush1.bf16.msra.mxu1 %v21173_v7 }
 0xe01   : > { %13261 = vmatprep.subr.bf16.mxu1 %v21178_v31 }
 0xe02   : > { %12253 = vmatpush1.bf16.msra.mxu0 %v21059_v38  ;;  %v21121_v38 = vld [vmem:[%s25676_s10 + $0xb6c] ss:$16 sps:$4 sm:$0xff]  }
 0xe03   : > { %12254 = vmatprep.subr.bf16.mxu0 %v21064_v49  ;;  %v21176_v49 = vld [vmem:[#allocation10 + $0x1c0] ss:$16 sps:$4 sm:$0xff]  }
 0xe04   : > { %13262 = vmatpush1.bf16.msra.mxu1 %v21176_v49 }
 0xe06   : > { %12255 = vmatpush1.bf16.msra.mxu0 %v21062_v0  ;;  %v21181_v0 = vld [vmem:[#allocation10 + $0x1e4] ss:$16 sps:$4 sm:$0xff]  }
 0xe07   : > { %12256 = vmatprep.subr.bf16.mxu0 %v21067_v57  ;;  %v21124_v57 = vld [vmem:[%s25676_s10 + $0xb8c] ss:$16 sps:$4 sm:$0xff]   ;;  %13263 = vmatprep.subr.bf16.mxu1 %v21181_v0 }
 0xe08   : > { %13264 = vmatpush1.bf16.msra.mxu1 %v21179_v33  ;;  %v21190_v33 = vld [vmem:[#allocation10 + $0x244] ss:$16 sps:$4 sm:$0xff]  }
 0xe0a   : > { %12257 = vmatpush1.bf16.msra.mxu0 %v21065_v25  ;;  %v21184_v25 = vld [vmem:[#allocation10 + $0x204] ss:$16 sps:$4 sm:$0xff]  }
 0xe0b   : > { %12258 = vmatprep.subr.bf16.mxu0 %v21070_v37  ;;  %v21127_v37 = vld [vmem:[%s25676_s10 + $0xbac] ss:$16 sps:$4 sm:$0xff]   ;;  %13286 = vmatprep.subr.bf16.mxu1 %v21184_v25 }
 0xe0e   : > { %12259 = vmatpush1.bf16.msra.mxu0 %v21068_v14  ;;  %v21128_v14 = vld [vmem:[%s25676_s10 + $0xbc8] ss:$16 sps:$4 sm:$0xff]  }
 0xe0f   : > { %12260 = vmatprep.subr.bf16.mxu0 %v21073_v62  ;;  %v21133_v62 = vld [vmem:[%s25676_s10 + $0xbec] ss:$16 sps:$4 sm:$0xff]  }
 0xe12   : > { %12261 = vmatpush1.bf16.msra.mxu0 %v21071_v41  ;;  %v10209_v41 = vrot.slane %v25157_v6, %v22794_v51 }
 0xe13   : > { %12262 = vmatprep.subr.bf16.mxu0 %v21076_v17  ;;  %v10213_v17 = vrot.slane %v25157_v6, %v22797_v61 }
 0xe16   : > { %12263 = vmatpush1.bf16.msra.mxu0 %v21074_v34 }
 0xe17   : > { %12264 = vmatprep.subr.bf16.mxu0 %v21079_v15 }
 0xe1a   : > { %12265 = vmatpush1.bf16.msra.mxu0 %v21077_v48 }
 0xe1b   : > { %12266 = vmatprep.subr.bf16.mxu0 %v21082_v30 }
 0xe1e   : > { %12267 = vmatpush1.bf16.msra.mxu0 %v21080_v36 }
 0xe1f   : > { %12268 = vmatprep.subr.bf16.mxu0 %v21085_v27 }
 0xe22   : > { %12269 = vmatpush1.bf16.msra.mxu0 %v21083_v19 }
 0xe23   : > { %12291 = vmatprep.subr.bf16.mxu0 %v21088_v8 }
 0xe25   : > { %12271 = vmatmul.mubr.bf16.vlgmr.msra.gmra.mrb[48].mxu0 %v24830_v24  ;;  %v21097_v24 = vld [vmem:[%s25676_s10 + $0xa6c] ss:$16 sps:$4 sm:$0xff]  }
 0xe26   : > { %12280 = vmatprep.mubr.bf16.mxu0 %v24836_v45  ;;  %12292 = vmatpush1.bf16.msra.mxu0 %v21086_v18  ;;  %v21095_v45 = vld [vmem:[%s25676_s10 + $0xa68] ss:$16 sps:$4 sm:$0xff]  }
 0xe27   : > { %12293 = vmatprep.subr.bf16.mxu0 %v21091_v35 }
 0xe2a   : > { %12294 = vmatpush1.bf16.msra.mxu0 %v21089_v11 }
 0xe2b   : > { %12295 = vmatprep.subr.bf16.mxu0 %v21094_v5 }
 0xe2d   : > { %12281 = vmatmul.mubr.bf16.gmra.mrb[52].mxu0 %v24855_v23  ;;  %v21103_v23 = vld [vmem:[%s25676_s10 + $0xaac] ss:$16 sps:$4 sm:$0xff]  }
 0xe2e   : > { %12296 = vmatpush1.bf16.msra.mxu0 %v21092_v44  ;;  %12323 = vmatprep.mubr.bf16.mxu0 %v24861_v40  ;;  %v21101_v40 = vld [vmem:[%s25676_s10 + $0xaa8] ss:$16 sps:$4 sm:$0xff]  }
 0xe2f   : > { %12297 = vmatprep.subr.bf16.mxu0 %v21097_v24 }
 0xe32   : > { %12298 = vmatpush1.bf16.msra.mxu0 %v21095_v45 }
 0xe33   : > { %12299 = vmatprep.subr.bf16.mxu0 %v21100_v50 }
 0xe36   : > { %12300 = vmatpush1.bf16.msra.mxu0 %v21098_v58 }
 0xe37   : > { %12301 = vmatprep.subr.bf16.mxu0 %v21103_v23 }
 0xe3a   : > { %12302 = vmatpush1.bf16.msra.mxu0 %v21101_v40 }
 0xe3b   : > { %12303 = vmatprep.subr.bf16.mxu0 %v21106_v60 }
 0xe3e   : > { %12304 = vmatpush1.bf16.msra.mxu0 %v21104_v55 }
 0xe3f   : > { %12305 = vmatprep.subr.bf16.mxu0 %v21109_v1 }
 0xe42   : > { %12306 = vmatpush1.bf16.msra.mxu0 %v21107_v3 }
 0xe43   : > { %12307 = vmatprep.subr.bf16.mxu0 %v21112_v43 }
 0xe46   : > { %12308 = vmatpush1.bf16.msra.mxu0 %v21110_v47 }
 0xe47   : > { %12309 = vmatprep.subr.bf16.mxu0 %v21115_v16 }
 0xe4a   : > { %12310 = vmatpush1.bf16.msra.mxu0 %v21113_v53 }
 0xe4b   : > { %12311 = vmatprep.subr.bf16.mxu0 %v21118_v22  ;;  %v21187_v22 = vld [vmem:[#allocation10 + $0x224] ss:$16 sps:$4 sm:$0xff]  }
 0xe4e   : > { %12312 = vmatpush1.bf16.msra.mxu0 %v21116_v10 }
 0xe4f   : > { %12313 = vmatprep.subr.bf16.mxu0 %v21121_v38 }
 0xe52   : > { %12314 = vmatpush1.bf16.msra.mxu0 %v21119_v54  ;;  %v21185_v54 = vld [vmem:[#allocation10 + $0x220] ss:$16 sps:$4 sm:$0xff]  }
 0xe53   : > { %12315 = vmatprep.subr.bf16.mxu0 %v21124_v57 }
 0xe56   : > { %12316 = vmatpush1.bf16.msra.mxu0 %v21122_v12 }
 0xe57   : > { %12317 = vmatprep.subr.bf16.mxu0 %v21127_v37 }
 0xe5a   : > { %12318 = vmatpush1.bf16.msra.mxu0 %v21125_v13  ;;  %v21188_v13 = vld [vmem:[#allocation10 + $0x240] ss:$16 sps:$4 sm:$0xff]  }
 0xe5b   : > { %12319 = vmatprep.subr.bf16.mxu0 %v21130_v56 }
 0xe5e   : > { %12320 = vmatpush1.bf16.msra.mxu0 %v21128_v14  ;;  %v21193_v14 = vld [vmem:[#allocation10 + $0x264] ss:$16 sps:$4 sm:$0xff]  }
 0xe5f   : > { %12321 = vmatprep.subr.bf16.mxu0 %v21133_v62  ;;  %v21191_v62 = vld [vmem:[#allocation10 + $0x260] ss:$16 sps:$4 sm:$0xff]  }
 0xe62   : > { %12322 = vmatpush1.bf16.msra.mxu0 %v21131_v59  ;;  %v21196_v59 = vld [vmem:[#allocation10 + $0x284] ss:$16 sps:$4 sm:$0xff]  }
 0xe65   : > { %12324 = vmatmul.mubr.bf16.vlgmr.msra.gmra.mrb[48].mxu0 %v24952_v39 }
 0xe66   : > { %12333 = vmatprep.mubr.bf16.mxu0 %v24958_v20 }
 0xe6d   : > { %12334 = vmatmul.mubr.bf16.gmra.mrb[52].mxu0 %v24975_v42 }
 0xeb8   : > { %v12219_v2 = vpop.f32.mrb[40].mxu0 }
 0xeb9   : > { %v19225_v4 = vadd.f32 %v12219_v2, %v10209_v41  ;;  %v12221_v34 = vpop.f32.mrb[41].mxu0  ;;  %v21197_v2 = vld [vmem:[#allocation10 + $0x2a0] ss:$16 sps:$4 sm:$0xff]  }
 0xeba   : > { %v19226_v15 = vadd.f32 %v12221_v34, %v10213_v17  ;;  %v12223_v28 = vpop.f32.mrb[42].mxu0  ;;  %v21200_v34 = vld [vmem:[#allocation10 + $0x2c0] ss:$16 sps:$4 sm:$0xff]  }
 0xebb   : > { %v19227_v63 = vadd.f32 %v12223_v28, %v10209_v41  ;;  %v12225_v48 = vpop.f32.mrb[43].mxu0  ;;  %v12360_v30 = vmax.f32 %v19225_v4, 0.0  ;;  %v21202_v4 = vld [vmem:[#allocation10 + $0x2c4] ss:$16 sps:$4 sm:$0xff]   ;;  %v21203_v28 = vld [vmem:[#allocation10 + $0x2e0] ss:$16 sps:$4 sm:$0xff]  }
 0xebc   : > { %v19228_v39 = vadd.f32 %v12225_v48, %v10213_v17  ;;  %v12361_v32 = vmax.f32 %v19226_v15, 0.0  ;;  %v21205_v15 = vld [vmem:[#allocation10 + $0x2e4] ss:$16 sps:$4 sm:$0xff]   ;;  %v21206_v48 = vld [vmem:[#allocation10 + $0x300] ss:$16 sps:$4 sm:$0xff]  }
 0xebd   : > { %v12364_v20 = vmax.f32 %v19227_v63, 0.0  ;;  %v21208_v63 = vld [vmem:[#allocation10 + $0x304] ss:$16 sps:$4 sm:$0xff]  }
 0xebe   : > { %v12365_v42 = vmax.f32 %v19228_v39, 0.0  ;;  %v21211_v39 = vld [vmem:[#allocation10 + $0x324] ss:$16 sps:$4 sm:$0xff]  }
 0xebf   : > { %v12377_v36 = vpack.c.bf16 %v12364_v20, %v12360_v30  ;;  %v21209_v30 = vld [vmem:[#allocation10 + $0x320] ss:$16 sps:$4 sm:$0xff]   ;;  %v21214_v20 = vld [vmem:[#allocation10 + $0x344] ss:$16 sps:$4 sm:$0xff]  }
 0xec0   : > { %v12378_v27 = vpack.c.bf16 %v12365_v42, %v12361_v32  ;;  %v12229_v19 = vpop.f32.mrb[44].mxu0  ;;  %v21212_v32 = vld [vmem:[#allocation10 + $0x340] ss:$16 sps:$4 sm:$0xff]   ;;  %v21217_v42 = vld [vmem:[#allocation10 + $0x364] ss:$16 sps:$4 sm:$0xff]  }
 0xec1   : > { %v12386_v8 = vshrl.u32 %v12377_v36, 16  ;;  %v19229_v18 = vadd.f32 %v12229_v19, %v10209_v41  ;;  %v12231_v35 = vpop.f32.mrb[45].mxu0  ;;  %v12389_v45 = vshll.u32 %v12377_v36, 16  ;;  %v21215_v36 = vld [vmem:[#allocation10 + $0x360] ss:$16 sps:$4 sm:$0xff]  }
 0xec2   : > { %v12393_v11 = vshrl.u32 %v12378_v27, 16  ;;  %v19230_v5 = vadd.f32 %v12231_v35, %v10213_v17  ;;  %v12233_v44 = vpop.f32.mrb[46].mxu0  ;;  %v12396_v40 = vshll.u32 %v12378_v27, 16  ;;  %v21220_v27 = vld [vmem:[#allocation10 + $0x384] ss:$16 sps:$4 sm:$0xff]  }
 0xec3   : > { %v12388_v24 = vrot.slane %v12386_v8, 7  ;;  %v19231_v50 = vadd.f32 %v12233_v44, %v10209_v41  ;;  %v12235_v58 = vpop.f32.mrb[47].mxu0  ;;  %v12368_v1 = vmax.f32 %v19229_v18, 0.0  ;;  %v21194_v41 = vld [vmem:[#allocation10 + $0x280] ss:$16 sps:$4 sm:$0xff]  }
 0xec4   : > { %v12395_v23 = vrot.slane %v12393_v11, 7  ;;  %v19232_v60 = vadd.f32 %v12235_v58, %v10213_v17  ;;  %v12369_v47 = vmax.f32 %v19230_v5, 0.0  ;;  %v21199_v17 = vld [vmem:[#allocation10 + $0x2a4] ss:$16 sps:$4 sm:$0xff]   ;;  %v21218_v19 = vld [vmem:[#allocation10 + $0x380] ss:$16 sps:$4 sm:$0xff]  }
 0xec5   : > { %v12391_v55 = vor.u32 %v12389_v45, %v12388_v24  ;;  %v12372_v3 = vmax.f32 %v19231_v50, 0.0  ;;  %v21223_v8 = vld [vmem:[#allocation10 + $0x3a4] ss:$16 sps:$4 sm:$0xff]   ;;  %v21221_v18 = vld [vmem:[#allocation10 + $0x3a0] ss:$16 sps:$4 sm:$0xff]   ;;  %v10217_v45 = vrot.slane %v25157_v6, %v22806_v29  ;;  %v10221_v50 = vrot.slane %v25157_v6, %v23984_v9 }
 0xec6   : > { %v12398_v43 = vor.u32 %v12396_v40, %v12395_v23  ;;  %v12373_v16 = vmax.f32 %v19232_v60, 0.0  ;;  %v21226_v35 = vld [vmem:[#allocation10 + $0x3c4] ss:$16 sps:$4 sm:$0xff]   ;;  %v21224_v11 = vld [vmem:[#allocation10 + $0x3c0] ss:$16 sps:$4 sm:$0xff]  }
 0xec7   : > { %v12381_v26 = vpack.c.bf16 %v12372_v3, %v12368_v1  ;;  %v25170_v10 = vsel %vm23571_vm15, 0, %v12391_v55  ;;  %v21229_v5 = vld [vmem:[#allocation10 + $0x3e4] ss:$16 sps:$4 sm:$0xff]   ;;  %v21227_v44 = vld [vmem:[#allocation10 + $0x3e0] ss:$16 sps:$4 sm:$0xff]  }
 0xec8   : > { %v12382_v53 = vpack.c.bf16 %v12373_v16, %v12369_v47  ;;  %v25165_v52 = vsel %vm23571_vm15, 0, %v12398_v43 }
 0xec9   : > { %v12414_v7 = vshrl.u32 %v12381_v26, 16  ;;  %13265 = vmatprep.mubr.bf16.mxu1 %v25165_v52  ;;  %v12417_v31 = vshll.u32 %v12381_v26, 16 }
 0xeca   : > { %v12422_v38 = vshrl.u32 %v12382_v53, 16  ;;  %13266 = vmatmul.mubr.bf16.vlgmr.msra.gmra.mrb[92].mxu1 %v25170_v10  ;;  %v12425_v57 = vshll.u32 %v12382_v53, 16 }
 0xecb   : > { %v25173_v49 = vrot.slane %v12414_v7, 7  ;;  %13287 = vmatpush1.bf16.msra.mxu1 %v21182_v46 }
 0xecc   : > { %v25175_v0 = vrot.slane %v12422_v38, 7  ;;  %13288 = vmatprep.subr.bf16.mxu1 %v21187_v22 }
 0xecd   : > { %v12419_v12 = vor.u32 %v12417_v31, %v25173_v49 }
 0xece   : > { %v12427_v25 = vor.u32 %v12425_v57, %v25175_v0 }
 0xecf   : > { %v25180_v37 = vsel %vm6100_vm14, %v12388_v24, %v12419_v12  ;;  %13289 = vmatpush1.bf16.msra.mxu1 %v21185_v54  ;;  %v21232_v24 = vld [vmem:[#allocation10 + $0xc] ss:$16 sps:$4 sm:$0xff]  }
 0xed0   : > { %v25183_v56 = vsel %vm6100_vm14, %v12395_v23, %v12427_v25  ;;  %13290 = vmatprep.subr.bf16.mxu1 %v21190_v33 }
 0xed1   : > { %13275 = vmatprep.mubr.bf16.mxu1 %v25183_v56 }
 0xed2   : > { %13276 = vmatmul.mubr.bf16.gmra.mrb[96].mxu1 %v25180_v37 }
 0xed3   : > { %13291 = vmatpush1.bf16.msra.mxu1 %v21188_v13 }
 0xed4   : > { %13292 = vmatprep.subr.bf16.mxu1 %v21193_v14 }
 0xed7   : > { %13293 = vmatpush1.bf16.msra.mxu1 %v21191_v62 }
 0xed8   : > { %13294 = vmatprep.subr.bf16.mxu1 %v21196_v59 }
 0xedb   : > { %13295 = vmatpush1.bf16.msra.mxu1 %v21194_v41 }
 0xedc   : > { %13296 = vmatprep.subr.bf16.mxu1 %v21199_v17 }
 0xedf   : > { %13297 = vmatpush1.bf16.msra.mxu1 %v21197_v2 }
 0xee0   : > { %13298 = vmatprep.subr.bf16.mxu1 %v21202_v4 }
 0xee3   : > { %13299 = vmatpush1.bf16.msra.mxu1 %v21200_v34 }
 0xee4   : > { %13300 = vmatprep.subr.bf16.mxu1 %v21205_v15 }
 0xee7   : > { %13301 = vmatpush1.bf16.msra.mxu1 %v21203_v28 }
 0xee8   : > { %13302 = vmatprep.subr.bf16.mxu1 %v21208_v63 }
 0xeeb   : > { %13303 = vmatpush1.bf16.msra.mxu1 %v21206_v48  ;;  %v21230_v48 = vld [vmem:[#allocation10 + $0x8] ss:$16 sps:$4 sm:$0xff]  }
 0xeec   : > { %13304 = vmatprep.subr.bf16.mxu1 %v21211_v39 }
 0xeef   : > { %13305 = vmatpush1.bf16.msra.mxu1 %v21209_v30 }
 0xef0   : > { %13306 = vmatprep.subr.bf16.mxu1 %v21214_v20  ;;  %v21235_v20 = vld [vmem:[#allocation10 + $0x2c] ss:$16 sps:$4 sm:$0xff]  }
 0xef3   : > { %13307 = vmatpush1.bf16.msra.mxu1 %v21212_v32 }
 0xef4   : > { %13308 = vmatprep.subr.bf16.mxu1 %v21217_v42 }
 0xef7   : > { %13309 = vmatpush1.bf16.msra.mxu1 %v21215_v36 }
 0xef8   : > { %13310 = vmatprep.subr.bf16.mxu1 %v21220_v27 }
 0xefb   : > { %13311 = vmatpush1.bf16.msra.mxu1 %v21218_v19 }
 0xefc   : > { %13312 = vmatprep.subr.bf16.mxu1 %v21223_v8  ;;  %v21233_v8 = vld [vmem:[#allocation10 + $0x28] ss:$16 sps:$4 sm:$0xff]  }
 0xeff   : > { %13313 = vmatpush1.bf16.msra.mxu1 %v21221_v18 }
 0xf00   : > { %13314 = vmatprep.subr.bf16.mxu1 %v21226_v35 }
 0xf03   : > { %13315 = vmatpush1.bf16.msra.mxu1 %v21224_v11  ;;  %v21238_v11 = vld [vmem:[#allocation10 + $0x4c] ss:$16 sps:$4 sm:$0xff]  }
 0xf04   : > { %13316 = vmatprep.subr.bf16.mxu1 %v21229_v5 }
 0xf07   : > { %13317 = vmatpush1.bf16.msra.mxu1 %v21227_v44 }
 0xf08   : > { %13339 = vmatprep.subr.bf16.mxu1 %v21232_v24  ;;  %v21236_v24 = vld [vmem:[#allocation10 + $0x48] ss:$16 sps:$4 sm:$0xff]  }
 0xf38   : > { %v12325_v58 = vpop.f32.mrb[48].mxu0 }
 0xf39   : > { %v19233_v23 = vadd.f32 %v12325_v58, %v10217_v45  ;;  %v12327_v40 = vpop.f32.mrb[49].mxu0  ;;  %v21241_v58 = vld [vmem:[#allocation10 + $0x6c] ss:$16 sps:$4 sm:$0xff]  }
 0xf3a   : > { %v19234_v60 = vadd.f32 %v12327_v40, %v10221_v50  ;;  %v12329_v55 = vpop.f32.mrb[50].mxu0  ;;  %v21244_v40 = vld [vmem:[#allocation10 + $0x8c] ss:$16 sps:$4 sm:$0xff]  }
 0xf3b   : > { %v19235_v1 = vadd.f32 %v12329_v55, %v10217_v45  ;;  %v12331_v3 = vpop.f32.mrb[51].mxu0  ;;  %v12362_v47 = vmax.f32 %v19233_v23, 0.0  ;;  %v21239_v23 = vld [vmem:[#allocation10 + $0x68] ss:$16 sps:$4 sm:$0xff]   ;;  %v21247_v55 = vld [vmem:[#allocation10 + $0xac] ss:$16 sps:$4 sm:$0xff]  }
 0xf3c   : > { %v19236_v43 = vadd.f32 %v12331_v3, %v10221_v50  ;;  %v12363_v26 = vmax.f32 %v19234_v60, 0.0  ;;  %v21242_v60 = vld [vmem:[#allocation10 + $0x88] ss:$16 sps:$4 sm:$0xff]   ;;  %v21250_v3 = vld [vmem:[#allocation10 + $0xcc] ss:$16 sps:$4 sm:$0xff]  }
 0xf3d   : > { %v12366_v16 = vmax.f32 %v19235_v1, 0.0  ;;  %v21245_v1 = vld [vmem:[#allocation10 + $0xa8] ss:$16 sps:$4 sm:$0xff]  }
 0xf3e   : > { %v12367_v46 = vmax.f32 %v19236_v43, 0.0  ;;  %v21248_v43 = vld [vmem:[#allocation10 + $0xc8] ss:$16 sps:$4 sm:$0xff]  }
 0xf3f   : > { %v12379_v53 = vpack.c.bf16 %v12366_v16, %v12362_v47  ;;  %v21253_v47 = vld [vmem:[#allocation10 + $0xec] ss:$16 sps:$4 sm:$0xff]   ;;  %v21251_v16 = vld [vmem:[#allocation10 + $0xe8] ss:$16 sps:$4 sm:$0xff]  }
 0xf40   : > { %v12380_v22 = vpack.c.bf16 %v12367_v46, %v12363_v26  ;;  %v12335_v7 = vpop.f32.mrb[52].mxu0  ;;  %v21256_v26 = vld [vmem:[#allocation10 + $0x10c] ss:$16 sps:$4 sm:$0xff]   ;;  %v21254_v46 = vld [vmem:[#allocation10 + $0x108] ss:$16 sps:$4 sm:$0xff]  }
 0xf41   : > { %v12400_v38 = vshrl.u32 %v12379_v53, 16  ;;  %v19237_v31 = vadd.f32 %v12335_v7, %v10217_v45  ;;  %v12337_v54 = vpop.f32.mrb[53].mxu0  ;;  %v12403_v25 = vshll.u32 %v12379_v53, 16  ;;  %v21259_v53 = vld [vmem:[#allocation10 + $0x12c] ss:$16 sps:$4 sm:$0xff]  }
 0xf42   : > { %v12407_v57 = vshrl.u32 %v12380_v22, 16  ;;  %v19238_v6 = vadd.f32 %v12337_v54, %v10221_v50  ;;  %v12339_v33 = vpop.f32.mrb[54].mxu0  ;;  %v12410_v59 = vshll.u32 %v12380_v22, 16  ;;  %v21257_v22 = vld [vmem:[#allocation10 + $0x128] ss:$16 sps:$4 sm:$0xff]  }
 0xf43   : > { %v12402_v12 = vrot.slane %v12400_v38, 7  ;;  %v19239_v13 = vadd.f32 %v12339_v33, %v10217_v45  ;;  %v12341_v14 = vpop.f32.mrb[55].mxu0  ;;  %v12370_v2 = vmax.f32 %v19237_v31, 0.0  ;;  %v21262_v7 = vld [vmem:[#allocation10 + $0x14c] ss:$16 sps:$4 sm:$0xff]  }
 0xf44   : > { %v12409_v62 = vrot.slane %v12407_v57, 7  ;;  %v19240_v41 = vadd.f32 %v12341_v14, %v10221_v50  ;;  %v12371_v15 = vmax.f32 %v19238_v6, 0.0  ;;  %v21260_v38 = vld [vmem:[#allocation10 + $0x148] ss:$16 sps:$4 sm:$0xff]   ;;  %v21265_v31 = vld [vmem:[#allocation10 + $0x16c] ss:$16 sps:$4 sm:$0xff]  }
 0xf45   : > { %v12405_v17 = vor.u32 %v12403_v25, %v12402_v12  ;;  %v12374_v4 = vmax.f32 %v19239_v13, 0.0  ;;  %v21263_v54 = vld [vmem:[#allocation10 + $0x168] ss:$16 sps:$4 sm:$0xff]   ;;  %v21268_v57 = vld [vmem:[#allocation10 + $0x18c] ss:$16 sps:$4 sm:$0xff]  }
 0xf46   : > { %v12412_v34 = vor.u32 %v12410_v59, %v12409_v62  ;;  %v12375_v28 = vmax.f32 %v19240_v41, 0.0  ;;  %v21266_v6 = vld [vmem:[#allocation10 + $0x188] ss:$16 sps:$4 sm:$0xff]   ;;  %v21271_v33 = vld [vmem:[#allocation10 + $0x1ac] ss:$16 sps:$4 sm:$0xff]  }
 0xf47   : > { %v12383_v63 = vpack.c.bf16 %v12374_v4, %v12370_v2  ;;  %v25198_v42 = vsel %vm23571_vm15, 0, %v12405_v17  ;;  %v21274_v25 = vld [vmem:[#allocation10 + $0x1cc] ss:$16 sps:$4 sm:$0xff]   ;;  %v21272_v13 = vld [vmem:[#allocation10 + $0x1c8] ss:$16 sps:$4 sm:$0xff]  }
 0xf48   : > { %v12384_v39 = vpack.c.bf16 %v12375_v28, %v12371_v15  ;;  %v25193_v30 = vsel %vm23571_vm15, 0, %v12412_v34  ;;  %v21277_v14 = vld [vmem:[#allocation10 + $0x1ec] ss:$16 sps:$4 sm:$0xff]   ;;  %v21278_v41 = vld [vmem:[#allocation10 + $0x208] ss:$16 sps:$4 sm:$0xff]  }
 0xf49   : > { %v12430_v32 = vshrl.u32 %v12383_v63, 16  ;;  %13318 = vmatprep.mubr.bf16.mxu1 %v25193_v30  ;;  %v12433_v19 = vshll.u32 %v12383_v63, 16  ;;  %v21280_v59 = vld [vmem:[#allocation10 + $0x20c] ss:$16 sps:$4 sm:$0xff]   ;;  %v21281_v2 = vld [vmem:[#allocation10 + $0x228] ss:$16 sps:$4 sm:$0xff]  }
 0xf4a   : > { %v12438_v36 = vshrl.u32 %v12384_v39, 16  ;;  %13319 = vmatmul.mubr.bf16.vlgmr.msra.gmra.mrb[92].mxu1 %v25198_v42  ;;  %v12441_v35 = vshll.u32 %v12384_v39, 16  ;;  %v21283_v17 = vld [vmem:[#allocation10 + $0x22c] ss:$16 sps:$4 sm:$0xff]   ;;  %v21284_v34 = vld [vmem:[#allocation10 + $0x248] ss:$16 sps:$4 sm:$0xff]  }
 0xf4b   : > { %v25201_v27 = vrot.slane %v12430_v32, 7  ;;  %13340 = vmatpush1.bf16.msra.mxu1 %v21230_v48  ;;  %v21286_v4 = vld [vmem:[#allocation10 + $0x24c] ss:$16 sps:$4 sm:$0xff]   ;;  %v21287_v28 = vld [vmem:[#allocation10 + $0x268] ss:$16 sps:$4 sm:$0xff]  }
 0xf4c   : > { %v25203_v18 = vrot.slane %v12438_v36, 7  ;;  %13341 = vmatprep.subr.bf16.mxu1 %v21235_v20  ;;  %v21289_v15 = vld [vmem:[#allocation10 + $0x26c] ss:$16 sps:$4 sm:$0xff]   ;;  %v21290_v48 = vld [vmem:[#allocation10 + $0x288] ss:$16 sps:$4 sm:$0xff]  }
 0xf4d   : > { %v12435_v5 = vor.u32 %v12433_v19, %v25201_v27  ;;  %v21292_v63 = vld [vmem:[#allocation10 + $0x28c] ss:$16 sps:$4 sm:$0xff]   ;;  %v21293_v20 = vld [vmem:[#allocation10 + $0x2a8] ss:$16 sps:$4 sm:$0xff]  }
 0xf4e   : > { %v12443_v44 = vor.u32 %v12441_v35, %v25203_v18  ;;  %v21295_v39 = vld [vmem:[#allocation10 + $0x2ac] ss:$16 sps:$4 sm:$0xff]   ;;  %v21296_v36 = vld [vmem:[#allocation10 + $0x2c8] ss:$16 sps:$4 sm:$0xff]  }
 0xf4f   : > { %13342 = vmatpush1.bf16.msra.mxu1 %v21233_v8  ;;  %v25208_v45 = vsel %vm6100_vm14, %v12402_v12, %v12435_v5  ;;  %v21269_v12 = vld [vmem:[#allocation10 + $0x1a8] ss:$16 sps:$4 sm:$0xff]   ;;  %v21298_v32 = vld [vmem:[#allocation10 + $0x2cc] ss:$16 sps:$4 sm:$0xff]  }
 0xf50   : > { %v25211_v50 = vsel %vm6100_vm14, %v12409_v62, %v12443_v44  ;;  %13343 = vmatprep.subr.bf16.mxu1 %v21238_v11  ;;  %v21275_v62 = vld [vmem:[#allocation10 + $0x1e8] ss:$16 sps:$4 sm:$0xff]   ;;  %v21301_v19 = vld [vmem:[#allocation10 + $0x2ec] ss:$16 sps:$4 sm:$0xff]  }
 0xf51   : > { %13328 = vmatprep.mubr.bf16.mxu1 %v25211_v50  ;;  %v21299_v8 = vld [vmem:[#allocation10 + $0x2e8] ss:$16 sps:$4 sm:$0xff]   ;;  %v21304_v35 = vld [vmem:[#allocation10 + $0x30c] ss:$16 sps:$4 sm:$0xff]  }
 0xf52   : > { %13329 = vmatmul.mubr.bf16.gmra.mrb[96].mxu1 %v25208_v45  ;;  %v21302_v11 = vld [vmem:[#allocation10 + $0x308] ss:$16 sps:$4 sm:$0xff]   ;;  %v21307_v5 = vld [vmem:[#allocation10 + $0x32c] ss:$16 sps:$4 sm:$0xff]  }
 0xf53   : > { %13344 = vmatpush1.bf16.msra.mxu1 %v21236_v24  ;;  %13371 = vmatprep.mubr.bf16.mxu1 %v25165_v52  ;;  %v21305_v44 = vld [vmem:[#allocation10 + $0x328] ss:$16 sps:$4 sm:$0xff]   ;;  %v21310_v24 = vld [vmem:[#allocation10 + $0x34c] ss:$16 sps:$4 sm:$0xff]  }
 0xf54   : > { %13345 = vmatprep.subr.bf16.mxu1 %v21241_v58  ;;  %v21308_v58 = vld [vmem:[#allocation10 + $0x348] ss:$16 sps:$4 sm:$0xff]  }
 0xf57   : > { %13346 = vmatpush1.bf16.msra.mxu1 %v21239_v23  ;;  %v21313_v23 = vld [vmem:[#allocation10 + $0x36c] ss:$16 sps:$4 sm:$0xff]  }
 0xf58   : > { %13347 = vmatprep.subr.bf16.mxu1 %v21244_v40  ;;  %v21311_v40 = vld [vmem:[#allocation10 + $0x368] ss:$16 sps:$4 sm:$0xff]  }
 0xf5b   : > { %13348 = vmatpush1.bf16.msra.mxu1 %v21242_v60  ;;  %v21316_v60 = vld [vmem:[#allocation10 + $0x38c] ss:$16 sps:$4 sm:$0xff]  }
 0xf5c   : > { %13349 = vmatprep.subr.bf16.mxu1 %v21247_v55  ;;  %v21314_v55 = vld [vmem:[#allocation10 + $0x388] ss:$16 sps:$4 sm:$0xff]  }
 0xf5f   : > { %13350 = vmatpush1.bf16.msra.mxu1 %v21245_v1  ;;  %v21319_v1 = vld [vmem:[#allocation10 + $0x3ac] ss:$16 sps:$4 sm:$0xff]  }
 0xf60   : > { %13351 = vmatprep.subr.bf16.mxu1 %v21250_v3  ;;  %v21317_v3 = vld [vmem:[#allocation10 + $0x3a8] ss:$16 sps:$4 sm:$0xff]  }
 0xf63   : > { %13352 = vmatpush1.bf16.msra.mxu1 %v21248_v43  ;;  %v21322_v43 = vld [vmem:[#allocation10 + $0x3cc] ss:$16 sps:$4 sm:$0xff]  }
 0xf64   : > { %13353 = vmatprep.subr.bf16.mxu1 %v21253_v47  ;;  %v21320_v47 = vld [vmem:[#allocation10 + $0x3c8] ss:$16 sps:$4 sm:$0xff]  }
 0xf67   : > { %13354 = vmatpush1.bf16.msra.mxu1 %v21251_v16  ;;  %v21325_v16 = vld [vmem:[#allocation10 + $0x3ec] ss:$16 sps:$4 sm:$0xff]  }
 0xf68   : > { %13355 = vmatprep.subr.bf16.mxu1 %v21256_v26  ;;  %v21323_v26 = vld [vmem:[#allocation10 + $0x3e8] ss:$16 sps:$4 sm:$0xff]  }
 0xf6b   : > { %13356 = vmatpush1.bf16.msra.mxu1 %v21254_v46  ;;  %v21328_v46 = vld [vmem:[#allocation10 + $0x404] ss:$16 sps:$4 sm:$0xff]  }
 0xf6c   : > { %13357 = vmatprep.subr.bf16.mxu1 %v21259_v53  ;;  %v21326_v53 = vld [vmem:[#allocation10 + $0x400] ss:$16 sps:$4 sm:$0xff]  }
 0xf6f   : > { %13358 = vmatpush1.bf16.msra.mxu1 %v21257_v22  ;;  %v21331_v22 = vld [vmem:[#allocation10 + $0x424] ss:$16 sps:$4 sm:$0xff]  }
 0xf70   : > { %13359 = vmatprep.subr.bf16.mxu1 %v21262_v7  ;;  %v13626_v7 = vshll.u32 %v25165_v52, 16 }
 0xf73   : > { %13360 = vmatpush1.bf16.msra.mxu1 %v21260_v38  ;;  %v13631_v38 = vshll.u32 %v25183_v56, 16 }
 0xf74   : > { %13361 = vmatprep.subr.bf16.mxu1 %v21265_v31  ;;  %v21329_v31 = vld [vmem:[#allocation10 + $0x420] ss:$16 sps:$4 sm:$0xff]  }
 0xf77   : > { %13362 = vmatpush1.bf16.msra.mxu1 %v21263_v54  ;;  %v21334_v54 = vld [vmem:[#allocation10 + $0x444] ss:$16 sps:$4 sm:$0xff]  }
 0xf78   : > { %13363 = vmatprep.subr.bf16.mxu1 %v21268_v57  ;;  %v13628_v57 = vrot.slane %v13626_v7, 1  ;;  %v25247_v7 = vsel %vm23571_vm15, %v25173_v49, 0  ;;  %v21377_v49 = vld [vmem:[#allocation10 + $0x620] ss:$16 sps:$4 sm:$0xff]  }
 0xf7b   : > { %13364 = vmatpush1.bf16.msra.mxu1 %v21266_v6  ;;  %v13624_v6 = vshrl.u32 %v25165_v52, 16 }
 0xf7c   : > { %13365 = vmatprep.subr.bf16.mxu1 %v21271_v33  ;;  %v25225_v33 = vrot.slane %v13631_v38, 1 }
 0xf7f   : > { %13366 = vmatpush1.bf16.msra.mxu1 %v21269_v12  ;;  %v21332_v12 = vld [vmem:[#allocation10 + $0x440] ss:$16 sps:$4 sm:$0xff]  }
 0xf80   : > { %13367 = vmatprep.subr.bf16.mxu1 %v21274_v25  ;;  %v13629_v25 = vor.u32 %v13628_v57, %v13624_v6 }
 0xf83   : > { %13368 = vmatpush1.bf16.msra.mxu1 %v21272_v13  ;;  %v21337_v13 = vld [vmem:[#allocation10 + $0x464] ss:$16 sps:$4 sm:$0xff]  }
 0xf84   : > { %13369 = vmatprep.subr.bf16.mxu1 %v21277_v14  ;;  %v25230_v14 = vsel %vm723_vm5, %v13629_v25, %v25225_v33  ;;  %v13663_v25 = vshll.u32 %v25247_v7, 16 }
 0xf87   : > { %13370 = vmatpush1.bf16.msra.mxu1 %v21275_v62  ;;  %v21335_v62 = vld [vmem:[#allocation10 + $0x460] ss:$16 sps:$4 sm:$0xff]  }
 0xf88   : > { %13392 = vmatprep.subr.bf16.mxu1 %v21280_v59  ;;  %v21340_v59 = vld [vmem:[#allocation10 + $0x484] ss:$16 sps:$4 sm:$0xff]  }
 0xf8a   : > { %13372 = vmatmul.mubr.bf16.vlgmr.msra.gmra.mrb[100].mxu1 %v25170_v10 }
 0xf8b   : > { %13381 = vmatprep.mubr.bf16.mxu1 %v25183_v56  ;;  %13393 = vmatpush1.bf16.msra.mxu1 %v21278_v41  ;;  %v21338_v41 = vld [vmem:[#allocation10 + $0x480] ss:$16 sps:$4 sm:$0xff]  }
 0xf8c   : > { %13394 = vmatprep.subr.bf16.mxu1 %v21283_v17  ;;  %v21343_v17 = vld [vmem:[#allocation10 + $0x4a4] ss:$16 sps:$4 sm:$0xff]  }
 0xf8f   : > { %13395 = vmatpush1.bf16.msra.mxu1 %v21281_v2  ;;  %v21341_v2 = vld [vmem:[#allocation10 + $0x4a0] ss:$16 sps:$4 sm:$0xff]  }
 0xf90   : > { %13396 = vmatprep.subr.bf16.mxu1 %v21286_v4  ;;  %v21346_v4 = vld [vmem:[#allocation10 + $0x4c4] ss:$16 sps:$4 sm:$0xff]  }
 0xf92   : > { %13382 = vmatmul.mubr.bf16.gmra.mrb[104].mxu1 %v25180_v37 }
 0xf93   : > { %13397 = vmatpush1.bf16.msra.mxu1 %v21284_v34  ;;  %13424 = vmatprep.mubr.bf16.mxu1 %v25193_v30  ;;  %v21344_v34 = vld [vmem:[#allocation10 + $0x4c0] ss:$16 sps:$4 sm:$0xff]  }
 0xf94   : > { %13398 = vmatprep.subr.bf16.mxu1 %v21289_v15  ;;  %v21349_v15 = vld [vmem:[#allocation10 + $0x4e4] ss:$16 sps:$4 sm:$0xff]  }
 0xf97   : > { %13399 = vmatpush1.bf16.msra.mxu1 %v21287_v28  ;;  %v21347_v28 = vld [vmem:[#allocation10 + $0x4e0] ss:$16 sps:$4 sm:$0xff]  }
 0xf98   : > { %13400 = vmatprep.subr.bf16.mxu1 %v21292_v63  ;;  %v21352_v63 = vld [vmem:[#allocation10 + $0x504] ss:$16 sps:$4 sm:$0xff]  }
 0xf9b   : > { %13401 = vmatpush1.bf16.msra.mxu1 %v21290_v48  ;;  %v21350_v48 = vld [vmem:[#allocation10 + $0x500] ss:$16 sps:$4 sm:$0xff]  }
 0xf9c   : > { %13402 = vmatprep.subr.bf16.mxu1 %v21295_v39  ;;  %v21355_v39 = vld [vmem:[#allocation10 + $0x524] ss:$16 sps:$4 sm:$0xff]  }
 0xf9f   : > { %13403 = vmatpush1.bf16.msra.mxu1 %v21293_v20  ;;  %v21353_v20 = vld [vmem:[#allocation10 + $0x520] ss:$16 sps:$4 sm:$0xff]  }
 0xfa0   : > { %13404 = vmatprep.subr.bf16.mxu1 %v21298_v32  ;;  %v21358_v32 = vld [vmem:[#allocation10 + $0x544] ss:$16 sps:$4 sm:$0xff]  }
 0xfa3   : > { %13405 = vmatpush1.bf16.msra.mxu1 %v21296_v36  ;;  %v21356_v36 = vld [vmem:[#allocation10 + $0x540] ss:$16 sps:$4 sm:$0xff]  }
 0xfa4   : > { %13406 = vmatprep.subr.bf16.mxu1 %v21301_v19  ;;  %v21361_v19 = vld [vmem:[#allocation10 + $0x564] ss:$16 sps:$4 sm:$0xff]  }
 0xfa7   : > { %13407 = vmatpush1.bf16.msra.mxu1 %v21299_v8  ;;  %v21359_v8 = vld [vmem:[#allocation10 + $0x560] ss:$16 sps:$4 sm:$0xff]  }
 0xfa8   : > { %13408 = vmatprep.subr.bf16.mxu1 %v21304_v35  ;;  %v21364_v35 = vld [vmem:[#allocation10 + $0x584] ss:$16 sps:$4 sm:$0xff]  }
 0xfab   : > { %13409 = vmatpush1.bf16.msra.mxu1 %v21302_v11  ;;  %v21362_v11 = vld [vmem:[#allocation10 + $0x580] ss:$16 sps:$4 sm:$0xff]  }
 0xfac   : > { %13410 = vmatprep.subr.bf16.mxu1 %v21307_v5  ;;  %v21367_v5 = vld [vmem:[#allocation10 + $0x5a4] ss:$16 sps:$4 sm:$0xff]  }
 0xfaf   : > { %13411 = vmatpush1.bf16.msra.mxu1 %v21305_v44  ;;  %v21365_v44 = vld [vmem:[#allocation10 + $0x5a0] ss:$16 sps:$4 sm:$0xff]  }
 0xfb0   : > { %13412 = vmatprep.subr.bf16.mxu1 %v21310_v24  ;;  %v21370_v24 = vld [vmem:[#allocation10 + $0x5c4] ss:$16 sps:$4 sm:$0xff]  }
 0xfb3   : > { %13413 = vmatpush1.bf16.msra.mxu1 %v21308_v58  ;;  %v13614_v58 = vshll.u32 %v25170_v10, 16 }
 0xfb4   : > { %13414 = vmatprep.subr.bf16.mxu1 %v21313_v23  ;;  %v21368_v23 = vld [vmem:[#allocation10 + $0x5c0] ss:$16 sps:$4 sm:$0xff]  }
 0xfb7   : > { %13415 = vmatpush1.bf16.msra.mxu1 %v21311_v40  ;;  %v21373_v40 = vld [vmem:[#allocation10 + $0x5e4] ss:$16 sps:$4 sm:$0xff]  }
 0xfb8   : > { %13416 = vmatprep.subr.bf16.mxu1 %v21316_v60  ;;  %v25237_v60 = vsel %vm23571_vm15, %v25175_v0, 0  ;;  %v21374_v0 = vld [vmem:[#allocation10 + $0x600] ss:$16 sps:$4 sm:$0xff]  }
 0xfbb   : > { %13417 = vmatpush1.bf16.msra.mxu1 %v21314_v55  ;;  %v13619_v55 = vshll.u32 %v25180_v37, 16 }
 0xfbc   : > { %13418 = vmatprep.subr.bf16.mxu1 %v21319_v1  ;;  %v21371_v1 = vld [vmem:[#allocation10 + $0x5e0] ss:$16 sps:$4 sm:$0xff]  }
 0xfbf   : > { %13419 = vmatpush1.bf16.msra.mxu1 %v21317_v3  ;;  %v13616_v3 = vrot.slane %v13614_v58, 1  ;;  %v21401_v58 = vld [vmem:[#allocation10 + $0x720] ss:$16 sps:$4 sm:$0xff]  }
 0xfc0   : > { %13420 = vmatprep.subr.bf16.mxu1 %v21322_v43  ;;  %v21376_v43 = vld [vmem:[#allocation10 + $0x604] ss:$16 sps:$4 sm:$0xff]  }
 0xfc3   : > { %13421 = vmatpush1.bf16.msra.mxu1 %v21320_v47  ;;  %v13667_v47 = vshrl.u32 %v25183_v56, 16 }
 0xfc4   : > { %13422 = vmatprep.subr.bf16.mxu1 %v21325_v16  ;;  %v13671_v16 = vshll.u32 %v25237_v60, 16 }
 0xfc6   : > { %v13673_v38 = vrot.slane %v13671_v16, 1  ;;  %v21413_v16 = vld [vmem:[#allocation10 + $0x7a0] ss:$16 sps:$4 sm:$0xff]  }
 0xfc7   : > { %13423 = vmatpush1.bf16.msra.mxu1 %v21323_v26  ;;  %v13612_v26 = vshrl.u32 %v25170_v10, 16 }
 0xfc8   : > { %14339 = vmatprep.subr.bf16.mxu1 %v21328_v46  ;;  %v13621_v46 = vrot.slane %v13619_v55, 1  ;;  %v21409_v55 = vld [vmem:[#allocation10 + $0x764] ss:$16 sps:$4 sm:$0xff]  }
 0xfca   : > { %13425 = vmatmul.mubr.bf16.vlgmr.msra.gmra.mrb[100].mxu1 %v25198_v42 }
 0xfcb   : > { %13434 = vmatprep.mubr.bf16.mxu1 %v25211_v50  ;;  %14340 = vmatpush1.bf16.msra.mxu1 %v21326_v53  ;;  %v13669_v53 = vor.u32 %v13667_v47, %v25225_v33  ;;  %v13655_v33 = vshll.u32 %v25211_v50, 16  ;;  %v21415_v47 = vld [vmem:[#allocation10 + $0x7a4] ss:$16 sps:$4 sm:$0xff]  }
 0xfcc   : > { %14341 = vmatprep.subr.bf16.mxu1 %v21331_v22  ;;  %v13617_v22 = vor.u32 %v13616_v3, %v13612_v26  ;;  %v21412_v3 = vld [vmem:[#allocation10 + $0x784] ss:$16 sps:$4 sm:$0xff]  }
 0xfcd   : > { %v25255_v6 = vsel %vm723_vm5, %v13669_v53, %v13673_v38  ;;  %v21418_v26 = vld [vmem:[#allocation10 + $0x7c4] ss:$16 sps:$4 sm:$0xff]   ;;  %v21416_v53 = vld [vmem:[#allocation10 + $0x7c0] ss:$16 sps:$4 sm:$0xff]   ;;  %v13643_v38 = vshll.u32 %v25208_v45, 16 }
 0xfce   : > { %v25251_v57 = vsel %vm723_vm5, %v13617_v22, %v13621_v46  ;;  %v21421_v22 = vld [vmem:[#allocation10 + $0x7e4] ss:$16 sps:$4 sm:$0xff]  }
 0xfcf   : > { %14342 = vmatpush1.bf16.msra.mxu1 %v21329_v31  ;;  %v21379_v31 = vld [vmem:[#allocation10 + $0x624] ss:$16 sps:$4 sm:$0xff]  }
 0xfd0   : > { %14343 = vmatprep.subr.bf16.mxu1 %v21334_v54  ;;  %v13650_v54 = vshll.u32 %v25193_v30, 16 }
 0xfd2   : > { %13435 = vmatmul.mubr.bf16.gmra.mrb[104].mxu1 %v25208_v45 }
 0xfd3   : > { %14344 = vmatpush1.bf16.msra.mxu1 %v21332_v12  ;;  %14371 = vmatprep.mubr.bf16.mxu1 %v25230_v14  ;;  %v13659_v12 = vshrl.u32 %v25180_v37, 16 }
 0xfd4   : > { %14345 = vmatprep.subr.bf16.mxu1 %v21337_v13  ;;  %v21382_v13 = vld [vmem:[#allocation10 + $0x644] ss:$16 sps:$4 sm:$0xff]  }
 0xfd7   : > { %14346 = vmatpush1.bf16.msra.mxu1 %v21335_v62  ;;  %v13652_v62 = vrot.slane %v13650_v54, 1 }
 0xfd8   : > { %14347 = vmatprep.subr.bf16.mxu1 %v21340_v59  ;;  %v13661_v59 = vor.u32 %v13659_v12, %v13621_v46  ;;  %v13638_v46 = vshll.u32 %v25198_v42, 16 }
 0xfda   : > { %v13640_v54 = vrot.slane %v13638_v46, 1  ;;  %v21460_v46 = vld [vmem:[#allocation10 + $0x58c] ss:$16 sps:$4 sm:$0xff]  }
 0xfdb   : > { %14348 = vmatpush1.bf16.msra.mxu1 %v21338_v41  ;;  %v13648_v41 = vshrl.u32 %v25193_v30, 16 }
 0xfdc   : > { %14349 = vmatprep.subr.bf16.mxu1 %v21343_v17  ;;  %v25262_v17 = vrot.slane %v13655_v33, 1  ;;  %v21424_v33 = vld [vmem:[#allocation10 + $0x40c] ss:$16 sps:$4 sm:$0xff]  }
 0xfdf   : > { %14350 = vmatpush1.bf16.msra.mxu1 %v21341_v2  ;;  %v13665_v2 = vrot.slane %v13663_v25, 1  ;;  %v13636_v25 = vshrl.u32 %v25198_v42, 16 }
 0xfe0   : > { %14351 = vmatprep.subr.bf16.mxu1 %v21346_v4  ;;  %v21380_v4 = vld [vmem:[#allocation10 + $0x640] ss:$16 sps:$4 sm:$0xff]  }
 0xfe3   : > { %14352 = vmatpush1.bf16.msra.mxu1 %v21344_v34  ;;  %v13653_v34 = vor.u32 %v13652_v62, %v13648_v41  ;;  %v25287_v41 = vsel %vm23571_vm15, %v25201_v27, 0  ;;  %v21430_v27 = vld [vmem:[#allocation10 + $0x44c] ss:$16 sps:$4 sm:$0xff]  }
 0xfe4   : > { %14353 = vmatprep.subr.bf16.mxu1 %v21349_v15  ;;  %v21385_v15 = vld [vmem:[#allocation10 + $0x664] ss:$16 sps:$4 sm:$0xff]   ;;  %v13679_v21 = vshll.u32 %v25287_v41, 16 }
 0xfe7   : > { %14354 = vmatpush1.bf16.msra.mxu1 %v21347_v28  ;;  %v25265_v28 = vsel %vm723_vm5, %v13661_v59, %v13665_v2  ;;  %v13641_v59 = vor.u32 %v13640_v54, %v13636_v25  ;;  %v21464_v54 = vld [vmem:[#allocation10 + $0x5c8] ss:$16 sps:$4 sm:$0xff]  }
 0xfe8   : > { %14355 = vmatprep.subr.bf16.mxu1 %v21352_v63  ;;  %v25270_v63 = vsel %vm723_vm5, %v13653_v34, %v25262_v17  ;;  %v21470_v25 = vld [vmem:[#allocation10 + $0x608] ss:$16 sps:$4 sm:$0xff]  }
 0xfeb   : > { %14356 = vmatpush1.bf16.msra.mxu1 %v21350_v48  ;;  %v21383_v48 = vld [vmem:[#allocation10 + $0x660] ss:$16 sps:$4 sm:$0xff]  }
 0xfec   : > { %14357 = vmatprep.subr.bf16.mxu1 %v21355_v39  ;;  %v21388_v39 = vld [vmem:[#allocation10 + $0x684] ss:$16 sps:$4 sm:$0xff]  }
 0xfef   : > { %14358 = vmatpush1.bf16.msra.mxu1 %v21353_v20  ;;  %v21386_v20 = vld [vmem:[#allocation10 + $0x680] ss:$16 sps:$4 sm:$0xff]  }
 0xff0   : > { %14359 = vmatprep.subr.bf16.mxu1 %v21358_v32  ;;  %v21391_v32 = vld [vmem:[#allocation10 + $0x6a4] ss:$16 sps:$4 sm:$0xff]  }
 0xff3   : > { %14360 = vmatpush1.bf16.msra.mxu1 %v21356_v36  ;;  %v21389_v36 = vld [vmem:[#allocation10 + $0x6a0] ss:$16 sps:$4 sm:$0xff]  }
 0xff4   : > { %14361 = vmatprep.subr.bf16.mxu1 %v21361_v19  ;;  %v21394_v19 = vld [vmem:[#allocation10 + $0x6c4] ss:$16 sps:$4 sm:$0xff]  }
 0xff7   : > { %14362 = vmatpush1.bf16.msra.mxu1 %v21359_v8  ;;  %v21392_v8 = vld [vmem:[#allocation10 + $0x6c0] ss:$16 sps:$4 sm:$0xff]  }
 0xff8   : > { %14363 = vmatprep.subr.bf16.mxu1 %v21364_v35  ;;  %v21397_v35 = vld [vmem:[#allocation10 + $0x6e4] ss:$16 sps:$4 sm:$0xff]  }
 0xffb   : > { %14364 = vmatpush1.bf16.msra.mxu1 %v21362_v11  ;;  %v21395_v11 = vld [vmem:[#allocation10 + $0x6e0] ss:$16 sps:$4 sm:$0xff]  }
 0xffc   : > { %14365 = vmatprep.subr.bf16.mxu1 %v21367_v5  ;;  %v21400_v5 = vld [vmem:[#allocation10 + $0x704] ss:$16 sps:$4 sm:$0xff]  }
 0xfff   : > { %14366 = vmatpush1.bf16.msra.mxu1 %v21365_v44  ;;  %v21398_v44 = vld [vmem:[#allocation10 + $0x700] ss:$16 sps:$4 sm:$0xff]  }
0x1000   : > { %14367 = vmatprep.subr.bf16.mxu1 %v21370_v24  ;;  %v21403_v24 = vld [vmem:[#allocation10 + $0x724] ss:$16 sps:$4 sm:$0xff]  }
0x1003   : > { %14368 = vmatpush1.bf16.msra.mxu1 %v21368_v23  ;;  %v21406_v23 = vld [vmem:[#allocation10 + $0x744] ss:$16 sps:$4 sm:$0xff]  }
0x1004   : > { %14369 = vmatprep.subr.bf16.mxu1 %v21373_v40  ;;  %v21404_v40 = vld [vmem:[#allocation10 + $0x740] ss:$16 sps:$4 sm:$0xff]  }
0x1007   : > { %14370 = vmatpush1.bf16.msra.mxu1 %v21371_v1  ;;  %v21407_v1 = vld [vmem:[#allocation10 + $0x760] ss:$16 sps:$4 sm:$0xff]  }
0x1008   : > { %14392 = vmatprep.subr.bf16.mxu1 %v21376_v43  ;;  %v21410_v43 = vld [vmem:[#allocation10 + $0x780] ss:$16 sps:$4 sm:$0xff]  }
0x100a   : > { %14372 = vmatmul.mubr.bf16.vlgmr.msra.gmra.mrb[92].mxu1 %v25251_v57 }
0x100b   : > { %14381 = vmatprep.mubr.bf16.mxu1 %v25255_v6  ;;  %14393 = vmatpush1.bf16.msra.mxu1 %v21374_v0  ;;  %v25277_v0 = vsel %vm23571_vm15, %v25203_v18, 0  ;;  %v21422_v18 = vld [vmem:[#allocation10 + $0x408] ss:$16 sps:$4 sm:$0xff]  }
0x100c   : > { %14394 = vmatprep.subr.bf16.mxu1 %v21379_v31  ;;  %v21419_v31 = vld [vmem:[#allocation10 + $0x7e0] ss:$16 sps:$4 sm:$0xff]   ;;  %v13687_v12 = vshll.u32 %v25277_v0, 16 }
0x100e   : > { %v13689_v2 = vrot.slane %v13687_v12, 1  ;;  %v21472_v12 = vld [vmem:[#allocation10 + $0x60c] ss:$16 sps:$4 sm:$0xff]  }
0x100f   : > { %14395 = vmatpush1.bf16.msra.mxu1 %v21377_v49  ;;  %v13683_v49 = vshrl.u32 %v25211_v50, 16 }
0x1010   : > { %14396 = vmatprep.subr.bf16.mxu1 %v21382_v13  ;;  %v13645_v13 = vrot.slane %v13643_v38, 1  ;;  %v21461_v38 = vld [vmem:[#allocation10 + $0x5a8] ss:$16 sps:$4 sm:$0xff]  }
0x1011   : > { %v13685_v62 = vor.u32 %v13683_v49, %v25262_v17  ;;  %v21425_v17 = vld [vmem:[#allocation10 + $0x428] ss:$16 sps:$4 sm:$0xff]  }
0x1012   : > { %14382 = vmatmul.mubr.bf16.gmra.mrb[96].mxu1 %v25265_v28  ;;  %v25290_v34 = vsel %vm723_vm5, %v13641_v59, %v13645_v13  ;;  %v21467_v49 = vld [vmem:[#allocation10 + $0x5e8] ss:$16 sps:$4 sm:$0xff]   ;;  %v21478_v59 = vld [vmem:[#allocation10 + $0x64c] ss:$16 sps:$4 sm:$0xff]  }
0x1013   : > { %14397 = vmatpush1.bf16.msra.mxu1 %v21380_v4  ;;  %14424 = vmatprep.mubr.bf16.mxu1 %v25270_v63  ;;  %v21427_v4 = vld [vmem:[#allocation10 + $0x42c] ss:$16 sps:$4 sm:$0xff]  }
0x1014   : > { %14398 = vmatprep.subr.bf16.mxu1 %v21385_v15  ;;  %v25294_v15 = vsel %vm723_vm5, %v13685_v62, %v13689_v2  ;;  %v21473_v62 = vld [vmem:[#allocation10 + $0x628] ss:$16 sps:$4 sm:$0xff]   ;;  %v21481_v2 = vld [vmem:[#allocation10 + $0x66c] ss:$16 sps:$4 sm:$0xff]  }
0x1017   : > { %14399 = vmatpush1.bf16.msra.mxu1 %v21383_v48  ;;  %v13675_v48 = vshrl.u32 %v25208_v45, 16 }
0x1018   : > { %14400 = vmatprep.subr.bf16.mxu1 %v21388_v39 }
0x1019   : > { %v13677_v39 = vor.u32 %v13675_v48, %v13645_v13  ;;  %v21475_v13 = vld [vmem:[#allocation10 + $0x62c] ss:$16 sps:$4 sm:$0xff]   ;;  %v21485_v48 = vld [vmem:[#allocation10 + $0x6a8] ss:$16 sps:$4 sm:$0xff]  }
0x101b   : > { %14401 = vmatpush1.bf16.msra.mxu1 %v21386_v20  ;;  %v13681_v20 = vrot.slane %v13679_v21, 1  ;;  %v21490_v21 = vld [vmem:[#allocation10 + $0x6cc] ss:$16 sps:$4 sm:$0xff]  }
0x101c   : > { %14402 = vmatprep.subr.bf16.mxu1 %v21391_v32  ;;  %v21428_v32 = vld [vmem:[#allocation10 + $0x448] ss:$16 sps:$4 sm:$0xff]  }
0x101f   : > { %14403 = vmatpush1.bf16.msra.mxu1 %v21389_v36  ;;  %v21433_v36 = vld [vmem:[#allocation10 + $0x46c] ss:$16 sps:$4 sm:$0xff]  }
0x1020   : > { %14404 = vmatprep.subr.bf16.mxu1 %v21394_v19  ;;  %v25300_v19 = vsel %vm723_vm5, %v13677_v39, %v13681_v20  ;;  %v21493_v39 = vld [vmem:[#allocation10 + $0x6ec] ss:$16 sps:$4 sm:$0xff]  }
0x1021   : > { %v21496_v20 = vld [vmem:[#allocation10 + $0x70c] ss:$16 sps:$4 sm:$0xff]  }
0x1023   : > { %14405 = vmatpush1.bf16.msra.mxu1 %v21392_v8  ;;  %v21431_v8 = vld [vmem:[#allocation10 + $0x468] ss:$16 sps:$4 sm:$0xff]  }
0x1024   : > { %14406 = vmatprep.subr.bf16.mxu1 %v21397_v35  ;;  %v21436_v35 = vld [vmem:[#allocation10 + $0x48c] ss:$16 sps:$4 sm:$0xff]  }
0x1027   : > { %14407 = vmatpush1.bf16.msra.mxu1 %v21395_v11  ;;  %v21434_v11 = vld [vmem:[#allocation10 + $0x488] ss:$16 sps:$4 sm:$0xff]  }
0x1028   : > { %14408 = vmatprep.subr.bf16.mxu1 %v21400_v5  ;;  %v21439_v5 = vld [vmem:[#allocation10 + $0x4ac] ss:$16 sps:$4 sm:$0xff]  }
0x102b   : > { %14409 = vmatpush1.bf16.msra.mxu1 %v21398_v44  ;;  %v21437_v44 = vld [vmem:[#allocation10 + $0x4a8] ss:$16 sps:$4 sm:$0xff]  }
0x102c   : > { %14410 = vmatprep.subr.bf16.mxu1 %v21403_v24  ;;  %v21442_v24 = vld [vmem:[#allocation10 + $0x4cc] ss:$16 sps:$4 sm:$0xff]  }
0x102f   : > { %14411 = vmatpush1.bf16.msra.mxu1 %v21401_v58  ;;  %v21440_v58 = vld [vmem:[#allocation10 + $0x4c8] ss:$16 sps:$4 sm:$0xff]  }
0x1030   : > { %14412 = vmatprep.subr.bf16.mxu1 %v21406_v23  ;;  %v21445_v23 = vld [vmem:[#allocation10 + $0x4ec] ss:$16 sps:$4 sm:$0xff]  }
0x1033   : > { %14413 = vmatpush1.bf16.msra.mxu1 %v21404_v40  ;;  %v21443_v40 = vld [vmem:[#allocation10 + $0x4e8] ss:$16 sps:$4 sm:$0xff]  }
0x1034   : > { %14414 = vmatprep.subr.bf16.mxu1 %v21409_v55  ;;  %v21448_v55 = vld [vmem:[#allocation10 + $0x50c] ss:$16 sps:$4 sm:$0xff]  }
0x1037   : > { %14415 = vmatpush1.bf16.msra.mxu1 %v21407_v1  ;;  %v21451_v1 = vld [vmem:[#allocation10 + $0x52c] ss:$16 sps:$4 sm:$0xff]  }
0x1038   : > { %14416 = vmatprep.subr.bf16.mxu1 %v21412_v3  ;;  %v21449_v3 = vld [vmem:[#allocation10 + $0x528] ss:$16 sps:$4 sm:$0xff]  }
0x103b   : > { %14417 = vmatpush1.bf16.msra.mxu1 %v21410_v43  ;;  %v21454_v43 = vld [vmem:[#allocation10 + $0x54c] ss:$16 sps:$4 sm:$0xff]  }
0x103c   : > { %14418 = vmatprep.subr.bf16.mxu1 %v21415_v47  ;;  %v21452_v47 = vld [vmem:[#allocation10 + $0x548] ss:$16 sps:$4 sm:$0xff]  }
0x103f   : > { %14419 = vmatpush1.bf16.msra.mxu1 %v21413_v16  ;;  %v21457_v16 = vld [vmem:[#allocation10 + $0x56c] ss:$16 sps:$4 sm:$0xff]  }
0x1040   : > { %14420 = vmatprep.subr.bf16.mxu1 %v21418_v26  ;;  %v21455_v26 = vld [vmem:[#allocation10 + $0x568] ss:$16 sps:$4 sm:$0xff]  }
0x1043   : > { %14421 = vmatpush1.bf16.msra.mxu1 %v21416_v53  ;;  %v21458_v53 = vld [vmem:[#allocation10 + $0x588] ss:$16 sps:$4 sm:$0xff]  }
0x1044   : > { %14422 = vmatprep.subr.bf16.mxu1 %v21421_v22  ;;  %v21463_v22 = vld [vmem:[#allocation10 + $0x5ac] ss:$16 sps:$4 sm:$0xff]  }
0x1047   : > { %14423 = vmatpush1.bf16.msra.mxu1 %v21419_v31  ;;  %v21466_v31 = vld [vmem:[#allocation10 + $0x5cc] ss:$16 sps:$4 sm:$0xff]  }
0x1048   : > { %14445 = vmatprep.subr.bf16.mxu1 %v21424_v33  ;;  %v21469_v33 = vld [vmem:[#allocation10 + $0x5ec] ss:$16 sps:$4 sm:$0xff]  }
0x104a   : > { %14425 = vmatmul.mubr.bf16.vlgmr.msra.gmra.mrb[92].mxu1 %v25290_v34 }
0x104b   : > { %14434 = vmatprep.mubr.bf16.mxu1 %v25294_v15  ;;  %14446 = vmatpush1.bf16.msra.mxu1 %v21422_v18  ;;  %v21476_v18 = vld [vmem:[#allocation10 + $0x648] ss:$16 sps:$4 sm:$0xff]  }
0x104c   : > { %14447 = vmatprep.subr.bf16.mxu1 %v21427_v4  ;;  %v21479_v4 = vld [vmem:[#allocation10 + $0x668] ss:$16 sps:$4 sm:$0xff]  }
0x104f   : > { %14448 = vmatpush1.bf16.msra.mxu1 %v21425_v17  ;;  %v21484_v17 = vld [vmem:[#allocation10 + $0x68c] ss:$16 sps:$4 sm:$0xff]  }
0x1050   : > { %14449 = vmatprep.subr.bf16.mxu1 %v21430_v27  ;;  %v21488_v27 = vld [vmem:[#allocation10 + $0x6c8] ss:$16 sps:$4 sm:$0xff]  }
0x1052   : > { %14435 = vmatmul.mubr.bf16.gmra.mrb[96].mxu1 %v25300_v19 }
0x1053   : > { %14450 = vmatpush1.bf16.msra.mxu1 %v21428_v32  ;;  %14477 = vmatprep.mubr.bf16.mxu1 %v25230_v14  ;;  %v21446_v14 = vld [vmem:[#allocation10 + $0x508] ss:$16 sps:$4 sm:$0xff]   ;;  %v21499_v32 = vld [vmem:[#allocation10 + $0x72c] ss:$16 sps:$4 sm:$0xff]  }
0x1054   : > { %14451 = vmatprep.subr.bf16.mxu1 %v21433_v36  ;;  %v21497_v36 = vld [vmem:[#allocation10 + $0x728] ss:$16 sps:$4 sm:$0xff]  }
0x1057   : > { %14452 = vmatpush1.bf16.msra.mxu1 %v21431_v8  ;;  %v21502_v8 = vld [vmem:[#allocation10 + $0x74c] ss:$16 sps:$4 sm:$0xff]  }
0x1058   : > { %14453 = vmatprep.subr.bf16.mxu1 %v21436_v35  ;;  %v21500_v35 = vld [vmem:[#allocation10 + $0x748] ss:$16 sps:$4 sm:$0xff]  }
0x105b   : > { %14454 = vmatpush1.bf16.msra.mxu1 %v21434_v11  ;;  %v21505_v11 = vld [vmem:[#allocation10 + $0x76c] ss:$16 sps:$4 sm:$0xff]  }
0x105c   : > { %14455 = vmatprep.subr.bf16.mxu1 %v21439_v5  ;;  %v21503_v5 = vld [vmem:[#allocation10 + $0x768] ss:$16 sps:$4 sm:$0xff]  }
0x105f   : > { %14456 = vmatpush1.bf16.msra.mxu1 %v21437_v44  ;;  %v21508_v44 = vld [vmem:[#allocation10 + $0x78c] ss:$16 sps:$4 sm:$0xff]  }
0x1060   : > { %14457 = vmatprep.subr.bf16.mxu1 %v21442_v24  ;;  %v21506_v24 = vld [vmem:[#allocation10 + $0x788] ss:$16 sps:$4 sm:$0xff]  }
0x1063   : > { %14458 = vmatpush1.bf16.msra.mxu1 %v21440_v58  ;;  %v21511_v58 = vld [vmem:[#allocation10 + $0x7ac] ss:$16 sps:$4 sm:$0xff]  }
0x1064   : > { %14459 = vmatprep.subr.bf16.mxu1 %v21445_v23  ;;  %v21509_v23 = vld [vmem:[#allocation10 + $0x7a8] ss:$16 sps:$4 sm:$0xff]  }
0x1067   : > { %14460 = vmatpush1.bf16.msra.mxu1 %v21443_v40  ;;  %v21514_v40 = vld [vmem:[#allocation10 + $0x7cc] ss:$16 sps:$4 sm:$0xff]  }
0x1068   : > { %14461 = vmatprep.subr.bf16.mxu1 %v21448_v55  ;;  %v21512_v55 = vld [vmem:[#allocation10 + $0x7c8] ss:$16 sps:$4 sm:$0xff]  }
0x106b   : > { %14462 = vmatpush1.bf16.msra.mxu1 %v21446_v14  ;;  %v21517_v14 = vld [vmem:[#allocation10 + $0x7ec] ss:$16 sps:$4 sm:$0xff]  }
0x106c   : > { %14463 = vmatprep.subr.bf16.mxu1 %v21451_v1  ;;  %v21515_v1 = vld [vmem:[#allocation10 + $0x7e8] ss:$16 sps:$4 sm:$0xff]  }
0x106f   : > { %14464 = vmatpush1.bf16.msra.mxu1 %v21449_v3  ;;  %v21520_v3 = vld [vmem:[#allocation10 + $0x804] ss:$16 sps:$4 sm:$0xff]  }
0x1070   : > { %14465 = vmatprep.subr.bf16.mxu1 %v21454_v43  ;;  %v21518_v43 = vld [vmem:[#allocation10 + $0x800] ss:$16 sps:$4 sm:$0xff]  }
0x1073   : > { %14466 = vmatpush1.bf16.msra.mxu1 %v21452_v47  ;;  %v21523_v47 = vld [vmem:[#allocation10 + $0x824] ss:$16 sps:$4 sm:$0xff]  }
0x1074   : > { %14467 = vmatprep.subr.bf16.mxu1 %v21457_v16  ;;  %v21521_v16 = vld [vmem:[#allocation10 + $0x820] ss:$16 sps:$4 sm:$0xff]  }
0x1077   : > { %14468 = vmatpush1.bf16.msra.mxu1 %v21455_v26  ;;  %v21526_v26 = vld [vmem:[#allocation10 + $0x844] ss:$16 sps:$4 sm:$0xff]  }
0x1078   : > { %14469 = vmatprep.subr.bf16.mxu1 %v21460_v46  ;;  %v14708_v46 = vrot.slane %v25183_v56, 1 }
0x107b   : > { %14470 = vmatpush1.bf16.msra.mxu1 %v21458_v53  ;;  %v21524_v53 = vld [vmem:[#allocation10 + $0x840] ss:$16 sps:$4 sm:$0xff]  }
0x107c   : > { %14471 = vmatprep.subr.bf16.mxu1 %v21463_v22  ;;  %v14707_v22 = vrot.slane %v25165_v52, 1  ;;  %v21533_v52 = vld [vmem:[#allocation10 + $0x8a0] ss:$16 sps:$4 sm:$0xff]  }
0x107f   : > { %14472 = vmatpush1.bf16.msra.mxu1 %v21461_v38  ;;  %v21529_v38 = vld [vmem:[#allocation10 + $0x864] ss:$16 sps:$4 sm:$0xff]  }
0x1080   : > { %14473 = vmatprep.subr.bf16.mxu1 %v21466_v31  ;;  %v21532_v31 = vld [vmem:[#allocation10 + $0x884] ss:$16 sps:$4 sm:$0xff]  }
0x1083   : > { %14474 = vmatpush1.bf16.msra.mxu1 %v21464_v54  ;;  %v21530_v54 = vld [vmem:[#allocation10 + $0x880] ss:$16 sps:$4 sm:$0xff]  }
0x1084   : > { %14475 = vmatprep.subr.bf16.mxu1 %v21469_v33  ;;  %v21535_v33 = vld [vmem:[#allocation10 + $0x8a4] ss:$16 sps:$4 sm:$0xff]  }
0x1087   : > { %14476 = vmatpush1.bf16.msra.mxu1 %v21467_v49  ;;  %v21538_v49 = vld [vmem:[#allocation10 + $0x8c4] ss:$16 sps:$4 sm:$0xff]  }
0x1088   : > { %14498 = vmatprep.subr.bf16.mxu1 %v21472_v12  ;;  %v21541_v12 = vld [vmem:[#allocation10 + $0x8e4] ss:$16 sps:$4 sm:$0xff]  }
0x108a   : > { %14478 = vmatmul.mubr.bf16.vlgmr.msra.gmra.mrb[100].mxu1 %v25251_v57  ;;  %v21482_v57 = vld [vmem:[#allocation10 + $0x688] ss:$16 sps:$4 sm:$0xff]  }
0x108b   : > { %14487 = vmatprep.mubr.bf16.mxu1 %v25255_v6  ;;  %14499 = vmatpush1.bf16.msra.mxu1 %v21470_v25  ;;  %v21487_v6 = vld [vmem:[#allocation10 + $0x6ac] ss:$16 sps:$4 sm:$0xff]   ;;  %v21539_v25 = vld [vmem:[#allocation10 + $0x8e0] ss:$16 sps:$4 sm:$0xff]  }
0x108c   : > { %14500 = vmatprep.subr.bf16.mxu1 %v21475_v13  ;;  %v21544_v13 = vld [vmem:[#allocation10 + $0x904] ss:$16 sps:$4 sm:$0xff]  }
0x108f   : > { %14501 = vmatpush1.bf16.msra.mxu1 %v21473_v62  ;;  %v21542_v62 = vld [vmem:[#allocation10 + $0x900] ss:$16 sps:$4 sm:$0xff]  }
0x1090   : > { %14502 = vmatprep.subr.bf16.mxu1 %v21478_v59  ;;  %v21547_v59 = vld [vmem:[#allocation10 + $0x924] ss:$16 sps:$4 sm:$0xff]  }
0x1092   : > { %14488 = vmatmul.mubr.bf16.gmra.mrb[104].mxu1 %v25265_v28  ;;  %v21491_v28 = vld [vmem:[#allocation10 + $0x6e8] ss:$16 sps:$4 sm:$0xff]  }
0x1093   : > { %14503 = vmatpush1.bf16.msra.mxu1 %v21476_v18  ;;  %14530 = vmatprep.mubr.bf16.mxu1 %v25270_v63  ;;  %v21494_v63 = vld [vmem:[#allocation10 + $0x708] ss:$16 sps:$4 sm:$0xff]   ;;  %v21545_v18 = vld [vmem:[#allocation10 + $0x920] ss:$16 sps:$4 sm:$0xff]  }
0x1094   : > { %14504 = vmatprep.subr.bf16.mxu1 %v21481_v2  ;;  %v21550_v2 = vld [vmem:[#allocation10 + $0x944] ss:$16 sps:$4 sm:$0xff]  }
0x1097   : > { %14505 = vmatpush1.bf16.msra.mxu1 %v21479_v4  ;;  %v21548_v4 = vld [vmem:[#allocation10 + $0x940] ss:$16 sps:$4 sm:$0xff]  }
0x1098   : > { %14506 = vmatprep.subr.bf16.mxu1 %v21484_v17  ;;  %v21553_v17 = vld [vmem:[#allocation10 + $0x964] ss:$16 sps:$4 sm:$0xff]  }
0x109b   : > { %14507 = vmatpush1.bf16.msra.mxu1 %v21482_v57  ;;  %v21551_v57 = vld [vmem:[#allocation10 + $0x960] ss:$16 sps:$4 sm:$0xff]  }
0x109c   : > { %14508 = vmatprep.subr.bf16.mxu1 %v21487_v6  ;;  %v21556_v6 = vld [vmem:[#allocation10 + $0x984] ss:$16 sps:$4 sm:$0xff]  }
0x109f   : > { %14509 = vmatpush1.bf16.msra.mxu1 %v21485_v48  ;;  %v21554_v48 = vld [vmem:[#allocation10 + $0x980] ss:$16 sps:$4 sm:$0xff]  }
0x10a0   : > { %14510 = vmatprep.subr.bf16.mxu1 %v21490_v21  ;;  %v21559_v21 = vld [vmem:[#allocation10 + $0x9a4] ss:$16 sps:$4 sm:$0xff]  }
0x10a3   : > { %14511 = vmatpush1.bf16.msra.mxu1 %v21488_v27  ;;  %v21557_v27 = vld [vmem:[#allocation10 + $0x9a0] ss:$16 sps:$4 sm:$0xff]  }
0x10a4   : > { %14512 = vmatprep.subr.bf16.mxu1 %v21493_v39  ;;  %v21562_v39 = vld [vmem:[#allocation10 + $0x9c4] ss:$16 sps:$4 sm:$0xff]  }
0x10a7   : > { %14513 = vmatpush1.bf16.msra.mxu1 %v21491_v28  ;;  %v21560_v28 = vld [vmem:[#allocation10 + $0x9c0] ss:$16 sps:$4 sm:$0xff]  }
0x10a8   : > { %14514 = vmatprep.subr.bf16.mxu1 %v21496_v20  ;;  %v21565_v20 = vld [vmem:[#allocation10 + $0x9e4] ss:$16 sps:$4 sm:$0xff]  }
0x10ab   : > { %14515 = vmatpush1.bf16.msra.mxu1 %v21494_v63  ;;  %v21563_v63 = vld [vmem:[#allocation10 + $0x9e0] ss:$16 sps:$4 sm:$0xff]  }
0x10ac   : > { %14516 = vmatprep.subr.bf16.mxu1 %v21499_v32  ;;  %v21568_v32 = vld [vmem:[#allocation10 + $0xa04] ss:$16 sps:$4 sm:$0xff]  }
0x10af   : > { %14517 = vmatpush1.bf16.msra.mxu1 %v21497_v36  ;;  %v14705_v36 = vrot.slane %v25180_v37, 1  ;;  %v21569_v37 = vld [vmem:[#allocation10 + $0xa20] ss:$16 sps:$4 sm:$0xff]  }
0x10b0   : > { %14518 = vmatprep.subr.bf16.mxu1 %v21502_v8  ;;  %v14704_v8 = vrot.slane %v25170_v10, 1  ;;  %v21574_v10 = vld [vmem:[#allocation10 + $0xa44] ss:$16 sps:$4 sm:$0xff]  }
0x10b3   : > { %14519 = vmatpush1.bf16.msra.mxu1 %v21500_v35  ;;  %v21566_v35 = vld [vmem:[#allocation10 + $0xa00] ss:$16 sps:$4 sm:$0xff]  }
0x10b4   : > { %14520 = vmatprep.subr.bf16.mxu1 %v21505_v11  ;;  %v14718_v11 = vrot.slane %v25237_v60, 1  ;;  %v14716_v60 = vrot.slane %v25247_v7, 1  ;;  %v21580_v7 = vld [vmem:[#allocation10 + $0xa84] ss:$16 sps:$4 sm:$0xff]  }
0x10b6   : > { %v25336_v56 = vsel %vm808_vm6, %v14705_v36, %v14716_v60  ;;  %v15636_v60 = vld [vmem:[%s25678_s12 + $0xa0] sm:$0xff] }
0x10b7   : > { %14521 = vmatpush1.bf16.msra.mxu1 %v21503_v5  ;;  %v21571_v5 = vld [vmem:[#allocation10 + $0xa24] ss:$16 sps:$4 sm:$0xff]  }
0x10b8   : > { %14522 = vmatprep.subr.bf16.mxu1 %v21508_v44  ;;  %v25323_v44 = vsel %vm808_vm6, %v14704_v8, %v14705_v36  ;;  %v15633_v36 = vld [vmem:[%s25678_s12 + $0x88] sm:$0xff] }
0x10bb   : > { %14523 = vmatpush1.bf16.msra.mxu1 %v21506_v24  ;;  %v25329_v24 = vsel %vm808_vm6, %v14708_v46, %v14718_v11  ;;  %v15634_v11 = vld [vmem:[%s25678_s12 + $0x90] sm:$0xff] }
0x10bc   : > { %14524 = vmatprep.subr.bf16.mxu1 %v21511_v58  ;;  %v14714_v58 = vrot.slane %v25211_v50, 1  ;;  %v21628_v50 = vld [vmem:[#allocation10 + $0x88c] ss:$16 sps:$4 sm:$0xff]  }
0x10bf   : > { %14525 = vmatpush1.bf16.msra.mxu1 %v21509_v23  ;;  %v21572_v23 = vld [vmem:[#allocation10 + $0xa40] ss:$16 sps:$4 sm:$0xff]  }
0x10c0   : > { %14526 = vmatprep.subr.bf16.mxu1 %v21514_v40  ;;  %v14713_v40 = vrot.slane %v25193_v30, 1  ;;  %v21583_v30 = vld [vmem:[#allocation10 + $0xaa4] ss:$16 sps:$4 sm:$0xff]  }
0x10c3   : > { %14527 = vmatpush1.bf16.msra.mxu1 %v21512_v55  ;;  %v21577_v55 = vld [vmem:[#allocation10 + $0xa64] ss:$16 sps:$4 sm:$0xff]  }
0x10c4   : > { %14528 = vmatprep.subr.bf16.mxu1 %v21517_v14  ;;  %v25342_v14 = vsel %vm808_vm6, %v14713_v40, %v14714_v58 }
0x10c7   : > { %14529 = vmatpush1.bf16.msra.mxu1 %v21515_v1  ;;  %v21575_v1 = vld [vmem:[#allocation10 + $0xa60] ss:$16 sps:$4 sm:$0xff]  }
0x10c8   : > { %15372 = vmatprep.subr.bf16.mxu1 %v21520_v3  ;;  %v21578_v3 = vld [vmem:[#allocation10 + $0xa80] ss:$16 sps:$4 sm:$0xff]  }
0x10ca   : > { %14531 = vmatmul.mubr.bf16.vlgmr.msra.gmra.mrb[100].mxu1 %v25290_v34  ;;  %v25316_v34 = vsel %vm808_vm6, %v14707_v22, %v14708_v46  ;;  %v21587_v46 = vld [vmem:[#allocation10 + $0xae0] ss:$16 sps:$4 sm:$0xff]  }
0x10cb   : > { %14540 = vmatprep.mubr.bf16.mxu1 %v25294_v15  ;;  %15373 = vmatpush1.bf16.msra.mxu1 %v21518_v43  ;;  %v21527_v15 = vld [vmem:[#allocation10 + $0x860] ss:$16 sps:$4 sm:$0xff]  }
0x10cc   : > { %15374 = vmatprep.subr.bf16.mxu1 %v21523_v47  ;;  %v21581_v43 = vld [vmem:[#allocation10 + $0xaa0] ss:$16 sps:$4 sm:$0xff]   ;;  %v21586_v47 = vld [vmem:[#allocation10 + $0xac4] ss:$16 sps:$4 sm:$0xff]  }
0x10cd   : > { %v21590_v22 = vld [vmem:[#allocation10 + $0xb00] ss:$16 sps:$4 sm:$0xff]  }
0x10cf   : > { %15375 = vmatpush1.bf16.msra.mxu1 %v21521_v16  ;;  %v21584_v16 = vld [vmem:[#allocation10 + $0xac0] ss:$16 sps:$4 sm:$0xff]  }
0x10d0   : > { %15376 = vmatprep.subr.bf16.mxu1 %v21526_v26  ;;  %v21589_v26 = vld [vmem:[#allocation10 + $0xae4] ss:$16 sps:$4 sm:$0xff]  }
0x10d2   : > { %14541 = vmatmul.mubr.bf16.gmra.mrb[104].mxu1 %v25300_v19  ;;  %v21536_v19 = vld [vmem:[#allocation10 + $0x8c0] ss:$16 sps:$4 sm:$0xff]  }
0x10d3   : > { %15377 = vmatpush1.bf16.msra.mxu1 %v21524_v53  ;;  %15404 = vmatprep.mubr.bf16.mxu1 %v25316_v34  ;;  %v21592_v53 = vld [vmem:[#allocation10 + $0xb04] ss:$16 sps:$4 sm:$0xff]  }
0x10d4   : > { %15378 = vmatprep.subr.bf16.mxu1 %v21529_v38  ;;  %v21595_v38 = vld [vmem:[#allocation10 + $0xb24] ss:$16 sps:$4 sm:$0xff]  }
0x10d7   : > { %15379 = vmatpush1.bf16.msra.mxu1 %v21527_v15  ;;  %v21593_v15 = vld [vmem:[#allocation10 + $0xb20] ss:$16 sps:$4 sm:$0xff]  }
0x10d8   : > { %15380 = vmatprep.subr.bf16.mxu1 %v21532_v31  ;;  %v21598_v31 = vld [vmem:[#allocation10 + $0xb44] ss:$16 sps:$4 sm:$0xff]  }
0x10db   : > { %15381 = vmatpush1.bf16.msra.mxu1 %v21530_v54  ;;  %v21596_v54 = vld [vmem:[#allocation10 + $0xb40] ss:$16 sps:$4 sm:$0xff]  }
0x10dc   : > { %15382 = vmatprep.subr.bf16.mxu1 %v21535_v33  ;;  %v21601_v33 = vld [vmem:[#allocation10 + $0xb64] ss:$16 sps:$4 sm:$0xff]  }
0x10df   : > { %15383 = vmatpush1.bf16.msra.mxu1 %v21533_v52  ;;  %v21599_v52 = vld [vmem:[#allocation10 + $0xb60] ss:$16 sps:$4 sm:$0xff]  }
0x10e0   : > { %15384 = vmatprep.subr.bf16.mxu1 %v21538_v49  ;;  %v21604_v49 = vld [vmem:[#allocation10 + $0xb84] ss:$16 sps:$4 sm:$0xff]  }
0x10e3   : > { %15385 = vmatpush1.bf16.msra.mxu1 %v21536_v19  ;;  %v21602_v19 = vld [vmem:[#allocation10 + $0xb80] ss:$16 sps:$4 sm:$0xff]  }
0x10e4   : > { %15386 = vmatprep.subr.bf16.mxu1 %v21541_v12  ;;  %v21607_v12 = vld [vmem:[#allocation10 + $0xba4] ss:$16 sps:$4 sm:$0xff]  }
0x10e7   : > { %15387 = vmatpush1.bf16.msra.mxu1 %v21539_v25  ;;  %v21605_v25 = vld [vmem:[#allocation10 + $0xba0] ss:$16 sps:$4 sm:$0xff]  }
0x10e8   : > { %15388 = vmatprep.subr.bf16.mxu1 %v21544_v13  ;;  %v21610_v13 = vld [vmem:[#allocation10 + $0xbc4] ss:$16 sps:$4 sm:$0xff]  }
0x10eb   : > { %15389 = vmatpush1.bf16.msra.mxu1 %v21542_v62  ;;  %v21608_v62 = vld [vmem:[#allocation10 + $0xbc0] ss:$16 sps:$4 sm:$0xff]  }
0x10ec   : > { %15390 = vmatprep.subr.bf16.mxu1 %v21547_v59  ;;  %v21613_v59 = vld [vmem:[#allocation10 + $0xbe4] ss:$16 sps:$4 sm:$0xff]  }
0x10ef   : > { %15391 = vmatpush1.bf16.msra.mxu1 %v21545_v18  ;;  %v21611_v18 = vld [vmem:[#allocation10 + $0xbe0] ss:$16 sps:$4 sm:$0xff]  }
0x10f0   : > { %15392 = vmatprep.subr.bf16.mxu1 %v21550_v2  ;;  %v21616_v2 = vld [vmem:[#allocation10 + $0x80c] ss:$16 sps:$4 sm:$0xff]  }
0x10f3   : > { %15393 = vmatpush1.bf16.msra.mxu1 %v21548_v4  ;;  %v14711_v4 = vrot.slane %v25208_v45, 1  ;;  %v21617_v45 = vld [vmem:[#allocation10 + $0x828] ss:$16 sps:$4 sm:$0xff]  }
0x10f4   : > { %15394 = vmatprep.subr.bf16.mxu1 %v21553_v17  ;;  %v14710_v17 = vrot.slane %v25198_v42, 1  ;;  %v21622_v42 = vld [vmem:[#allocation10 + $0x84c] ss:$16 sps:$4 sm:$0xff]  }
0x10f7   : > { %15395 = vmatpush1.bf16.msra.mxu1 %v21551_v57  ;;  %v21614_v57 = vld [vmem:[#allocation10 + $0x808] ss:$16 sps:$4 sm:$0xff]  }
0x10f8   : > { %15396 = vmatprep.subr.bf16.mxu1 %v21556_v6  ;;  %v14722_v6 = vrot.slane %v25277_v0, 1  ;;  %v14720_v0 = vrot.slane %v25287_v41, 1  ;;  %v15616_v41 = vld [vmem:[%s25678_s12] sm:$0xff] }
0x10fb   : > { %15397 = vmatpush1.bf16.msra.mxu1 %v21554_v48  ;;  %v21619_v48 = vld [vmem:[#allocation10 + $0x82c] ss:$16 sps:$4 sm:$0xff]  }
0x10fc   : > { %15398 = vmatprep.subr.bf16.mxu1 %v21559_v21  ;;  %v25349_v21 = vsel %vm808_vm6, %v14710_v17, %v14711_v4  ;;  %v21640_v17 = vld [vmem:[#allocation10 + $0x90c] ss:$16 sps:$4 sm:$0xff]  }
0x10ff   : > { %15399 = vmatpush1.bf16.msra.mxu1 %v21557_v27  ;;  %v25355_v27 = vsel %vm808_vm6, %v14714_v58, %v14722_v6  ;;  %v15619_v58 = vld [vmem:[%s25678_s12 + $0x18] sm:$0xff]  ;;  %v15645_v6 = vld [vmem:[%s25678_s12 + $0xe8] sm:$0xff] }
0x1100   : > { %15400 = vmatprep.subr.bf16.mxu1 %v21562_v39  ;;  %v21620_v39 = vld [vmem:[#allocation10 + $0x848] ss:$16 sps:$4 sm:$0xff]  }
0x1103   : > { %15401 = vmatpush1.bf16.msra.mxu1 %v21560_v28  ;;  %v21625_v28 = vld [vmem:[#allocation10 + $0x86c] ss:$16 sps:$4 sm:$0xff]  }
0x1104   : > { %15402 = vmatprep.subr.bf16.mxu1 %v21565_v20  ;;  %v25360_v20 = vsel %vm808_vm6, %v14711_v4, %v14720_v0  ;;  %v15627_v4 = vld [vmem:[%s25678_s12 + $0x58] sm:$0xff] }
0x1105   : > { %v21643_v0 = vld [vmem:[#allocation10 + $0x92c] ss:$16 sps:$4 sm:$0xff]  }
0x1107   : > { %15403 = vmatpush1.bf16.msra.mxu1 %v21563_v63  ;;  %v21623_v63 = vld [vmem:[#allocation10 + $0x868] ss:$16 sps:$4 sm:$0xff]  }
0x1108   : > { %15425 = vmatprep.subr.bf16.mxu1 %v21568_v32  ;;  %v15632_v32 = vld [vmem:[%s25678_s12 + $0x80] sm:$0xff] }
0x1109   : > { %v19057_v8 = vpack.c.bf16 %v15633_v36, %v15632_v32  ;;  %v21647_v32 = vld [vmem:[#allocation10 + $0x968] ss:$16 sps:$4 sm:$0xff]   ;;  %v21652_v36 = vld [vmem:[#allocation10 + $0x98c] ss:$16 sps:$4 sm:$0xff]  }
0x110a   : > { %15405 = vmatmul.mubr.bf16.vlgmr.msra.gmra.mrb[92].mxu1 %v25323_v44 }
0x110b   : > { %15414 = vmatprep.mubr.bf16.mxu1 %v25329_v24  ;;  %15426 = vmatpush1.bf16.msra.mxu1 %v21566_v35  ;;  %v15617_v35 = vld [vmem:[%s25678_s12 + $0x8] sm:$0xff] }
0x110c   : > { %15427 = vmatprep.subr.bf16.mxu1 %v21571_v5  ;;  %v15635_v5 = vld [vmem:[%s25678_s12 + $0x98] sm:$0xff]  ;;  %19058 = vmatprep.subr.bf16.mxu0 %v19057_v8 }
0x110d   : > { %v21655_v8 = vld [vmem:[#allocation10 + $0x9ac] ss:$16 sps:$4 sm:$0xff]  }
0x110f   : > { %15428 = vmatpush1.bf16.msra.mxu1 %v21569_v37  ;;  %v19059_v37 = vpack.c.bf16 %v15617_v35, %v15616_v41  ;;  %v21650_v41 = vld [vmem:[#allocation10 + $0x988] ss:$16 sps:$4 sm:$0xff]  }
0x1110   : > { %15429 = vmatprep.subr.bf16.mxu1 %v21574_v10  ;;  %v19061_v10 = vpack.c.bf16 %v15635_v5, %v15634_v11  ;;  %v21653_v35 = vld [vmem:[#allocation10 + $0x9a8] ss:$16 sps:$4 sm:$0xff]   ;;  %v21658_v11 = vld [vmem:[#allocation10 + $0x9cc] ss:$16 sps:$4 sm:$0xff]  }
0x1111   : > { %19060 = vmatpush3.bf16.msra.mxu0 %v19059_v37  ;;  %v21656_v5 = vld [vmem:[#allocation10 + $0x9c8] ss:$16 sps:$4 sm:$0xff]   ;;  %v21661_v37 = vld [vmem:[#allocation10 + $0x9ec] ss:$16 sps:$4 sm:$0xff]  }
0x1112   : > { %15415 = vmatmul.mubr.bf16.gmra.mrb[96].mxu1 %v25336_v56  ;;  %19062 = vmatprep.subr.bf16.mxu0 %v19061_v10  ;;  %v21659_v10 = vld [vmem:[#allocation10 + $0x9e8] ss:$16 sps:$4 sm:$0xff]  }
0x1113   : > { %15430 = vmatpush1.bf16.msra.mxu1 %v21572_v23  ;;  %15457 = vmatprep.mubr.bf16.mxu1 %v25342_v14  ;;  %v15637_v23 = vld [vmem:[%s25678_s12 + $0xa8] sm:$0xff] }
0x1114   : > { %15431 = vmatprep.subr.bf16.mxu1 %v21577_v55  ;;  %v21626_v55 = vld [vmem:[#allocation10 + $0x888] ss:$16 sps:$4 sm:$0xff]  }
0x1117   : > { %15432 = vmatpush1.bf16.msra.mxu1 %v21575_v1  ;;  %v19065_v1 = vpack.c.bf16 %v15637_v23, %v15636_v60  ;;  %v21667_v60 = vld [vmem:[#allocation10 + $0xa2c] ss:$16 sps:$4 sm:$0xff]   ;;  %v21665_v23 = vld [vmem:[#allocation10 + $0xa28] ss:$16 sps:$4 sm:$0xff]  }
0x1118   : > { %15433 = vmatprep.subr.bf16.mxu1 %v21580_v7  ;;  %v15620_v7 = vld [vmem:[%s25678_s12 + $0x20] sm:$0xff] }
0x111b   : > { %15434 = vmatpush1.bf16.msra.mxu1 %v21578_v3  ;;  %v15621_v3 = vld [vmem:[%s25678_s12 + $0x28] sm:$0xff] }
0x111c   : > { %15435 = vmatprep.subr.bf16.mxu1 %v21583_v30  ;;  %v21631_v30 = vld [vmem:[#allocation10 + $0x8ac] ss:$16 sps:$4 sm:$0xff]  }
0x111f   : > { %15436 = vmatpush1.bf16.msra.mxu1 %v21581_v43  ;;  %v15638_v43 = vld [vmem:[%s25678_s12 + $0xb0] sm:$0xff] }
0x1120   : > { %15437 = vmatprep.subr.bf16.mxu1 %v21586_v47  ;;  %v15639_v47 = vld [vmem:[%s25678_s12 + $0xb8] sm:$0xff] }
0x1123   : > { %15438 = vmatpush1.bf16.msra.mxu1 %v21584_v16  ;;  %v19067_v16 = vpack.c.bf16 %v15621_v3, %v15620_v7  ;;  %v21671_v7 = vld [vmem:[#allocation10 + $0xa68] ss:$16 sps:$4 sm:$0xff]   ;;  %v21676_v3 = vld [vmem:[#allocation10 + $0xa8c] ss:$16 sps:$4 sm:$0xff]  }
0x1124   : > { %15439 = vmatprep.subr.bf16.mxu1 %v21589_v26  ;;  %v21629_v26 = vld [vmem:[#allocation10 + $0x8a8] ss:$16 sps:$4 sm:$0xff]  }
0x1127   : > { %15440 = vmatpush1.bf16.msra.mxu1 %v21587_v46  ;;  %v19069_v46 = vpack.c.bf16 %v15639_v47, %v15638_v43  ;;  %v21682_v43 = vld [vmem:[#allocation10 + $0xacc] ss:$16 sps:$4 sm:$0xff]   ;;  %v21680_v47 = vld [vmem:[#allocation10 + $0xac8] ss:$16 sps:$4 sm:$0xff]  }
0x1128   : > { %15441 = vmatprep.subr.bf16.mxu1 %v21592_v53  ;;  %v15622_v53 = vld [vmem:[%s25678_s12 + $0x30] sm:$0xff] }
0x112b   : > { %15442 = vmatpush1.bf16.msra.mxu1 %v21590_v22  ;;  %v15623_v22 = vld [vmem:[%s25678_s12 + $0x38] sm:$0xff] }
0x112c   : > { %15443 = vmatprep.subr.bf16.mxu1 %v21595_v38  ;;  %v21634_v38 = vld [vmem:[#allocation10 + $0x8cc] ss:$16 sps:$4 sm:$0xff]  }
0x112f   : > { %15444 = vmatpush1.bf16.msra.mxu1 %v21593_v15  ;;  %v15640_v15 = vld [vmem:[%s25678_s12 + $0xc0] sm:$0xff] }
0x1130   : > { %15445 = vmatprep.subr.bf16.mxu1 %v21598_v31  ;;  %v15641_v31 = vld [vmem:[%s25678_s12 + $0xc8] sm:$0xff] }
0x1133   : > { %15446 = vmatpush1.bf16.msra.mxu1 %v21596_v54  ;;  %v19071_v54 = vpack.c.bf16 %v15623_v22, %v15622_v53  ;;  %v15646_v53 = vld [vmem:[%s25678_s12 + $0xf0] sm:$0xff]  ;;  %v15647_v22 = vld [vmem:[%s25678_s12 + $0xf8] sm:$0xff] }
0x1134   : > { %15447 = vmatprep.subr.bf16.mxu1 %v21601_v33  ;;  %v21632_v33 = vld [vmem:[#allocation10 + $0x8c8] ss:$16 sps:$4 sm:$0xff]  }
0x1137   : > { %15448 = vmatpush1.bf16.msra.mxu1 %v21599_v52  ;;  %v19073_v52 = vpack.c.bf16 %v15641_v31, %v15640_v15  ;;  %v21688_v15 = vld [vmem:[#allocation10 + $0xb0c] ss:$16 sps:$4 sm:$0xff]   ;;  %v19085_v31 = vpack.c.bf16 %v15647_v22, %v15646_v53 }
0x1138   : > { %15449 = vmatprep.subr.bf16.mxu1 %v21604_v49  ;;  %v15624_v49 = vld [vmem:[%s25678_s12 + $0x40] sm:$0xff] }
0x113b   : > { %15450 = vmatpush1.bf16.msra.mxu1 %v21602_v19  ;;  %v15625_v19 = vld [vmem:[%s25678_s12 + $0x48] sm:$0xff] }
0x113c   : > { %15451 = vmatprep.subr.bf16.mxu1 %v21607_v12  ;;  %v21637_v12 = vld [vmem:[#allocation10 + $0x8ec] ss:$16 sps:$4 sm:$0xff]  }
0x113f   : > { %15452 = vmatpush1.bf16.msra.mxu1 %v21605_v25  ;;  %v15642_v25 = vld [vmem:[%s25678_s12 + $0xd0] sm:$0xff] }
0x1140   : > { %15453 = vmatprep.subr.bf16.mxu1 %v21610_v13  ;;  %v15643_v13 = vld [vmem:[%s25678_s12 + $0xd8] sm:$0xff] }
0x1143   : > { %15454 = vmatpush1.bf16.msra.mxu1 %v21608_v62  ;;  %v19075_v62 = vpack.c.bf16 %v15625_v19, %v15624_v49  ;;  %v21691_v49 = vld [vmem:[#allocation10 + $0xb2c] ss:$16 sps:$4 sm:$0xff]   ;;  %v21689_v19 = vld [vmem:[#allocation10 + $0xb28] ss:$16 sps:$4 sm:$0xff]  }
0x1144   : > { %15455 = vmatprep.subr.bf16.mxu1 %v21613_v59  ;;  %v21635_v59 = vld [vmem:[#allocation10 + $0x8e8] ss:$16 sps:$4 sm:$0xff]  }
0x1147   : > { %15456 = vmatpush1.bf16.msra.mxu1 %v21611_v18  ;;  %v19077_v18 = vpack.c.bf16 %v15643_v13, %v15642_v25  ;;  %v21692_v25 = vld [vmem:[#allocation10 + $0xb48] ss:$16 sps:$4 sm:$0xff]   ;;  %v21697_v13 = vld [vmem:[#allocation10 + $0xb6c] ss:$16 sps:$4 sm:$0xff]  }
0x1148   : > { %15478 = vmatprep.subr.bf16.mxu1 %v21616_v2  ;;  %v15626_v2 = vld [vmem:[%s25678_s12 + $0x50] sm:$0xff] }
0x114a   : > { %15458 = vmatmul.mubr.bf16.vlgmr.msra.gmra.mrb[92].mxu1 %v25349_v21 }
0x114b   : > { %15467 = vmatprep.mubr.bf16.mxu1 %v25355_v27  ;;  %15479 = vmatpush1.bf16.msra.mxu1 %v21614_v57  ;;  %v15644_v57 = vld [vmem:[%s25678_s12 + $0xe0] sm:$0xff] }
0x114c   : > { %15480 = vmatprep.subr.bf16.mxu1 %v21619_v48  ;;  %v19079_v48 = vpack.c.bf16 %v15627_v4, %v15626_v2  ;;  %v21695_v2 = vld [vmem:[#allocation10 + $0xb68] ss:$16 sps:$4 sm:$0xff]   ;;  %v21700_v4 = vld [vmem:[#allocation10 + $0xb8c] ss:$16 sps:$4 sm:$0xff]  }
0x114f   : > { %15481 = vmatpush1.bf16.msra.mxu1 %v21617_v45  ;;  %v21638_v45 = vld [vmem:[#allocation10 + $0x908] ss:$16 sps:$4 sm:$0xff]  }
0x1150   : > { %15482 = vmatprep.subr.bf16.mxu1 %v21622_v42  ;;  %v19081_v42 = vpack.c.bf16 %v15645_v6, %v15644_v57  ;;  %v21703_v57 = vld [vmem:[#allocation10 + $0xbac] ss:$16 sps:$4 sm:$0xff]   ;;  %v21701_v6 = vld [vmem:[#allocation10 + $0xba8] ss:$16 sps:$4 sm:$0xff]  }
0x1152   : > { %15468 = vmatmul.mubr.bf16.gmra.mrb[96].mxu1 %v25360_v20 }
0x1153   : > { %15483 = vmatpush1.bf16.msra.mxu1 %v21620_v39  ;;  %15510 = vmatprep.mubr.bf16.mxu1 %v25316_v34  ;;  %v15618_v34 = vld [vmem:[%s25678_s12 + $0x10] sm:$0xff]  ;;  %v21641_v39 = vld [vmem:[#allocation10 + $0x928] ss:$16 sps:$4 sm:$0xff]  }
0x1154   : > { %15484 = vmatprep.subr.bf16.mxu1 %v21625_v28  ;;  %v19063_v40 = vpack.c.bf16 %v15619_v58, %v15618_v34  ;;  %v21646_v28 = vld [vmem:[#allocation10 + $0x94c] ss:$16 sps:$4 sm:$0xff]   ;;  %v21662_v58 = vld [vmem:[#allocation10 + $0xa08] ss:$16 sps:$4 sm:$0xff]  }
0x1155   : > { %v21664_v34 = vld [vmem:[#allocation10 + $0xa0c] ss:$16 sps:$4 sm:$0xff]  }
0x1156   : > { %19064 = vmatpush3.bf16.msra.mxu0 %v19063_v40  ;;  %v21670_v40 = vld [vmem:[#allocation10 + $0xa4c] ss:$16 sps:$4 sm:$0xff]  }
0x1157   : > { %15485 = vmatpush1.bf16.msra.mxu1 %v21623_v63  ;;  %19066 = vmatprep.subr.bf16.mxu0 %v19065_v1  ;;  %v21644_v63 = vld [vmem:[#allocation10 + $0x948] ss:$16 sps:$4 sm:$0xff]   ;;  %v21673_v1 = vld [vmem:[#allocation10 + $0xa6c] ss:$16 sps:$4 sm:$0xff]  }
0x1158   : > { %15486 = vmatprep.subr.bf16.mxu1 %v21628_v50  ;;  %v21649_v50 = vld [vmem:[#allocation10 + $0x96c] ss:$16 sps:$4 sm:$0xff]  }
0x115a   : > { %19068 = vmatpush3.bf16.msra.mxu0 %v19067_v16  ;;  %v21685_v16 = vld [vmem:[#allocation10 + $0xaec] ss:$16 sps:$4 sm:$0xff]  }
0x115b   : > { %15487 = vmatpush1.bf16.msra.mxu1 %v21626_v55  ;;  %19070 = vmatprep.subr.bf16.mxu0 %v19069_v46  ;;  %v21668_v55 = vld [vmem:[#allocation10 + $0xa48] ss:$16 sps:$4 sm:$0xff]  }
0x115c   : > { %15488 = vmatprep.subr.bf16.mxu1 %v21631_v30  ;;  %v21677_v30 = vld [vmem:[#allocation10 + $0xaa8] ss:$16 sps:$4 sm:$0xff]  }
0x115d   : > { %v21683_v46 = vld [vmem:[#allocation10 + $0xae8] ss:$16 sps:$4 sm:$0xff]  }
0x115e   : > { %19072 = vmatpush3.bf16.msra.mxu0 %v19071_v54  ;;  %v15631_v54 = vld [vmem:[%s25678_s12 + $0x78] sm:$0xff] }
0x115f   : > { %15489 = vmatpush1.bf16.msra.mxu1 %v21629_v26  ;;  %19074 = vmatprep.subr.bf16.mxu0 %v19073_v52  ;;  %v21686_v52 = vld [vmem:[#allocation10 + $0xb08] ss:$16 sps:$4 sm:$0xff]  }
0x1160   : > { %15490 = vmatprep.subr.bf16.mxu1 %v21634_v38  ;;  %v15630_v38 = vld [vmem:[%s25678_s12 + $0x70] sm:$0xff] }
0x1162   : > { %19076 = vmatpush3.bf16.msra.mxu0 %v19075_v62  ;;  %v15664_v62 = vld [vmem:[%s25678_s12 + $0x180] sm:$0xff] }
0x1163   : > { %15491 = vmatpush1.bf16.msra.mxu1 %v21632_v33  ;;  %19078 = vmatprep.subr.bf16.mxu0 %v19077_v18  ;;  %v19087_v33 = vpack.c.bf16 %v15631_v54, %v15630_v38 }
0x1164   : > { %15492 = vmatprep.subr.bf16.mxu1 %v21637_v12  ;;  %v21694_v12 = vld [vmem:[#allocation10 + $0xb4c] ss:$16 sps:$4 sm:$0xff]  }
0x1166   : > { %19080 = vmatpush3.bf16.msra.mxu0 %v19079_v48  ;;  %v21706_v48 = vld [vmem:[#allocation10 + $0xbcc] ss:$16 sps:$4 sm:$0xff]  }
0x1167   : > { %15493 = vmatpush1.bf16.msra.mxu1 %v21635_v59  ;;  %19082 = vmatprep.subr.bf16.mxu0 %v19081_v42  ;;  %v15665_v59 = vld [vmem:[%s25678_s12 + $0x188] sm:$0xff] }
0x1168   : > { %15494 = vmatprep.subr.bf16.mxu1 %v21640_v17  ;;  %v19089_v18 = vpack.c.bf16 %v15665_v59, %v15664_v62  ;;  %v21698_v17 = vld [vmem:[#allocation10 + $0xb88] ss:$16 sps:$4 sm:$0xff]   ;;  %v21709_v42 = vld [vmem:[#allocation10 + $0xbec] ss:$16 sps:$4 sm:$0xff]   ;;  %v15656_v59 = vld [vmem:[%s25678_s12 + $0x140] sm:$0xff] }
0x116b   : > { %15495 = vmatpush1.bf16.msra.mxu1 %v21638_v45  ;;  %v21704_v45 = vld [vmem:[#allocation10 + $0xbc8] ss:$16 sps:$4 sm:$0xff]  }
0x116c   : > { %15496 = vmatprep.subr.bf16.mxu1 %v21643_v0  ;;  %v21707_v0 = vld [vmem:[#allocation10 + $0xbe8] ss:$16 sps:$4 sm:$0xff]  }
0x116f   : > { %15497 = vmatpush1.bf16.msra.mxu1 %v21641_v39  ;;  %v25473_v39 = vld [vmem:[#allocation11 + $0x12] sm:$0xf] }
0x1170   : > { %15498 = vmatprep.subr.bf16.mxu1 %v21646_v28  ;;  %v13449_v28 = vrot.slane %v25473_v39, %v22794_v51  ;;  %v15666_v51 = vld [vmem:[%s25678_s12 + $0x190] sm:$0xff] }
0x1173   : > { %15499 = vmatpush1.bf16.msra.mxu1 %v21644_v63  ;;  %v13453_v63 = vrot.slane %v25473_v39, %v22797_v61  ;;  %v15667_v61 = vld [vmem:[%s25678_s12 + $0x198] sm:$0xff] }
0x1174   : > { %15500 = vmatprep.subr.bf16.mxu1 %v21649_v50 }
0x1177   : > { %15501 = vmatpush1.bf16.msra.mxu1 %v21647_v32 }
0x1178   : > { %15502 = vmatprep.subr.bf16.mxu1 %v21652_v36 }
0x117b   : > { %15503 = vmatpush1.bf16.msra.mxu1 %v21650_v41  ;;  %v15648_v41 = vld [vmem:[%s25678_s12 + $0x100] sm:$0xff] }
0x117c   : > { %15504 = vmatprep.subr.bf16.mxu1 %v21655_v8 }
0x117f   : > { %15505 = vmatpush1.bf16.msra.mxu1 %v21653_v35 }
0x1180   : > { %15506 = vmatprep.subr.bf16.mxu1 %v21658_v11 }
0x1183   : > { %15507 = vmatpush1.bf16.msra.mxu1 %v21656_v5 }
0x1184   : > { %15508 = vmatprep.subr.bf16.mxu1 %v21661_v37 }
0x1187   : > { %15509 = vmatpush1.bf16.msra.mxu1 %v21659_v10 }
0x1188   : > { %15531 = vmatprep.subr.bf16.mxu1 %v21664_v34  ;;  %v19093_v34 = vpack.c.bf16 %v15667_v61, %v15666_v51  ;;  %v15864_v61 = vld [vmem:[%s25737_s24] sm:$0xff] }
0x118a   : > { %15511 = vmatmul.mubr.bf16.vlgmr.msra.gmra.mrb[100].mxu1 %v25323_v44  ;;  %v21674_v44 = vld [vmem:[#allocation10 + $0xa88] ss:$16 sps:$4 sm:$0xff]  }
0x118b   : > { %15520 = vmatprep.mubr.bf16.mxu1 %v25329_v24  ;;  %15532 = vmatpush1.bf16.msra.mxu1 %v21662_v58  ;;  %v21679_v24 = vld [vmem:[#allocation10 + $0xaac] ss:$16 sps:$4 sm:$0xff]   ;;  %v15650_v58 = vld [vmem:[%s25678_s12 + $0x110] sm:$0xff] }
0x118c   : > { %15533 = vmatprep.subr.bf16.mxu1 %v21667_v60  ;;  %v15651_v60 = vld [vmem:[%s25678_s12 + $0x118] sm:$0xff] }
0x118f   : > { %15534 = vmatpush1.bf16.msra.mxu1 %v21665_v23 }
0x1190   : > { %15535 = vmatprep.subr.bf16.mxu1 %v21670_v40  ;;  %v15668_v40 = vld [vmem:[%s25678_s12 + $0x1a0] sm:$0xff] }
0x1192   : > { %15521 = vmatmul.mubr.bf16.gmra.mrb[104].mxu1 %v25336_v56  ;;  %v15628_v56 = vld [vmem:[%s25678_s12 + $0x60] sm:$0xff] }
0x1193   : > { %15536 = vmatpush1.bf16.msra.mxu1 %v21668_v55  ;;  %15563 = vmatprep.mubr.bf16.mxu1 %v25342_v14  ;;  %v15629_v14 = vld [vmem:[%s25678_s12 + $0x68] sm:$0xff] }
0x1194   : > { %15537 = vmatprep.subr.bf16.mxu1 %v21673_v1  ;;  %v19083_v26 = vpack.c.bf16 %v15629_v14, %v15628_v56  ;;  %v15669_v55 = vld [vmem:[%s25678_s12 + $0x1a8] sm:$0xff]  ;;  %v15670_v14 = vld [vmem:[%s25678_s12 + $0x1b0] sm:$0xff] }
0x1196   : > { %19084 = vmatpush3.bf16.msra.mxu0 %v19083_v26  ;;  %v15671_v26 = vld [vmem:[%s25678_s12 + $0x1b8] sm:$0xff] }
0x1197   : > { %15538 = vmatpush1.bf16.msra.mxu1 %v21671_v7  ;;  %19086 = vmatprep.subr.bf16.mxu0 %v19085_v31  ;;  %v19095_v7 = vpack.c.bf16 %v15651_v60, %v15650_v58  ;;  %v19101_v54 = vpack.c.bf16 %v15671_v26, %v15670_v14 }
0x1198   : > { %15539 = vmatprep.subr.bf16.mxu1 %v21676_v3 }
0x119a   : > { %19088 = vmatpush3.bf16.msra.mxu0 %v19087_v33  ;;  %v15654_v33 = vld [vmem:[%s25678_s12 + $0x130] sm:$0xff] }
0x119b   : > { %15540 = vmatpush1.bf16.msra.mxu1 %v21674_v44  ;;  %19090 = vmatprep.subr.bf16.mxu0 %v19089_v18  ;;  %v15657_v18 = vld [vmem:[%s25678_s12 + $0x148] sm:$0xff] }
0x119c   : > { %15541 = vmatprep.subr.bf16.mxu1 %v21679_v24 }
0x119f   : > { %15542 = vmatpush1.bf16.msra.mxu1 %v21677_v30  ;;  %v19097_v30 = vpack.c.bf16 %v15669_v55, %v15668_v40 }
0x11a0   : > { %15543 = vmatprep.subr.bf16.mxu1 %v21682_v43  ;;  %v15652_v43 = vld [vmem:[%s25678_s12 + $0x120] sm:$0xff] }
0x11a3   : > { %15544 = vmatpush1.bf16.msra.mxu1 %v21680_v47  ;;  %v15653_v47 = vld [vmem:[%s25678_s12 + $0x128] sm:$0xff] }
0x11a4   : > { %15545 = vmatprep.subr.bf16.mxu1 %v21685_v16  ;;  %v19099_v38 = vpack.c.bf16 %v15653_v47, %v15652_v43 }
0x11a7   : > { %15546 = vmatpush1.bf16.msra.mxu1 %v21683_v46 }
0x11a8   : > { %15547 = vmatprep.subr.bf16.mxu1 %v21688_v15 }
0x11ab   : > { %15548 = vmatpush1.bf16.msra.mxu1 %v21686_v52  ;;  %v15655_v52 = vld [vmem:[%s25678_s12 + $0x138] sm:$0xff] }
0x11ac   : > { %15549 = vmatprep.subr.bf16.mxu1 %v21691_v49 }
0x11af   : > { %15550 = vmatpush1.bf16.msra.mxu1 %v21689_v19  ;;  %v15672_v19 = vld [vmem:[%s25678_s12 + $0x1c0] sm:$0xff] }
0x11b0   : > { %15551 = vmatprep.subr.bf16.mxu1 %v21694_v12  ;;  %v15673_v12 = vld [vmem:[%s25678_s12 + $0x1c8] sm:$0xff] }
0x11b1   : > { %v19105_v62 = vpack.c.bf16 %v15673_v12, %v15672_v19 }
0x11b3   : > { %15552 = vmatpush1.bf16.msra.mxu1 %v21692_v25  ;;  %v19103_v25 = vpack.c.bf16 %v15655_v52, %v15654_v33 }
0x11b4   : > { %15553 = vmatprep.subr.bf16.mxu1 %v21697_v13 }
0x11b7   : > { %15554 = vmatpush1.bf16.msra.mxu1 %v21695_v2  ;;  %v15674_v2 = vld [vmem:[%s25678_s12 + $0x1d0] sm:$0xff] }
0x11b8   : > { %15555 = vmatprep.subr.bf16.mxu1 %v21700_v4  ;;  %v15675_v4 = vld [vmem:[%s25678_s12 + $0x1d8] sm:$0xff] }
0x11bb   : > { %15556 = vmatpush1.bf16.msra.mxu1 %v21698_v17  ;;  %v19107_v17 = vpack.c.bf16 %v15657_v18, %v15656_v59 }
0x11bc   : > { %15557 = vmatprep.subr.bf16.mxu1 %v21703_v57  ;;  %v19109_v57 = vpack.c.bf16 %v15675_v4, %v15674_v2 }
0x11bf   : > { %15558 = vmatpush1.bf16.msra.mxu1 %v21701_v6  ;;  %v15658_v6 = vld [vmem:[%s25678_s12 + $0x150] sm:$0xff] }
0x11c0   : > { %15559 = vmatprep.subr.bf16.mxu1 %v21706_v48  ;;  %v15659_v48 = vld [vmem:[%s25678_s12 + $0x158] sm:$0xff] }
0x11c3   : > { %15560 = vmatpush1.bf16.msra.mxu1 %v21704_v45  ;;  %v15676_v45 = vld [vmem:[%s25678_s12 + $0x1e0] sm:$0xff] }
0x11c4   : > { %15561 = vmatprep.subr.bf16.mxu1 %v21709_v42  ;;  %v15677_v42 = vld [vmem:[%s25678_s12 + $0x1e8] sm:$0xff] }
0x11c7   : > { %15562 = vmatpush1.bf16.msra.mxu1 %v21707_v0  ;;  %v19111_v0 = vpack.c.bf16 %v15659_v48, %v15658_v6 }
0x11ca   : > { %15564 = vmatmul.mubr.bf16.vlgmr.msra.gmra.mrb[100].mxu1 %v25349_v21  ;;  %v15649_v21 = vld [vmem:[%s25678_s12 + $0x108] sm:$0xff] }
0x11cb   : > { %15573 = vmatprep.mubr.bf16.mxu1 %v25355_v27  ;;  %v19091_v5 = vpack.c.bf16 %v15649_v21, %v15648_v41 }
0x11d2   : > { %15574 = vmatmul.mubr.bf16.gmra.mrb[104].mxu1 %v25360_v20 }
0x121d   : > { %v15459_v50 = vpop.f32.mrb[92].mxu1 }
0x121e   : > { %v19241_v32 = vadd.f32 %v15459_v50, %v13449_v28  ;;  %v15461_v36 = vpop.f32.mrb[93].mxu1  ;;  %v15661_v50 = vld [vmem:[%s25678_s12 + $0x168] sm:$0xff] }
0x121f   : > { %v19242_v27 = vadd.f32 %v15461_v36, %v13453_v63  ;;  %v15463_v20 = vpop.f32.mrb[94].mxu1  ;;  %v15679_v36 = vld [vmem:[%s25678_s12 + $0x1f8] sm:$0xff] }
0x1220   : > { %v15465_v8 = vpop.f32.mrb[95].mxu1  ;;  %v15600_v37 = vmax.f32 %v19241_v32, 0.0  ;;  %v19243_v10 = vadd.f32 %v15463_v20, %v13449_v28  ;;  %v15678_v32 = vld [vmem:[%s25678_s12 + $0x1f0] sm:$0xff]  ;;  %v15663_v20 = vld [vmem:[%s25678_s12 + $0x178] sm:$0xff] }
0x1221   : > { %v15601_v35 = vmax.f32 %v19242_v27, 0.0  ;;  %v19244_v11 = vadd.f32 %v15465_v8, %v13453_v63  ;;  %v19117_v21 = vpack.c.bf16 %v15679_v36, %v15678_v32  ;;  %v15662_v27 = vld [vmem:[%s25678_s12 + $0x170] sm:$0xff]  ;;  %v15865_v8 = vld [vmem:[%s25738_s17 + $0x8] sm:$0xff] }
0x1222   : > { %v15604_v3 = vmax.f32 %v19243_v10, 0.0  ;;  %v19119_v51 = vpack.c.bf16 %v15663_v20, %v15662_v27 }
0x1223   : > { %v15605_v23 = vmax.f32 %v19244_v11, 0.0  ;;  %15744 = vmatprep.mubr.f32.mxu0 %v15601_v35  ;;  %v19121_v35 = vpack.c.bf16 %v15865_v8, %v15864_v61  ;;  %v13457_v11 = vrot.slane %v25473_v39, %v22806_v29 }
0x1224   : > { %15745 = vmatmul.mubr.f32.vlgmr.msra.gmra.mrb[56].mxu0 %v15600_v37 }
0x1225   : > { %v15469_v1 = vpop.f32.mrb[96].mxu1  ;;  %15749 = vmatprep.mubr.f32.mxu0 %v15605_v23  ;;  %19092 = vmatpush3.bf16.msra.mxu0 %v19091_v5  ;;  %v13461_v5 = vrot.slane %v25473_v39, %v23984_v9 }
0x1226   : > { %v19245_v44 = vadd.f32 %v15469_v1, %v13449_v28  ;;  %v15471_v24 = vpop.f32.mrb[97].mxu1  ;;  %19094 = vmatprep.subr.bf16.mxu0 %v19093_v34 }
0x1227   : > { %v19246_v16 = vadd.f32 %v15471_v24, %v13453_v63  ;;  %v15473_v56 = vpop.f32.mrb[98].mxu1 }
0x1228   : > { %v15475_v46 = vpop.f32.mrb[99].mxu1  ;;  %15750 = vmatmul.mubr.f32.gmra.mrb[58].mxu0 %v15604_v3  ;;  %v15608_v15 = vmax.f32 %v19245_v44, 0.0  ;;  %v19247_v31 = vadd.f32 %v15473_v56, %v13449_v28  ;;  %v19113_v28 = vpack.c.bf16 %v15677_v42, %v15676_v45 }
0x1229   : > { %v15609_v53 = vmax.f32 %v19246_v16, 0.0  ;;  %v19248_v22 = vadd.f32 %v15475_v46, %v13453_v63  ;;  %19096 = vmatpush3.bf16.msra.mxu0 %v19095_v7  ;;  %v15660_v63 = vld [vmem:[%s25678_s12 + $0x160] sm:$0xff] }
0x122a   : > { %19098 = vmatprep.subr.bf16.mxu0 %v19097_v30  ;;  %v15612_v13 = vmax.f32 %v19247_v31, 0.0  ;;  %v19115_v41 = vpack.c.bf16 %v15661_v50, %v15660_v63 }
0x122b   : > { %v15613_v49 = vmax.f32 %v19248_v22, 0.0  ;;  %15754 = vmatprep.mubr.f32.mxu0 %v15609_v53 }
0x122c   : > { %15755 = vmatmul.mubr.f32.gmra.mrb[60].mxu0 %v15608_v15 }
0x122d   : > { %15759 = vmatprep.mubr.f32.mxu0 %v15613_v49  ;;  %19100 = vmatpush3.bf16.msra.mxu0 %v19099_v38 }
0x122e   : > { %19102 = vmatprep.subr.bf16.mxu0 %v19101_v54 }
0x1230   : > { %15760 = vmatmul.mubr.f32.gmra.mrb[62].mxu0 %v15612_v13 }
0x1231   : > { %19104 = vmatpush3.bf16.msra.mxu0 %v19103_v25 }
0x1232   : > { %19106 = vmatprep.subr.bf16.mxu0 %v19105_v62 }
0x1235   : > { %19108 = vmatpush3.bf16.msra.mxu0 %v19107_v17 }
0x1236   : > { %19110 = vmatprep.subr.bf16.mxu0 %v19109_v57 }
0x1239   : > { %19112 = vmatpush3.bf16.msra.mxu0 %v19111_v0 }
0x123a   : > { %19114 = vmatprep.subr.bf16.mxu0 %v19113_v28 }
0x123d   : > { %19116 = vmatpush3.bf16.msra.mxu0 %v19115_v41 }
0x123e   : > { %19118 = vmatprep.subr.bf16.mxu0 %v19117_v21 }
0x1241   : > { %19120 = vmatpush3.bf16.msra.mxu0 %v19119_v51 }
0x1242   : > { %19122 = vmatprep.subr.bf16.mxu0 %v19121_v35 }
0x129d   : > { %v15565_v37 = vpop.f32.mrb[100].mxu1 }
0x129e   : > { %v19249_v10 = vadd.f32 %v15565_v37, %v13457_v11  ;;  %v15567_v34 = vpop.f32.mrb[101].mxu1 }
0x129f   : > { %v19250_v58 = vadd.f32 %v15567_v34, %v13461_v5  ;;  %v15569_v60 = vpop.f32.mrb[102].mxu1 }
0x12a0   : > { %v15571_v23 = vpop.f32.mrb[103].mxu1  ;;  %v15602_v1 = vmax.f32 %v19249_v10, 0.0  ;;  %v19251_v7 = vadd.f32 %v15569_v60, %v13457_v11 }
0x12a1   : > { %v15603_v40 = vmax.f32 %v19250_v58, 0.0  ;;  %v19252_v55 = vadd.f32 %v15571_v23, %v13461_v5 }
0x12a2   : > { %v15606_v29 = vmax.f32 %v19251_v7, 0.0 }
0x12a3   : > { %v15607_v3 = vmax.f32 %v19252_v55, 0.0  ;;  %15829 = vmatprep.mubr.f32.mxu0 %v15603_v40 }
0x12a4   : > { %15830 = vmatmul.mubr.f32.vlgmr.msra.gmra.mrb[64].mxu0 %v15602_v1 }
0x12a5   : > { %v15575_v44 = vpop.f32.mrb[104].mxu1  ;;  %15834 = vmatprep.mubr.f32.mxu0 %v15607_v3  ;;  %19124 = vmatpush3.bf16.msra.mxu0 %v19121_v35 }
0x12a6   : > { %v19253_v24 = vadd.f32 %v15575_v44, %v13457_v11  ;;  %v15577_v30 = vpop.f32.mrb[105].mxu1 }
0x12a7   : > { %v19254_v9 = vadd.f32 %v15577_v30, %v13461_v5  ;;  %v15579_v39 = vpop.f32.mrb[106].mxu1 }
0x12a8   : > { %v15581_v43 = vpop.f32.mrb[107].mxu1  ;;  %15835 = vmatmul.mubr.f32.gmra.mrb[66].mxu0 %v15606_v29  ;;  %v15610_v56 = vmax.f32 %v19253_v24, 0.0  ;;  %v19255_v14 = vadd.f32 %v15579_v39, %v13457_v11 }
0x12a9   : > { %v15611_v47 = vmax.f32 %v19254_v9, 0.0  ;;  %v19256_v16 = vadd.f32 %v15581_v43, %v13461_v5 }
0x12aa   : > { %v15614_v46 = vmax.f32 %v19255_v14, 0.0 }
0x12ab   : > { %v15615_v26 = vmax.f32 %v19256_v16, 0.0  ;;  %15839 = vmatprep.mubr.f32.mxu0 %v15611_v47 }
0x12ac   : > { %15840 = vmatmul.mubr.f32.gmra.mrb[68].mxu0 %v15610_v56 }
0x12ad   : > { %15844 = vmatprep.mubr.f32.mxu0 %v15615_v26 }
0x12b0   : > { %15845 = vmatmul.mubr.f32.gmra.mrb[70].mxu0 %v15614_v46 }
0x12f7   : > { %v18641_v53 = vpop.f32.mrb[56].mxu0 }
0x12f8   : > { %v18642_v22 = vpop.f32.mrb[57].mxu0 }
0x12f9   : > { %v18643_v38 = vadd.f32 %v18642_v22, %v18641_v53 }
0x12fb   : > { %v18644_v15 = vpop.f32.mrb[58].mxu0 }
0x12fc   : > { %v18645_v31 = vpop.f32.mrb[59].mxu0 }
0x12fd   : > { %v18646_v54 = vadd.f32 %v18645_v31, %v18644_v15 }
0x12ff   : > { %v18647_v33 = vpop.f32.mrb[60].mxu0 }
0x1300   : > { %v18648_v52 = vpop.f32.mrb[61].mxu0 }
0x1301   : > { %v18649_v49 = vadd.f32 %v18648_v52, %v18647_v33 }
0x1303   : > { %v18650_v19 = vpop.f32.mrb[62].mxu0 }
0x1304   : > { %v18651_v12 = vpop.f32.mrb[63].mxu0 }
0x1305   : > { %v18652_v25 = vadd.f32 %v18651_v12, %v18650_v19 }
0x1377   : > { %v18685_v13 = vpop.f32.mrb[64].mxu0 }
0x1378   : > { %v18686_v62 = vpop.f32.mrb[65].mxu0 }
0x1379   : > { %v18687_v59 = vadd.f32 %v18686_v62, %v18685_v13 }
0x137b   : > { %v15832_v18 = vadd.f32 %v18687_v59, %v18643_v38  ;;  %v18688_v2 = vpop.f32.mrb[66].mxu0 }
0x137c   : > { %v18689_v4 = vpop.f32.mrb[67].mxu0 }
0x137d   : > { %v18690_v17 = vadd.f32 %v18689_v4, %v18688_v2  ;;  %19051 = vmatprep.mubr.msk.f32.mxu0 %vm15850_vm0, %v15832_v18  ;;  %v15851_v45 = vsel %vm15850_vm0, %v15832_v18, 0.0 }
0x137f   : > { %v15837_v57 = vadd.f32 %v18690_v17, %v18646_v54  ;;  %v18691_v6 = vpop.f32.mrb[68].mxu0 }
0x1380   : > { %v18692_v48 = vpop.f32.mrb[69].mxu0 }
0x1381   : > { %v15852_v42 = vsel %vm15850_vm0, %v15837_v57, 0.0  ;;  %v18693_v0 = vadd.f32 %v18692_v48, %v18691_v6  ;;  %19052 = vmatmul.mubr.msk.f32.vlgmr.msra.gmra.mrb[72].mxu0 %vm15850_vm0, %v15837_v57 }
0x1382   : > { %v15853_v28 = vadd.f32 %v15852_v42, %v15851_v45 }
0x1383   : > { %v15842_v63 = vadd.f32 %v18693_v0, %v18649_v49  ;;  %v18694_v50 = vpop.f32.mrb[70].mxu0 }
0x1384   : > { %v18695_v32 = vpop.f32.mrb[71].mxu0 }
0x1385   : > { %v15854_v36 = vsel %vm15850_vm0, %v15842_v63, 0.0  ;;  %v18696_v41 = vadd.f32 %v18695_v32, %v18694_v50  ;;  %19054 = vmatprep.mubr.msk.f32.mxu0 %vm15850_vm0, %v15842_v63 }
0x1386   : > { %v15855_v21 = vadd.f32 %v15854_v36, %v15853_v28 }
0x1387   : > { %v15847_v27 = vadd.f32 %v18696_v41, %v18652_v25 }
0x1389   : > { %v15856_v20 = vsel %vm15850_vm0, %v15847_v27, 0.0  ;;  %19055 = vmatmul.mubr.msk.f32.gmra.mrb[74].mxu0 %vm15850_vm0, %v15847_v27 }
0x138a   : > { %v15857_v51 = vadd.f32 %v15856_v20, %v15855_v21 }
0x138c   : > { %v15858_v61 = vrot.slane %v15857_v51, 4 }
0x138e   : > { %v15859_v8 = vadd.f32 %v15858_v61, %v15857_v51 }
0x1390   : > { %v15860_v35 = vrot.slane %v15859_v8, 2 }
0x1392   : > { %v15861_v11 = vadd.f32 %v15860_v35, %v15859_v8 }
0x1394   : > { %v15862_v5 = vrot.slane %v15861_v11, 1 }
0x1396   : > { %v15863_v37 = vadd.f32 %v15862_v5, %v15861_v11 }
0x1398   : > { %15980 = vst.msk [vmem:[%s609_s18] sm:$0x1] %vm15979_vm1, %v15863_v37 }
0x1399   : > { %21927 = shalt.err (!%p21924_p6)
}
0x139a   : > { %s21928_s24 = scalar_lea.hbm %s25597_s30, 16  ;;  %s21932_s20 = scalar_lea.hbm %s25741_s27, 32 }
0x139b   : > { %p21929_p9 = scmp.ne.s32.totalorder %s25597_s30, %s21928_s24  ;;  %p21933_p1 = scmp.lt.u32.totalorder %s25597_s30, %s25741_s27 }
0x139c   : > { %p21934_p2 = scmp.lt.u32.totalorder %s21932_s20, %s21928_s24  ;;  %p21936_p4 = scmp.lt.u32.totalorder %s21928_s24, %s25597_s30 }
0x139d   : > { %p21930_p10 = pnand %p21929_p9, %p25742_p7 }
0x139e   : > { %p21935_p3 = por %p21934_p2, %p21933_p1 }
0x139f   : > { %p21931_p12 = pneg %p21930_p10 }
0x13a0   : > { %p21937_p8 = por %p21936_p4, %p21935_p3 }
0x13a2   : > { %p21938_p11 = pnand %p21937_p8, %p21931_p12 }
0x13a4   : > { %21941 = shalt.err (!%p21938_p11)
}
0x13a5   : > { %19641 = dma.vmem_to_hbm [thread:$0]  (%p25742_p7), %s16014_s16, 16, %s25597_s30, %s15988_s15   ;;  %vm15963_vm2 = vcmask 80896   ;;  %v15977_v43 = vld [vmem:[#allocation11 + $0x16] sm:$0x1]  ;;  %vm15981_vm3 = vcmask 73728  }
0x13a6   : > { %s603_s0 = scalar_lea.vmem [#allocation13], %s25588_s22  ;;  %s25743_s9 = sld [smem:[#allocation34_spill]] }
0x13a7   : > { %s16000_s30 = sshll.u32 %s603_s0, 4  ;;  %s15984_s5 = scalar_lea.sflag [#allocation4], %s25588_s22  ;;  %s25625_s30 = int_to_ptr.vmem [resolvable:$true] %s16000_s30 }
0x13a8   : > { %s21942_s21 = scalar_lea.vmem %s25625_s30, 16  ;;  %s22041_s24 = smov [#allocation13]  }
0x13a9   : > { %p21943_p13 = scmp.ne.s32.totalorder %s25625_s30, %s21942_s21  ;;  %s21946_s28 = sshll.u32 %s22041_s24, 4  ;;  %s21947_s28 = int_to_ptr.vmem [resolvable:$false] %s21946_s28 }
0x13aa   : > { %s21948_s25 = scalar_lea.vmem %s21947_s28, 32  ;;  %p21949_p6 = scmp.lt.s32.totalorder %s25625_s30, %s21947_s28 }
0x13ab   : > { %p21944_p5 = pnand %p21943_p13, %p25742_p7  ;;  %p21950_p9 = scmp.lt.s32.totalorder %s21948_s25, %s21942_s21 }
0x13ac   : > { %s25623_s13 = scalar_lea.hbm %s25743_s9, %s18235_s26 }
0x13ad   : > { %p21945_p0 = pneg %p21944_p5  ;;  %p21951_p10 = por %p21950_p9, %p21949_p6 }
0x13af   : > { %p21952_p12 = pnand %p21951_p10, %p21945_p0 }
0x1454   : > { %v19053_v10 = vpop.f32.mrb[72].mxu0 }
0x1455   : > { %v15965_v34 = vsel %vm15963_vm2, %v19053_v10, 0.0  ;;  %v15944_v58 = vpop.f32.mrb[73].mxu0 }
0x1456   : > { %v15964_v60 = vsel %vm15963_vm2, %v15944_v58, 0.0 }
0x1457   : > { %v15966_v23 = vadd.f32 %v15965_v34, %v15964_v60 }
0x145c   : > { %v19056_v40 = vpop.f32.mrb[74].mxu0 }
0x145d   : > { %v15954_v55 = vpop.f32.mrb[75].mxu0  ;;  %v15969_v3 = vsel %vm15963_vm2, %v19056_v40, 0.0 }
0x145e   : > { %v15967_v1 = vsel %vm15963_vm2, %v15954_v55, 0.0 }
0x145f   : > { %v15968_v7 = vadd.f32 %v15967_v1, %v15966_v23 }
0x1461   : > { %v15970_v44 = vadd.f32 %v15969_v3, %v15968_v7 }
0x1463   : > { %v15971_v29 = vrot.slane %v15970_v44, 4 }
0x1465   : > { %v15972_v24 = vadd.f32 %v15971_v29, %v15970_v44 }
0x1467   : > { %v15973_v30 = vrot.slane %v15972_v24, 2 }
0x1469   : > { %v15974_v9 = vadd.f32 %v15973_v30, %v15972_v24 }
0x146b   : > { %v15975_v39 = vrot.slane %v15974_v9, 1 }
0x146d   : > { %v15976_v47 = vadd.f32 %v15975_v39, %v15974_v9 }
0x146f   : > { %v15978_v16 = vadd.f32 %v15977_v43, %v15976_v47 }
0x1471   : > { %15982 = vst.msk [vmem:[%s603_s0] sm:$0x1] %vm15981_vm3, %v15978_v16 }
0x1472   : > { %21955 = shalt.err (!%p21952_p12)
}
0x1473   : > { %s21956_s22 = scalar_lea.hbm %s25623_s13, 16  ;;  %s21960_s20 = scalar_lea.hbm %s25743_s9, 32 }
0x1474   : > { %p21957_p1 = scmp.ne.s32.totalorder %s25623_s13, %s21956_s22  ;;  %p21961_p4 = scmp.lt.u32.totalorder %s25623_s13, %s25743_s9 }
0x1475   : > { %p21962_p8 = scmp.lt.u32.totalorder %s21960_s20, %s21956_s22  ;;  %p21964_p13 = scmp.lt.u32.totalorder %s21956_s22, %s25623_s13 }
0x1476   : > { %p21958_p2 = pnand %p21957_p1, %p25742_p7 }
0x1477   : > { %p21963_p11 = por %p21962_p8, %p21961_p4 }
0x1478   : > { %p21959_p3 = pneg %p21958_p2 }
0x1479   : > { %p21965_p5 = por %p21964_p13, %p21963_p11 }
0x147b   : > { %p21966_p0 = pnand %p21965_p5, %p21959_p3 }
0x147d   : > { %21969 = shalt.err (!%p21966_p0)
}
0x147e   : > { %19640 = dma.vmem_to_hbm [thread:$0]  (%p25742_p7), %s25625_s30, 16, %s25623_s13, %s15984_s5  }
0x147f PF: > { %s25744_s0 = sld [smem:[#allocation25_spill]]  ;;  %s25745_s16 = sld [smem:[#allocation22_spill]] }
0x1480   : > { %s25746_s15 = sld [smem:[#allocation29_spill]] }
0x1485   : > { %p19682_p6 = scmp.ge.s32.totalorder %s25744_s0, 2  ;;  %s16025_s21 = sand.u32 1, %s25745_s16  }
0x1486   : > { %p25747_p9 = scmp.ne.s32.totalorder %s25746_s15, 0  ;;  %s16026_s24 = scalar_lea.sflag [#allocation4], %s16025_s21 }
0x1488   : > { %p19664_p10 = pnand %p19682_p6, %p25747_p9 }
0x148a   : > { %22003 = dma.done.wait (!%p19664_p10), %s16026_s24, 16  }
0x148b   : > { %22005 = vsyncadd (!%p19664_p10), %s16026_s24, 4294967280  ;;  %s16034_s28 = scalar_lea.sflag [#allocation15], %s16025_s21 }
0x148c   : > { %22007 = dma.done.wait (!%p19664_p10), %s16034_s28, 16  }
0x148d   : > { %22009 = vsyncadd (!%p19664_p10), %s16034_s28, 4294967280  ;;  %s25748_s24 = sld [smem:[#allocation26_spill]]  ;;  %s25749_s21 = sld [smem:[#allocation23_spill]] }
0x148e   : > { %s25750_s22 = sld [smem:[#allocation24_spill]]  ;;  %s25751_s23 = sld [smem:[#allocation27_spill]] }
0x1493   : > { %p34_p7 = scmp.ge.s32.totalorder %s25748_s24, 4  }
0x1495   :  { %36 = sbr.rel (!%p34_p7) target bundleno = 16 (0x10), region = 191 }
0x149c   :  { %16038 = vsyncpa [#allocation3], 1 }
0x149d   :  { %16040 = vsyncpa [#allocation3 + $0x1], 1 }
0x149e   :  { %16041 = vsyncpa [#allocation6], 1 }
0x149f   :  { %16042 = vsyncpa [#allocation9], 1 }
0x14a0   :  { %16043 = vsyncpa [#allocation12], 1 }
0x14a1   :  { %16044 = vsyncpa [#allocation4], 1 }
0x14a2   :  { %16046 = vsyncpa [#allocation4 + $0x1], 1 }
0x14a3   :  { %16047 = vsyncpa [#allocation15], 1 }
0x14a4   :  { %16049 = vsyncpa [#allocation15 + $0x1], 1 }

</bundles_post_ra>
